<compile_context>
chip_gen: v6e
topology: v6e:2x2x1
jax: 0.10.0
libtpu: 0.0.40
codegen_flags: <defaults>
</compile_context>

<pallas_src>
import jax
import jax.numpy as jnp
from jax.experimental import pallas as pl
from jax.experimental.pallas import tpu as pltpu

LANE = 128
SUBLANE_ALIGN = 32            # multiple of the sublane tile for f32/bf16/int8
TINY_BYTES = 64 * 1024        # below this, plain jnp.sin (XLA fuses it)


def _sin_kernel(x_ref, o_ref):
    # Widen to f32 for the transcendental (bf16 bytes stay narrow on the HBM
    # path; math runs on the supported f32 VPU path, incl. v5e).
    # TODO(synk): if a bundle dump shows the VALU slot saturating (v7x f32 /
    # bf16 on v6e+), replace jnp.sin with a cheaper range-reduced minimax
    # polynomial sized to the activation's actual input range.
    o_ref[...] = jnp.sin(x_ref[...].astype(jnp.float32)).astype(o_ref.dtype)


def _round_up(a, b):
    return ((a + b - 1) // b) * b


def _hw_config():
    """Per-generation block / VMEM / grid-step knobs (conservative default)."""
    kind = ""
    try:
        kind = jax.devices()[0].device_kind.lower()
    except Exception:
        pass
    if "v7" in kind or "7x" in kind:
        # 64 MiB physical VMEM: 8 MiB blocks (4x double-buffered = 32 MiB),
        # >= 4 grid steps (>= 2 per TensorCore) and an even step count.
        return dict(target_bytes=8 << 20, vmem_limit=40 << 20,
                    min_steps=4, steps_multiple=2)
    if "v6" in kind:
        # 128 MiB physical VMEM: 8 MiB blocks cut per-step overhead to ~3%.
        return dict(target_bytes=8 << 20, vmem_limit=64 << 20,
                    min_steps=2, steps_multiple=1)
    # v5e / unknown: HBM-bound already at 4 MiB blocks.
    return dict(target_bytes=4 << 20, vmem_limit=32 << 20,
                min_steps=2, steps_multiple=1)


def _choose_tile_rows(rows, itemsize, cfg):
    """Rows (of 128 lanes) per block: ~target_bytes, sublane-aligned, with
    enough grid steps for pipelining / dual-TC sharding."""
    target_rows = max(
        SUBLANE_ALIGN,
        (cfg["target_bytes"] // (LANE * itemsize)) // SUBLANE_ALIGN * SUBLANE_ALIGN,
    )
    steps = max(cfg["min_steps"], pl.cdiv(rows, target_rows))
    steps = _round_up(steps, cfg["steps_multiple"])
    return max(SUBLANE_ALIGN, _round_up(pl.cdiv(rows, steps), SUBLANE_ALIGN))


def _unit_index_map(ndim):
    if ndim == 1:
        return lambda i: (i,)
    return lambda i: (i, 0)


def _pallas_sin_call(x, block_shape, grid, n, itemsize, cfg):
    return pl.pallas_call(
        _sin_kernel,
        out_shape=jax.ShapeDtypeStruct(x.shape, x.dtype),
        grid_spec=pltpu.PrefetchScalarGridSpec(
            num_scalar_prefetch=0,
            grid=grid,
            in_specs=[pl.BlockSpec(block_shape, _unit_index_map(len(block_shape)))],
            out_specs=pl.BlockSpec(block_shape, _unit_index_map(len(block_shape))),
        ),
        compiler_params=pltpu.CompilerParams(
            dimension_semantics=("parallel",),
            vmem_limit_bytes=cfg["vmem_limit"],
        ),
        cost_estimate=pl.CostEstimate(
            flops=0, transcendentals=n, bytes_accessed=2 * n * itemsize),
    )(x)


def sin_pallas(x: jax.Array) -> jax.Array:
    """Elementwise sin(x) for arbitrary-shaped input via a Pallas TPU kernel."""
    orig_shape = x.shape
    dtype = x.dtype
    n = x.size
    itemsize = jnp.dtype(dtype).itemsize

    # Tiny (or empty) tensors: a single-step pallas_call costs more in launch
    # + DMA-prime overhead than XLA's fused sin.
    if n * itemsize < TINY_BYTES:
        return jnp.sin(x)

    cfg = _hw_config()
    flat = x.reshape(-1)

    if n % LANE == 0:
        # Lane-aligned: free reshape to a lane-dense (rows, 128) slab.
        rows = n // LANE
        tile_rows = _choose_tile_rows(rows, itemsize, cfg)
        grid = (pl.cdiv(rows, tile_rows),)
        out = _pallas_sin_call(flat.reshape(rows, LANE), (tile_rows, LANE),
                               grid, n, itemsize, cfg)
    else:
        # Ragged element count: tile the flat array with 1-D blocks (multiple
        # of 8*128 elements). The edge block is partially out of bounds; its
        # extra lanes are dropped by the masked write, so there is no
        # wrapper-side pad or slice copy at all.
        rows = pl.cdiv(n, LANE)
        tile_rows = _choose_tile_rows(rows, itemsize, cfg)
        block = tile_rows * LANE
        grid = (pl.cdiv(n, block),)
        out = _pallas_sin_call(flat, (block,), grid, n, itemsize, cfg)

    return out.reshape(orig_shape)


if __name__ == "__main__":
    key = jax.random.PRNGKey(0)
    k1, k2, k3, k4 = jax.random.split(key, 4)

    # 1) Small NN-activation-style tensor (batch=2, channels=4, 16x16):
    #    takes the tiny-input fallback (plain jnp.sin, fusable by XLA).
    x_small = jax.random.normal(k1, (2, 4, 16, 16), dtype=jnp.float32)
    y_small = sin_pallas(x_small)
    jax.block_until_ready(y_small)
    assert y_small.shape == x_small.shape and y_small.dtype == x_small.dtype
    assert jnp.allclose(y_small, jnp.sin(x_small), atol=1e-5, rtol=1e-5)

    # 2) Lane-aligned f32 tensor large enough for the 2-D Pallas path with a
    #    multi-step grid.
    x_f32 = jax.random.normal(k2, (2, 4, 128, 128), dtype=jnp.float32)
    y_f32 = sin_pallas(x_f32)
    jax.block_until_ready(y_f32)
    assert y_f32.shape == x_f32.shape and y_f32.dtype == x_f32.dtype
    assert jnp.allclose(y_f32, jnp.sin(x_f32), atol=1e-5, rtol=1e-5)

    # 3) Ragged element count (not a multiple of 128): 1-D Pallas path with a
    #    masked edge block; no pad/slice copies in the wrapper.
    x_rag = jax.random.normal(k3, (5, 37, 201), dtype=jnp.float32)
    y_rag = sin_pallas(x_rag)
    jax.block_until_ready(y_rag)
    assert y_rag.shape == x_rag.shape and y_rag.dtype == x_rag.dtype
    assert jnp.allclose(y_rag, jnp.sin(x_rag), atol=1e-5, rtol=1e-5)

    # 4) bf16 streamed narrow through HBM, f32 math inside the kernel.
    x_bf16 = jax.random.normal(k4, (4, 128, 256), dtype=jnp.bfloat16)
    y_bf16 = sin_pallas(x_bf16)
    jax.block_until_ready(y_bf16)
    assert y_bf16.shape == x_bf16.shape and y_bf16.dtype == jnp.bfloat16
    assert jnp.allclose(y_bf16.astype(jnp.float32),
                        jnp.sin(x_bf16.astype(jnp.float32)),
                        atol=1e-2, rtol=1e-2)

    print("KERNEL_OK")
</pallas_src>

<mosaic_0001>
module attributes {stable_mosaic.version = 11 : i64} {
  func.func @_sin_kernel(%arg0: i32, %arg1: memref<512x128xf32, #tpu.memory_space<vmem>>, %arg2: memref<512x128xf32, #tpu.memory_space<vmem>>) attributes {dimension_semantics = [#tpu.dimension_semantics<parallel>], iteration_bounds = array<i64: 2>, scalar_prefetch = 0 : i64, scratch_operands = 0 : i64, tpu.core_type = #tpu.core_type<tc>, window_params = [{transform_indices = @transform_0, window_bounds = array<i64: 512, 128>}, {transform_indices = @transform_1, window_bounds = array<i64: 512, 128>}]} {
    %c0 = arith.constant 0 : index
    %c0_0 = arith.constant 0 : index
    %0 = vector.load %arg1[%c0, %c0_0] : memref<512x128xf32, #tpu.memory_space<vmem>>, vector<512x128xf32>
    %1 = math.sin %0 : vector<512x128xf32>
    %c0_1 = arith.constant 0 : index
    %c0_2 = arith.constant 0 : index
    %2 = vector.load %arg2[%c0_1, %c0_2] : memref<512x128xf32, #tpu.memory_space<vmem>>, vector<512x128xf32>
    tpu.vector_store %arg2[%c0_1, %c0_2], %1 {strides = array<i32>} : memref<512x128xf32, #tpu.memory_space<vmem>>, vector<512x128xf32>,
    return
  }
  func.func @transform_0(%arg0: i32) -> (i32, i32) {
    %c0_i32 = arith.constant 0 : i32
    %c0_i32_0 = arith.constant 0 : i32
    return %arg0, %c0_i32 : i32, i32
  }
  func.func @transform_1(%arg0: i32) -> (i32, i32) {
    %c0_i32 = arith.constant 0 : i32
    %c0_i32_0 = arith.constant 0 : i32
    return %arg0, %c0_i32 : i32, i32
  }
}

</mosaic_0001>

<bundles_post_ra>
// kernel: tpu_custom_call.1
= control target key start
LH: loop header
LB: loop body
LE: loop exit
PB: predicated region body
PF: predicated region fallthrough
CT: control target
= control target key end

     0   :  { %6 = vsyncpa [#allocation3], 0  ;;  %s13125_s0 = inlined_call_operand.hbm [shape: f32[1024,128], index: 0, kind: input, shape index: {}]   ;;  %s13126_s1 = inlined_call_operand.hbm [shape: f32[1024,128], index: 1, kind: output, shape index: {}]  }
   0x1   :  { %8 = vsyncpa [#allocation3 + $0x1], 0 }
   0x2   :  { %9 = vsyncpa [#allocation4], 0 }
   0x3   :  { %11 = vsyncpa [#allocation4 + $0x1], 0  ;;  %s7964_s6 = smov 0   ;;  %s7966_s7 = smov 0  }
   0x4   :  { %s7968_s8 = smov 0   ;;  %s7970_s9 = smov 0  }
   0x5 LB: > { %s7985_s10 = sadd.s32 4294967295, %s7940_s9   ;;  %s7008_s11 = sadd.s32 4294967294, %s7940_s9   ;;  %s7940_s9 = sphi %s7970_s9, %s13265_s9   ;;  %s7936_s8 = sphi %s7968_s8, %s13264_s8   ;;  %s7932_s7 = sphi %s7966_s7, %s13263_s7   ;;  %s7928_s6 = sphi %s7964_s6, %s13262_s6  }
   0x6   : > { %s7989_s12 = sadd.s32 1, %s7940_s9   ;;  %s24_s13 = sadd.s32 1, %s7936_s8 }
   0x7   : > { %s21_s14 = ssub.s32 %s7940_s9, %s7989_s12  ;;  %p31_p0 = scmp.ne.s32.totalorder %s7936_s8, %s7932_s7 }
   0x8   : > { %p22_p1 = scmp.eq.s32.totalorder %s21_s14, 0  ;;  %p32_p2 = scmp.eq.s32.totalorder %s7940_s9, 0 }
   0x9   : > { %p37_p3 = scmp.ne.s32.totalorder %s7932_s7, %s7928_s6  ;;  %p38_p4 = scmp.eq.s32.totalorder %s7985_s10, 0 }
   0xa   : > { %s8001_s15 = scalar_select %p22_p1, %s7936_s8, %s24_s13  }
   0xb   : > { %p8003_p5 = por %p32_p2, %p31_p0  ;;  %p8007_p6 = por %p38_p4, %p37_p3 }
   0xc   : > { %p61_p7 = scmp.eq.s32.totalorder %s7985_s10, 1  ;;  %p67_p8 = scmp.eq.s32.totalorder %s7008_s11, 1 }
   0xd   : > { %s13130_s17 = scalar_select %p8007_p6, 1, 0 }
   0xe   : > { %p7548_p10 = scmp.lt.s32.totalorder %s7940_s9, 2  ;;  %p8014_p11 = por %p61_p7, %p31_p0 }
   0xf   : > { %p8018_p12 = por %p67_p8, %p37_p3  ;;  %s87_s20 = sand.u32 1, %s7936_s8  }
  0x10   : > { %s13131_s18 = scalar_select %p8014_p11, 1, 0 }
  0x11   : > { %s13132_s19 = scalar_select %p8018_p12, 1, 0 }
  0x12   : > { %s7278_s21 = sshll.u32 %s7940_s9, 13  ;;  %s7011_s22 = sshll.u32 %s87_s20, 9 }
  0x13   : > { %s8027_s25 = scalar_lea.hbm %s13125_s0, %s7278_s21  ;;  %s91_s26 = scalar_lea.vmem [#allocation2], %s7011_s22 }
  0x14   : > { %s98_s27 = sshll.u32 %s91_s26, 4  ;;  %p8031_p13 = pnand %p7548_p10, %p8003_p5  ;;  %s8035_s27 = int_to_ptr.vmem [resolvable:$true] %s98_s27 }
  0x15   : > { %s8037_s29 = scalar_lea.sflag [#allocation3], %s87_s20  ;;  %s7848_s30 = scalar_lea.hbm %s8027_s25, 8192 }
  0x16   : > { %p7849_p0 = scmp.ne.s32.totalorder %s8027_s25, %s7848_s30  ;;  %p7850_p1 = pneg %p8031_p13 }
  0x17   : > { %s7853_s4 = scalar_lea.hbm %s13125_s0, 16384  ;;  %p7854_p4 = scmp.lt.s32.totalorder %s8027_s25, %s13125_s0 }
  0x18   : > { %p7851_p2 = pnand %p7850_p1, %p7849_p0  ;;  %p7855_p5 = scmp.lt.s32.totalorder %s7853_s4, %s7848_s30 }
  0x1a   : > { %p7852_p3 = pneg %p7851_p2  ;;  %p7856_p7 = por %p7855_p5, %p7854_p4 }
  0x1c   : > { %p7857_p8 = pnand %p7856_p7, %p7852_p3 }
  0x1e   : > { %7860 = shalt.err (!%p7857_p8)
}
  0x1f   : > { %s7861_s13 = scalar_lea.vmem %s8035_s27, 8192  ;;  %s7942_s14 = smov [#allocation2]  }
  0x20   : > { %p7862_p10 = scmp.ne.s32.totalorder %s8035_s27, %s7861_s13  ;;  %s7866_s16 = sshll.u32 %s7942_s14, 4  ;;  %s7867_s16 = int_to_ptr.vmem [resolvable:$false] %s7866_s16 }
  0x21   : > { %s7868_s20 = scalar_lea.vmem %s7867_s16, 16384  ;;  %p7869_p2 = scmp.lt.s32.totalorder %s8035_s27, %s7867_s16 }
  0x22   : > { %p7864_p9 = pnand %p7862_p10, %p7850_p1  ;;  %p7870_p12 = scmp.lt.s32.totalorder %s7868_s20, %s7861_s13 }
  0x24   : > { %p7865_p0 = pneg %p7864_p9  ;;  %p7871_p11 = por %p7870_p12, %p7869_p2 }
  0x26   : > { %p7872_p6 = pnand %p7871_p11, %p7865_p0 }
  0x28   : > { %7875 = shalt.err (!%p7872_p6)
}
  0x29   : > { %s7943_s21 = smov 128   ;;  %s7944_s22 = smov 8  }
  0x2a   : > { %7543 = dma.hbm_to_vmem [thread:$0]  (!%p8031_p13), %s8027_s25, 8192, %s8035_s27, %s8037_s29, %s7943_s21, %s7943_s21, %s7944_s22  }
  0x2b   : > { %p7014_p9 = scmp.ge.s32.totalorder %s7940_s9, 1  ;;  %p106_p1 = scmp.lt.s32.totalorder %s7940_s9, 3 }
  0x2d   : > { %p107_p3 = pnand %p7014_p9, %p106_p1 }
  0x2e   : > { %s8061_s23 = sand.u32 (!%p107_p3), 1, %s7932_s7   ;;  %p13134_p6 = scmp.ne.s32.totalorder (!%p107_p3), %s13130_s17, 0 }
  0x2f   : > { %110 = sbr.rel (%p107_p3) target bundleno = 1678 (0x68e), region = 24  ;;  %s7015_s24 = sshll.u32 (!%p107_p3), %s8061_s23, 9 }
  0x30   : > { %s113_s26 = scalar_lea.sflag (!%p107_p3), [#allocation3], %s8061_s23  ;;  %s8067_s30 = scalar_lea.vmem (!%p107_p3), [#allocation2], %s7015_s24 }
  0x34   : > { %7919 = dma.done.wait (%p13134_p6), %s113_s26, 8192  }
  0x35   : > { %7921 = vsyncadd (%p13134_p6), %s113_s26, 4294959104  ;;  %v8074_v0 = vld [vmem:[%s8067_s30] sm:$0xff]  ;;  %v8078_v2 = vld [vmem:[%s8067_s30 + $0x8] sm:$0xff]  ;;  %v7945_v24 = vmov 683565275   ;;  %s8364_s17 = scalar_lea.vmem [#allocation5], %s7015_s24 }
  0x36   : > { %v201_v1 = vand.u32 2147483647, %v8074_v0  ;;  %v204_v3 = vand.u32 2139095040, %v8074_v0  ;;  %v305_v4 = vand.u32 2147483647, %v8078_v2  ;;  %v308_v7 = vand.u32 2139095040, %v8078_v2 }
  0x37   : > { %v8088_v15 = vld [vmem:[%s8067_s30 + $0x10] sm:$0xff]  ;;  %v7946_v26 = vmov 2475754826   ;;  %v7947_v28 = vmov 2131351028   ;;  %vm203_vm12 = vcmp.lt.s32.totalorder %v8074_v0, 0 }
  0x38   : > { %v205_v5 = vshrl.u32 %v204_v3, 23  ;;  %v208_v6 = vand.u32 8388607, %v201_v1  ;;  %v309_v9 = vshrl.u32 %v308_v7, 23  ;;  %v312_v10 = vand.u32 8388607, %v305_v4 }
  0x39   : > { %v412_v22 = vand.u32 2139095040, %v8088_v15  ;;  %v7948_v30 = vmov 2102212464   ;;  %v7949_v32 = vmov 920167782   ;;  %s7279_s25 = sshll.u32 %s7985_s10, 13 }
  0x3a   : > { %v7017_v8 = vadd.s32 4294967169, %v205_v5  ;;  %v209_v12 = vor.u32 8388608, %v208_v6  ;;  %v7021_v13 = vadd.s32 4294967169, %v309_v9  ;;  %v313_v14 = vor.u32 8388608, %v312_v10  ;;  %s6935_s27 = sshll.u32 %s8364_s17, 4  ;;  %s13079_s2 = scalar_lea.hbm %s13126_s1, %s7279_s25  ;;  %s13081_s27 = int_to_ptr.vmem [resolvable:$true] %s6935_s27 }
  0x3b   : > { %v7950_v39 = vmov 1326507024   ;;  %vm8173_vm14 = vcmp.le.f32.partialorder %v201_v1, 0.7853982  ;;  %s6922_s10 = scalar_lea.sflag [#allocation4], %s8061_s23  ;;  %s7876_s3 = scalar_lea.vmem %s13081_s27, 8192 }
  0x3c   : > { %v211_v11 = vadd.s32 1, %v7017_v8  ;;  %v315_v17 = vadd.s32 1, %v7021_v13  ;;  %v8090_v20 = vshll.u32 %v209_v12, 8  ;;  %v8092_v21 = vshll.u32 %v313_v14, 8  ;;  %p7877_p11 = scmp.ne.s32.totalorder %s13081_s27, %s7876_s3  ;;  %p13259_p12 = scmp.ne.s32.totalorder %s13131_s18, 0 }
  0x3d   : > { %s7951_s4 = smov [#allocation5]  }
  0x3e   : > { %vm212_vm0 = vcmp.gt.s32.totalorder %v211_v11, 0  ;;  %vm316_vm1 = vcmp.gt.s32.totalorder %v315_v17, 0  ;;  %p7878_p13 = pnand %p7877_p11, %p13259_p12  ;;  %s7880_s5 = sshll.u32 %s7951_s4, 4  ;;  %s7881_s5 = int_to_ptr.vmem [resolvable:$false] %s7880_s5 }
  0x3f   : > { %v213_v16 = vsel %vm212_vm0, %v211_v11, 0  ;;  %v317_v44 = vsel %vm316_vm1, %v315_v17, 0  ;;  %vm307_vm0 = vcmp.lt.s32.totalorder %v8078_v2, 0  ;;  %s7882_s11 = scalar_lea.vmem %s7881_s5, 16384  ;;  %p7883_p5 = scmp.lt.s32.totalorder %s13081_s27, %s7881_s5 }
  0x40   : > { %v214_v18 = vshrl.u32 %v213_v16, 5  ;;  %v215_v19 = vand.u32 31, %v213_v16  ;;  %v318_v47 = vshrl.u32 %v317_v44, 5  ;;  %v319_v48 = vand.u32 31, %v317_v44  ;;  %p7879_p4 = pneg %p7878_p13  ;;  %p7884_p7 = scmp.lt.s32.totalorder %s7882_s11, %s7876_s3 }
  0x42   : > { %v216_v23 = vsub.s32 32, %v215_v19  ;;  %v218_v25 = vshll.u32 %v7945_v24, %v215_v19  ;;  %v221_v27 = vshll.u32 %v7946_v26, %v215_v19  ;;  %v224_v29 = vshll.u32 %v7947_v28, %v215_v19  ;;  %p7885_p8 = por %p7884_p7, %p7883_p5 }
  0x43   : > { %v227_v31 = vshll.u32 %v7948_v30, %v215_v19  ;;  %v230_v33 = vshll.u32 %v7949_v32, %v215_v19  ;;  %vm233_vm2 = vcmp.lt.s32.totalorder %v214_v18, 1  ;;  %vm234_vm3 = vcmp.lt.s32.totalorder %v214_v18, 2 }
  0x44   : > { %v217_v34 = vshrl.u32 %v7945_v24, %v216_v23  ;;  %v219_v35 = vshrl.u32 %v7946_v26, %v216_v23  ;;  %v222_v36 = vshrl.u32 %v7947_v28, %v216_v23  ;;  %v225_v37 = vshrl.u32 %v7948_v30, %v216_v23  ;;  %p7886_p10 = pnand %p7885_p8, %p7879_p4 }
  0x45   : > { %v228_v38 = vshrl.u32 %v7949_v32, %v216_v23  ;;  %v231_v40 = vshrl.u32 %v7950_v39, %v216_v23  ;;  %vm235_vm4 = vcmp.lt.s32.totalorder %v214_v18, 3  ;;  %vm236_vm5 = vcmp.lt.s32.totalorder %v214_v18, 4 }
  0x46   : > { %v220_v41 = vor.u32 %v219_v35, %v218_v25  ;;  %v223_v42 = vor.u32 %v222_v36, %v221_v27  ;;  %v226_v43 = vor.u32 %v225_v37, %v224_v29  ;;  %v320_v56 = vsub.s32 32, %v319_v48 }
  0x47   : > { %v229_v45 = vor.u32 %v228_v38, %v227_v31  ;;  %v232_v46 = vor.u32 %v231_v40, %v230_v33  ;;  %v322_v60 = vshll.u32 %v7945_v24, %v319_v48  ;;  %v325_v10 = vshll.u32 %v7946_v26, %v319_v48 }
  0x48   : > { %v237_v49 = vsel %vm233_vm2, %v217_v34, %v220_v41  ;;  %v238_v50 = vsel %vm236_vm5, %v226_v43, 2102212464  ;;  %v241_v51 = vsel %vm233_vm2, %v220_v41, %v223_v42  ;;  %v245_v52 = vsel %vm233_vm2, %v223_v42, %v226_v43 }
  0x49   : > { %v239_v53 = vsel %vm235_vm4, %v223_v42, %v238_v50  ;;  %v242_v54 = vsel %vm236_vm5, %v229_v45, 920167782  ;;  %v246_v55 = vsel %vm236_vm5, %v232_v46, 1326507024  ;;  %v321_v3 = vshrl.u32 %v7945_v24, %v320_v56 }
  0x4a   : > { %v240_v57 = vsel %vm234_vm3, %v237_v49, %v239_v53  ;;  %v243_v58 = vsel %vm235_vm4, %v226_v43, %v242_v54  ;;  %v247_v59 = vsel %vm235_vm4, %v229_v45, %v246_v55  ;;  %v323_v9 = vshrl.u32 %v7946_v26, %v320_v56 }
  0x4b   : > { %v244_v61 = vsel %vm234_vm3, %v241_v51, %v243_v58  ;;  %v248_v62 = vsel %vm234_vm3, %v245_v52, %v247_v59  ;;  %v256_v63 = vmul.u32 %v8090_v20, %v240_v57  ;;  %v326_v11 = vshrl.u32 %v7947_v28, %v320_v56 }
  0x4c   : > { %v8120_v5 = vmul.u32.u64.low %v8090_v20, %v248_v62  ;;  %v8121_v6 = vmul.u32.u64.high %v8090_v20, %v248_v62, %v8120_v5  ;;  %v8124_v7 = vmul.u32.u64.low %v8090_v20, %v244_v61  ;;  %v8125_v8 = vmul.u32.u64.high %v8090_v20, %v244_v61, %v8124_v7 }
  0x4d   : > { %v328_v12 = vshll.u32 %v7947_v28, %v319_v48  ;;  %v329_v13 = vshrl.u32 %v7948_v30, %v320_v56  ;;  %v331_v14 = vshll.u32 %v7948_v30, %v319_v48  ;;  %v332_v16 = vshrl.u32 %v7949_v32, %v320_v56 }
  0x4e   : > { %v334_v17 = vshll.u32 %v7949_v32, %v319_v48  ;;  %v324_v18 = vor.u32 %v323_v9, %v322_v60  ;;  %v327_v19 = vor.u32 %v326_v11, %v325_v10  ;;  %v335_v20 = vshrl.u32 %v7950_v39, %v320_v56  ;;  %v8160_v60 = vld [vmem:[%s8067_s30 + $0x18] sm:$0xff] }
  0x4f   : > { %vm337_vm6 = vcmp.lt.s32.totalorder %v318_v47, 1  ;;  %vm258_vm7 = vc.u32 %v8121_v6, %v8124_v7  ;;  %v259_v23 = vadd.s32 1, %v8125_v8  ;;  %v330_v25 = vor.u32 %v329_v13, %v328_v12 }
  0x50   : > { %v413_v27 = vshrl.u32 %v412_v22, 23  ;;  %v333_v29 = vor.u32 %v332_v16, %v331_v14  ;;  %v336_v31 = vor.u32 %v335_v20, %v334_v17  ;;  %vm338_vm8 = vcmp.lt.s32.totalorder %v318_v47, 2 }
  0x51   : > { %vm339_vm9 = vcmp.lt.s32.totalorder %v318_v47, 3  ;;  %v260_v33 = vsel %vm258_vm7, %v259_v23, %v8125_v8  ;;  %vm340_vm10 = vcmp.lt.s32.totalorder %v318_v47, 4  ;;  %v341_v34 = vsel %vm337_vm6, %v321_v3, %v324_v18 }
  0x52   : > { %v345_v35 = vsel %vm337_vm6, %v324_v18, %v327_v19  ;;  %v261_v36 = vadd.s32 %v260_v33, %v256_v63  ;;  %v342_v37 = vsel %vm340_vm10, %v330_v25, 2102212464  ;;  %v346_v38 = vsel %vm340_vm10, %v333_v29, 920167782  ;;  %v8182_v18 = vld [vmem:[%s8067_s30 + $0x20] sm:$0xff] }
  0x53   : > { %v349_v40 = vsel %vm337_vm6, %v327_v19, %v330_v25  ;;  %v343_v41 = vsel %vm339_vm9, %v327_v19, %v342_v37  ;;  %v347_v42 = vsel %vm339_vm9, %v330_v25, %v346_v38  ;;  %v350_v22 = vsel %vm340_vm10, %v336_v31, 1326507024 }
  0x54   : > { %v7025_v43 = vadd.s32 4294967169, %v413_v27  ;;  %v262_v44 = vadd.s32 536870912, %v261_v36  ;;  %v348_v45 = vsel %vm338_vm8, %v345_v35, %v347_v42  ;;  %v351_v46 = vsel %vm339_vm9, %v333_v29, %v350_v22 }
  0x55   : > { %v409_v48 = vand.u32 2147483647, %v8088_v15  ;;  %v344_v49 = vsel %vm338_vm8, %v341_v34, %v343_v41  ;;  %v352_v50 = vsel %vm338_vm8, %v349_v40, %v351_v46  ;;  %v516_v9 = vand.u32 2139095040, %v8160_v60 }
  0x56   : > { %v8151_v51 = vmul.u32.u64.low %v8092_v21, %v348_v45  ;;  %v8152_v52 = vmul.u32.u64.high %v8092_v21, %v348_v45, %v8151_v51  ;;  %v263_v53 = vshrl.u32 %v262_v44, 30  ;;  %v419_v56 = vadd.s32 1, %v7025_v43 }
  0x57   : > { %v8155_v54 = vmul.u32.u64.low %v8092_v21, %v352_v50  ;;  %v8156_v55 = vmul.u32.u64.high %v8092_v21, %v352_v50, %v8155_v54  ;;  %v360_v59 = vmul.u32 %v8092_v21, %v344_v49  ;;  %v416_v47 = vand.u32 8388607, %v409_v48 }
  0x58   : > { %v264_v57 = vshll.u32 %v263_v53, 30  ;;  %v287_v58 = vsub.s32 4, %v263_v53  ;;  %v363_v61 = vadd.s32 1, %v8152_v52  ;;  %vm420_vm11 = vcmp.gt.s32.totalorder %v419_v56, 0 }
  0x59   : > { %vm362_vm13 = vc.u32 %v8156_v55, %v8151_v51  ;;  %v421_v21 = vsel %vm420_vm11, %v419_v56, 0  ;;  %v417_v11 = vor.u32 8388608, %v416_v47  ;;  %v257_v19 = vadd.s32 %v8124_v7, %v8121_v6 }
  0x5a   : > { %v265_v62 = vsub.s32 %v261_v36, %v264_v57  ;;  %v288_v63 = vsel %vm203_vm12, %v287_v58, %v263_v53  ;;  %v364_v3 = vsel %vm362_vm13, %v363_v61, %v8152_v52  ;;  %v8177_v12 = vshrl.u32 %v421_v21, 5 }
  0x5b   : > { %v365_v8 = vadd.s32 %v364_v3, %v360_v59  ;;  %v423_v13 = vand.u32 31, %v421_v21  ;;  %v290_v16 = vsel %vm8173_vm14, 0, %v288_v63  ;;  %v513_v1 = vand.u32 2147483647, %v8160_v60 }
  0x5c   : > { %v267_v5 = vsub.s32 0, %v265_v62  ;;  %v8188_v25 = vadd.s32 %v8151_v51, %v8156_v55  ;;  %v517_v27 = vshrl.u32 %v516_v9, 23  ;;  %v617_v29 = vand.u32 2147483647, %v8182_v18 }
  0x5d   : > { %v366_v17 = vadd.s32 536870912, %v365_v8  ;;  %v424_v20 = vsub.s32 32, %v423_v13  ;;  %v8191_v31 = vadd.s32 3, %v290_v16  ;;  %vm441_vm15 = vcmp.lt.s32.totalorder %v8177_v12, 1 }
  0x5e   : > { %v7018_v14 = vmin.u32 %v267_v5, %v265_v62  ;;  %v8194_v34 = vshll.u32 %v417_v11, 8  ;;  %v426_v6 = vshll.u32 %v7945_v24, %v423_v13  ;;  %v429_v7 = vshll.u32 %v7946_v26, %v423_v13 }
  0x5f   : > { %v367_v33 = vshrl.u32 %v366_v17, 30  ;;  %v432_v36 = vshll.u32 %v7947_v28, %v423_v13  ;;  %v427_v38 = vshrl.u32 %v7946_v26, %v424_v20  ;;  %v430_v40 = vshrl.u32 %v7947_v28, %v424_v20 }
  0x60   : > { %v269_v23 = vclz %v7018_v14  ;;  %v433_v41 = vshrl.u32 %v7948_v30, %v424_v20  ;;  %v425_v42 = vshrl.u32 %v7945_v24, %v424_v20  ;;  %v435_v22 = vshll.u32 %v7948_v30, %v423_v13 }
  0x61   : > { %v368_v37 = vshll.u32 %v367_v33, 30  ;;  %v436_v43 = vshrl.u32 %v7949_v32, %v424_v20  ;;  %v438_v46 = vshll.u32 %v7949_v32, %v423_v13  ;;  %v439_v49 = vshrl.u32 %v7950_v39, %v424_v20 }
  0x62   : > { %v7019_v35 = vadd.s32 4294967294, %v269_v23  ;;  %v391_v53 = vsub.s32 4, %v367_v33  ;;  %v428_v55 = vor.u32 %v427_v38, %v426_v6  ;;  %v431_v56 = vor.u32 %v430_v40, %v429_v7 }
  0x63   : > { %v8206_v45 = vsub.s32 %v365_v8, %v368_v37  ;;  %v434_v57 = vor.u32 %v433_v41, %v432_v36  ;;  %vm8213_vm2 = vcmp.le.f32.partialorder %v305_v4, 0.7853982  ;;  %v437_v47 = vor.u32 %v436_v43, %v435_v22 }
  0x64   : > { %vm7020_vm1 = vcmp.lt.s32.totalorder %v7019_v35, 0  ;;  %vm444_vm3 = vcmp.lt.s32.totalorder %v8177_v12, 4  ;;  %v440_v63 = vor.u32 %v439_v49, %v438_v46  ;;  %v7029_v21 = vadd.s32 4294967169, %v517_v27 }
  0x65   : > { %v272_v44 = vsel %vm7020_vm1, 0, %v7019_v35  ;;  %v371_v54 = vsub.s32 0, %v8206_v45  ;;  %v446_v3 = vsel %vm444_vm3, %v434_v57, 2102212464  ;;  %vm442_vm4 = vcmp.lt.s32.totalorder %v8177_v12, 2 }
  0x66   : > { %v273_v50 = vsub.s32 32, %v272_v44  ;;  %v274_v51 = vshll.u32 %v265_v62, %v272_v44  ;;  %v277_v52 = vsub.s32 4294967266, %v272_v44  ;;  %vm443_vm5 = vcmp.lt.s32.totalorder %v8177_v12, 3 }
  0x67   : > { %v7022_v62 = vmin.u32 %v371_v54, %v8206_v45  ;;  %v445_v9 = vsel %vm441_vm15, %v425_v42, %v428_v55  ;;  %v447_v11 = vsel %vm443_vm5, %v431_v56, %v446_v3  ;;  %v449_v13 = vsel %vm441_vm15, %v428_v55, %v431_v56 }
  0x68   : > { %v275_v58 = vshrl.u32 %v257_v19, %v273_v50  ;;  %v278_v59 = vadd.s32 127, %v277_v52  ;;  %v392_v17 = vsel %vm307_vm0, %v391_v53, %v367_v33  ;;  %v450_v19 = vsel %vm444_vm3, %v437_v47, 920167782 }
  0x69   : > { %v373_v4 = vclz %v7022_v62  ;;  %v451_v23 = vsel %vm443_vm5, %v434_v57, %v450_v19  ;;  %v453_v27 = vsel %vm441_vm15, %v431_v56, %v434_v57  ;;  %v454_v35 = vsel %vm444_vm3, %v440_v63, 1326507024 }
  0x6a   : > { %v276_v5 = vor.u32 %v275_v58, %v274_v51  ;;  %v279_v8 = vshll.u32 %v278_v59, 23  ;;  %v448_v7 = vsel %vm442_vm4, %v445_v9, %v447_v11  ;;  %v452_v33 = vsel %vm442_vm4, %v449_v13, %v451_v23 }
  0x6b   : > { %v7023_v20 = vadd.s32 4294967294, %v373_v4  ;;  %v455_v36 = vsel %vm443_vm5, %v437_v47, %v454_v35  ;;  %v8248_v38 = vmul.u32.u64.low %v8194_v34, %v452_v33  ;;  %v8249_v40 = vmul.u32.u64.high %v8194_v34, %v452_v33, %v8248_v38 }
  0x6c   : > { %v280_v14 = vor.u32 4788187, %v279_v8  ;;  %v283_v16 = vcvt.s32.f32 %v276_v5  ;;  %v456_v37 = vsel %vm442_vm4, %v453_v27, %v455_v36  ;;  %v394_v50 = vsel %vm8213_vm2, 0, %v392_v17 }
  0x6d   : > { %vm7024_vm6 = vcmp.lt.s32.totalorder %v7023_v20, 0  ;;  %v8253_v22 = vmul.u32.u64.low %v8194_v34, %v456_v37  ;;  %v8254_v43 = vmul.u32.u64.high %v8194_v34, %v456_v37, %v8253_v22  ;;  %v464_v51 = vmul.u32 %v8194_v34, %v448_v7 }
  0x6e   : > { %v281_v6 = vand.u32 2147483647, %v280_v14  ;;  %v376_v42 = vsel %vm7024_vm6, 0, %v7023_v20  ;;  %v520_v52 = vand.u32 8388607, %v513_v1  ;;  %v523_v53 = vadd.s32 1, %v7029_v21 }
  0x6f   : > { %v377_v44 = vsub.s32 32, %v376_v42  ;;  %v378_v46 = vshll.u32 %v8206_v45, %v376_v42  ;;  %v381_v49 = vsub.s32 4294967266, %v376_v42  ;;  %v8263_v54 = vand.u32 3, %v8191_v31 }
  0x70   : > { %v284_v41 = vmul.f32 %v283_v16, %v281_v6  ;;  %v467_v57 = vadd.s32 1, %v8249_v40  ;;  %v398_v58 = vadd.s32 3, %v394_v50  ;;  %vm466_vm7 = vc.u32 %v8254_v43, %v8248_v38 }
  0x71   : > { %v379_v55 = vshrl.u32 %v8188_v25, %v377_v44  ;;  %v382_v56 = vadd.s32 127, %v381_v49  ;;  %vm524_vm8 = vcmp.gt.s32.totalorder %v523_v53, 0  ;;  %v521_v62 = vor.u32 8388608, %v520_v52 }
  0x72   : > { %v285_v12 = vxor.u32 2147483648, %v284_v41  ;;  %v468_v47 = vsel %vm466_vm7, %v467_v57, %v8249_v40  ;;  %v525_v63 = vsel %vm524_vm8, %v523_v53, 0  ;;  %v620_v5 = vand.u32 2139095040, %v8182_v18 }
  0x73   : > { %v380_v59 = vor.u32 %v379_v55, %v378_v46  ;;  %v383_v31 = vshll.u32 %v382_v56, 23  ;;  %v469_v25 = vadd.s32 %v468_v47, %v464_v51  ;;  %v527_v4 = vand.u32 31, %v525_v63 }
  0x74   : > { %v286_v45 = vsel %vm203_vm12, %v285_v12, %v284_v41  ;;  %v8276_v11 = vand.u32 3, %v398_v58  ;;  %v8280_v10 = vand.u32 8388607, %v617_v29  ;;  %v8284_v14 = vshrl.u32 %v525_v63, 5 }
  0x75   : > { %v289_v34 = vsel %vm8173_vm14, %v8074_v0, %v286_v45  ;;  %v384_v3 = vor.u32 4788187, %v383_v31  ;;  %v387_v21 = vcvt.s32.f32 %v380_v59  ;;  %v470_v8 = vadd.s32 536870912, %v469_v25 }
  0x76   : > { %7592 = vcosq.f32 %v289_v34  ;;  %v528_v16 = vsub.s32 32, %v527_v4  ;;  %v8286_v17 = vshll.u32 %v521_v62, 8  ;;  %vm300_vm9 = vcmp.eq.s32.totalorder %v8263_v54, 2 }
  0x77   : > { %7594 = vsinq.f32 %v289_v34  ;;  %v385_v9 = vand.u32 2147483647, %v384_v3  ;;  %v8282_v13 = vshrl.u32 %v470_v8, 30  ;;  %v530_v20 = vshll.u32 %v7945_v24, %v527_v4 }
  0x78   : > { %v533_v23 = vshll.u32 %v7946_v26, %v527_v4  ;;  %v621_v27 = vshrl.u32 %v620_v5, 23  ;;  %vm297_vm10 = vcmp.eq.s32.totalorder %v8263_v54, 0  ;;  %v531_v6 = vshrl.u32 %v7946_v26, %v528_v16 }
  0x79   : > { %v388_v19 = vmul.f32 %v387_v21, %v385_v9  ;;  %v472_v35 = vshll.u32 %v8282_v13, 30  ;;  %v536_v7 = vshll.u32 %v7947_v28, %v527_v4  ;;  %v539_v33 = vshll.u32 %v7948_v30, %v527_v4 }
  0x7a   : > { %vm296_vm11 = vcmp.lt.s32.totalorder %v8263_v54, 2  ;;  %v534_v37 = vshrl.u32 %v7947_v28, %v528_v16  ;;  %v537_v40 = vshrl.u32 %v7948_v30, %v528_v16  ;;  %v540_v41 = vshrl.u32 %v7949_v32, %v528_v16 }
  0x7b   : > { %v389_v36 = vxor.u32 2147483648, %v388_v19  ;;  %vm293_vm12 = vweird.f32 %v8074_v0  ;;  %v8301_v42 = vsub.s32 %v469_v25, %v472_v35  ;;  %v542_v22 = vshll.u32 %v7949_v32, %v527_v4 }
  0x7c   : > { %v543_v44 = vshrl.u32 %v7950_v39, %v528_v16  ;;  %vm545_vm13 = vcmp.lt.s32.totalorder %v8284_v14, 1  ;;  %v529_v49 = vshrl.u32 %v7945_v24, %v528_v16  ;;  %v532_v50 = vor.u32 %v531_v6, %v530_v20 }
  0x7d   : > { %v390_v46 = vsel %vm307_vm0, %v389_v36, %v388_v19  ;;  %v535_v12 = vor.u32 %v534_v37, %v533_v23  ;;  %v475_v52 = vsub.s32 0, %v8301_v42  ;;  %v538_v53 = vor.u32 %v537_v40, %v536_v7 }
  0x7e   : > { %v393_v51 = vsel %vm8213_vm2, %v8078_v2, %v390_v46  ;;  %v541_v55 = vor.u32 %v540_v41, %v539_v33  ;;  %v465_v56 = vadd.s32 %v8248_v38, %v8254_v43  ;;  %vm547_vm14 = vcmp.lt.s32.totalorder %v8284_v14, 3 }
  0x7f   : > { %7596 = vcosq.f32 %v393_v51  ;;  %vm548_vm15 = vcmp.lt.s32.totalorder %v8284_v14, 4  ;;  %v7026_v57 = vmin.u32 %v475_v52, %v8301_v42  ;;  %v544_v45 = vor.u32 %v543_v44, %v542_v22 }
  0x80   : > { %7598 = vsinq.f32 %v393_v51  ;;  %v550_v61 = vsel %vm548_vm15, %v538_v53, 2102212464  ;;  %vm546_vm0 = vcmp.lt.s32.totalorder %v8284_v14, 2  ;;  %v553_v34 = vsel %vm545_vm13, %v532_v50, %v535_v12 }
  0x81   : > { %v554_v38 = vsel %vm548_vm15, %v541_v55, 920167782  ;;  %v7033_v43 = vadd.s32 4294967169, %v621_v27  ;;  %v477_v47 = vclz %v7026_v57  ;;  %v495_v25 = vsub.s32 4, %v8282_v13 }
  0x82   : > { %v549_v62 = vsel %vm545_vm13, %v529_v49, %v532_v50  ;;  %v551_v3 = vsel %vm547_vm14, %v535_v12, %v550_v61  ;;  %v555_v21 = vsel %vm547_vm14, %v538_v53, %v554_v38  ;;  %v557_v5 = vsel %vm545_vm13, %v535_v12, %v538_v53 }
  0x83   : > { %v7593_v58 = vpop.eup %7592  ;;  %v7027_v4 = vadd.s32 4294967294, %v477_v47  ;;  %v556_v9 = vsel %vm546_vm0, %v553_v34, %v555_v21  ;;  %v558_v16 = vsel %vm548_vm15, %v544_v45, 1326507024  ;;  %v552_v6 = vsel %vm546_vm0, %v549_v62, %v551_v3  ;;  %v8397_v62 = vld [vmem:[%s8067_s30 + $0x28] sm:$0xff] }
  0x84   : > { %v7595_v59 = vpop.eup %7594  ;;  %v301_v31 = vxor.u32 2147483648, %v7593_v58  ;;  %v559_v20 = vsel %vm547_vm14, %v541_v55, %v558_v16  ;;  %v8345_v23 = vmul.u32.u64.low %v8286_v17, %v556_v9  ;;  %v8346_v27 = vmul.u32.u64.high %v8286_v17, %v556_v9, %v8345_v23 }
  0x85   : > { %v298_v63 = vxor.u32 2147483648, %v7595_v59  ;;  %vm7028_vm1 = vcmp.lt.s32.totalorder %v7027_v4, 0  ;;  %v560_v7 = vsel %vm546_vm0, %v557_v5, %v559_v20  ;;  %v627_v44 = vadd.s32 1, %v7033_v43 }
  0x86   : > { %v302_v8 = vsel %vm300_vm9, %v301_v31, %v7595_v59  ;;  %v480_v36 = vsel %vm7028_vm1, 0, %v7027_v4  ;;  %v8358_v37 = vmul.u32.u64.low %v8286_v17, %v560_v7  ;;  %v8359_v40 = vmul.u32.u64.high %v8286_v17, %v560_v7, %v8358_v37 }
  0x87   : > { %v299_v19 = vsel %vm297_vm10, %v7593_v58, %v298_v63  ;;  %v481_v41 = vsub.s32 32, %v480_v36  ;;  %v482_v22 = vshll.u32 %v8301_v42, %v480_v36  ;;  %v485_v54 = vsub.s32 4294967266, %v480_v36 }
  0x88   : > { %v303_v35 = vsel %vm296_vm11, %v299_v19, %v302_v8  ;;  %vm397_vm2 = vweird.f32 %v8078_v2  ;;  %vm411_vm3 = vcmp.lt.s32.totalorder %v8088_v15, 0  ;;  %v568_v0 = vmul.u32 %v8286_v17, %v552_v6 }
  0x89   : > { %v304_v33 = vsel %vm293_vm12, nan, %v303_v35  ;;  %v571_v14 = vadd.s32 1, %v8346_v27  ;;  %vm8373_vm4 = vcmp.le.f32.partialorder %v409_v48, 0.7853982  ;;  %v483_v42 = vshrl.u32 %v465_v56, %v481_v41 }
  0x8a   : > { %6857 = vst [vmem:[%s8364_s17] sm:$0xff] %v304_v33  ;;  %v486_v49 = vadd.s32 127, %v485_v54  ;;  %vm628_vm5 = vcmp.gt.s32.totalorder %v627_v44, 0  ;;  %vm404_vm6 = vcmp.eq.s32.totalorder %v8276_v11, 2  ;;  %vm570_vm7 = vc.u32 %v8359_v40, %v8345_v23 }
  0x8b   : > { %v625_v50 = vor.u32 8388608, %v8280_v10  ;;  %v629_v12 = vsel %vm628_vm5, %v627_v44, 0  ;;  %v484_v51 = vor.u32 %v483_v42, %v482_v22  ;;  %v8384_v48 = vsel %vm411_vm3, %v495_v25, %v8282_v13 }
  0x8c   : > { %v7597_v17 = vpop.eup %7596  ;;  %v487_v52 = vshll.u32 %v486_v49, 23  ;;  %v572_v53 = vsel %vm570_vm7, %v571_v14, %v8346_v27  ;;  %vm401_vm8 = vcmp.eq.s32.totalorder %v8276_v11, 0  ;;  %v631_v45 = vand.u32 31, %v629_v12 }
  0x8d   : > { %v7599_v55 = vpop.eup %7598  ;;  %v405_v56 = vxor.u32 2147483648, %v7597_v17  ;;  %v573_v57 = vadd.s32 %v572_v53, %v568_v0  ;;  %vm400_vm9 = vcmp.lt.s32.totalorder %v8276_v11, 2  ;;  %v491_v58 = vcvt.s32.f32 %v484_v51 }
  0x8e   : > { %v402_v10 = vxor.u32 2147483648, %v7599_v55  ;;  %v488_v61 = vor.u32 4788187, %v487_v52  ;;  %v498_v13 = vsel %vm8373_vm4, 0, %v8384_v48  ;;  %v632_v43 = vsub.s32 32, %v631_v45 }
  0x8f   : > { %v406_v34 = vsel %vm404_vm6, %v405_v56, %v7599_v55  ;;  %v574_v38 = vadd.s32 536870912, %v573_v57  ;;  %v630_v47 = vshrl.u32 %v629_v12, 5  ;;  %v8394_v25 = vshll.u32 %v625_v50, 8 }
  0x90   : > { %v403_v59 = vsel %vm401_vm8, %v7597_v17, %v402_v10  ;;  %v489_v31 = vand.u32 2147483647, %v488_v61  ;;  %v634_v21 = vshll.u32 %v7945_v24, %v631_v45  ;;  %v637_v11 = vshll.u32 %v7946_v26, %v631_v45 }
  0x91   : > { %v407_v63 = vsel %vm400_vm9, %v403_v59, %v406_v34  ;;  %v575_v3 = vshrl.u32 %v574_v38, 30  ;;  %v635_v4 = vshrl.u32 %v7946_v26, %v632_v43  ;;  %v638_v9 = vshrl.u32 %v7947_v28, %v632_v43 }
  0x92   : > { %v408_v5 = vsel %vm397_vm2, nan, %v407_v63  ;;  %v492_v8 = vmul.f32 %v491_v58, %v489_v31  ;;  %vm515_vm10 = vcmp.lt.s32.totalorder %v8160_v60, 0  ;;  %v640_v19 = vshll.u32 %v7947_v28, %v631_v45 }
  0x93   : > { %v576_v16 = vshll.u32 %v575_v3, 30  ;;  %v641_v20 = vshrl.u32 %v7948_v30, %v632_v43  ;;  %v643_v27 = vshll.u32 %v7948_v30, %v631_v45  ;;  %6858 = vst [vmem:[%s8364_s17 + $0x8] sm:$0xff] %v408_v5  ;;  %v644_v6 = vshrl.u32 %v7949_v32, %v632_v43 }
  0x94   : > { %v493_v35 = vxor.u32 2147483648, %v492_v8  ;;  %vm649_vm11 = vcmp.lt.s32.totalorder %v630_v47, 1  ;;  %v724_v2 = vand.u32 2139095040, %v8397_v62  ;;  %v633_v33 = vshrl.u32 %v7945_v24, %v632_v43 }
  0x95   : > { %v8412_v7 = vsub.s32 %v573_v57, %v576_v16  ;;  %v646_v36 = vshll.u32 %v7949_v32, %v631_v45  ;;  %v647_v37 = vshrl.u32 %v7950_v39, %v632_v43  ;;  %vm8421_vm12 = vcmp.le.f32.partialorder %v513_v1, 0.7853982 }
  0x96   : > { %v494_v41 = vsel %vm411_vm3, %v493_v35, %v492_v8  ;;  %v636_v54 = vor.u32 %v635_v4, %v634_v21  ;;  %v639_v44 = vor.u32 %v638_v9, %v637_v11  ;;  %v645_v0 = vor.u32 %v644_v6, %v643_v27 }
  0x97   : > { %v497_v14 = vsel %vm8373_vm4, %v8088_v15, %v494_v41  ;;  %v579_v42 = vsub.s32 0, %v8412_v7  ;;  %v599_v49 = vsub.s32 4, %v575_v3  ;;  %v642_v50 = vor.u32 %v641_v20, %v640_v19 }
  0x98   : > { %7600 = vcosq.f32 %v497_v14  ;;  %v648_v12 = vor.u32 %v647_v37, %v646_v36  ;;  %vm650_vm13 = vcmp.lt.s32.totalorder %v630_v47, 2  ;;  %vm652_vm14 = vcmp.lt.s32.totalorder %v630_v47, 4 }
  0x99   : > { %7602 = vsinq.f32 %v497_v14  ;;  %v7030_v1 = vmin.u32 %v579_v42, %v8412_v7  ;;  %vm651_vm15 = vcmp.lt.s32.totalorder %v630_v47, 3  ;;  %v654_v17 = vsel %vm652_vm14, %v642_v50, 2102212464  ;;  %v8465_v14 = vld [vmem:[%s8067_s30 + $0x30] sm:$0xff] }
  0x9a   : > { %v653_v51 = vsel %vm649_vm11, %v633_v33, %v636_v54  ;;  %v655_v52 = vsel %vm651_vm15, %v639_v44, %v654_v17  ;;  %v657_v46 = vsel %vm649_vm11, %v636_v54, %v639_v44  ;;  %v658_v48 = vsel %vm652_vm14, %v645_v0, 920167782 }
  0x9b   : > { %v502_v53 = vadd.s32 3, %v498_v13  ;;  %v569_v55 = vadd.s32 %v8345_v23, %v8359_v40  ;;  %v581_v56 = vclz %v7030_v1  ;;  %v661_v57 = vsel %vm649_vm11, %v639_v44, %v642_v50 }
  0x9c   : > { %v600_v45 = vsel %vm515_vm10, %v599_v49, %v575_v3  ;;  %v659_v10 = vsel %vm651_vm15, %v642_v50, %v658_v48  ;;  %v662_v61 = vsel %vm652_vm14, %v648_v12, 1326507024  ;;  %v725_v58 = vshrl.u32 %v724_v2, 23 }
  0x9d   : > { %v7031_v34 = vadd.s32 4294967294, %v581_v56  ;;  %v656_v38 = vsel %vm650_vm13, %v653_v51, %v655_v52  ;;  %v660_v43 = vsel %vm650_vm13, %v657_v46, %v659_v10  ;;  %v663_v13 = vsel %vm651_vm15, %v645_v0, %v662_v61 }
  0x9e   : > { %v664_v59 = vsel %vm650_vm13, %v661_v57, %v663_v13  ;;  %v8444_v23 = vmul.u32.u64.low %v8394_v25, %v660_v43  ;;  %v8445_v40 = vmul.u32.u64.high %v8394_v25, %v660_v43, %v8444_v23  ;;  %v7037_v31 = vadd.s32 4294967169, %v725_v58 }
  0x9f   : > { %vm7032_vm0 = vcmp.lt.s32.totalorder %v7031_v34, 0  ;;  %v602_v63 = vsel %vm8421_vm12, 0, %v600_v45  ;;  %v8451_v3 = vmul.u32.u64.low %v8394_v25, %v664_v59  ;;  %v8452_v21 = vmul.u32.u64.high %v8394_v25, %v664_v59, %v8451_v3 }
  0xa0   : > { %v503_v11 = vand.u32 3, %v502_v53  ;;  %v584_v5 = vsel %vm7032_vm0, 0, %v7031_v34  ;;  %v731_v8 = vadd.s32 1, %v7037_v31  ;;  %v672_v16 = vmul.u32 %v8394_v25, %v656_v38 }
  0xa1   : > { %v585_v4 = vsub.s32 32, %v584_v5  ;;  %v586_v47 = vshll.u32 %v8412_v7, %v584_v5  ;;  %v589_v9 = vsub.s32 4294967266, %v584_v5  ;;  %v606_v19 = vadd.s32 3, %v602_v63 }
  0xa2   : > { %v675_v20 = vadd.s32 1, %v8445_v40  ;;  %vm732_vm1 = vcmp.gt.s32.totalorder %v731_v8, 0  ;;  %vm501_vm2 = vweird.f32 %v8088_v15  ;;  %vm674_vm3 = vc.u32 %v8452_v21, %v8444_v23 }
  0xa3   : > { %v587_v27 = vshrl.u32 %v569_v55, %v585_v4  ;;  %v590_v35 = vadd.s32 127, %v589_v9  ;;  %vm504_vm4 = vcmp.lt.s32.totalorder %v503_v11, 2  ;;  %v721_v2 = vand.u32 2147483647, %v8397_v62 }
  0xa4   : > { %v676_v6 = vsel %vm674_vm3, %v675_v20, %v8445_v40  ;;  %v733_v7 = vsel %vm732_vm1, %v731_v8, 0  ;;  %vm508_vm5 = vcmp.eq.s32.totalorder %v503_v11, 2  ;;  %vm505_vm6 = vcmp.eq.s32.totalorder %v503_v11, 0 }
  0xa5   : > { %v7601_v33 = vpop.eup %7600  ;;  %v588_v25 = vor.u32 %v587_v27, %v586_v47  ;;  %v591_v36 = vshll.u32 %v590_v35, 23  ;;  %v677_v37 = vadd.s32 %v676_v6, %v672_v16  ;;  %v8462_v44 = vand.u32 3, %v606_v19 }
  0xa6   : > { %v7603_v41 = vpop.eup %7602  ;;  %v509_v54 = vxor.u32 2147483648, %v7601_v33  ;;  %v735_v0 = vand.u32 31, %v733_v7  ;;  %v728_v17 = vand.u32 8388607, %v721_v2  ;;  %v825_v52 = vand.u32 2147483647, %v8465_v14 }
  0xa7   : > { %v506_v42 = vxor.u32 2147483648, %v7603_v41  ;;  %v592_v49 = vor.u32 4788187, %v591_v36  ;;  %v595_v50 = vcvt.s32.f32 %v588_v25  ;;  %v678_v12 = vadd.s32 536870912, %v677_v37 }
  0xa8   : > { %v510_v1 = vsel %vm508_vm5, %v509_v54, %v7603_v41  ;;  %v736_v51 = vsub.s32 32, %v735_v0  ;;  %v738_v55 = vshll.u32 %v7945_v24, %v735_v0  ;;  %v741_v45 = vshll.u32 %v7946_v26, %v735_v0 }
  0xa9   : > { %v507_v46 = vsel %vm505_vm6, %v7601_v33, %v506_v42  ;;  %v593_v48 = vand.u32 2147483647, %v592_v49  ;;  %v679_v53 = vshrl.u32 %v678_v12, 30  ;;  %v744_v10 = vshll.u32 %v7947_v28, %v735_v0 }
  0xaa   : > { %v511_v56 = vsel %vm504_vm4, %v507_v46, %v510_v1  ;;  %v739_v57 = vshrl.u32 %v7946_v26, %v736_v51  ;;  %v742_v38 = vshrl.u32 %v7947_v28, %v736_v51  ;;  %v729_v43 = vor.u32 8388608, %v728_v17 }
  0xab   : > { %v512_v61 = vsel %vm501_vm2, nan, %v511_v56  ;;  %v596_v58 = vmul.f32 %v595_v50, %v593_v48  ;;  %v680_v34 = vshll.u32 %v679_v53, 30  ;;  %v734_v13 = vshrl.u32 %v733_v7, 5 }
  0xac   : > { %v745_v59 = vshrl.u32 %v7948_v30, %v736_v51  ;;  %v747_v40 = vshll.u32 %v7948_v30, %v735_v0  ;;  %6859 = vst [vmem:[%s8364_s17 + $0x10] sm:$0xff] %v512_v61  ;;  %v748_v3 = vshrl.u32 %v7949_v32, %v736_v51  ;;  %v828_v11 = vand.u32 2139095040, %v8465_v14 }
  0xad   : > { %v597_v31 = vxor.u32 2147483648, %v596_v58  ;;  %v8481_v63 = vsub.s32 %v677_v37, %v680_v34  ;;  %vm619_vm7 = vcmp.lt.s32.totalorder %v8182_v18, 0  ;;  %v737_v15 = vshrl.u32 %v7945_v24, %v736_v51 }
  0xae   : > { %v740_v5 = vor.u32 %v739_v57, %v738_v55  ;;  %v750_v8 = vshll.u32 %v7949_v32, %v735_v0  ;;  %v751_v4 = vshrl.u32 %v7950_v39, %v736_v51  ;;  %v743_v16 = vor.u32 %v742_v38, %v741_v45 }
  0xaf   : > { %v598_v47 = vsel %vm515_vm10, %v597_v31, %v596_v58  ;;  %v683_v9 = vsub.s32 0, %v8481_v63  ;;  %v746_v19 = vor.u32 %v745_v59, %v744_v10  ;;  %v749_v27 = vor.u32 %v748_v3, %v747_v40 }
  0xb0   : > { %v601_v20 = vsel %vm8421_vm12, %v8160_v60, %v598_v47  ;;  %v752_v35 = vor.u32 %v751_v4, %v750_v8  ;;  %vm753_vm8 = vcmp.lt.s32.totalorder %v734_v13, 1  ;;  %vm8497_vm9 = vcmp.le.f32.partialorder %v617_v29, 0.7853982 }
  0xb1   : > { %7604 = vcosq.f32 %v601_v20  ;;  %v7034_v7 = vmin.u32 %v683_v9, %v8481_v63  ;;  %v769_v33 = vshll.u32 %v729_v43, 8  ;;  %v829_v25 = vshrl.u32 %v828_v11, 23 }
  0xb2   : > { %7606 = vsinq.f32 %v601_v20  ;;  %v703_v36 = vsub.s32 4, %v679_v53  ;;  %vm755_vm10 = vcmp.lt.s32.totalorder %v734_v13, 3  ;;  %vm756_vm11 = vcmp.lt.s32.totalorder %v734_v13, 4 }
  0xb3   : > { %v685_v22 = vclz %v7034_v7  ;;  %vm754_vm12 = vcmp.lt.s32.totalorder %v734_v13, 2  ;;  %v757_v37 = vsel %vm753_vm8, %v737_v15, %v740_v5  ;;  %v761_v41 = vsel %vm753_vm8, %v740_v5, %v743_v16 }
  0xb4   : > { %v758_v54 = vsel %vm756_vm11, %v746_v19, 2102212464  ;;  %v762_v0 = vsel %vm756_vm11, %v749_v27, 920167782  ;;  %v765_v29 = vsel %vm753_vm8, %v743_v16, %v746_v19  ;;  %v766_v42 = vsel %vm756_vm11, %v752_v35, 1326507024 }
  0xb5   : > { %v7035_v49 = vadd.s32 4294967294, %v685_v22  ;;  %v759_v50 = vsel %vm755_vm10, %v743_v16, %v758_v54  ;;  %v763_v12 = vsel %vm755_vm10, %v746_v19, %v762_v0  ;;  %v767_v1 = vsel %vm755_vm10, %v749_v27, %v766_v42 }
  0xb6   : > { %v673_v17 = vadd.s32 %v8444_v23, %v8452_v21  ;;  %v764_v51 = vsel %vm754_vm12, %v761_v41, %v763_v12  ;;  %v768_v46 = vsel %vm754_vm12, %v765_v29, %v767_v1  ;;  %v7041_v48 = vadd.s32 4294967169, %v829_v25  ;;  %v8535_v41 = vld [vmem:[%s8067_s30 + $0x38] sm:$0xff] }
  0xb7   : > { %vm7036_vm13 = vcmp.lt.s32.totalorder %v7035_v49, 0  ;;  %v704_v55 = vsel %vm619_vm7, %v703_v36, %v679_v53  ;;  %v8511_v56 = vmul.u32.u64.low %v769_v33, %v768_v46  ;;  %v8512_v57 = vmul.u32.u64.high %v769_v33, %v768_v46, %v8511_v56 }
  0xb8   : > { %v688_v45 = vsel %vm7036_vm13, 0, %v7035_v49  ;;  %v760_v10 = vsel %vm754_vm12, %v757_v37, %v759_v50  ;;  %v8515_v61 = vmul.u32.u64.low %v769_v33, %v764_v51  ;;  %v8516_v58 = vmul.u32.u64.high %v769_v33, %v764_v51, %v8515_v61 }
  0xb9   : > { %v689_v23 = vsub.s32 32, %v688_v45  ;;  %v690_v21 = vshll.u32 %v8481_v63, %v688_v45  ;;  %v693_v34 = vsub.s32 4294967266, %v688_v45  ;;  %v835_v38 = vadd.s32 1, %v7041_v48 }
  0xba   : > { %vm605_vm14 = vweird.f32 %v8160_v60  ;;  %v706_v53 = vsel %vm8497_vm9, 0, %v704_v55  ;;  %v776_v40 = vmul.u32 %v769_v33, %v760_v10  ;;  %vm778_vm15 = vc.u32 %v8512_v57, %v8515_v61 }
  0xbb   : > { %v691_v43 = vshrl.u32 %v673_v17, %v689_v23  ;;  %v694_v59 = vadd.s32 127, %v693_v34  ;;  %vm608_vm0 = vcmp.lt.s32.totalorder %v8462_v44, 2  ;;  %v779_v13 = vadd.s32 1, %v8516_v58 }
  0xbc   : > { %v832_v31 = vand.u32 8388607, %v825_v52  ;;  %vm836_vm1 = vcmp.gt.s32.totalorder %v835_v38, 0  ;;  %vm609_vm2 = vcmp.eq.s32.totalorder %v8462_v44, 0  ;;  %vm612_vm3 = vcmp.eq.s32.totalorder %v8462_v44, 2 }
  0xbd   : > { %v692_v63 = vor.u32 %v691_v43, %v690_v21  ;;  %v695_v3 = vshll.u32 %v694_v59, 23  ;;  %v837_v11 = vsel %vm836_vm1, %v835_v38, 0  ;;  %v710_v5 = vadd.s32 3, %v706_v53 }
  0xbe   : > { %v7605_v15 = vpop.eup %7604  ;;  %v780_v8 = vsel %vm778_vm15, %v779_v13, %v8516_v58  ;;  %v839_v4 = vand.u32 31, %v837_v11  ;;  %v833_v35 = vor.u32 8388608, %v832_v31  ;;  %v838_v51 = vshrl.u32 %v837_v11, 5 }
  0xbf   : > { %v7607_v47 = vpop.eup %7606  ;;  %v613_v9 = vxor.u32 2147483648, %v7605_v15  ;;  %v696_v16 = vor.u32 4788187, %v695_v3  ;;  %v699_v19 = vcvt.s32.f32 %v692_v63  ;;  %v781_v20 = vadd.s32 %v780_v8, %v776_v40 }
  0xc0   : > { %v610_v27 = vxor.u32 2147483648, %v7607_v47  ;;  %v840_v7 = vsub.s32 32, %v839_v4  ;;  %v842_v33 = vshll.u32 %v7945_v24, %v839_v4  ;;  %v845_v37 = vshll.u32 %v7946_v26, %v839_v4 }
  0xc1   : > { %v614_v25 = vsel %vm612_vm3, %v613_v9, %v7607_v47  ;;  %v697_v36 = vand.u32 2147483647, %v696_v16  ;;  %v782_v22 = vadd.s32 536870912, %v781_v20  ;;  %v848_v42 = vshll.u32 %v7947_v28, %v839_v4 }
  0xc2   : > { %v611_v54 = vsel %vm609_vm2, %v7605_v15, %v610_v27  ;;  %v843_v0 = vshrl.u32 %v7946_v26, %v840_v7  ;;  %v846_v29 = vshrl.u32 %v7947_v28, %v840_v7  ;;  %v849_v1 = vshrl.u32 %v7948_v30, %v840_v7 }
  0xc3   : > { %v615_v49 = vsel %vm608_vm0, %v611_v54, %v614_v25  ;;  %v700_v50 = vmul.f32 %v699_v19, %v697_v36  ;;  %v783_v12 = vshrl.u32 %v782_v22, 30  ;;  %v851_v46 = vshll.u32 %v7948_v30, %v839_v4 }
  0xc4   : > { %v616_v17 = vsel %vm605_vm14, nan, %v615_v49  ;;  %v8548_v48 = vshll.u32 %v833_v35, 8  ;;  %v841_v45 = vshrl.u32 %v7945_v24, %v840_v7  ;;  %v932_v10 = vand.u32 2139095040, %v8535_v41 }
  0xc5   : > { %v701_v55 = vxor.u32 2147483648, %v700_v50  ;;  %v784_v56 = vshll.u32 %v783_v12, 30  ;;  %6860 = vst [vmem:[%s8364_s17 + $0x18] sm:$0xff] %v616_v17  ;;  %v844_v44 = vor.u32 %v843_v0, %v842_v33  ;;  %v852_v58 = vshrl.u32 %v7949_v32, %v840_v7 }
  0xc6   : > { %v854_v23 = vshll.u32 %v7949_v32, %v839_v4  ;;  %v855_v60 = vshrl.u32 %v7950_v39, %v840_v7  ;;  %v847_v38 = vor.u32 %v846_v29, %v845_v37  ;;  %v850_v53 = vor.u32 %v849_v1, %v848_v42 }
  0xc7   : > { %v702_v21 = vsel %vm619_vm7, %v701_v55, %v700_v50  ;;  %v8558_v34 = vsub.s32 %v781_v20, %v784_v56  ;;  %v853_v59 = vor.u32 %v852_v58, %v851_v46  ;;  %vm857_vm4 = vcmp.lt.s32.totalorder %v838_v51, 1 }
  0xc8   : > { %v705_v43 = vsel %vm8497_vm9, %v8182_v18, %v702_v21  ;;  %v856_v40 = vor.u32 %v855_v60, %v854_v23  ;;  %vm859_vm5 = vcmp.lt.s32.totalorder %v838_v51, 3  ;;  %v933_v31 = vshrl.u32 %v932_v10, 23  ;;  %v8604_v60 = vld [vmem:[%s8067_s30 + $0x40] sm:$0xff] }
  0xc9   : > { %7608 = vcosq.f32 %v705_v43  ;;  %v787_v13 = vsub.s32 0, %v8558_v34  ;;  %vm858_vm6 = vcmp.lt.s32.totalorder %v838_v51, 2  ;;  %vm860_vm8 = vcmp.lt.s32.totalorder %v838_v51, 4 }
  0xca   : > { %7610 = vsinq.f32 %v705_v43  ;;  %v861_v63 = vsel %vm857_vm4, %v841_v45, %v844_v44  ;;  %v862_v11 = vsel %vm860_vm8, %v850_v53, 2102212464  ;;  %v865_v15 = vsel %vm857_vm4, %v844_v44, %v847_v38 }
  0xcb   : > { %v7038_v3 = vmin.u32 %v787_v13, %v8558_v34  ;;  %v866_v8 = vsel %vm860_vm8, %v853_v59, 920167782  ;;  %v863_v6 = vsel %vm859_vm5, %v847_v38, %v862_v11  ;;  %v869_v47 = vsel %vm857_vm4, %v847_v38, %v850_v53 }
  0xcc   : > { %v867_v4 = vsel %vm859_vm5, %v850_v53, %v866_v8  ;;  %v870_v9 = vsel %vm860_vm8, %v856_v40, 1326507024  ;;  %v711_v16 = vand.u32 3, %v710_v5  ;;  %v807_v20 = vsub.s32 4, %v783_v12 }
  0xcd   : > { %v789_v19 = vclz %v7038_v3  ;;  %v864_v27 = vsel %vm858_vm6, %v861_v63, %v863_v6  ;;  %v868_v35 = vsel %vm858_vm6, %v865_v15, %v867_v4  ;;  %v871_v7 = vsel %vm859_vm5, %v853_v59, %v870_v9 }
  0xce   : > { %v7045_v33 = vadd.s32 4294967169, %v933_v31  ;;  %v872_v36 = vsel %vm858_vm6, %v869_v47, %v871_v7  ;;  %v8572_v22 = vmul.u32.u64.low %v8548_v48, %v868_v35  ;;  %v8573_v37 = vmul.u32.u64.high %v8548_v48, %v868_v35, %v8572_v22 }
  0xcf   : > { %v7039_v25 = vadd.s32 4294967294, %v789_v19  ;;  %vm723_vm7 = vcmp.lt.s32.totalorder %v8397_v62, 0  ;;  %v8578_v5 = vmul.u32.u64.low %v8548_v48, %v872_v36  ;;  %v8579_v54 = vmul.u32.u64.high %v8548_v48, %v872_v36, %v8578_v5 }
  0xd0   : > { %v929_v0 = vand.u32 2147483647, %v8535_v41  ;;  %vm709_vm9 = vweird.f32 %v8182_v18  ;;  %v777_v29 = vadd.s32 %v8515_v61, %v8512_v57  ;;  %v808_v42 = vsel %vm723_vm7, %v807_v20, %v783_v12 }
  0xd1   : > { %vm7040_vm10 = vcmp.lt.s32.totalorder %v7039_v25, 0  ;;  %v939_v49 = vadd.s32 1, %v7045_v33  ;;  %vm712_vm11 = vcmp.lt.s32.totalorder %v711_v16, 2  ;;  %vm8589_vm12 = vcmp.le.f32.partialorder %v721_v2, 0.7853982 }
  0xd2   : > { %v792_v1 = vsel %vm7040_vm10, 0, %v7039_v25  ;;  %v880_v17 = vmul.u32 %v8548_v48, %v864_v27  ;;  %v883_v57 = vadd.s32 1, %v8573_v37  ;;  %v810_v61 = vsel %vm8589_vm12, 0, %v808_v42 }
  0xd3   : > { %v793_v51 = vsub.s32 32, %v792_v1  ;;  %v794_v46 = vshll.u32 %v8558_v34, %v792_v1  ;;  %v797_v55 = vsub.s32 4294967266, %v792_v1  ;;  %vm882_vm13 = vc.u32 %v8579_v54, %v8572_v22 }
  0xd4   : > { %v936_v2 = vand.u32 8388607, %v929_v0  ;;  %vm940_vm14 = vcmp.gt.s32.totalorder %v939_v49, 0  ;;  %v884_v48 = vsel %vm882_vm13, %v883_v57, %v8573_v37  ;;  %vm713_vm15 = vcmp.eq.s32.totalorder %v711_v16, 0 }
  0xd5   : > { %v795_v12 = vshrl.u32 %v777_v29, %v793_v51  ;;  %v798_v56 = vadd.s32 127, %v797_v55  ;;  %v941_v45 = vsel %vm940_vm14, %v939_v49, 0  ;;  %vm716_vm0 = vcmp.eq.s32.totalorder %v711_v16, 2 }
  0xd6   : > { %v7609_v10 = vpop.eup %7608  ;;  %v885_v44 = vadd.s32 %v884_v48, %v880_v17  ;;  %v943_v58 = vand.u32 31, %v941_v45  ;;  %v8606_v53 = vadd.s32 3, %v810_v61  ;;  %v937_v40 = vor.u32 8388608, %v936_v2 }
  0xd7   : > { %v7611_v23 = vpop.eup %7610  ;;  %v717_v21 = vxor.u32 2147483648, %v7609_v10  ;;  %v796_v34 = vor.u32 %v795_v12, %v794_v46  ;;  %v799_v38 = vshll.u32 %v798_v56, 23  ;;  %v1033_v11 = vand.u32 2147483647, %v8604_v60 }
  0xd8   : > { %v714_v43 = vxor.u32 2147483648, %v7611_v23  ;;  %v886_v59 = vadd.s32 536870912, %v885_v44  ;;  %v944_v13 = vsub.s32 32, %v943_v58  ;;  %v942_v6 = vshrl.u32 %v941_v45, 5 }
  0xd9   : > { %v718_v31 = vsel %vm716_vm0, %v717_v21, %v7611_v23  ;;  %v800_v63 = vor.u32 4788187, %v799_v38  ;;  %v803_v3 = vcvt.s32.f32 %v796_v34  ;;  %v1036_v4 = vand.u32 2139095040, %v8604_v60 }
  0xda   : > { %v715_v15 = vsel %vm713_vm15, %v7609_v10, %v714_v43  ;;  %v887_v8 = vshrl.u32 %v886_v59, 30  ;;  %v946_v19 = vshll.u32 %v7945_v24, %v943_v58  ;;  %v949_v20 = vshll.u32 %v7946_v26, %v943_v58 }
  0xdb   : > { %v719_v47 = vsel %vm712_vm11, %v715_v15, %v718_v31  ;;  %v801_v9 = vand.u32 2147483647, %v800_v63  ;;  %v947_v7 = vshrl.u32 %v7946_v26, %v944_v13  ;;  %v950_v33 = vshrl.u32 %v7947_v28, %v944_v13 }
  0xdc   : > { %v720_v27 = vsel %vm709_vm9, nan, %v719_v47  ;;  %v888_v35 = vshll.u32 %v887_v8, 30  ;;  %v952_v36 = vshll.u32 %v7947_v28, %v943_v58  ;;  %v953_v37 = vshrl.u32 %v7948_v30, %v944_v13 }
  0xdd   : > { %v804_v25 = vmul.f32 %v803_v3, %v801_v9  ;;  %v955_v16 = vshll.u32 %v7948_v30, %v943_v58  ;;  %6861 = vst [vmem:[%s8364_s17 + $0x20] sm:$0xff] %v720_v27  ;;  %v956_v29 = vshrl.u32 %v7949_v32, %v944_v13  ;;  %v958_v18 = vshll.u32 %v7949_v32, %v943_v58 }
  0xde   : > { %v8622_v5 = vsub.s32 %v885_v44, %v888_v35  ;;  %v8626_v42 = vshll.u32 %v937_v40, 8  ;;  %v881_v1 = vadd.s32 %v8572_v22, %v8579_v54  ;;  %v959_v17 = vshrl.u32 %v7950_v39, %v944_v13 }
  0xdf   : > { %v805_v49 = vxor.u32 2147483648, %v804_v25  ;;  %v1037_v51 = vshrl.u32 %v1036_v4, 23  ;;  %vm827_vm1 = vcmp.lt.s32.totalorder %v8465_v14, 0  ;;  %v945_v55 = vshrl.u32 %v7945_v24, %v944_v13 }
  0xe0   : > { %v891_v46 = vsub.s32 0, %v8622_v5  ;;  %v948_v57 = vor.u32 %v947_v7, %v946_v19  ;;  %v951_v61 = vor.u32 %v950_v33, %v949_v20  ;;  %v954_v12 = vor.u32 %v953_v37, %v952_v36 }
  0xe1   : > { %v806_v2 = vsel %vm723_vm7, %v805_v49, %v804_v25  ;;  %v957_v56 = vor.u32 %v956_v29, %v955_v16  ;;  %vm961_vm2 = vcmp.lt.s32.totalorder %v942_v6, 1  ;;  %v960_v48 = vor.u32 %v959_v17, %v958_v18 }
  0xe2   : > { %v809_v22 = vsel %vm8589_vm12, %v8397_v62, %v806_v2  ;;  %v7042_v54 = vmin.u32 %v891_v46, %v8622_v5  ;;  %vm964_vm3 = vcmp.lt.s32.totalorder %v942_v6, 4  ;;  %vm962_vm4 = vcmp.lt.s32.totalorder %v942_v6, 2 }
  0xe3   : > { %7612 = vcosq.f32 %v809_v22  ;;  %vm963_vm5 = vcmp.lt.s32.totalorder %v942_v6, 3  ;;  %v966_v45 = vsel %vm964_vm3, %v954_v12, 2102212464  ;;  %v965_v44 = vsel %vm961_vm2, %v945_v55, %v948_v57 }
  0xe4   : > { %7614 = vsinq.f32 %v809_v22  ;;  %v893_v10 = vclz %v7042_v54  ;;  %v969_v58 = vsel %vm961_vm2, %v948_v57, %v951_v61  ;;  %v911_v23 = vsub.s32 4, %v887_v8 }
  0xe5   : > { %v967_v21 = vsel %vm963_vm5, %v951_v61, %v966_v45  ;;  %v970_v34 = vsel %vm964_vm3, %v957_v56, 920167782  ;;  %v973_v50 = vsel %vm961_vm2, %v951_v61, %v954_v12  ;;  %v974_v59 = vsel %vm964_vm3, %v960_v48, 1326507024 }
  0xe6   : > { %v7043_v38 = vadd.s32 4294967294, %v893_v10  ;;  %v971_v43 = vsel %vm963_vm5, %v954_v12, %v970_v34  ;;  %v1040_v40 = vand.u32 8388607, %v1033_v11  ;;  %v968_v13 = vsel %vm962_vm4, %v965_v44, %v967_v21 }
  0xe7   : > { %v972_v31 = vsel %vm962_vm4, %v969_v58, %v971_v43  ;;  %v975_v63 = vsel %vm963_vm5, %v957_v56, %v974_v59  ;;  %v7049_v3 = vadd.s32 4294967169, %v1037_v51  ;;  %v912_v19 = vsel %vm827_vm1, %v911_v23, %v887_v8 }
  0xe8   : > { %vm7044_vm6 = vcmp.lt.s32.totalorder %v7043_v38, 0  ;;  %v976_v15 = vsel %vm962_vm4, %v973_v50, %v975_v63  ;;  %v8652_v4 = vmul.u32.u64.low %v8626_v42, %v972_v31  ;;  %v8653_v47 = vmul.u32.u64.high %v8626_v42, %v972_v31, %v8652_v4 }
  0xe9   : > { %v896_v9 = vsel %vm7044_vm6, 0, %v7043_v38  ;;  %v8659_v20 = vmul.u32.u64.low %v8626_v42, %v976_v15  ;;  %v8660_v27 = vmul.u32.u64.high %v8626_v42, %v976_v15, %v8659_v20  ;;  %v1043_v25 = vadd.s32 1, %v7049_v3 }
  0xea   : > { %v897_v35 = vsub.s32 32, %v896_v9  ;;  %v898_v7 = vshll.u32 %v8622_v5, %v896_v9  ;;  %v901_v33 = vsub.s32 4294967266, %v896_v9  ;;  %v815_v6 = vand.u32 3, %v8606_v53 }
  0xeb   : > { %vm8666_vm8 = vcmp.le.f32.partialorder %v825_v52, 0.7853982  ;;  %v984_v37 = vmul.u32 %v8626_v42, %v968_v13  ;;  %v987_v29 = vadd.s32 1, %v8653_v47  ;;  %vm1044_vm7 = vcmp.gt.s32.totalorder %v1043_v25, 0 }
  0xec   : > { %v899_v8 = vshrl.u32 %v881_v1, %v897_v35  ;;  %v902_v16 = vadd.s32 127, %v901_v33  ;;  %v914_v5 = vsel %vm8666_vm8, 0, %v912_v19  ;;  %vm986_vm9 = vc.u32 %v8660_v27, %v8652_v4 }
  0xed   : > { %v1041_v53 = vor.u32 8388608, %v1040_v40  ;;  %v1045_v18 = vsel %vm1044_vm7, %v1043_v25, 0  ;;  %v988_v17 = vsel %vm986_vm9, %v987_v29, %v8653_v47  ;;  %vm813_vm10 = vweird.f32 %v8397_v62  ;;  %v8696_v47 = vld [vmem:[%s8067_s30 + $0x48] sm:$0xff] }
  0xee   : > { %v900_v49 = vor.u32 %v899_v8, %v898_v7  ;;  %v903_v52 = vshll.u32 %v902_v16, 23  ;;  %v8677_v51 = vshrl.u32 %v1045_v18, 5  ;;  %vm816_vm11 = vcmp.lt.s32.totalorder %v815_v6, 2 }
  0xef   : > { %v989_v42 = vadd.s32 %v988_v17, %v984_v37  ;;  %v1047_v1 = vand.u32 31, %v1045_v18  ;;  %vm817_vm12 = vcmp.eq.s32.totalorder %v815_v6, 0  ;;  %vm820_vm13 = vcmp.eq.s32.totalorder %v815_v6, 2 }
  0xf0   : > { %v7613_v46 = vpop.eup %7612  ;;  %v904_v55 = vor.u32 4788187, %v903_v52  ;;  %v907_v57 = vcvt.s32.f32 %v900_v49  ;;  %v918_v12 = vadd.s32 3, %v914_v5  ;;  %vm1065_vm14 = vcmp.lt.s32.totalorder %v8677_v51, 1 }
  0xf1   : > { %v7615_v61 = vpop.eup %7614  ;;  %v821_v2 = vxor.u32 2147483648, %v7613_v46  ;;  %v990_v56 = vadd.s32 536870912, %v989_v42  ;;  %v1048_v22 = vsub.s32 32, %v1047_v1  ;;  %v8681_v45 = vshll.u32 %v1041_v53, 8 }
  0xf2   : > { %v818_v54 = vxor.u32 2147483648, %v7615_v61  ;;  %v905_v48 = vand.u32 2147483647, %v904_v55  ;;  %v1050_v58 = vshll.u32 %v7945_v24, %v1047_v1  ;;  %vm931_vm15 = vcmp.lt.s32.totalorder %v8535_v41, 0 }
  0xf3   : > { %v822_v10 = vsel %vm820_vm13, %v821_v2, %v7615_v61  ;;  %v991_v44 = vshrl.u32 %v990_v56, 30  ;;  %v1051_v23 = vshrl.u32 %v7946_v26, %v1048_v22  ;;  %v1053_v50 = vshll.u32 %v7946_v26, %v1047_v1 }
  0xf4   : > { %v819_v21 = vsel %vm817_vm12, %v7613_v46, %v818_v54  ;;  %v908_v34 = vmul.f32 %v907_v57, %v905_v48  ;;  %v1054_v38 = vshrl.u32 %v7947_v28, %v1048_v22  ;;  %v1056_v40 = vshll.u32 %v7947_v28, %v1047_v1 }
  0xf5   : > { %v823_v43 = vsel %vm816_vm11, %v819_v21, %v822_v10  ;;  %v992_v59 = vshll.u32 %v991_v44, 30  ;;  %v1057_v13 = vshrl.u32 %v7948_v30, %v1048_v22  ;;  %v1015_v3 = vsub.s32 4, %v991_v44 }
  0xf6   : > { %v824_v31 = vsel %vm813_vm10, nan, %v823_v43  ;;  %v909_v63 = vxor.u32 2147483648, %v908_v34  ;;  %v1049_v15 = vshrl.u32 %v7945_v24, %v1048_v22  ;;  %v1052_v19 = vor.u32 %v1051_v23, %v1050_v58 }
  0xf7   : > { %v8698_v9 = vsub.s32 %v989_v42, %v992_v59  ;;  %v1059_v20 = vshll.u32 %v7948_v30, %v1047_v1  ;;  %v1060_v35 = vshrl.u32 %v7949_v32, %v1048_v22  ;;  %6862 = vst [vmem:[%s8364_s17 + $0x28] sm:$0xff] %v824_v31  ;;  %v1055_v33 = vor.u32 %v1054_v38, %v1053_v50 }
  0xf8   : > { %v910_v7 = vsel %vm827_vm1, %v909_v63, %v908_v34  ;;  %v1062_v62 = vshll.u32 %v7949_v32, %v1047_v1  ;;  %v1063_v25 = vshrl.u32 %v7950_v39, %v1048_v22  ;;  %vm8712_vm0 = vcmp.le.f32.partialorder %v929_v0, 0.7853982 }
  0xf9   : > { %v913_v6 = vsel %vm8666_vm8, %v8465_v14, %v910_v7  ;;  %v995_v8 = vsub.s32 0, %v8698_v9  ;;  %v1058_v16 = vor.u32 %v1057_v13, %v1056_v40  ;;  %v1061_v29 = vor.u32 %v1060_v35, %v1059_v20 }
  0xfa   : > { %7616 = vcosq.f32 %v913_v6  ;;  %v1064_v5 = vor.u32 %v1063_v25, %v1062_v62  ;;  %vm1068_vm1 = vcmp.lt.s32.totalorder %v8677_v51, 4  ;;  %v1140_v53 = vand.u32 2139095040, %v8696_v47 }
  0xfb   : > { %7618 = vsinq.f32 %v913_v6  ;;  %v7046_v36 = vmin.u32 %v995_v8, %v8698_v9  ;;  %vm1066_vm2 = vcmp.lt.s32.totalorder %v8677_v51, 2  ;;  %vm1067_vm3 = vcmp.lt.s32.totalorder %v8677_v51, 3 }
  0xfc   : > { %v1069_v0 = vsel %vm1065_vm14, %v1049_v15, %v1052_v19  ;;  %v1070_v18 = vsel %vm1068_vm1, %v1058_v16, 2102212464  ;;  %v1073_v49 = vsel %vm1065_vm14, %v1052_v19, %v1055_v33  ;;  %v1074_v52 = vsel %vm1068_vm1, %v1061_v29, 920167782 }
  0xfd   : > { %v8730_v17 = vand.u32 3, %v918_v12  ;;  %v997_v42 = vclz %v7046_v36  ;;  %v1016_v1 = vsel %vm931_vm15, %v1015_v3, %v991_v44  ;;  %v1077_v46 = vsel %vm1065_vm14, %v1055_v33, %v1058_v16 }
  0xfe   : > { %v1071_v55 = vsel %vm1067_vm3, %v1055_v33, %v1070_v18  ;;  %v1075_v57 = vsel %vm1067_vm3, %v1058_v16, %v1074_v52  ;;  %v1078_v61 = vsel %vm1068_vm1, %v1064_v5, 1326507024  ;;  %v1141_v2 = vshrl.u32 %v1140_v53, 23 }
  0xff   : > { %v7047_v56 = vadd.s32 4294967294, %v997_v42  ;;  %v1072_v12 = vsel %vm1066_vm2, %v1069_v0, %v1071_v55  ;;  %v1076_v22 = vsel %vm1066_vm2, %v1073_v49, %v1075_v57  ;;  %v1079_v54 = vsel %vm1067_vm3, %v1061_v29, %v1078_v61 }
 0x100   : > { %v985_v48 = vadd.s32 %v8652_v4, %v8660_v27  ;;  %v1080_v10 = vsel %vm1066_vm2, %v1077_v46, %v1079_v54  ;;  %v8753_v44 = vmul.u32.u64.low %v8681_v45, %v1076_v22  ;;  %v8754_v58 = vmul.u32.u64.high %v8681_v45, %v1076_v22, %v8753_v44 }
 0x101   : > { %vm7048_vm4 = vcmp.lt.s32.totalorder %v7047_v56, 0  ;;  %v8758_v23 = vmul.u32.u64.low %v8681_v45, %v1080_v10  ;;  %v8759_v21 = vmul.u32.u64.high %v8681_v45, %v1080_v10, %v8758_v23  ;;  %v7053_v34 = vadd.s32 4294967169, %v1141_v2 }
 0x102   : > { %v1000_v50 = vsel %vm7048_vm4, 0, %v7047_v56  ;;  %v1018_v38 = vsel %vm8712_vm0, 0, %v1016_v1  ;;  %v1088_v4 = vmul.u32 %v8681_v45, %v1072_v12  ;;  %v1137_v27 = vand.u32 2147483647, %v8696_v47  ;;  %v8782_v1 = vld [vmem:[%s8067_s30 + $0x50] sm:$0xff] }
 0x103   : > { %v1001_v51 = vsub.s32 32, %v1000_v50  ;;  %v1002_v43 = vshll.u32 %v8698_v9, %v1000_v50  ;;  %v1005_v59 = vsub.s32 4294967266, %v1000_v50  ;;  %v1147_v40 = vadd.s32 1, %v7053_v34 }
 0x104   : > { %vm917_vm5 = vweird.f32 %v8465_v14  ;;  %v1091_v13 = vadd.s32 1, %v8754_v58  ;;  %vm924_vm6 = vcmp.eq.s32.totalorder %v8730_v17, 2  ;;  %vm1090_vm8 = vc.u32 %v8759_v21, %v8753_v44 }
 0x105   : > { %v1003_v31 = vshrl.u32 %v985_v48, %v1001_v51  ;;  %v1006_v63 = vadd.s32 127, %v1005_v59  ;;  %v1022_v3 = vadd.s32 3, %v1018_v38  ;;  %v1144_v15 = vand.u32 8388607, %v1137_v27 }
 0x106   : > { %v1092_v45 = vsel %vm1090_vm8, %v1091_v13, %v8754_v58  ;;  %vm1148_vm7 = vcmp.gt.s32.totalorder %v1147_v40, 0  ;;  %vm920_vm9 = vcmp.lt.s32.totalorder %v8730_v17, 2  ;;  %vm921_vm10 = vcmp.eq.s32.totalorder %v8730_v17, 0 }
 0x107   : > { %v7617_v9 = vpop.eup %7616  ;;  %v1004_v19 = vor.u32 %v1003_v31, %v1002_v43  ;;  %v1007_v20 = vshll.u32 %v1006_v63, 23  ;;  %v1093_v35 = vadd.s32 %v1092_v45, %v1088_v4  ;;  %v1149_v7 = vsel %vm1148_vm7, %v1147_v40, 0 }
 0x108   : > { %v7619_v33 = vpop.eup %7618  ;;  %v925_v62 = vxor.u32 2147483648, %v7617_v9  ;;  %v1151_v25 = vand.u32 31, %v1149_v7  ;;  %v8778_v53 = vand.u32 3, %v1022_v3  ;;  %v1145_v36 = vor.u32 8388608, %v1144_v15 }
 0x109   : > { %v922_v6 = vxor.u32 2147483648, %v7619_v33  ;;  %v1008_v8 = vor.u32 4788187, %v1007_v20  ;;  %v1011_v16 = vcvt.s32.f32 %v1004_v19  ;;  %v1094_v29 = vadd.s32 536870912, %v1093_v35 }
 0x10a   : > { %v926_v5 = vsel %vm924_vm6, %v925_v62, %v7619_v33  ;;  %v1152_v0 = vsub.s32 32, %v1151_v25  ;;  %v1154_v42 = vshll.u32 %v7945_v24, %v1151_v25  ;;  %v1157_v57 = vshll.u32 %v7946_v26, %v1151_v25 }
 0x10b   : > { %v923_v18 = vsel %vm921_vm10, %v7617_v9, %v922_v6  ;;  %v1009_v49 = vand.u32 2147483647, %v1008_v8  ;;  %v1095_v52 = vshrl.u32 %v1094_v29, 30  ;;  %v1160_v61 = vshll.u32 %v7947_v28, %v1151_v25 }
 0x10c   : > { %v927_v46 = vsel %vm920_vm9, %v923_v18, %v926_v5  ;;  %v1155_v55 = vshrl.u32 %v7946_v26, %v1152_v0  ;;  %v1158_v22 = vshrl.u32 %v7947_v28, %v1152_v0  ;;  %v1150_v54 = vshrl.u32 %v1149_v7, 5 }
 0x10d   : > { %v928_v2 = vsel %vm917_vm5, nan, %v927_v46  ;;  %v1012_v56 = vmul.f32 %v1011_v16, %v1009_v49  ;;  %v1096_v12 = vshll.u32 %v1095_v52, 30  ;;  %v1161_v48 = vshrl.u32 %v7948_v30, %v1152_v0 }
 0x10e   : > { %v1163_v10 = vshll.u32 %v7948_v30, %v1151_v25  ;;  %v1241_v17 = vand.u32 2147483647, %v8782_v1  ;;  %6863 = vst [vmem:[%s8364_s17 + $0x30] sm:$0xff] %v928_v2  ;;  %v1164_v34 = vshrl.u32 %v7949_v32, %v1152_v0  ;;  %v1244_v14 = vand.u32 2139095040, %v8782_v1 }
 0x10f   : > { %v1013_v58 = vxor.u32 2147483648, %v1012_v56  ;;  %v8796_v23 = vsub.s32 %v1093_v35, %v1096_v12  ;;  %vm1035_vm11 = vcmp.lt.s32.totalorder %v8604_v60, 0  ;;  %v1153_v50 = vshrl.u32 %v7945_v24, %v1152_v0 }
 0x110   : > { %v1156_v38 = vor.u32 %v1155_v55, %v1154_v42  ;;  %v1166_v4 = vshll.u32 %v7949_v32, %v1151_v25  ;;  %v1167_v51 = vshrl.u32 %v7950_v39, %v1152_v0  ;;  %v1159_v40 = vor.u32 %v1158_v22, %v1157_v57 }
 0x111   : > { %v1014_v43 = vsel %vm931_vm15, %v1013_v58, %v1012_v56  ;;  %v1099_v59 = vsub.s32 0, %v8796_v23  ;;  %v1162_v13 = vor.u32 %v1161_v48, %v1160_v61  ;;  %v1165_v63 = vor.u32 %v1164_v34, %v1163_v10 }
 0x112   : > { %v1017_v31 = vsel %vm8712_vm0, %v8535_v41, %v1014_v43  ;;  %v1168_v3 = vor.u32 %v1167_v51, %v1166_v4  ;;  %vm1169_vm12 = vcmp.lt.s32.totalorder %v1150_v54, 1  ;;  %vm8812_vm13 = vcmp.le.f32.partialorder %v1033_v11, 0.7853982 }
 0x113   : > { %7620 = vcosq.f32 %v1017_v31  ;;  %v7050_v15 = vmin.u32 %v1099_v59, %v8796_v23  ;;  %v1185_v9 = vshll.u32 %v1145_v36, 8  ;;  %v1245_v19 = vshrl.u32 %v1244_v14, 23 }
 0x114   : > { %7622 = vsinq.f32 %v1017_v31  ;;  %v1119_v20 = vsub.s32 4, %v1095_v52  ;;  %vm1171_vm14 = vcmp.lt.s32.totalorder %v1150_v54, 3  ;;  %vm1172_vm15 = vcmp.lt.s32.totalorder %v1150_v54, 4 }
 0x115   : > { %v1101_v37 = vclz %v7050_v15  ;;  %vm1170_vm0 = vcmp.lt.s32.totalorder %v1150_v54, 2  ;;  %v1173_v35 = vsel %vm1169_vm12, %v1153_v50, %v1156_v38  ;;  %v1177_v7 = vsel %vm1169_vm12, %v1156_v38, %v1159_v40 }
 0x116   : > { %v1174_v33 = vsel %vm1172_vm15, %v1162_v13, 2102212464  ;;  %v1178_v62 = vsel %vm1172_vm15, %v1165_v63, 920167782  ;;  %v1181_v11 = vsel %vm1169_vm12, %v1159_v40, %v1162_v13  ;;  %v1182_v25 = vsel %vm1172_vm15, %v1168_v3, 1326507024 }
 0x117   : > { %v7051_v6 = vadd.s32 4294967294, %v1101_v37  ;;  %v1175_v8 = vsel %vm1171_vm14, %v1159_v40, %v1174_v33  ;;  %v1179_v16 = vsel %vm1171_vm14, %v1162_v13, %v1178_v62  ;;  %v1183_v29 = vsel %vm1171_vm14, %v1165_v63, %v1182_v25 }
 0x118   : > { %v1089_v5 = vadd.s32 %v8753_v44, %v8759_v21  ;;  %v1180_v36 = vsel %vm1170_vm0, %v1177_v7, %v1179_v16  ;;  %v1184_v0 = vsel %vm1170_vm0, %v1181_v11, %v1183_v29  ;;  %v7057_v18 = vadd.s32 4294967169, %v1245_v19  ;;  %v8850_v7 = vld [vmem:[%s8067_s30 + $0x58] sm:$0xff] }
 0x119   : > { %vm7052_vm1 = vcmp.lt.s32.totalorder %v7051_v6, 0  ;;  %v1120_v49 = vsel %vm1035_vm11, %v1119_v20, %v1095_v52  ;;  %v8826_v42 = vmul.u32.u64.low %v1185_v9, %v1184_v0  ;;  %v8827_v46 = vmul.u32.u64.high %v1185_v9, %v1184_v0, %v8826_v42 }
 0x11a   : > { %v1104_v55 = vsel %vm7052_vm1, 0, %v7051_v6  ;;  %v1176_v57 = vsel %vm1170_vm0, %v1173_v35, %v1175_v8  ;;  %v8830_v61 = vmul.u32.u64.low %v1185_v9, %v1180_v36  ;;  %v8831_v2 = vmul.u32.u64.high %v1185_v9, %v1180_v36, %v8830_v61 }
 0x11b   : > { %v1105_v44 = vsub.s32 32, %v1104_v55  ;;  %v1106_v21 = vshll.u32 %v8796_v23, %v1104_v55  ;;  %v1109_v56 = vsub.s32 4294967266, %v1104_v55  ;;  %v1251_v12 = vadd.s32 1, %v7057_v18 }
 0x11c   : > { %vm1021_vm2 = vweird.f32 %v8535_v41  ;;  %v1122_v52 = vsel %vm8812_vm13, 0, %v1120_v49  ;;  %v1192_v10 = vmul.u32 %v1185_v9, %v1176_v57  ;;  %vm1194_vm3 = vc.u32 %v8827_v46, %v8830_v61 }
 0x11d   : > { %v1107_v22 = vshrl.u32 %v1089_v5, %v1105_v44  ;;  %v1110_v48 = vadd.s32 127, %v1109_v56  ;;  %vm1024_vm4 = vcmp.lt.s32.totalorder %v8778_v53, 2  ;;  %v1195_v54 = vadd.s32 1, %v8831_v2 }
 0x11e   : > { %v1248_v58 = vand.u32 8388607, %v1241_v17  ;;  %vm1252_vm5 = vcmp.gt.s32.totalorder %v1251_v12, 0  ;;  %vm1025_vm6 = vcmp.eq.s32.totalorder %v8778_v53, 0  ;;  %vm1028_vm8 = vcmp.eq.s32.totalorder %v8778_v53, 2 }
 0x11f   : > { %v1108_v23 = vor.u32 %v1107_v22, %v1106_v21  ;;  %v1111_v34 = vshll.u32 %v1110_v48, 23  ;;  %v1253_v14 = vsel %vm1252_vm5, %v1251_v12, 0  ;;  %v1126_v38 = vadd.s32 3, %v1122_v52 }
 0x120   : > { %v7621_v50 = vpop.eup %7620  ;;  %v1196_v4 = vsel %vm1194_vm3, %v1195_v54, %v8831_v2  ;;  %v1255_v51 = vand.u32 31, %v1253_v14  ;;  %v1249_v3 = vor.u32 8388608, %v1248_v58  ;;  %v1254_v36 = vshrl.u32 %v1253_v14, 5 }
 0x121   : > { %v7623_v43 = vpop.eup %7622  ;;  %v1029_v59 = vxor.u32 2147483648, %v7621_v50  ;;  %v1112_v40 = vor.u32 4788187, %v1111_v34  ;;  %v1115_v13 = vcvt.s32.f32 %v1108_v23  ;;  %v1197_v31 = vadd.s32 %v1196_v4, %v1192_v10 }
 0x122   : > { %v1026_v63 = vxor.u32 2147483648, %v7623_v43  ;;  %v1256_v15 = vsub.s32 32, %v1255_v51  ;;  %v1258_v9 = vshll.u32 %v7945_v24, %v1255_v51  ;;  %v1261_v35 = vshll.u32 %v7946_v26, %v1255_v51 }
 0x123   : > { %v1030_v19 = vsel %vm1028_vm8, %v1029_v59, %v7623_v43  ;;  %v1113_v20 = vand.u32 2147483647, %v1112_v40  ;;  %v1198_v37 = vadd.s32 536870912, %v1197_v31  ;;  %v1264_v25 = vshll.u32 %v7947_v28, %v1255_v51 }
 0x124   : > { %v1027_v33 = vsel %vm1025_vm6, %v7621_v50, %v1026_v63  ;;  %v1259_v62 = vshrl.u32 %v7946_v26, %v1256_v15  ;;  %v1262_v11 = vshrl.u32 %v7947_v28, %v1256_v15  ;;  %v1265_v29 = vshrl.u32 %v7948_v30, %v1256_v15 }
 0x125   : > { %v1031_v6 = vsel %vm1024_vm4, %v1027_v33, %v1030_v19  ;;  %v1116_v8 = vmul.f32 %v1115_v13, %v1113_v20  ;;  %v1199_v16 = vshrl.u32 %v1198_v37, 30  ;;  %v1267_v0 = vshll.u32 %v7948_v30, %v1255_v51 }
 0x126   : > { %v1032_v5 = vsel %vm1021_vm2, nan, %v1031_v6  ;;  %v8863_v18 = vshll.u32 %v1249_v3, 8  ;;  %v1257_v55 = vshrl.u32 %v7945_v24, %v1256_v15  ;;  %v1348_v57 = vand.u32 2139095040, %v8850_v7 }
 0x127   : > { %v1117_v49 = vxor.u32 2147483648, %v1116_v8  ;;  %v1200_v42 = vshll.u32 %v1199_v16, 30  ;;  %6864 = vst [vmem:[%s8364_s17 + $0x38] sm:$0xff] %v1032_v5  ;;  %v1260_v53 = vor.u32 %v1259_v62, %v1258_v9  ;;  %v1268_v2 = vshrl.u32 %v7949_v32, %v1256_v15 }
 0x128   : > { %v1270_v44 = vshll.u32 %v7949_v32, %v1255_v51  ;;  %v1271_v41 = vshrl.u32 %v7950_v39, %v1256_v15  ;;  %v1263_v12 = vor.u32 %v1262_v11, %v1261_v35  ;;  %v1266_v52 = vor.u32 %v1265_v29, %v1264_v25 }
 0x129   : > { %v1118_v21 = vsel %vm1035_vm11, %v1117_v49, %v1116_v8  ;;  %v8873_v56 = vsub.s32 %v1197_v31, %v1200_v42  ;;  %v1269_v48 = vor.u32 %v1268_v2, %v1267_v0  ;;  %vm1273_vm7 = vcmp.lt.s32.totalorder %v1254_v36, 1 }
 0x12a   : > { %v1121_v22 = vsel %vm8812_vm13, %v8604_v60, %v1118_v21  ;;  %v1272_v10 = vor.u32 %v1271_v41, %v1270_v44  ;;  %vm1275_vm9 = vcmp.lt.s32.totalorder %v1254_v36, 3  ;;  %v1349_v58 = vshrl.u32 %v1348_v57, 23  ;;  %v8919_v41 = vld [vmem:[%s8067_s30 + $0x60] sm:$0xff] }
 0x12b   : > { %7624 = vcosq.f32 %v1121_v22  ;;  %v1203_v54 = vsub.s32 0, %v8873_v56  ;;  %vm1274_vm10 = vcmp.lt.s32.totalorder %v1254_v36, 2  ;;  %vm1276_vm12 = vcmp.lt.s32.totalorder %v1254_v36, 4 }
 0x12c   : > { %7626 = vsinq.f32 %v1121_v22  ;;  %v1277_v23 = vsel %vm1273_vm7, %v1257_v55, %v1260_v53  ;;  %v1278_v14 = vsel %vm1276_vm12, %v1266_v52, 2102212464  ;;  %v1281_v50 = vsel %vm1273_vm7, %v1260_v53, %v1263_v12 }
 0x12d   : > { %v7054_v34 = vmin.u32 %v1203_v54, %v8873_v56  ;;  %v1282_v4 = vsel %vm1276_vm12, %v1269_v48, 920167782  ;;  %v1279_v45 = vsel %vm1275_vm9, %v1263_v12, %v1278_v14  ;;  %v1285_v43 = vsel %vm1273_vm7, %v1263_v12, %v1266_v52 }
 0x12e   : > { %v1283_v51 = vsel %vm1275_vm9, %v1266_v52, %v1282_v4  ;;  %v1286_v59 = vsel %vm1276_vm12, %v1272_v10, 1326507024  ;;  %v1127_v40 = vand.u32 3, %v1126_v38  ;;  %v1223_v31 = vsub.s32 4, %v1199_v16 }
 0x12f   : > { %v1205_v13 = vclz %v7054_v34  ;;  %v1280_v63 = vsel %vm1274_vm10, %v1277_v23, %v1279_v45  ;;  %v1284_v3 = vsel %vm1274_vm10, %v1281_v50, %v1283_v51  ;;  %v1287_v15 = vsel %vm1275_vm9, %v1269_v48, %v1286_v59 }
 0x130   : > { %v7061_v9 = vadd.s32 4294967169, %v1349_v58  ;;  %v1288_v20 = vsel %vm1274_vm10, %v1285_v43, %v1287_v15  ;;  %v8887_v37 = vmul.u32.u64.low %v8863_v18, %v1284_v3  ;;  %v8888_v35 = vmul.u32.u64.high %v8863_v18, %v1284_v3, %v8887_v37 }
 0x131   : > { %v7055_v19 = vadd.s32 4294967294, %v1205_v13  ;;  %vm1139_vm11 = vcmp.lt.s32.totalorder %v8696_v47, 0  ;;  %v8893_v38 = vmul.u32.u64.low %v8863_v18, %v1288_v20  ;;  %v8894_v33 = vmul.u32.u64.high %v8863_v18, %v1288_v20, %v8893_v38 }
 0x132   : > { %v1345_v62 = vand.u32 2147483647, %v8850_v7  ;;  %vm1125_vm13 = vweird.f32 %v8604_v60  ;;  %v1193_v11 = vadd.s32 %v8830_v61, %v8827_v46  ;;  %v1224_v25 = vsel %vm1139_vm11, %v1223_v31, %v1199_v16 }
 0x133   : > { %vm7056_vm14 = vcmp.lt.s32.totalorder %v7055_v19, 0  ;;  %v1355_v6 = vadd.s32 1, %v7061_v9  ;;  %vm1128_vm15 = vcmp.lt.s32.totalorder %v1127_v40, 2  ;;  %vm8904_vm0 = vcmp.le.f32.partialorder %v1137_v27, 0.7853982 }
 0x134   : > { %v1208_v29 = vsel %vm7056_vm14, 0, %v7055_v19  ;;  %v1296_v5 = vmul.u32 %v8863_v18, %v1280_v63  ;;  %v1299_v46 = vadd.s32 1, %v8888_v35  ;;  %v1226_v61 = vsel %vm8904_vm0, 0, %v1224_v25 }
 0x135   : > { %v1209_v36 = vsub.s32 32, %v1208_v29  ;;  %v1210_v0 = vshll.u32 %v8873_v56, %v1208_v29  ;;  %v1213_v49 = vsub.s32 4294967266, %v1208_v29  ;;  %vm1298_vm1 = vc.u32 %v8894_v33, %v8887_v37 }
 0x136   : > { %v1352_v27 = vand.u32 8388607, %v1345_v62  ;;  %vm1356_vm2 = vcmp.gt.s32.totalorder %v1355_v6, 0  ;;  %v1300_v18 = vsel %vm1298_vm1, %v1299_v46, %v8888_v35  ;;  %vm1129_vm3 = vcmp.eq.s32.totalorder %v1127_v40, 0 }
 0x137   : > { %v1211_v16 = vshrl.u32 %v1193_v11, %v1209_v36  ;;  %v1214_v42 = vadd.s32 127, %v1213_v49  ;;  %v1357_v55 = vsel %vm1356_vm2, %v1355_v6, 0  ;;  %vm1132_vm4 = vcmp.eq.s32.totalorder %v1127_v40, 2 }
 0x138   : > { %v7625_v57 = vpop.eup %7624  ;;  %v1301_v53 = vadd.s32 %v1300_v18, %v1296_v5  ;;  %v1359_v2 = vand.u32 31, %v1357_v55  ;;  %v8921_v52 = vadd.s32 3, %v1226_v61  ;;  %v1353_v10 = vor.u32 8388608, %v1352_v27 }
 0x139   : > { %v7627_v44 = vpop.eup %7626  ;;  %v1133_v21 = vxor.u32 2147483648, %v7625_v57  ;;  %v1212_v56 = vor.u32 %v1211_v16, %v1210_v0  ;;  %v1215_v12 = vshll.u32 %v1214_v42, 23  ;;  %v1449_v14 = vand.u32 2147483647, %v8919_v41 }
 0x13a   : > { %v1130_v22 = vxor.u32 2147483648, %v7627_v44  ;;  %v1302_v48 = vadd.s32 536870912, %v1301_v53  ;;  %v1360_v54 = vsub.s32 32, %v1359_v2  ;;  %v1358_v45 = vshrl.u32 %v1357_v55, 5 }
 0x13b   : > { %v1134_v58 = vsel %vm1132_vm4, %v1133_v21, %v7627_v44  ;;  %v1216_v23 = vor.u32 4788187, %v1215_v12  ;;  %v1219_v34 = vcvt.s32.f32 %v1212_v56  ;;  %v1452_v51 = vand.u32 2139095040, %v8919_v41 }
 0x13c   : > { %v1131_v50 = vsel %vm1129_vm3, %v7625_v57, %v1130_v22  ;;  %v1303_v4 = vshrl.u32 %v1302_v48, 30  ;;  %v1362_v13 = vshll.u32 %v7945_v24, %v1359_v2  ;;  %v1365_v31 = vshll.u32 %v7946_v26, %v1359_v2 }
 0x13d   : > { %v1135_v43 = vsel %vm1128_vm15, %v1131_v50, %v1134_v58  ;;  %v1217_v59 = vand.u32 2147483647, %v1216_v23  ;;  %v1363_v15 = vshrl.u32 %v7946_v26, %v1360_v54  ;;  %v1366_v9 = vshrl.u32 %v7947_v28, %v1360_v54 }
 0x13e   : > { %v1136_v63 = vsel %vm1125_vm13, nan, %v1135_v43  ;;  %v1304_v3 = vshll.u32 %v1303_v4, 30  ;;  %v1368_v20 = vshll.u32 %v7947_v28, %v1359_v2  ;;  %v1369_v35 = vshrl.u32 %v7948_v30, %v1360_v54 }
 0x13f   : > { %v1220_v19 = vmul.f32 %v1219_v34, %v1217_v59  ;;  %v1371_v40 = vshll.u32 %v7948_v30, %v1359_v2  ;;  %6865 = vst [vmem:[%s8364_s17 + $0x40] sm:$0xff] %v1136_v63  ;;  %v1372_v11 = vshrl.u32 %v7949_v32, %v1360_v54  ;;  %v1374_v60 = vshll.u32 %v7949_v32, %v1359_v2 }
 0x140   : > { %v8937_v38 = vsub.s32 %v1301_v53, %v1304_v3  ;;  %v8941_v25 = vshll.u32 %v1353_v10, 8  ;;  %v1297_v29 = vadd.s32 %v8887_v37, %v8894_v33  ;;  %v1375_v5 = vshrl.u32 %v7950_v39, %v1360_v54 }
 0x141   : > { %v1221_v6 = vxor.u32 2147483648, %v1220_v19  ;;  %v1453_v36 = vshrl.u32 %v1452_v51, 23  ;;  %vm1243_vm5 = vcmp.lt.s32.totalorder %v8782_v1, 0  ;;  %v1361_v49 = vshrl.u32 %v7945_v24, %v1360_v54 }
 0x142   : > { %v1307_v0 = vsub.s32 0, %v8937_v38  ;;  %v1364_v46 = vor.u32 %v1363_v15, %v1362_v13  ;;  %v1367_v61 = vor.u32 %v1366_v9, %v1365_v31  ;;  %v1370_v16 = vor.u32 %v1369_v35, %v1368_v20 }
 0x143   : > { %v1222_v27 = vsel %vm1139_vm11, %v1221_v6, %v1220_v19  ;;  %v1373_v42 = vor.u32 %v1372_v11, %v1371_v40  ;;  %vm1377_vm6 = vcmp.lt.s32.totalorder %v1358_v45, 1  ;;  %v1376_v18 = vor.u32 %v1375_v5, %v1374_v60 }
 0x144   : > { %v1225_v37 = vsel %vm8904_vm0, %v8696_v47, %v1222_v27  ;;  %v7058_v33 = vmin.u32 %v1307_v0, %v8937_v38  ;;  %vm1380_vm8 = vcmp.lt.s32.totalorder %v1358_v45, 4  ;;  %vm1378_vm7 = vcmp.lt.s32.totalorder %v1358_v45, 2 }
 0x145   : > { %7628 = vcosq.f32 %v1225_v37  ;;  %vm1379_vm9 = vcmp.lt.s32.totalorder %v1358_v45, 3  ;;  %v1382_v55 = vsel %vm1380_vm8, %v1370_v16, 2102212464  ;;  %v1381_v53 = vsel %vm1377_vm6, %v1361_v49, %v1364_v46 }
 0x146   : > { %7630 = vsinq.f32 %v1225_v37  ;;  %v1309_v57 = vclz %v7058_v33  ;;  %v1385_v2 = vsel %vm1377_vm6, %v1364_v46, %v1367_v61  ;;  %v1327_v44 = vsub.s32 4, %v1303_v4 }
 0x147   : > { %v1383_v21 = vsel %vm1379_vm9, %v1367_v61, %v1382_v55  ;;  %v1386_v56 = vsel %vm1380_vm8, %v1373_v42, 920167782  ;;  %v1389_v8 = vsel %vm1377_vm6, %v1367_v61, %v1370_v16  ;;  %v1390_v48 = vsel %vm1380_vm8, %v1376_v18, 1326507024 }
 0x148   : > { %v7059_v12 = vadd.s32 4294967294, %v1309_v57  ;;  %v1387_v22 = vsel %vm1379_vm9, %v1370_v16, %v1386_v56  ;;  %v1456_v10 = vand.u32 8388607, %v1449_v14  ;;  %v1384_v54 = vsel %vm1378_vm7, %v1381_v53, %v1383_v21 }
 0x149   : > { %v1388_v58 = vsel %vm1378_vm7, %v1385_v2, %v1387_v22  ;;  %v1391_v23 = vsel %vm1379_vm9, %v1373_v42, %v1390_v48  ;;  %v7065_v34 = vadd.s32 4294967169, %v1453_v36  ;;  %v1328_v13 = vsel %vm1243_vm5, %v1327_v44, %v1303_v4 }
 0x14a   : > { %vm7060_vm10 = vcmp.lt.s32.totalorder %v7059_v12, 0  ;;  %v1392_v50 = vsel %vm1378_vm7, %v1389_v8, %v1391_v23  ;;  %v8967_v51 = vmul.u32.u64.low %v8941_v25, %v1388_v58  ;;  %v8968_v43 = vmul.u32.u64.high %v8941_v25, %v1388_v58, %v8967_v51 }
 0x14b   : > { %v1312_v59 = vsel %vm7060_vm10, 0, %v7059_v12  ;;  %v8974_v31 = vmul.u32.u64.low %v8941_v25, %v1392_v50  ;;  %v8975_v63 = vmul.u32.u64.high %v8941_v25, %v1392_v50, %v8974_v31  ;;  %v1459_v19 = vadd.s32 1, %v7065_v34 }
 0x14c   : > { %v1313_v3 = vsub.s32 32, %v1312_v59  ;;  %v1314_v15 = vshll.u32 %v8937_v38, %v1312_v59  ;;  %v1317_v9 = vsub.s32 4294967266, %v1312_v59  ;;  %v1231_v45 = vand.u32 3, %v8921_v52 }
 0x14d   : > { %vm8981_vm12 = vcmp.le.f32.partialorder %v1241_v17, 0.7853982  ;;  %v1400_v35 = vmul.u32 %v8941_v25, %v1384_v54  ;;  %v1403_v11 = vadd.s32 1, %v8968_v43  ;;  %vm1460_vm11 = vcmp.gt.s32.totalorder %v1459_v19, 0 }
 0x14e   : > { %v1315_v4 = vshrl.u32 %v1297_v29, %v1313_v3  ;;  %v1318_v40 = vadd.s32 127, %v1317_v9  ;;  %v1330_v38 = vsel %vm8981_vm12, 0, %v1328_v13  ;;  %vm1402_vm13 = vc.u32 %v8975_v63, %v8967_v51 }
 0x14f   : > { %v1457_v52 = vor.u32 8388608, %v1456_v10  ;;  %v1461_v60 = vsel %vm1460_vm11, %v1459_v19, 0  ;;  %v1404_v5 = vsel %vm1402_vm13, %v1403_v11, %v8968_v43  ;;  %vm1229_vm14 = vweird.f32 %v8696_v47  ;;  %v9011_v43 = vld [vmem:[%s8067_s30 + $0x68] sm:$0xff] }
 0x150   : > { %v1316_v6 = vor.u32 %v1315_v4, %v1314_v15  ;;  %v1319_v17 = vshll.u32 %v1318_v40, 23  ;;  %v8992_v36 = vshrl.u32 %v1461_v60, 5  ;;  %vm1232_vm15 = vcmp.lt.s32.totalorder %v1231_v45, 2 }
 0x151   : > { %v1405_v25 = vadd.s32 %v1404_v5, %v1400_v35  ;;  %v1463_v29 = vand.u32 31, %v1461_v60  ;;  %vm1233_vm0 = vcmp.eq.s32.totalorder %v1231_v45, 0  ;;  %vm1236_vm1 = vcmp.eq.s32.totalorder %v1231_v45, 2 }
 0x152   : > { %v7629_v0 = vpop.eup %7628  ;;  %v1320_v49 = vor.u32 4788187, %v1319_v17  ;;  %v1323_v46 = vcvt.s32.f32 %v1316_v6  ;;  %v1334_v16 = vadd.s32 3, %v1330_v38  ;;  %vm1481_vm2 = vcmp.lt.s32.totalorder %v8992_v36, 1 }
 0x153   : > { %v7631_v61 = vpop.eup %7630  ;;  %v1237_v27 = vxor.u32 2147483648, %v7629_v0  ;;  %v1406_v42 = vadd.s32 536870912, %v1405_v25  ;;  %v1464_v37 = vsub.s32 32, %v1463_v29  ;;  %v8996_v55 = vshll.u32 %v1457_v52, 8 }
 0x154   : > { %v1234_v33 = vxor.u32 2147483648, %v7631_v61  ;;  %v1321_v18 = vand.u32 2147483647, %v1320_v49  ;;  %v1466_v2 = vshll.u32 %v7945_v24, %v1463_v29  ;;  %vm1347_vm3 = vcmp.lt.s32.totalorder %v8850_v7, 0 }
 0x155   : > { %v1238_v57 = vsel %vm1236_vm1, %v1237_v27, %v7631_v61  ;;  %v1407_v53 = vshrl.u32 %v1406_v42, 30  ;;  %v1467_v44 = vshrl.u32 %v7946_v26, %v1464_v37  ;;  %v1469_v8 = vshll.u32 %v7946_v26, %v1463_v29 }
 0x156   : > { %v1235_v21 = vsel %vm1233_vm0, %v7629_v0, %v1234_v33  ;;  %v1324_v56 = vmul.f32 %v1323_v46, %v1321_v18  ;;  %v1470_v12 = vshrl.u32 %v7947_v28, %v1464_v37  ;;  %v1472_v10 = vshll.u32 %v7947_v28, %v1463_v29 }
 0x157   : > { %v1239_v22 = vsel %vm1232_vm15, %v1235_v21, %v1238_v57  ;;  %v1408_v48 = vshll.u32 %v1407_v53, 30  ;;  %v1473_v54 = vshrl.u32 %v7948_v30, %v1464_v37  ;;  %v1431_v34 = vsub.s32 4, %v1407_v53 }
 0x158   : > { %v1240_v58 = vsel %vm1229_vm14, nan, %v1239_v22  ;;  %v1325_v23 = vxor.u32 2147483648, %v1324_v56  ;;  %v1465_v50 = vshrl.u32 %v7945_v24, %v1464_v37  ;;  %v1468_v13 = vor.u32 %v1467_v44, %v1466_v2 }
 0x159   : > { %v9013_v59 = vsub.s32 %v1405_v25, %v1408_v48  ;;  %v1475_v31 = vshll.u32 %v7948_v30, %v1463_v29  ;;  %v1476_v3 = vshrl.u32 %v7949_v32, %v1464_v37  ;;  %6866 = vst [vmem:[%s8364_s17 + $0x48] sm:$0xff] %v1240_v58  ;;  %v1471_v9 = vor.u32 %v1470_v12, %v1469_v8 }
 0x15a   : > { %v1326_v15 = vsel %vm1243_vm5, %v1325_v23, %v1324_v56  ;;  %v1478_v47 = vshll.u32 %v7949_v32, %v1463_v29  ;;  %v1479_v19 = vshrl.u32 %v7950_v39, %v1464_v37  ;;  %vm9027_vm4 = vcmp.le.f32.partialorder %v1345_v62, 0.7853982 }
 0x15b   : > { %v1329_v45 = vsel %vm8981_vm12, %v8782_v1, %v1326_v15  ;;  %v1411_v4 = vsub.s32 0, %v9013_v59  ;;  %v1474_v40 = vor.u32 %v1473_v54, %v1472_v10  ;;  %v1477_v11 = vor.u32 %v1476_v3, %v1475_v31 }
 0x15c   : > { %7632 = vcosq.f32 %v1329_v45  ;;  %v1480_v38 = vor.u32 %v1479_v19, %v1478_v47  ;;  %vm1484_vm5 = vcmp.lt.s32.totalorder %v8992_v36, 4  ;;  %v1556_v52 = vand.u32 2139095040, %v9011_v43 }
 0x15d   : > { %7634 = vsinq.f32 %v1329_v45  ;;  %v7062_v20 = vmin.u32 %v1411_v4, %v9013_v59  ;;  %vm1482_vm6 = vcmp.lt.s32.totalorder %v8992_v36, 2  ;;  %vm1483_vm8 = vcmp.lt.s32.totalorder %v8992_v36, 3 }
 0x15e   : > { %v1485_v62 = vsel %vm1481_vm2, %v1465_v50, %v1468_v13  ;;  %v1486_v60 = vsel %vm1484_vm5, %v1474_v40, 2102212464  ;;  %v1489_v6 = vsel %vm1481_vm2, %v1468_v13, %v1471_v9  ;;  %v1490_v17 = vsel %vm1484_vm5, %v1477_v11, 920167782 }
 0x15f   : > { %v9045_v5 = vand.u32 3, %v1334_v16  ;;  %v1413_v25 = vclz %v7062_v20  ;;  %v1432_v29 = vsel %vm1347_vm3, %v1431_v34, %v1407_v53  ;;  %v1493_v0 = vsel %vm1481_vm2, %v1471_v9, %v1474_v40 }
 0x160   : > { %v1487_v49 = vsel %vm1483_vm8, %v1471_v9, %v1486_v60  ;;  %v1491_v46 = vsel %vm1483_vm8, %v1474_v40, %v1490_v17  ;;  %v1494_v61 = vsel %vm1484_vm5, %v1480_v38, 1326507024  ;;  %v1557_v27 = vshrl.u32 %v1556_v52, 23 }
 0x161   : > { %v7063_v42 = vadd.s32 4294967294, %v1413_v25  ;;  %v1488_v16 = vsel %vm1482_vm6, %v1485_v62, %v1487_v49  ;;  %v1492_v37 = vsel %vm1482_vm6, %v1489_v6, %v1491_v46  ;;  %v1495_v33 = vsel %vm1483_vm8, %v1477_v11, %v1494_v61 }
 0x162   : > { %v1401_v18 = vadd.s32 %v8967_v51, %v8975_v63  ;;  %v1496_v57 = vsel %vm1482_vm6, %v1493_v0, %v1495_v33  ;;  %v9068_v53 = vmul.u32.u64.low %v8996_v55, %v1492_v37  ;;  %v9069_v2 = vmul.u32.u64.high %v8996_v55, %v1492_v37, %v9068_v53 }
 0x163   : > { %vm7064_vm7 = vcmp.lt.s32.totalorder %v7063_v42, 0  ;;  %v9073_v44 = vmul.u32.u64.low %v8996_v55, %v1496_v57  ;;  %v9074_v21 = vmul.u32.u64.high %v8996_v55, %v1496_v57, %v9073_v44  ;;  %v7069_v56 = vadd.s32 4294967169, %v1557_v27 }
 0x164   : > { %v1416_v8 = vsel %vm7064_vm7, 0, %v7063_v42  ;;  %v1434_v12 = vsel %vm9027_vm4, 0, %v1432_v29  ;;  %v1504_v51 = vmul.u32 %v8996_v55, %v1488_v16  ;;  %v1553_v63 = vand.u32 2147483647, %v9011_v43  ;;  %v9097_v29 = vld [vmem:[%s8067_s30 + $0x70] sm:$0xff] }
 0x165   : > { %v1417_v36 = vsub.s32 32, %v1416_v8  ;;  %v1418_v22 = vshll.u32 %v9013_v59, %v1416_v8  ;;  %v1421_v48 = vsub.s32 4294967266, %v1416_v8  ;;  %v1563_v10 = vadd.s32 1, %v7069_v56 }
 0x166   : > { %vm1333_vm9 = vweird.f32 %v8782_v1  ;;  %v1507_v54 = vadd.s32 1, %v9069_v2  ;;  %vm1340_vm10 = vcmp.eq.s32.totalorder %v9045_v5, 2  ;;  %vm1506_vm12 = vc.u32 %v9074_v21, %v9068_v53 }
 0x167   : > { %v1419_v58 = vshrl.u32 %v1401_v18, %v1417_v36  ;;  %v1422_v23 = vadd.s32 127, %v1421_v48  ;;  %v1438_v34 = vadd.s32 3, %v1434_v12  ;;  %v1560_v50 = vand.u32 8388607, %v1553_v63 }
 0x168   : > { %v1508_v55 = vsel %vm1506_vm12, %v1507_v54, %v9069_v2  ;;  %vm1564_vm11 = vcmp.gt.s32.totalorder %v1563_v10, 0  ;;  %vm1336_vm13 = vcmp.lt.s32.totalorder %v9045_v5, 2  ;;  %vm1337_vm14 = vcmp.eq.s32.totalorder %v9045_v5, 0 }
 0x169   : > { %v7633_v59 = vpop.eup %7632  ;;  %v1420_v13 = vor.u32 %v1419_v58, %v1418_v22  ;;  %v1423_v31 = vshll.u32 %v1422_v23, 23  ;;  %v1509_v3 = vadd.s32 %v1508_v55, %v1504_v51  ;;  %v1565_v15 = vsel %vm1564_vm11, %v1563_v10, 0 }
 0x16a   : > { %v7635_v9 = vpop.eup %7634  ;;  %v1341_v47 = vxor.u32 2147483648, %v7633_v59  ;;  %v1567_v19 = vand.u32 31, %v1565_v15  ;;  %v9093_v52 = vand.u32 3, %v1438_v34  ;;  %v1561_v20 = vor.u32 8388608, %v1560_v50 }
 0x16b   : > { %v1338_v45 = vxor.u32 2147483648, %v7635_v9  ;;  %v1424_v4 = vor.u32 4788187, %v1423_v31  ;;  %v1427_v40 = vcvt.s32.f32 %v1420_v13  ;;  %v1510_v11 = vadd.s32 536870912, %v1509_v3 }
 0x16c   : > { %v1342_v38 = vsel %vm1340_vm10, %v1341_v47, %v7635_v9  ;;  %v1568_v62 = vsub.s32 32, %v1567_v19  ;;  %v1570_v25 = vshll.u32 %v7945_v24, %v1567_v19  ;;  %v1573_v46 = vshll.u32 %v7946_v26, %v1567_v19 }
 0x16d   : > { %v1339_v60 = vsel %vm1337_vm14, %v7633_v59, %v1338_v45  ;;  %v1425_v6 = vand.u32 2147483647, %v1424_v4  ;;  %v1511_v17 = vshrl.u32 %v1510_v11, 30  ;;  %v1576_v61 = vshll.u32 %v7947_v28, %v1567_v19 }
 0x16e   : > { %v1343_v0 = vsel %vm1336_vm13, %v1339_v60, %v1342_v38  ;;  %v1571_v49 = vshrl.u32 %v7946_v26, %v1568_v62  ;;  %v1574_v37 = vshrl.u32 %v7947_v28, %v1568_v62  ;;  %v1566_v33 = vshrl.u32 %v1565_v15, 5 }
 0x16f   : > { %v1344_v27 = vsel %vm1333_vm9, nan, %v1343_v0  ;;  %v1428_v42 = vmul.f32 %v1427_v40, %v1425_v6  ;;  %v1512_v16 = vshll.u32 %v1511_v17, 30  ;;  %v1577_v18 = vshrl.u32 %v7948_v30, %v1568_v62 }
 0x170   : > { %v1579_v57 = vshll.u32 %v7948_v30, %v1567_v19  ;;  %v1657_v5 = vand.u32 2147483647, %v9097_v29  ;;  %6867 = vst [vmem:[%s8364_s17 + $0x50] sm:$0xff] %v1344_v27  ;;  %v1580_v56 = vshrl.u32 %v7949_v32, %v1568_v62  ;;  %v1660_v1 = vand.u32 2139095040, %v9097_v29 }
 0x171   : > { %v1429_v2 = vxor.u32 2147483648, %v1428_v42  ;;  %v9111_v44 = vsub.s32 %v1509_v3, %v1512_v16  ;;  %vm1451_vm15 = vcmp.lt.s32.totalorder %v8919_v41, 0  ;;  %v1569_v8 = vshrl.u32 %v7945_v24, %v1568_v62 }
 0x172   : > { %v1572_v12 = vor.u32 %v1571_v49, %v1570_v25  ;;  %v1582_v51 = vshll.u32 %v7949_v32, %v1567_v19  ;;  %v1583_v36 = vshrl.u32 %v7950_v39, %v1568_v62  ;;  %v1575_v10 = vor.u32 %v1574_v37, %v1573_v46 }
 0x173   : > { %v1430_v22 = vsel %vm1347_vm3, %v1429_v2, %v1428_v42  ;;  %v1515_v48 = vsub.s32 0, %v9111_v44  ;;  %v1578_v54 = vor.u32 %v1577_v18, %v1576_v61  ;;  %v1581_v23 = vor.u32 %v1580_v56, %v1579_v57 }
 0x174   : > { %v1433_v58 = vsel %vm9027_vm4, %v8850_v7, %v1430_v22  ;;  %v1584_v34 = vor.u32 %v1583_v36, %v1582_v51  ;;  %vm1585_vm0 = vcmp.lt.s32.totalorder %v1566_v33, 1  ;;  %vm9127_vm1 = vcmp.le.f32.partialorder %v1449_v14, 0.7853982 }
 0x175   : > { %7636 = vcosq.f32 %v1433_v58  ;;  %v7066_v50 = vmin.u32 %v1515_v48, %v9111_v44  ;;  %v1601_v59 = vshll.u32 %v1561_v20, 8  ;;  %v1661_v13 = vshrl.u32 %v1660_v1, 23 }
 0x176   : > { %7638 = vsinq.f32 %v1433_v58  ;;  %v1535_v31 = vsub.s32 4, %v1511_v17  ;;  %vm1587_vm2 = vcmp.lt.s32.totalorder %v1566_v33, 3  ;;  %vm1588_vm3 = vcmp.lt.s32.totalorder %v1566_v33, 4 }
 0x177   : > { %v1517_v35 = vclz %v7066_v50  ;;  %vm1586_vm4 = vcmp.lt.s32.totalorder %v1566_v33, 2  ;;  %v1589_v3 = vsel %vm1585_vm0, %v1569_v8, %v1572_v12  ;;  %v1593_v15 = vsel %vm1585_vm0, %v1572_v12, %v1575_v10 }
 0x178   : > { %v1590_v9 = vsel %vm1588_vm3, %v1578_v54, 2102212464  ;;  %v1594_v47 = vsel %vm1588_vm3, %v1581_v23, 920167782  ;;  %v1597_v14 = vsel %vm1585_vm0, %v1575_v10, %v1578_v54  ;;  %v1598_v19 = vsel %vm1588_vm3, %v1584_v34, 1326507024 }
 0x179   : > { %v7067_v45 = vadd.s32 4294967294, %v1517_v35  ;;  %v1591_v4 = vsel %vm1587_vm2, %v1575_v10, %v1590_v9  ;;  %v1595_v40 = vsel %vm1587_vm2, %v1578_v54, %v1594_v47  ;;  %v1599_v11 = vsel %vm1587_vm2, %v1581_v23, %v1598_v19 }
 0x17a   : > { %v1505_v38 = vadd.s32 %v9068_v53, %v9074_v21  ;;  %v1596_v20 = vsel %vm1586_vm4, %v1593_v15, %v1595_v40  ;;  %v1600_v62 = vsel %vm1586_vm4, %v1597_v14, %v1599_v11  ;;  %v7073_v60 = vadd.s32 4294967169, %v1661_v13  ;;  %v9165_v15 = vld [vmem:[%s8067_s30 + $0x78] sm:$0xff] }
 0x17b   : > { %vm7068_vm5 = vcmp.lt.s32.totalorder %v7067_v45, 0  ;;  %v1536_v6 = vsel %vm1451_vm15, %v1535_v31, %v1511_v17  ;;  %v9141_v25 = vmul.u32.u64.low %v1601_v59, %v1600_v62  ;;  %v9142_v0 = vmul.u32.u64.high %v1601_v59, %v1600_v62, %v9141_v25 }
 0x17c   : > { %v1520_v49 = vsel %vm7068_vm5, 0, %v7067_v45  ;;  %v1592_v46 = vsel %vm1586_vm4, %v1589_v3, %v1591_v4  ;;  %v9145_v61 = vmul.u32.u64.low %v1601_v59, %v1596_v20  ;;  %v9146_v27 = vmul.u32.u64.high %v1601_v59, %v1596_v20, %v9145_v61 }
 0x17d   : > { %v1521_v53 = vsub.s32 32, %v1520_v49  ;;  %v1522_v21 = vshll.u32 %v9111_v44, %v1520_v49  ;;  %v1525_v42 = vsub.s32 4294967266, %v1520_v49  ;;  %v1667_v16 = vadd.s32 1, %v7073_v60 }
 0x17e   : > { %vm1437_vm6 = vweird.f32 %v8850_v7  ;;  %v1538_v17 = vsel %vm9127_vm1, 0, %v1536_v6  ;;  %v1608_v57 = vmul.u32 %v1601_v59, %v1592_v46  ;;  %vm1610_vm8 = vc.u32 %v9142_v0, %v9145_v61 }
 0x17f   : > { %v1523_v37 = vshrl.u32 %v1505_v38, %v1521_v53  ;;  %v1526_v18 = vadd.s32 127, %v1525_v42  ;;  %vm1440_vm7 = vcmp.lt.s32.totalorder %v9093_v52, 2  ;;  %v1611_v33 = vadd.s32 1, %v9146_v27 }
 0x180   : > { %v1664_v2 = vand.u32 8388607, %v1657_v5  ;;  %vm1668_vm9 = vcmp.gt.s32.totalorder %v1667_v16, 0  ;;  %vm1441_vm10 = vcmp.eq.s32.totalorder %v9093_v52, 0  ;;  %vm1444_vm12 = vcmp.eq.s32.totalorder %v9093_v52, 2 }
 0x181   : > { %v1524_v44 = vor.u32 %v1523_v37, %v1522_v21  ;;  %v1527_v56 = vshll.u32 %v1526_v18, 23  ;;  %v1669_v1 = vsel %vm1668_vm9, %v1667_v16, 0  ;;  %v1542_v12 = vadd.s32 3, %v1538_v17 }
 0x182   : > { %v7637_v8 = vpop.eup %7636  ;;  %v1612_v51 = vsel %vm1610_vm8, %v1611_v33, %v9146_v27  ;;  %v1671_v36 = vand.u32 31, %v1669_v1  ;;  %v1665_v34 = vor.u32 8388608, %v1664_v2  ;;  %v1670_v20 = vshrl.u32 %v1669_v1, 5 }
 0x183   : > { %v7639_v22 = vpop.eup %7638  ;;  %v1445_v48 = vxor.u32 2147483648, %v7637_v8  ;;  %v1528_v10 = vor.u32 4788187, %v1527_v56  ;;  %v1531_v54 = vcvt.s32.f32 %v1524_v44  ;;  %v1613_v58 = vadd.s32 %v1612_v51, %v1608_v57 }
 0x184   : > { %v1442_v23 = vxor.u32 2147483648, %v7639_v22  ;;  %v1672_v50 = vsub.s32 32, %v1671_v36  ;;  %v1674_v59 = vshll.u32 %v7945_v24, %v1671_v36  ;;  %v1677_v3 = vshll.u32 %v7946_v26, %v1671_v36 }
 0x185   : > { %v1446_v13 = vsel %vm1444_vm12, %v1445_v48, %v7639_v22  ;;  %v1529_v31 = vand.u32 2147483647, %v1528_v10  ;;  %v1614_v35 = vadd.s32 536870912, %v1613_v58  ;;  %v1680_v19 = vshll.u32 %v7947_v28, %v1671_v36 }
 0x186   : > { %v1443_v9 = vsel %vm1441_vm10, %v7637_v8, %v1442_v23  ;;  %v1675_v47 = vshrl.u32 %v7946_v26, %v1672_v50  ;;  %v1678_v14 = vshrl.u32 %v7947_v28, %v1672_v50  ;;  %v1681_v11 = vshrl.u32 %v7948_v30, %v1672_v50 }
 0x187   : > { %v1447_v45 = vsel %vm1440_vm7, %v1443_v9, %v1446_v13  ;;  %v1532_v4 = vmul.f32 %v1531_v54, %v1529_v31  ;;  %v1615_v40 = vshrl.u32 %v1614_v35, 30  ;;  %v1683_v62 = vshll.u32 %v7948_v30, %v1671_v36 }
 0x188   : > { %v1448_v38 = vsel %vm1437_vm6, nan, %v1447_v45  ;;  %v9178_v60 = vshll.u32 %v1665_v34, 8  ;;  %v1673_v49 = vshrl.u32 %v7945_v24, %v1672_v50  ;;  %v1764_v46 = vand.u32 2139095040, %v9165_v15 }
 0x189   : > { %v1533_v6 = vxor.u32 2147483648, %v1532_v4  ;;  %v1616_v25 = vshll.u32 %v1615_v40, 30  ;;  %6868 = vst [vmem:[%s8364_s17 + $0x58] sm:$0xff] %v1448_v38  ;;  %v1676_v52 = vor.u32 %v1675_v47, %v1674_v59  ;;  %v1684_v27 = vshrl.u32 %v7949_v32, %v1672_v50 }
 0x18a   : > { %v1686_v53 = vshll.u32 %v7949_v32, %v1671_v36  ;;  %v1687_v7 = vshrl.u32 %v7950_v39, %v1672_v50  ;;  %v1679_v16 = vor.u32 %v1678_v14, %v1677_v3  ;;  %v1682_v17 = vor.u32 %v1681_v11, %v1680_v19 }
 0x18b   : > { %v1534_v21 = vsel %vm1451_vm15, %v1533_v6, %v1532_v4  ;;  %v9188_v42 = vsub.s32 %v1613_v58, %v1616_v25  ;;  %v1685_v18 = vor.u32 %v1684_v27, %v1683_v62  ;;  %vm1689_vm11 = vcmp.lt.s32.totalorder %v1670_v20, 1 }
 0x18c   : > { %v1537_v37 = vsel %vm9127_vm1, %v8919_v41, %v1534_v21  ;;  %v1688_v57 = vor.u32 %v1687_v7, %v1686_v53  ;;  %vm1691_vm13 = vcmp.lt.s32.totalorder %v1670_v20, 3  ;;  %v1765_v2 = vshrl.u32 %v1764_v46, 23  ;;  %v9234_v7 = vld [vmem:[%s8067_s30 + $0x80] sm:$0xff] }
 0x18d   : > { %7640 = vcosq.f32 %v1537_v37  ;;  %v1619_v33 = vsub.s32 0, %v9188_v42  ;;  %vm1690_vm14 = vcmp.lt.s32.totalorder %v1670_v20, 2  ;;  %vm1692_vm0 = vcmp.lt.s32.totalorder %v1670_v20, 4 }
 0x18e   : > { %7642 = vsinq.f32 %v1537_v37  ;;  %v1693_v44 = vsel %vm1689_vm11, %v1673_v49, %v1676_v52  ;;  %v1694_v1 = vsel %vm1692_vm0, %v1682_v17, 2102212464  ;;  %v1697_v8 = vsel %vm1689_vm11, %v1676_v52, %v1679_v16 }
 0x18f   : > { %v7070_v56 = vmin.u32 %v1619_v33, %v9188_v42  ;;  %v1698_v51 = vsel %vm1692_vm0, %v1685_v18, 920167782  ;;  %v1695_v55 = vsel %vm1691_vm13, %v1679_v16, %v1694_v1  ;;  %v1701_v22 = vsel %vm1689_vm11, %v1679_v16, %v1682_v17 }
 0x190   : > { %v1699_v36 = vsel %vm1691_vm13, %v1682_v17, %v1698_v51  ;;  %v1702_v48 = vsel %vm1692_vm0, %v1688_v57, 1326507024  ;;  %v1543_v10 = vand.u32 3, %v1542_v12  ;;  %v1639_v58 = vsub.s32 4, %v1615_v40 }
 0x191   : > { %v1621_v54 = vclz %v7070_v56  ;;  %v1696_v23 = vsel %vm1690_vm14, %v1693_v44, %v1695_v55  ;;  %v1700_v34 = vsel %vm1690_vm14, %v1697_v8, %v1699_v36  ;;  %v1703_v50 = vsel %vm1691_vm13, %v1685_v18, %v1702_v48 }
 0x192   : > { %v7077_v59 = vadd.s32 4294967169, %v1765_v2  ;;  %v1704_v31 = vsel %vm1690_vm14, %v1701_v22, %v1703_v50  ;;  %v9202_v35 = vmul.u32.u64.low %v9178_v60, %v1700_v34  ;;  %v9203_v3 = vmul.u32.u64.high %v9178_v60, %v1700_v34, %v9202_v35 }
 0x193   : > { %v7071_v13 = vadd.s32 4294967294, %v1621_v54  ;;  %vm1555_vm15 = vcmp.lt.s32.totalorder %v9011_v43, 0  ;;  %v9208_v12 = vmul.u32.u64.low %v9178_v60, %v1704_v31  ;;  %v9209_v9 = vmul.u32.u64.high %v9178_v60, %v1704_v31, %v9208_v12 }
 0x194   : > { %v1761_v47 = vand.u32 2147483647, %v9165_v15  ;;  %vm1541_vm1 = vweird.f32 %v8919_v41  ;;  %v1609_v14 = vadd.s32 %v9145_v61, %v9142_v0  ;;  %v1640_v19 = vsel %vm1555_vm15, %v1639_v58, %v1615_v40 }
 0x195   : > { %vm7072_vm2 = vcmp.lt.s32.totalorder %v7071_v13, 0  ;;  %v1771_v45 = vadd.s32 1, %v7077_v59  ;;  %vm1544_vm3 = vcmp.lt.s32.totalorder %v1543_v10, 2  ;;  %vm9219_vm4 = vcmp.le.f32.partialorder %v1553_v63, 0.7853982 }
 0x196   : > { %v1624_v11 = vsel %vm7072_vm2, 0, %v7071_v13  ;;  %v1712_v38 = vmul.u32 %v9178_v60, %v1696_v23  ;;  %v1715_v0 = vadd.s32 1, %v9203_v3  ;;  %v1642_v61 = vsel %vm9219_vm4, 0, %v1640_v19 }
 0x197   : > { %v1625_v20 = vsub.s32 32, %v1624_v11  ;;  %v1626_v62 = vshll.u32 %v9188_v42, %v1624_v11  ;;  %v1629_v6 = vsub.s32 4294967266, %v1624_v11  ;;  %vm1714_vm5 = vc.u32 %v9209_v9, %v9202_v35 }
 0x198   : > { %v1768_v63 = vand.u32 8388607, %v1761_v47  ;;  %vm1772_vm6 = vcmp.gt.s32.totalorder %v1771_v45, 0  ;;  %v1716_v60 = vsel %vm1714_vm5, %v1715_v0, %v9203_v3  ;;  %vm1545_vm8 = vcmp.eq.s32.totalorder %v1543_v10, 0 }
 0x199   : > { %v1627_v40 = vshrl.u32 %v1609_v14, %v1625_v20  ;;  %v1630_v25 = vadd.s32 127, %v1629_v6  ;;  %v1773_v49 = vsel %vm1772_vm6, %v1771_v45, 0  ;;  %vm1548_vm7 = vcmp.eq.s32.totalorder %v1543_v10, 2 }
 0x19a   : > { %v7641_v46 = vpop.eup %7640  ;;  %v1717_v52 = vadd.s32 %v1716_v60, %v1712_v38  ;;  %v1775_v27 = vand.u32 31, %v1773_v49  ;;  %v9236_v17 = vadd.s32 3, %v1642_v61  ;;  %v1769_v57 = vor.u32 8388608, %v1768_v63 }
 0x19b   : > { %v7643_v53 = vpop.eup %7642  ;;  %v1549_v21 = vxor.u32 2147483648, %v7641_v46  ;;  %v1628_v42 = vor.u32 %v1627_v40, %v1626_v62  ;;  %v1631_v16 = vshll.u32 %v1630_v25, 23  ;;  %v1865_v1 = vand.u32 2147483647, %v9234_v7 }
 0x19c   : > { %v1546_v37 = vxor.u32 2147483648, %v7643_v53  ;;  %v1718_v18 = vadd.s32 536870912, %v1717_v52  ;;  %v1776_v33 = vsub.s32 32, %v1775_v27  ;;  %v1774_v55 = vshrl.u32 %v1773_v49, 5 }
 0x19d   : > { %v1550_v2 = vsel %vm1548_vm7, %v1549_v21, %v7643_v53  ;;  %v1632_v44 = vor.u32 4788187, %v1631_v16  ;;  %v1635_v56 = vcvt.s32.f32 %v1628_v42  ;;  %v1868_v36 = vand.u32 2139095040, %v9234_v7 }
 0x19e   : > { %v1547_v8 = vsel %vm1545_vm8, %v7641_v46, %v1546_v37  ;;  %v1719_v51 = vshrl.u32 %v1718_v18, 30  ;;  %v1778_v54 = vshll.u32 %v7945_v24, %v1775_v27  ;;  %v1781_v58 = vshll.u32 %v7946_v26, %v1775_v27 }
 0x19f   : > { %v1551_v22 = vsel %vm1544_vm3, %v1547_v8, %v1550_v2  ;;  %v1633_v48 = vand.u32 2147483647, %v1632_v44  ;;  %v1779_v50 = vshrl.u32 %v7946_v26, %v1776_v33  ;;  %v1782_v59 = vshrl.u32 %v7947_v28, %v1776_v33 }
 0x1a0   : > { %v1552_v23 = vsel %vm1541_vm1, nan, %v1551_v22  ;;  %v1720_v34 = vshll.u32 %v1719_v51, 30  ;;  %v1784_v31 = vshll.u32 %v7947_v28, %v1775_v27  ;;  %v1785_v3 = vshrl.u32 %v7948_v30, %v1776_v33 }
 0x1a1   : > { %v1636_v13 = vmul.f32 %v1635_v56, %v1633_v48  ;;  %v1787_v10 = vshll.u32 %v7948_v30, %v1775_v27  ;;  %6869 = vst [vmem:[%s8364_s17 + $0x60] sm:$0xff] %v1552_v23  ;;  %v1788_v14 = vshrl.u32 %v7949_v32, %v1776_v33  ;;  %v1790_v41 = vshll.u32 %v7949_v32, %v1775_v27 }
 0x1a2   : > { %v9252_v12 = vsub.s32 %v1717_v52, %v1720_v34  ;;  %v9256_v19 = vshll.u32 %v1769_v57, 8  ;;  %v1713_v11 = vadd.s32 %v9202_v35, %v9209_v9  ;;  %v1791_v38 = vshrl.u32 %v7950_v39, %v1776_v33 }
 0x1a3   : > { %v1637_v45 = vxor.u32 2147483648, %v1636_v13  ;;  %v1869_v20 = vshrl.u32 %v1868_v36, 23  ;;  %vm1659_vm9 = vcmp.lt.s32.totalorder %v9097_v29, 0  ;;  %v1777_v6 = vshrl.u32 %v7945_v24, %v1776_v33 }
 0x1a4   : > { %v1723_v62 = vsub.s32 0, %v9252_v12  ;;  %v1780_v0 = vor.u32 %v1779_v50, %v1778_v54  ;;  %v1783_v61 = vor.u32 %v1782_v59, %v1781_v58  ;;  %v1786_v40 = vor.u32 %v1785_v3, %v1784_v31 }
 0x1a5   : > { %v1638_v63 = vsel %vm1555_vm15, %v1637_v45, %v1636_v13  ;;  %v1789_v25 = vor.u32 %v1788_v14, %v1787_v10  ;;  %vm1793_vm10 = vcmp.lt.s32.totalorder %v1774_v55, 1  ;;  %v1792_v60 = vor.u32 %v1791_v38, %v1790_v41 }
 0x1a6   : > { %v1641_v35 = vsel %vm9219_vm4, %v9011_v43, %v1638_v63  ;;  %v7074_v9 = vmin.u32 %v1723_v62, %v9252_v12  ;;  %vm1796_vm12 = vcmp.lt.s32.totalorder %v1774_v55, 4  ;;  %vm1794_vm11 = vcmp.lt.s32.totalorder %v1774_v55, 2 }
 0x1a7   : > { %7644 = vcosq.f32 %v1641_v35  ;;  %vm1795_vm13 = vcmp.lt.s32.totalorder %v1774_v55, 3  ;;  %v1798_v49 = vsel %vm1796_vm12, %v1786_v40, 2102212464  ;;  %v1797_v52 = vsel %vm1793_vm10, %v1777_v6, %v1780_v0 }
 0x1a8   : > { %7646 = vsinq.f32 %v1641_v35  ;;  %v1725_v46 = vclz %v7074_v9  ;;  %v1801_v27 = vsel %vm1793_vm10, %v1780_v0, %v1783_v61  ;;  %v1743_v53 = vsub.s32 4, %v1719_v51 }
 0x1a9   : > { %v1799_v21 = vsel %vm1795_vm13, %v1783_v61, %v1798_v49  ;;  %v1802_v42 = vsel %vm1796_vm12, %v1789_v25, 920167782  ;;  %v1805_v4 = vsel %vm1793_vm10, %v1783_v61, %v1786_v40  ;;  %v1806_v18 = vsel %vm1796_vm12, %v1792_v60, 1326507024 }
 0x1aa   : > { %v7075_v16 = vadd.s32 4294967294, %v1725_v46  ;;  %v1803_v37 = vsel %vm1795_vm13, %v1786_v40, %v1802_v42  ;;  %v1872_v57 = vand.u32 8388607, %v1865_v1  ;;  %v1800_v33 = vsel %vm1794_vm11, %v1797_v52, %v1799_v21 }
 0x1ab   : > { %v1804_v2 = vsel %vm1794_vm11, %v1801_v27, %v1803_v37  ;;  %v1807_v44 = vsel %vm1795_vm13, %v1789_v25, %v1806_v18  ;;  %v7081_v56 = vadd.s32 4294967169, %v1869_v20  ;;  %v1744_v54 = vsel %vm1659_vm9, %v1743_v53, %v1719_v51 }
 0x1ac   : > { %vm7076_vm14 = vcmp.lt.s32.totalorder %v7075_v16, 0  ;;  %v1808_v8 = vsel %vm1794_vm11, %v1805_v4, %v1807_v44  ;;  %v9282_v36 = vmul.u32.u64.low %v9256_v19, %v1804_v2  ;;  %v9283_v22 = vmul.u32.u64.high %v9256_v19, %v1804_v2, %v9282_v36 }
 0x1ad   : > { %v1728_v48 = vsel %vm7076_vm14, 0, %v7075_v16  ;;  %v9289_v58 = vmul.u32.u64.low %v9256_v19, %v1808_v8  ;;  %v9290_v23 = vmul.u32.u64.high %v9256_v19, %v1808_v8, %v9289_v58  ;;  %v1875_v13 = vadd.s32 1, %v7081_v56 }
 0x1ae   : > { %v1729_v34 = vsub.s32 32, %v1728_v48  ;;  %v1730_v50 = vshll.u32 %v9252_v12, %v1728_v48  ;;  %v1733_v59 = vsub.s32 4294967266, %v1728_v48  ;;  %v1647_v55 = vand.u32 3, %v9236_v17 }
 0x1af   : > { %vm9296_vm0 = vcmp.le.f32.partialorder %v1657_v5, 0.7853982  ;;  %v1816_v3 = vmul.u32 %v9256_v19, %v1800_v33  ;;  %v1819_v14 = vadd.s32 1, %v9283_v22  ;;  %vm1876_vm15 = vcmp.gt.s32.totalorder %v1875_v13, 0 }
 0x1b0   : > { %v1731_v51 = vshrl.u32 %v1713_v11, %v1729_v34  ;;  %v1734_v10 = vadd.s32 127, %v1733_v59  ;;  %v1746_v12 = vsel %vm9296_vm0, 0, %v1744_v54  ;;  %vm1818_vm1 = vc.u32 %v9290_v23, %v9282_v36 }
 0x1b1   : > { %v1873_v17 = vor.u32 8388608, %v1872_v57  ;;  %v1877_v41 = vsel %vm1876_vm15, %v1875_v13, 0  ;;  %v1820_v38 = vsel %vm1818_vm1, %v1819_v14, %v9283_v22  ;;  %vm1645_vm2 = vweird.f32 %v9011_v43  ;;  %v9326_v22 = vld [vmem:[%s8067_s30 + $0x88] sm:$0xff] }
 0x1b2   : > { %v1732_v45 = vor.u32 %v1731_v51, %v1730_v50  ;;  %v1735_v5 = vshll.u32 %v1734_v10, 23  ;;  %v9307_v20 = vshrl.u32 %v1877_v41, 5  ;;  %vm1648_vm3 = vcmp.lt.s32.totalorder %v1647_v55, 2 }
 0x1b3   : > { %v1821_v19 = vadd.s32 %v1820_v38, %v1816_v3  ;;  %v1879_v11 = vand.u32 31, %v1877_v41  ;;  %vm1649_vm4 = vcmp.eq.s32.totalorder %v1647_v55, 0  ;;  %vm1652_vm5 = vcmp.eq.s32.totalorder %v1647_v55, 2 }
 0x1b4   : > { %v7645_v62 = vpop.eup %7644  ;;  %v1736_v6 = vor.u32 4788187, %v1735_v5  ;;  %v1739_v0 = vcvt.s32.f32 %v1732_v45  ;;  %v1750_v40 = vadd.s32 3, %v1746_v12  ;;  %vm1897_vm6 = vcmp.lt.s32.totalorder %v9307_v20, 1 }
 0x1b5   : > { %v7647_v61 = vpop.eup %7646  ;;  %v1653_v63 = vxor.u32 2147483648, %v7645_v62  ;;  %v1822_v25 = vadd.s32 536870912, %v1821_v19  ;;  %v1880_v35 = vsub.s32 32, %v1879_v11  ;;  %v9311_v49 = vshll.u32 %v1873_v17, 8 }
 0x1b6   : > { %v1650_v9 = vxor.u32 2147483648, %v7647_v61  ;;  %v1737_v60 = vand.u32 2147483647, %v1736_v6  ;;  %v1882_v27 = vshll.u32 %v7945_v24, %v1879_v11  ;;  %vm1763_vm8 = vcmp.lt.s32.totalorder %v9165_v15, 0 }
 0x1b7   : > { %v1654_v46 = vsel %vm1652_vm5, %v1653_v63, %v7647_v61  ;;  %v1823_v52 = vshrl.u32 %v1822_v25, 30  ;;  %v1883_v53 = vshrl.u32 %v7946_v26, %v1880_v35  ;;  %v1885_v4 = vshll.u32 %v7946_v26, %v1879_v11 }
 0x1b8   : > { %v1651_v21 = vsel %vm1649_vm4, %v7645_v62, %v1650_v9  ;;  %v1740_v42 = vmul.f32 %v1739_v0, %v1737_v60  ;;  %v1886_v16 = vshrl.u32 %v7947_v28, %v1880_v35  ;;  %v1888_v57 = vshll.u32 %v7947_v28, %v1879_v11 }
 0x1b9   : > { %v1655_v37 = vsel %vm1648_vm3, %v1651_v21, %v1654_v46  ;;  %v1824_v18 = vshll.u32 %v1823_v52, 30  ;;  %v1889_v33 = vshrl.u32 %v7948_v30, %v1880_v35  ;;  %v1847_v56 = vsub.s32 4, %v1823_v52 }
 0x1ba   : > { %v1656_v2 = vsel %vm1645_vm2, nan, %v1655_v37  ;;  %v1741_v44 = vxor.u32 2147483648, %v1740_v42  ;;  %v1881_v8 = vshrl.u32 %v7945_v24, %v1880_v35  ;;  %v1884_v54 = vor.u32 %v1883_v53, %v1882_v27 }
 0x1bb   : > { %v9328_v48 = vsub.s32 %v1821_v19, %v1824_v18  ;;  %v1891_v58 = vshll.u32 %v7948_v30, %v1879_v11  ;;  %v1892_v34 = vshrl.u32 %v7949_v32, %v1880_v35  ;;  %6870 = vst [vmem:[%s8364_s17 + $0x68] sm:$0xff] %v1656_v2  ;;  %v1887_v59 = vor.u32 %v1886_v16, %v1885_v4 }
 0x1bc   : > { %v1742_v50 = vsel %vm1659_vm9, %v1741_v44, %v1740_v42  ;;  %v1894_v43 = vshll.u32 %v7949_v32, %v1879_v11  ;;  %v1895_v13 = vshrl.u32 %v7950_v39, %v1880_v35  ;;  %vm9342_vm7 = vcmp.le.f32.partialorder %v1761_v47, 0.7853982 }
 0x1bd   : > { %v1745_v55 = vsel %vm9296_vm0, %v9097_v29, %v1742_v50  ;;  %v1827_v51 = vsub.s32 0, %v9328_v48  ;;  %v1890_v10 = vor.u32 %v1889_v33, %v1888_v57  ;;  %v1893_v14 = vor.u32 %v1892_v34, %v1891_v58 }
 0x1be   : > { %7648 = vcosq.f32 %v1745_v55  ;;  %v1896_v12 = vor.u32 %v1895_v13, %v1894_v43  ;;  %vm1900_vm9 = vcmp.lt.s32.totalorder %v9307_v20, 4  ;;  %v1972_v17 = vand.u32 2139095040, %v9326_v22 }
 0x1bf   : > { %7650 = vsinq.f32 %v1745_v55  ;;  %v7078_v31 = vmin.u32 %v1827_v51, %v9328_v48  ;;  %vm1898_vm10 = vcmp.lt.s32.totalorder %v9307_v20, 2  ;;  %vm1899_vm12 = vcmp.lt.s32.totalorder %v9307_v20, 3 }
 0x1c0   : > { %v1901_v47 = vsel %vm1897_vm6, %v1881_v8, %v1884_v54  ;;  %v1902_v41 = vsel %vm1900_vm9, %v1890_v10, 2102212464  ;;  %v1905_v45 = vsel %vm1897_vm6, %v1884_v54, %v1887_v59  ;;  %v1906_v5 = vsel %vm1900_vm9, %v1893_v14, 920167782 }
 0x1c1   : > { %v9360_v38 = vand.u32 3, %v1750_v40  ;;  %v1829_v19 = vclz %v7078_v31  ;;  %v1848_v11 = vsel %vm1763_vm8, %v1847_v56, %v1823_v52  ;;  %v1909_v62 = vsel %vm1897_vm6, %v1887_v59, %v1890_v10 }
 0x1c2   : > { %v1903_v6 = vsel %vm1899_vm12, %v1887_v59, %v1902_v41  ;;  %v1907_v0 = vsel %vm1899_vm12, %v1890_v10, %v1906_v5  ;;  %v1910_v61 = vsel %vm1900_vm9, %v1896_v12, 1326507024  ;;  %v1973_v63 = vshrl.u32 %v1972_v17, 23 }
 0x1c3   : > { %v7079_v25 = vadd.s32 4294967294, %v1829_v19  ;;  %v1904_v40 = vsel %vm1898_vm10, %v1901_v47, %v1903_v6  ;;  %v1908_v35 = vsel %vm1898_vm10, %v1905_v45, %v1907_v0  ;;  %v1911_v9 = vsel %vm1899_vm12, %v1893_v14, %v1910_v61 }
 0x1c4   : > { %v1817_v60 = vadd.s32 %v9282_v36, %v9290_v23  ;;  %v1912_v46 = vsel %vm1898_vm10, %v1909_v62, %v1911_v9  ;;  %v9383_v52 = vmul.u32.u64.low %v9311_v49, %v1908_v35  ;;  %v9384_v27 = vmul.u32.u64.high %v9311_v49, %v1908_v35, %v9383_v52 }
 0x1c5   : > { %vm7080_vm11 = vcmp.lt.s32.totalorder %v7079_v25, 0  ;;  %v9388_v53 = vmul.u32.u64.low %v9311_v49, %v1912_v46  ;;  %v9389_v21 = vmul.u32.u64.high %v9311_v49, %v1912_v46, %v9388_v53  ;;  %v7085_v42 = vadd.s32 4294967169, %v1973_v63 }
 0x1c6   : > { %v1832_v4 = vsel %vm7080_vm11, 0, %v7079_v25  ;;  %v1850_v16 = vsel %vm9342_vm7, 0, %v1848_v11  ;;  %v1920_v36 = vmul.u32 %v9311_v49, %v1904_v40  ;;  %v1969_v23 = vand.u32 2147483647, %v9326_v22  ;;  %v9412_v11 = vld [vmem:[%s8067_s30 + $0x90] sm:$0xff] }
 0x1c7   : > { %v1833_v20 = vsub.s32 32, %v1832_v4  ;;  %v1834_v37 = vshll.u32 %v9328_v48, %v1832_v4  ;;  %v1837_v18 = vsub.s32 4294967266, %v1832_v4  ;;  %v1979_v57 = vadd.s32 1, %v7085_v42 }
 0x1c8   : > { %vm1749_vm13 = vweird.f32 %v9097_v29  ;;  %v1923_v33 = vadd.s32 1, %v9384_v27  ;;  %vm1756_vm14 = vcmp.eq.s32.totalorder %v9360_v38, 2  ;;  %vm1922_vm0 = vc.u32 %v9389_v21, %v9383_v52 }
 0x1c9   : > { %v1835_v2 = vshrl.u32 %v1817_v60, %v1833_v20  ;;  %v1838_v44 = vadd.s32 127, %v1837_v18  ;;  %v1854_v56 = vadd.s32 3, %v1850_v16  ;;  %v1976_v8 = vand.u32 8388607, %v1969_v23 }
 0x1ca   : > { %v1924_v49 = vsel %vm1922_vm0, %v1923_v33, %v9384_v27  ;;  %vm1980_vm15 = vcmp.gt.s32.totalorder %v1979_v57, 0  ;;  %vm1752_vm1 = vcmp.lt.s32.totalorder %v9360_v38, 2  ;;  %vm1753_vm2 = vcmp.eq.s32.totalorder %v9360_v38, 0 }
 0x1cb   : > { %v7649_v48 = vpop.eup %7648  ;;  %v1836_v54 = vor.u32 %v1835_v2, %v1834_v37  ;;  %v1839_v58 = vshll.u32 %v1838_v44, 23  ;;  %v1925_v34 = vadd.s32 %v1924_v49, %v1920_v36  ;;  %v1981_v50 = vsel %vm1980_vm15, %v1979_v57, 0 }
 0x1cc   : > { %v7651_v59 = vpop.eup %7650  ;;  %v1757_v43 = vxor.u32 2147483648, %v7649_v48  ;;  %v1983_v13 = vand.u32 31, %v1981_v50  ;;  %v9408_v17 = vand.u32 3, %v1854_v56  ;;  %v1977_v31 = vor.u32 8388608, %v1976_v8 }
 0x1cd   : > { %v1754_v55 = vxor.u32 2147483648, %v7651_v59  ;;  %v1840_v51 = vor.u32 4788187, %v1839_v58  ;;  %v1843_v10 = vcvt.s32.f32 %v1836_v54  ;;  %v1926_v14 = vadd.s32 536870912, %v1925_v34 }
 0x1ce   : > { %v1758_v12 = vsel %vm1756_vm14, %v1757_v43, %v7651_v59  ;;  %v1984_v47 = vsub.s32 32, %v1983_v13  ;;  %v1986_v19 = vshll.u32 %v7945_v24, %v1983_v13  ;;  %v1989_v0 = vshll.u32 %v7946_v26, %v1983_v13 }
 0x1cf   : > { %v1755_v41 = vsel %vm1753_vm2, %v7649_v48, %v1754_v55  ;;  %v1841_v45 = vand.u32 2147483647, %v1840_v51  ;;  %v1927_v5 = vshrl.u32 %v1926_v14, 30  ;;  %v1992_v61 = vshll.u32 %v7947_v28, %v1983_v13 }
 0x1d0   : > { %v1759_v62 = vsel %vm1752_vm1, %v1755_v41, %v1758_v12  ;;  %v1987_v6 = vshrl.u32 %v7946_v26, %v1984_v47  ;;  %v1990_v35 = vshrl.u32 %v7947_v28, %v1984_v47  ;;  %v1982_v9 = vshrl.u32 %v1981_v50, 5 }
 0x1d1   : > { %v1760_v63 = vsel %vm1749_vm13, nan, %v1759_v62  ;;  %v1844_v25 = vmul.f32 %v1843_v10, %v1841_v45  ;;  %v1928_v40 = vshll.u32 %v1927_v5, 30  ;;  %v1993_v60 = vshrl.u32 %v7948_v30, %v1984_v47 }
 0x1d2   : > { %v1995_v46 = vshll.u32 %v7948_v30, %v1983_v13  ;;  %v2073_v38 = vand.u32 2147483647, %v9412_v11  ;;  %6871 = vst [vmem:[%s8364_s17 + $0x70] sm:$0xff] %v1760_v63  ;;  %v1996_v42 = vshrl.u32 %v7949_v32, %v1984_v47  ;;  %v2076_v29 = vand.u32 2139095040, %v9412_v11 }
 0x1d3   : > { %v1845_v27 = vxor.u32 2147483648, %v1844_v25  ;;  %v9426_v53 = vsub.s32 %v1925_v34, %v1928_v40  ;;  %vm1867_vm3 = vcmp.lt.s32.totalorder %v9234_v7, 0  ;;  %v1985_v4 = vshrl.u32 %v7945_v24, %v1984_v47 }
 0x1d4   : > { %v1988_v16 = vor.u32 %v1987_v6, %v1986_v19  ;;  %v1998_v36 = vshll.u32 %v7949_v32, %v1983_v13  ;;  %v1999_v20 = vshrl.u32 %v7950_v39, %v1984_v47  ;;  %v1991_v57 = vor.u32 %v1990_v35, %v1989_v0 }
 0x1d5   : > { %v1846_v37 = vsel %vm1763_vm8, %v1845_v27, %v1844_v25  ;;  %v1931_v18 = vsub.s32 0, %v9426_v53  ;;  %v1994_v33 = vor.u32 %v1993_v60, %v1992_v61  ;;  %v1997_v44 = vor.u32 %v1996_v42, %v1995_v46 }
 0x1d6   : > { %v1849_v2 = vsel %vm9342_vm7, %v9165_v15, %v1846_v37  ;;  %v2000_v56 = vor.u32 %v1999_v20, %v1998_v36  ;;  %vm2001_vm4 = vcmp.lt.s32.totalorder %v1982_v9, 1  ;;  %vm9442_vm5 = vcmp.le.f32.partialorder %v1865_v1, 0.7853982 }
 0x1d7   : > { %7652 = vcosq.f32 %v1849_v2  ;;  %v7082_v8 = vmin.u32 %v1931_v18, %v9426_v53  ;;  %v2017_v48 = vshll.u32 %v1977_v31, 8  ;;  %v2077_v54 = vshrl.u32 %v2076_v29, 23 }
 0x1d8   : > { %7654 = vsinq.f32 %v1849_v2  ;;  %v1951_v58 = vsub.s32 4, %v1927_v5  ;;  %vm2003_vm6 = vcmp.lt.s32.totalorder %v1982_v9, 3  ;;  %vm2004_vm8 = vcmp.lt.s32.totalorder %v1982_v9, 4 }
 0x1d9   : > { %v1933_v3 = vclz %v7082_v8  ;;  %vm2002_vm7 = vcmp.lt.s32.totalorder %v1982_v9, 2  ;;  %v2005_v34 = vsel %vm2001_vm4, %v1985_v4, %v1988_v16  ;;  %v2009_v50 = vsel %vm2001_vm4, %v1988_v16, %v1991_v57 }
 0x1da   : > { %v2006_v59 = vsel %vm2004_vm8, %v1994_v33, 2102212464  ;;  %v2010_v43 = vsel %vm2004_vm8, %v1997_v44, 920167782  ;;  %v2013_v1 = vsel %vm2001_vm4, %v1991_v57, %v1994_v33  ;;  %v2014_v13 = vsel %vm2004_vm8, %v2000_v56, 1326507024 }
 0x1db   : > { %v7083_v55 = vadd.s32 4294967294, %v1933_v3  ;;  %v2007_v51 = vsel %vm2003_vm6, %v1991_v57, %v2006_v59  ;;  %v2011_v10 = vsel %vm2003_vm6, %v1994_v33, %v2010_v43  ;;  %v2015_v14 = vsel %vm2003_vm6, %v1997_v44, %v2014_v13 }
 0x1dc   : > { %v1921_v12 = vadd.s32 %v9383_v52, %v9389_v21  ;;  %v2012_v31 = vsel %vm2002_vm7, %v2009_v50, %v2011_v10  ;;  %v2016_v47 = vsel %vm2002_vm7, %v2013_v1, %v2015_v14  ;;  %v7089_v41 = vadd.s32 4294967169, %v2077_v54  ;;  %v9480_v50 = vld [vmem:[%s8067_s30 + $0x98] sm:$0xff] }
 0x1dd   : > { %vm7084_vm9 = vcmp.lt.s32.totalorder %v7083_v55, 0  ;;  %v1952_v45 = vsel %vm1867_vm3, %v1951_v58, %v1927_v5  ;;  %v9456_v19 = vmul.u32.u64.low %v2017_v48, %v2016_v47  ;;  %v9457_v62 = vmul.u32.u64.high %v2017_v48, %v2016_v47, %v9456_v19 }
 0x1de   : > { %v1936_v6 = vsel %vm7084_vm9, 0, %v7083_v55  ;;  %v2008_v0 = vsel %vm2002_vm7, %v2005_v34, %v2007_v51  ;;  %v9460_v61 = vmul.u32.u64.low %v2017_v48, %v2012_v31  ;;  %v9461_v63 = vmul.u32.u64.high %v2017_v48, %v2012_v31, %v9460_v61 }
 0x1df   : > { %v1937_v52 = vsub.s32 32, %v1936_v6  ;;  %v1938_v21 = vshll.u32 %v9426_v53, %v1936_v6  ;;  %v1941_v25 = vsub.s32 4294967266, %v1936_v6  ;;  %v2083_v40 = vadd.s32 1, %v7089_v41 }
 0x1e0   : > { %vm1853_vm10 = vweird.f32 %v9165_v15  ;;  %v1954_v5 = vsel %vm9442_vm5, 0, %v1952_v45  ;;  %v2024_v46 = vmul.u32 %v2017_v48, %v2008_v0  ;;  %vm2026_vm12 = vc.u32 %v9457_v62, %v9460_v61 }
 0x1e1   : > { %v1939_v35 = vshrl.u32 %v1921_v12, %v1937_v52  ;;  %v1942_v60 = vadd.s32 127, %v1941_v25  ;;  %vm1856_vm11 = vcmp.lt.s32.totalorder %v9408_v17, 2  ;;  %v2027_v9 = vadd.s32 1, %v9461_v63 }
 0x1e2   : > { %v2080_v27 = vand.u32 8388607, %v2073_v38  ;;  %vm2084_vm13 = vcmp.gt.s32.totalorder %v2083_v40, 0  ;;  %vm1857_vm14 = vcmp.eq.s32.totalorder %v9408_v17, 0  ;;  %vm1860_vm0 = vcmp.eq.s32.totalorder %v9408_v17, 2 }
 0x1e3   : > { %v1940_v53 = vor.u32 %v1939_v35, %v1938_v21  ;;  %v1943_v42 = vshll.u32 %v1942_v60, 23  ;;  %v2085_v29 = vsel %vm2084_vm13, %v2083_v40, 0  ;;  %v1958_v16 = vadd.s32 3, %v1954_v5 }
 0x1e4   : > { %v7653_v4 = vpop.eup %7652  ;;  %v2028_v36 = vsel %vm2026_vm12, %v2027_v9, %v9461_v63  ;;  %v2087_v20 = vand.u32 31, %v2085_v29  ;;  %v2081_v56 = vor.u32 8388608, %v2080_v27  ;;  %v2086_v31 = vshrl.u32 %v2085_v29, 5 }
 0x1e5   : > { %v7655_v37 = vpop.eup %7654  ;;  %v1861_v18 = vxor.u32 2147483648, %v7653_v4  ;;  %v1944_v57 = vor.u32 4788187, %v1943_v42  ;;  %v1947_v33 = vcvt.s32.f32 %v1940_v53  ;;  %v2029_v2 = vadd.s32 %v2028_v36, %v2024_v46 }
 0x1e6   : > { %v1858_v44 = vxor.u32 2147483648, %v7655_v37  ;;  %v2088_v8 = vsub.s32 32, %v2087_v20  ;;  %v2090_v48 = vshll.u32 %v7945_v24, %v2087_v20  ;;  %v2093_v34 = vshll.u32 %v7946_v26, %v2087_v20 }
 0x1e7   : > { %v1862_v54 = vsel %vm1860_vm0, %v1861_v18, %v7655_v37  ;;  %v1945_v58 = vand.u32 2147483647, %v1944_v57  ;;  %v2030_v3 = vadd.s32 536870912, %v2029_v2  ;;  %v2096_v13 = vshll.u32 %v7947_v28, %v2087_v20 }
 0x1e8   : > { %v1859_v59 = vsel %vm1857_vm14, %v7653_v4, %v1858_v44  ;;  %v2091_v43 = vshrl.u32 %v7946_v26, %v2088_v8  ;;  %v2094_v1 = vshrl.u32 %v7947_v28, %v2088_v8  ;;  %v2097_v14 = vshrl.u32 %v7948_v30, %v2088_v8 }
 0x1e9   : > { %v1863_v55 = vsel %vm1856_vm11, %v1859_v59, %v1862_v54  ;;  %v1948_v51 = vmul.f32 %v1947_v33, %v1945_v58  ;;  %v2031_v10 = vshrl.u32 %v2030_v3, 30  ;;  %v2099_v47 = vshll.u32 %v7948_v30, %v2087_v20 }
 0x1ea   : > { %v1864_v12 = vsel %vm1853_vm10, nan, %v1863_v55  ;;  %v9493_v41 = vshll.u32 %v2081_v56, 8  ;;  %v2089_v6 = vshrl.u32 %v7945_v24, %v2088_v8  ;;  %v2180_v0 = vand.u32 2139095040, %v9480_v50 }
 0x1eb   : > { %v1949_v45 = vxor.u32 2147483648, %v1948_v51  ;;  %v2032_v19 = vshll.u32 %v2031_v10, 30  ;;  %6872 = vst [vmem:[%s8364_s17 + $0x78] sm:$0xff] %v1864_v12  ;;  %v2092_v17 = vor.u32 %v2091_v43, %v2090_v48  ;;  %v2100_v63 = vshrl.u32 %v7949_v32, %v2088_v8 }
 0x1ec   : > { %v2102_v52 = vshll.u32 %v7949_v32, %v2087_v20  ;;  %v2103_v15 = vshrl.u32 %v7950_v39, %v2088_v8  ;;  %v2095_v40 = vor.u32 %v2094_v1, %v2093_v34  ;;  %v2098_v5 = vor.u32 %v2097_v14, %v2096_v13 }
 0x1ed   : > { %v1950_v21 = vsel %vm1867_vm3, %v1949_v45, %v1948_v51  ;;  %v9503_v25 = vsub.s32 %v2029_v2, %v2032_v19  ;;  %v2101_v60 = vor.u32 %v2100_v63, %v2099_v47  ;;  %vm2105_vm15 = vcmp.lt.s32.totalorder %v2086_v31, 1 }
 0x1ee   : > { %v1953_v35 = vsel %vm9442_vm5, %v9234_v7, %v1950_v21  ;;  %v2104_v46 = vor.u32 %v2103_v15, %v2102_v52  ;;  %vm2107_vm1 = vcmp.lt.s32.totalorder %v2086_v31, 3  ;;  %v2181_v27 = vshrl.u32 %v2180_v0, 23  ;;  %v9549_v15 = vld [vmem:[%s8067_s30 + $0xa0] sm:$0xff] }
 0x1ef   : > { %7656 = vcosq.f32 %v1953_v35  ;;  %v2035_v9 = vsub.s32 0, %v9503_v25  ;;  %vm2106_vm2 = vcmp.lt.s32.totalorder %v2086_v31, 2  ;;  %vm2108_vm4 = vcmp.lt.s32.totalorder %v2086_v31, 4 }
 0x1f0   : > { %7658 = vsinq.f32 %v1953_v35  ;;  %v2109_v53 = vsel %vm2105_vm15, %v2089_v6, %v2092_v17  ;;  %v2110_v29 = vsel %vm2108_vm4, %v2098_v5, 2102212464  ;;  %v2113_v4 = vsel %vm2105_vm15, %v2092_v17, %v2095_v40 }
 0x1f1   : > { %v7086_v42 = vmin.u32 %v2035_v9, %v9503_v25  ;;  %v2114_v36 = vsel %vm2108_vm4, %v2101_v60, 920167782  ;;  %v2111_v49 = vsel %vm2107_vm1, %v2095_v40, %v2110_v29  ;;  %v2117_v37 = vsel %vm2105_vm15, %v2095_v40, %v2098_v5 }
 0x1f2   : > { %v2115_v20 = vsel %vm2107_vm1, %v2098_v5, %v2114_v36  ;;  %v2118_v18 = vsel %vm2108_vm4, %v2104_v46, 1326507024  ;;  %v1959_v57 = vand.u32 3, %v1958_v16  ;;  %v2055_v2 = vsub.s32 4, %v2031_v10 }
 0x1f3   : > { %v2037_v33 = vclz %v7086_v42  ;;  %v2112_v44 = vsel %vm2106_vm2, %v2109_v53, %v2111_v49  ;;  %v2116_v56 = vsel %vm2106_vm2, %v2113_v4, %v2115_v20  ;;  %v2119_v8 = vsel %vm2107_vm1, %v2101_v60, %v2118_v18 }
 0x1f4   : > { %v7093_v48 = vadd.s32 4294967169, %v2181_v27  ;;  %v2120_v58 = vsel %vm2106_vm2, %v2117_v37, %v2119_v8  ;;  %v9517_v3 = vmul.u32.u64.low %v9493_v41, %v2116_v56  ;;  %v9518_v34 = vmul.u32.u64.high %v9493_v41, %v2116_v56, %v9517_v3 }
 0x1f5   : > { %v7087_v54 = vadd.s32 4294967294, %v2037_v33  ;;  %vm1971_vm3 = vcmp.lt.s32.totalorder %v9326_v22, 0  ;;  %v9523_v16 = vmul.u32.u64.low %v9493_v41, %v2120_v58  ;;  %v9524_v59 = vmul.u32.u64.high %v9493_v41, %v2120_v58, %v9523_v16 }
 0x1f6   : > { %v2177_v43 = vand.u32 2147483647, %v9480_v50  ;;  %vm1957_vm5 = vweird.f32 %v9234_v7  ;;  %v2025_v1 = vadd.s32 %v9460_v61, %v9457_v62  ;;  %v2056_v13 = vsel %vm1971_vm3, %v2055_v2, %v2031_v10 }
 0x1f7   : > { %vm7088_vm6 = vcmp.lt.s32.totalorder %v7087_v54, 0  ;;  %v2187_v55 = vadd.s32 1, %v7093_v48  ;;  %vm1960_vm8 = vcmp.lt.s32.totalorder %v1959_v57, 2  ;;  %vm9534_vm7 = vcmp.le.f32.partialorder %v1969_v23, 0.7853982 }
 0x1f8   : > { %v2040_v14 = vsel %vm7088_vm6, 0, %v7087_v54  ;;  %v2128_v12 = vmul.u32 %v9493_v41, %v2112_v44  ;;  %v2131_v62 = vadd.s32 1, %v9518_v34  ;;  %v2058_v61 = vsel %vm9534_vm7, 0, %v2056_v13 }
 0x1f9   : > { %v2041_v31 = vsub.s32 32, %v2040_v14  ;;  %v2042_v47 = vshll.u32 %v9503_v25, %v2040_v14  ;;  %v2045_v45 = vsub.s32 4294967266, %v2040_v14  ;;  %vm2130_vm9 = vc.u32 %v9524_v59, %v9517_v3 }
 0x1fa   : > { %v2184_v23 = vand.u32 8388607, %v2177_v43  ;;  %vm2188_vm10 = vcmp.gt.s32.totalorder %v2187_v55, 0  ;;  %v2132_v41 = vsel %vm2130_vm9, %v2131_v62, %v9518_v34  ;;  %vm1961_vm12 = vcmp.eq.s32.totalorder %v1959_v57, 0 }
 0x1fb   : > { %v2043_v10 = vshrl.u32 %v2025_v1, %v2041_v31  ;;  %v2046_v19 = vadd.s32 127, %v2045_v45  ;;  %v2189_v6 = vsel %vm2188_vm10, %v2187_v55, 0  ;;  %vm1964_vm11 = vcmp.eq.s32.totalorder %v1959_v57, 2 }
 0x1fc   : > { %v7657_v0 = vpop.eup %7656  ;;  %v2133_v17 = vadd.s32 %v2132_v41, %v2128_v12  ;;  %v2191_v63 = vand.u32 31, %v2189_v6  ;;  %v9551_v5 = vadd.s32 3, %v2058_v61  ;;  %v2185_v46 = vor.u32 8388608, %v2184_v23 }
 0x1fd   : > { %v7659_v52 = vpop.eup %7658  ;;  %v1965_v21 = vxor.u32 2147483648, %v7657_v0  ;;  %v2044_v25 = vor.u32 %v2043_v10, %v2042_v47  ;;  %v2047_v40 = vshll.u32 %v2046_v19, 23  ;;  %v2281_v29 = vand.u32 2147483647, %v9549_v15 }
 0x1fe   : > { %v1962_v35 = vxor.u32 2147483648, %v7659_v52  ;;  %v2134_v60 = vadd.s32 536870912, %v2133_v17  ;;  %v2192_v9 = vsub.s32 32, %v2191_v63  ;;  %v2190_v49 = vshrl.u32 %v2189_v6, 5 }
 0x1ff   : > { %v1966_v27 = vsel %vm1964_vm11, %v1965_v21, %v7659_v52  ;;  %v2048_v53 = vor.u32 4788187, %v2047_v40  ;;  %v2051_v42 = vcvt.s32.f32 %v2044_v25  ;;  %v2284_v20 = vand.u32 2139095040, %v9549_v15 }
 0x200   : > { %v1963_v4 = vsel %vm1961_vm12, %v7657_v0, %v1962_v35  ;;  %v2135_v36 = vshrl.u32 %v2134_v60, 30  ;;  %v2194_v33 = vshll.u32 %v7945_v24, %v2191_v63  ;;  %v2197_v2 = vshll.u32 %v7946_v26, %v2191_v63 }
 0x201   : > { %v1967_v37 = vsel %vm1960_vm8, %v1963_v4, %v1966_v27  ;;  %v2049_v18 = vand.u32 2147483647, %v2048_v53  ;;  %v2195_v8 = vshrl.u32 %v7946_v26, %v2192_v9  ;;  %v2198_v48 = vshrl.u32 %v7947_v28, %v2192_v9 }
 0x202   : > { %v1968_v44 = vsel %vm1957_vm5, nan, %v1967_v37  ;;  %v2136_v56 = vshll.u32 %v2135_v36, 30  ;;  %v2200_v58 = vshll.u32 %v7947_v28, %v2191_v63  ;;  %v2201_v34 = vshrl.u32 %v7948_v30, %v2192_v9 }
 0x203   : > { %v2052_v54 = vmul.f32 %v2051_v42, %v2049_v18  ;;  %v2203_v57 = vshll.u32 %v7948_v30, %v2191_v63  ;;  %6873 = vst [vmem:[%s8364_s17 + $0x80] sm:$0xff] %v1968_v44  ;;  %v2204_v1 = vshrl.u32 %v7949_v32, %v2192_v9  ;;  %v2206_v7 = vshll.u32 %v7949_v32, %v2191_v63 }
 0x204   : > { %v9567_v16 = vsub.s32 %v2133_v17, %v2136_v56  ;;  %v9571_v13 = vshll.u32 %v2185_v46, 8  ;;  %v2129_v14 = vadd.s32 %v9517_v3, %v9524_v59  ;;  %v2207_v12 = vshrl.u32 %v7950_v39, %v2192_v9 }
 0x205   : > { %v2053_v55 = vxor.u32 2147483648, %v2052_v54  ;;  %v2285_v31 = vshrl.u32 %v2284_v20, 23  ;;  %vm2075_vm13 = vcmp.lt.s32.totalorder %v9412_v11, 0  ;;  %v2193_v45 = vshrl.u32 %v7945_v24, %v2192_v9 }
 0x206   : > { %v2139_v47 = vsub.s32 0, %v9567_v16  ;;  %v2196_v62 = vor.u32 %v2195_v8, %v2194_v33  ;;  %v2199_v61 = vor.u32 %v2198_v48, %v2197_v2  ;;  %v2202_v10 = vor.u32 %v2201_v34, %v2200_v58 }
 0x207   : > { %v2054_v23 = vsel %vm1971_vm3, %v2053_v55, %v2052_v54  ;;  %v2205_v19 = vor.u32 %v2204_v1, %v2203_v57  ;;  %vm2209_vm14 = vcmp.lt.s32.totalorder %v2190_v49, 1  ;;  %v2208_v41 = vor.u32 %v2207_v12, %v2206_v7 }
 0x208   : > { %v2057_v3 = vsel %vm9534_vm7, %v9326_v22, %v2054_v23  ;;  %v7090_v59 = vmin.u32 %v2139_v47, %v9567_v16  ;;  %vm2212_vm0 = vcmp.lt.s32.totalorder %v2190_v49, 4  ;;  %vm2210_vm15 = vcmp.lt.s32.totalorder %v2190_v49, 2 }
 0x209   : > { %7660 = vcosq.f32 %v2057_v3  ;;  %vm2211_vm1 = vcmp.lt.s32.totalorder %v2190_v49, 3  ;;  %v2214_v6 = vsel %vm2212_vm0, %v2202_v10, 2102212464  ;;  %v2213_v17 = vsel %vm2209_vm14, %v2193_v45, %v2196_v62 }
 0x20a   : > { %7662 = vsinq.f32 %v2057_v3  ;;  %v2141_v0 = vclz %v7090_v59  ;;  %v2217_v63 = vsel %vm2209_vm14, %v2196_v62, %v2199_v61  ;;  %v2159_v52 = vsub.s32 4, %v2135_v36 }
 0x20b   : > { %v2215_v21 = vsel %vm2211_vm1, %v2199_v61, %v2214_v6  ;;  %v2218_v25 = vsel %vm2212_vm0, %v2205_v19, 920167782  ;;  %v2221_v51 = vsel %vm2209_vm14, %v2199_v61, %v2202_v10  ;;  %v2222_v60 = vsel %vm2212_vm0, %v2208_v41, 1326507024 }
 0x20c   : > { %v7091_v40 = vadd.s32 4294967294, %v2141_v0  ;;  %v2219_v35 = vsel %vm2211_vm1, %v2202_v10, %v2218_v25  ;;  %v2288_v46 = vand.u32 8388607, %v2281_v29  ;;  %v2216_v9 = vsel %vm2210_vm15, %v2213_v17, %v2215_v21 }
 0x20d   : > { %v2220_v27 = vsel %vm2210_vm15, %v2217_v63, %v2219_v35  ;;  %v2223_v53 = vsel %vm2211_vm1, %v2205_v19, %v2222_v60  ;;  %v7097_v42 = vadd.s32 4294967169, %v2285_v31  ;;  %v2160_v33 = vsel %vm2075_vm13, %v2159_v52, %v2135_v36 }
 0x20e   : > { %vm7092_vm2 = vcmp.lt.s32.totalorder %v7091_v40, 0  ;;  %v2224_v4 = vsel %vm2210_vm15, %v2221_v51, %v2223_v53  ;;  %v9597_v20 = vmul.u32.u64.low %v9571_v13, %v2220_v27  ;;  %v9598_v37 = vmul.u32.u64.high %v9571_v13, %v2220_v27, %v9597_v20 }
 0x20f   : > { %v2144_v18 = vsel %vm7092_vm2, 0, %v7091_v40  ;;  %v9604_v2 = vmul.u32.u64.low %v9571_v13, %v2224_v4  ;;  %v9605_v44 = vmul.u32.u64.high %v9571_v13, %v2224_v4, %v9604_v2  ;;  %v2291_v54 = vadd.s32 1, %v7097_v42 }
 0x210   : > { %v2145_v56 = vsub.s32 32, %v2144_v18  ;;  %v2146_v8 = vshll.u32 %v9567_v16, %v2144_v18  ;;  %v2149_v48 = vsub.s32 4294967266, %v2144_v18  ;;  %v2063_v49 = vand.u32 3, %v9551_v5 }
 0x211   : > { %vm9611_vm4 = vcmp.le.f32.partialorder %v2073_v38, 0.7853982  ;;  %v2232_v34 = vmul.u32 %v9571_v13, %v2216_v9  ;;  %v2235_v1 = vadd.s32 1, %v9598_v37  ;;  %vm2292_vm3 = vcmp.gt.s32.totalorder %v2291_v54, 0 }
 0x212   : > { %v2147_v36 = vshrl.u32 %v2129_v14, %v2145_v56  ;;  %v2150_v57 = vadd.s32 127, %v2149_v48  ;;  %v2162_v16 = vsel %vm9611_vm4, 0, %v2160_v33  ;;  %vm2234_vm5 = vc.u32 %v9605_v44, %v9597_v20 }
 0x213   : > { %v2289_v5 = vor.u32 8388608, %v2288_v46  ;;  %v2293_v7 = vsel %vm2292_vm3, %v2291_v54, 0  ;;  %v2236_v12 = vsel %vm2234_vm5, %v2235_v1, %v9598_v37  ;;  %vm2061_vm6 = vweird.f32 %v9326_v22  ;;  %v9641_v37 = vld [vmem:[%s8067_s30 + $0xa8] sm:$0xff] }
 0x214   : > { %v2148_v55 = vor.u32 %v2147_v36, %v2146_v8  ;;  %v2151_v38 = vshll.u32 %v2150_v57, 23  ;;  %v9622_v31 = vshrl.u32 %v2293_v7, 5  ;;  %vm2064_vm8 = vcmp.lt.s32.totalorder %v2063_v49, 2 }
 0x215   : > { %v2237_v13 = vadd.s32 %v2236_v12, %v2232_v34  ;;  %v2295_v14 = vand.u32 31, %v2293_v7  ;;  %vm2065_vm7 = vcmp.eq.s32.totalorder %v2063_v49, 0  ;;  %vm2068_vm9 = vcmp.eq.s32.totalorder %v2063_v49, 2 }
 0x216   : > { %v7661_v47 = vpop.eup %7660  ;;  %v2152_v45 = vor.u32 4788187, %v2151_v38  ;;  %v2155_v62 = vcvt.s32.f32 %v2148_v55  ;;  %v2166_v10 = vadd.s32 3, %v2162_v16  ;;  %vm2313_vm10 = vcmp.lt.s32.totalorder %v9622_v31, 1 }
 0x217   : > { %v7663_v61 = vpop.eup %7662  ;;  %v2069_v23 = vxor.u32 2147483648, %v7661_v47  ;;  %v2238_v19 = vadd.s32 536870912, %v2237_v13  ;;  %v2296_v3 = vsub.s32 32, %v2295_v14  ;;  %v9626_v6 = vshll.u32 %v2289_v5, 8 }
 0x218   : > { %v2066_v59 = vxor.u32 2147483648, %v7663_v61  ;;  %v2153_v41 = vand.u32 2147483647, %v2152_v45  ;;  %v2298_v63 = vshll.u32 %v7945_v24, %v2295_v14  ;;  %vm2179_vm12 = vcmp.lt.s32.totalorder %v9480_v50, 0 }
 0x219   : > { %v2070_v0 = vsel %vm2068_vm9, %v2069_v23, %v7663_v61  ;;  %v2239_v17 = vshrl.u32 %v2238_v19, 30  ;;  %v2299_v52 = vshrl.u32 %v7946_v26, %v2296_v3  ;;  %v2301_v51 = vshll.u32 %v7946_v26, %v2295_v14 }
 0x21a   : > { %v2067_v21 = vsel %vm2065_vm7, %v7661_v47, %v2066_v59  ;;  %v2156_v25 = vmul.f32 %v2155_v62, %v2153_v41  ;;  %v2302_v40 = vshrl.u32 %v7947_v28, %v2296_v3  ;;  %v2304_v46 = vshll.u32 %v7947_v28, %v2295_v14 }
 0x21b   : > { %v2071_v35 = vsel %vm2064_vm8, %v2067_v21, %v2070_v0  ;;  %v2240_v60 = vshll.u32 %v2239_v17, 30  ;;  %v2305_v9 = vshrl.u32 %v7948_v30, %v2296_v3  ;;  %v2263_v42 = vsub.s32 4, %v2239_v17 }
 0x21c   : > { %v2072_v27 = vsel %vm2061_vm6, nan, %v2071_v35  ;;  %v2157_v53 = vxor.u32 2147483648, %v2156_v25  ;;  %v2297_v4 = vshrl.u32 %v7945_v24, %v2296_v3  ;;  %v2300_v33 = vor.u32 %v2299_v52, %v2298_v63 }
 0x21d   : > { %v9643_v18 = vsub.s32 %v2237_v13, %v2240_v60  ;;  %v2307_v2 = vshll.u32 %v7948_v30, %v2295_v14  ;;  %v2308_v56 = vshrl.u32 %v7949_v32, %v2296_v3  ;;  %6874 = vst [vmem:[%s8364_s17 + $0x88] sm:$0xff] %v2072_v27  ;;  %v2303_v48 = vor.u32 %v2302_v40, %v2301_v51 }
 0x21e   : > { %v2158_v8 = vsel %vm2075_vm13, %v2157_v53, %v2156_v25  ;;  %v2310_v22 = vshll.u32 %v7949_v32, %v2295_v14  ;;  %v2311_v54 = vshrl.u32 %v7950_v39, %v2296_v3  ;;  %vm9657_vm11 = vcmp.le.f32.partialorder %v2177_v43, 0.7853982 }
 0x21f   : > { %v2161_v49 = vsel %vm9611_vm4, %v9412_v11, %v2158_v8  ;;  %v2243_v36 = vsub.s32 0, %v9643_v18  ;;  %v2306_v57 = vor.u32 %v2305_v9, %v2304_v46  ;;  %v2309_v1 = vor.u32 %v2308_v56, %v2307_v2 }
 0x220   : > { %7664 = vcosq.f32 %v2161_v49  ;;  %v2312_v16 = vor.u32 %v2311_v54, %v2310_v22  ;;  %vm2316_vm13 = vcmp.lt.s32.totalorder %v9622_v31, 4  ;;  %v2388_v5 = vand.u32 2139095040, %v9641_v37 }
 0x221   : > { %7666 = vsinq.f32 %v2161_v49  ;;  %v7094_v58 = vmin.u32 %v2243_v36, %v9643_v18  ;;  %vm2314_vm14 = vcmp.lt.s32.totalorder %v9622_v31, 2  ;;  %vm2315_vm0 = vcmp.lt.s32.totalorder %v9622_v31, 3 }
 0x222   : > { %v2317_v43 = vsel %vm2313_vm10, %v2297_v4, %v2300_v33  ;;  %v2318_v7 = vsel %vm2316_vm13, %v2306_v57, 2102212464  ;;  %v2321_v55 = vsel %vm2313_vm10, %v2300_v33, %v2303_v48  ;;  %v2322_v38 = vsel %vm2316_vm13, %v2309_v1, 920167782 }
 0x223   : > { %v9675_v12 = vand.u32 3, %v2166_v10  ;;  %v2245_v13 = vclz %v7094_v58  ;;  %v2264_v14 = vsel %vm2179_vm12, %v2263_v42, %v2239_v17  ;;  %v2325_v47 = vsel %vm2313_vm10, %v2303_v48, %v2306_v57 }
 0x224   : > { %v2319_v45 = vsel %vm2315_vm0, %v2303_v48, %v2318_v7  ;;  %v2323_v62 = vsel %vm2315_vm0, %v2306_v57, %v2322_v38  ;;  %v2326_v61 = vsel %vm2316_vm13, %v2312_v16, 1326507024  ;;  %v2389_v23 = vshrl.u32 %v2388_v5, 23 }
 0x225   : > { %v7095_v19 = vadd.s32 4294967294, %v2245_v13  ;;  %v2320_v10 = vsel %vm2314_vm14, %v2317_v43, %v2319_v45  ;;  %v2324_v3 = vsel %vm2314_vm14, %v2321_v55, %v2323_v62  ;;  %v2327_v59 = vsel %vm2315_vm0, %v2309_v1, %v2326_v61 }
 0x226   : > { %v2233_v41 = vadd.s32 %v9597_v20, %v9605_v44  ;;  %v2328_v0 = vsel %vm2314_vm14, %v2325_v47, %v2327_v59  ;;  %v9698_v17 = vmul.u32.u64.low %v9626_v6, %v2324_v3  ;;  %v9699_v63 = vmul.u32.u64.high %v9626_v6, %v2324_v3, %v9698_v17 }
 0x227   : > { %vm7096_vm15 = vcmp.lt.s32.totalorder %v7095_v19, 0  ;;  %v9703_v52 = vmul.u32.u64.low %v9626_v6, %v2328_v0  ;;  %v9704_v21 = vmul.u32.u64.high %v9626_v6, %v2328_v0, %v9703_v52  ;;  %v7101_v25 = vadd.s32 4294967169, %v2389_v23 }
 0x228   : > { %v2248_v51 = vsel %vm7096_vm15, 0, %v7095_v19  ;;  %v2266_v40 = vsel %vm9657_vm11, 0, %v2264_v14  ;;  %v2336_v20 = vmul.u32 %v9626_v6, %v2320_v10  ;;  %v2385_v44 = vand.u32 2147483647, %v9641_v37  ;;  %v9727_v14 = vld [vmem:[%s8067_s30 + $0xb0] sm:$0xff] }
 0x229   : > { %v2249_v31 = vsub.s32 32, %v2248_v51  ;;  %v2250_v35 = vshll.u32 %v9643_v18, %v2248_v51  ;;  %v2253_v60 = vsub.s32 4294967266, %v2248_v51  ;;  %v2395_v46 = vadd.s32 1, %v7101_v25 }
 0x22a   : > { %vm2165_vm1 = vweird.f32 %v9412_v11  ;;  %v2339_v9 = vadd.s32 1, %v9699_v63  ;;  %vm2172_vm2 = vcmp.eq.s32.totalorder %v9675_v12, 2  ;;  %vm2338_vm4 = vc.u32 %v9704_v21, %v9698_v17 }
 0x22b   : > { %v2251_v27 = vshrl.u32 %v2233_v41, %v2249_v31  ;;  %v2254_v53 = vadd.s32 127, %v2253_v60  ;;  %v2270_v42 = vadd.s32 3, %v2266_v40  ;;  %v2392_v4 = vand.u32 8388607, %v2385_v44 }
 0x22c   : > { %v2340_v6 = vsel %vm2338_vm4, %v2339_v9, %v9699_v63  ;;  %vm2396_vm3 = vcmp.gt.s32.totalorder %v2395_v46, 0  ;;  %vm2168_vm5 = vcmp.lt.s32.totalorder %v9675_v12, 2  ;;  %vm2169_vm6 = vcmp.eq.s32.totalorder %v9675_v12, 0 }
 0x22d   : > { %v7665_v18 = vpop.eup %7664  ;;  %v2252_v33 = vor.u32 %v2251_v27, %v2250_v35  ;;  %v2255_v2 = vshll.u32 %v2254_v53, 23  ;;  %v2341_v56 = vadd.s32 %v2340_v6, %v2336_v20  ;;  %v2397_v8 = vsel %vm2396_vm3, %v2395_v46, 0 }
 0x22e   : > { %v7667_v48 = vpop.eup %7666  ;;  %v2173_v22 = vxor.u32 2147483648, %v7665_v18  ;;  %v2399_v54 = vand.u32 31, %v2397_v8  ;;  %v9723_v5 = vand.u32 3, %v2270_v42  ;;  %v2393_v58 = vor.u32 8388608, %v2392_v4 }
 0x22f   : > { %v2170_v49 = vxor.u32 2147483648, %v7667_v48  ;;  %v2256_v36 = vor.u32 4788187, %v2255_v2  ;;  %v2259_v57 = vcvt.s32.f32 %v2252_v33  ;;  %v2342_v1 = vadd.s32 536870912, %v2341_v56 }
 0x230   : > { %v2174_v16 = vsel %vm2172_vm2, %v2173_v22, %v7667_v48  ;;  %v2400_v43 = vsub.s32 32, %v2399_v54  ;;  %v2402_v13 = vshll.u32 %v7945_v24, %v2399_v54  ;;  %v2405_v62 = vshll.u32 %v7946_v26, %v2399_v54 }
 0x231   : > { %v2171_v7 = vsel %vm2169_vm6, %v7665_v18, %v2170_v49  ;;  %v2257_v55 = vand.u32 2147483647, %v2256_v36  ;;  %v2343_v38 = vshrl.u32 %v2342_v1, 30  ;;  %v2408_v61 = vshll.u32 %v7947_v28, %v2399_v54 }
 0x232   : > { %v2175_v47 = vsel %vm2168_vm5, %v2171_v7, %v2174_v16  ;;  %v2403_v45 = vshrl.u32 %v7946_v26, %v2400_v43  ;;  %v2406_v3 = vshrl.u32 %v7947_v28, %v2400_v43  ;;  %v2398_v59 = vshrl.u32 %v2397_v8, 5 }
 0x233   : > { %v2176_v23 = vsel %vm2165_vm1, nan, %v2175_v47  ;;  %v2260_v19 = vmul.f32 %v2259_v57, %v2257_v55  ;;  %v2344_v10 = vshll.u32 %v2343_v38, 30  ;;  %v2409_v41 = vshrl.u32 %v7948_v30, %v2400_v43 }
 0x234   : > { %v2411_v0 = vshll.u32 %v7948_v30, %v2399_v54  ;;  %v2489_v12 = vand.u32 2147483647, %v9727_v14  ;;  %6875 = vst [vmem:[%s8364_s17 + $0x90] sm:$0xff] %v2176_v23  ;;  %v2412_v25 = vshrl.u32 %v7949_v32, %v2400_v43  ;;  %v2492_v11 = vand.u32 2139095040, %v9727_v14 }
 0x235   : > { %v2261_v63 = vxor.u32 2147483648, %v2260_v19  ;;  %v9741_v52 = vsub.s32 %v2341_v56, %v2344_v10  ;;  %vm2283_vm8 = vcmp.lt.s32.totalorder %v9549_v15, 0  ;;  %v2401_v51 = vshrl.u32 %v7945_v24, %v2400_v43 }
 0x236   : > { %v2404_v40 = vor.u32 %v2403_v45, %v2402_v13  ;;  %v2414_v20 = vshll.u32 %v7949_v32, %v2399_v54  ;;  %v2415_v31 = vshrl.u32 %v7950_v39, %v2400_v43  ;;  %v2407_v46 = vor.u32 %v2406_v3, %v2405_v62 }
 0x237   : > { %v2262_v35 = vsel %vm2179_vm12, %v2261_v63, %v2260_v19  ;;  %v2347_v60 = vsub.s32 0, %v9741_v52  ;;  %v2410_v9 = vor.u32 %v2409_v41, %v2408_v61  ;;  %v2413_v53 = vor.u32 %v2412_v25, %v2411_v0 }
 0x238   : > { %v2265_v27 = vsel %vm9657_vm11, %v9480_v50, %v2262_v35  ;;  %v2416_v42 = vor.u32 %v2415_v31, %v2414_v20  ;;  %vm2417_vm7 = vcmp.lt.s32.totalorder %v2398_v59, 1  ;;  %vm9757_vm9 = vcmp.le.f32.partialorder %v2281_v29, 0.7853982 }
 0x239   : > { %7668 = vcosq.f32 %v2265_v27  ;;  %v7098_v4 = vmin.u32 %v2347_v60, %v9741_v52  ;;  %v2433_v18 = vshll.u32 %v2393_v58, 8  ;;  %v2493_v33 = vshrl.u32 %v2492_v11, 23 }
 0x23a   : > { %7670 = vsinq.f32 %v2265_v27  ;;  %v2367_v2 = vsub.s32 4, %v2343_v38  ;;  %vm2419_vm10 = vcmp.lt.s32.totalorder %v2398_v59, 3  ;;  %vm2420_vm12 = vcmp.lt.s32.totalorder %v2398_v59, 4 }
 0x23b   : > { %v2349_v34 = vclz %v7098_v4  ;;  %vm2418_vm11 = vcmp.lt.s32.totalorder %v2398_v59, 2  ;;  %v2421_v56 = vsel %vm2417_vm7, %v2401_v51, %v2404_v40  ;;  %v2425_v8 = vsel %vm2417_vm7, %v2404_v40, %v2407_v46 }
 0x23c   : > { %v2422_v48 = vsel %vm2420_vm12, %v2410_v9, 2102212464  ;;  %v2426_v22 = vsel %vm2420_vm12, %v2413_v53, 920167782  ;;  %v2429_v29 = vsel %vm2417_vm7, %v2407_v46, %v2410_v9  ;;  %v2430_v54 = vsel %vm2420_vm12, %v2416_v42, 1326507024 }
 0x23d   : > { %v7099_v49 = vadd.s32 4294967294, %v2349_v34  ;;  %v2423_v36 = vsel %vm2419_vm10, %v2407_v46, %v2422_v48  ;;  %v2427_v57 = vsel %vm2419_vm10, %v2410_v9, %v2426_v22  ;;  %v2431_v1 = vsel %vm2419_vm10, %v2413_v53, %v2430_v54 }
 0x23e   : > { %v2337_v16 = vadd.s32 %v9698_v17, %v9704_v21  ;;  %v2428_v58 = vsel %vm2418_vm11, %v2425_v8, %v2427_v57  ;;  %v2432_v43 = vsel %vm2418_vm11, %v2429_v29, %v2431_v1  ;;  %v7105_v7 = vadd.s32 4294967169, %v2493_v33  ;;  %v9795_v8 = vld [vmem:[%s8067_s30 + $0xb8] sm:$0xff] }
 0x23f   : > { %vm7100_vm13 = vcmp.lt.s32.totalorder %v7099_v49, 0  ;;  %v2368_v55 = vsel %vm2283_vm8, %v2367_v2, %v2343_v38  ;;  %v9771_v13 = vmul.u32.u64.low %v2433_v18, %v2432_v43  ;;  %v9772_v47 = vmul.u32.u64.high %v2433_v18, %v2432_v43, %v9771_v13 }
 0x240   : > { %v2352_v45 = vsel %vm7100_vm13, 0, %v7099_v49  ;;  %v2424_v62 = vsel %vm2418_vm11, %v2421_v56, %v2423_v36  ;;  %v9775_v61 = vmul.u32.u64.low %v2433_v18, %v2428_v58  ;;  %v9776_v23 = vmul.u32.u64.high %v2433_v18, %v2428_v58, %v9775_v61 }
 0x241   : > { %v2353_v17 = vsub.s32 32, %v2352_v45  ;;  %v2354_v21 = vshll.u32 %v9741_v52, %v2352_v45  ;;  %v2357_v19 = vsub.s32 4294967266, %v2352_v45  ;;  %v2499_v10 = vadd.s32 1, %v7105_v7 }
 0x242   : > { %vm2269_vm14 = vweird.f32 %v9480_v50  ;;  %v2370_v38 = vsel %vm9757_vm9, 0, %v2368_v55  ;;  %v2440_v0 = vmul.u32 %v2433_v18, %v2424_v62  ;;  %vm2442_vm0 = vc.u32 %v9772_v47, %v9775_v61 }
 0x243   : > { %v2355_v3 = vshrl.u32 %v2337_v16, %v2353_v17  ;;  %v2358_v41 = vadd.s32 127, %v2357_v19  ;;  %vm2272_vm15 = vcmp.lt.s32.totalorder %v9723_v5, 2  ;;  %v2443_v59 = vadd.s32 1, %v9776_v23 }
 0x244   : > { %v2496_v63 = vand.u32 8388607, %v2489_v12  ;;  %vm2500_vm1 = vcmp.gt.s32.totalorder %v2499_v10, 0  ;;  %vm2273_vm2 = vcmp.eq.s32.totalorder %v9723_v5, 0  ;;  %vm2276_vm4 = vcmp.eq.s32.totalorder %v9723_v5, 2 }
 0x245   : > { %v2356_v52 = vor.u32 %v2355_v3, %v2354_v21  ;;  %v2359_v25 = vshll.u32 %v2358_v41, 23  ;;  %v2501_v11 = vsel %vm2500_vm1, %v2499_v10, 0  ;;  %v2374_v40 = vadd.s32 3, %v2370_v38 }
 0x246   : > { %v7669_v51 = vpop.eup %7668  ;;  %v2444_v20 = vsel %vm2442_vm0, %v2443_v59, %v9776_v23  ;;  %v2503_v31 = vand.u32 31, %v2501_v11  ;;  %v2497_v42 = vor.u32 8388608, %v2496_v63  ;;  %v2502_v58 = vshrl.u32 %v2501_v11, 5 }
 0x247   : > { %v7671_v35 = vpop.eup %7670  ;;  %v2277_v60 = vxor.u32 2147483648, %v7669_v51  ;;  %v2360_v46 = vor.u32 4788187, %v2359_v25  ;;  %v2363_v9 = vcvt.s32.f32 %v2356_v52  ;;  %v2445_v27 = vadd.s32 %v2444_v20, %v2440_v0 }
 0x248   : > { %v2274_v53 = vxor.u32 2147483648, %v7671_v35  ;;  %v2504_v4 = vsub.s32 32, %v2503_v31  ;;  %v2506_v18 = vshll.u32 %v7945_v24, %v2503_v31  ;;  %v2509_v56 = vshll.u32 %v7946_v26, %v2503_v31 }
 0x249   : > { %v2278_v33 = vsel %vm2276_vm4, %v2277_v60, %v7671_v35  ;;  %v2361_v2 = vand.u32 2147483647, %v2360_v46  ;;  %v2446_v34 = vadd.s32 536870912, %v2445_v27  ;;  %v2512_v54 = vshll.u32 %v7947_v28, %v2503_v31 }
 0x24a   : > { %v2275_v48 = vsel %vm2273_vm2, %v7669_v51, %v2274_v53  ;;  %v2507_v22 = vshrl.u32 %v7946_v26, %v2504_v4  ;;  %v2510_v29 = vshrl.u32 %v7947_v28, %v2504_v4  ;;  %v2513_v1 = vshrl.u32 %v7948_v30, %v2504_v4 }
 0x24b   : > { %v2279_v49 = vsel %vm2272_vm15, %v2275_v48, %v2278_v33  ;;  %v2364_v36 = vmul.f32 %v2363_v9, %v2361_v2  ;;  %v2447_v57 = vshrl.u32 %v2446_v34, 30  ;;  %v2515_v43 = vshll.u32 %v7948_v30, %v2503_v31 }
 0x24c   : > { %v2280_v16 = vsel %vm2269_vm14, nan, %v2279_v49  ;;  %v9808_v7 = vshll.u32 %v2497_v42, 8  ;;  %v2505_v45 = vshrl.u32 %v7945_v24, %v2504_v4  ;;  %v2596_v62 = vand.u32 2139095040, %v9795_v8 }
 0x24d   : > { %v2365_v55 = vxor.u32 2147483648, %v2364_v36  ;;  %v2448_v13 = vshll.u32 %v2447_v57, 30  ;;  %6876 = vst [vmem:[%s8364_s17 + $0x98] sm:$0xff] %v2280_v16  ;;  %v2508_v5 = vor.u32 %v2507_v22, %v2506_v18  ;;  %v2516_v23 = vshrl.u32 %v7949_v32, %v2504_v4 }
 0x24e   : > { %v2518_v17 = vshll.u32 %v7949_v32, %v2503_v31  ;;  %v2519_v50 = vshrl.u32 %v7950_v39, %v2504_v4  ;;  %v2511_v10 = vor.u32 %v2510_v29, %v2509_v56  ;;  %v2514_v38 = vor.u32 %v2513_v1, %v2512_v54 }
 0x24f   : > { %v2366_v21 = vsel %vm2283_vm8, %v2365_v55, %v2364_v36  ;;  %v9818_v19 = vsub.s32 %v2445_v27, %v2448_v13  ;;  %v2517_v41 = vor.u32 %v2516_v23, %v2515_v43  ;;  %vm2521_vm3 = vcmp.lt.s32.totalorder %v2502_v58, 1 }
 0x250   : > { %v2369_v3 = vsel %vm9757_vm9, %v9549_v15, %v2366_v21  ;;  %v2520_v0 = vor.u32 %v2519_v50, %v2518_v17  ;;  %vm2523_vm5 = vcmp.lt.s32.totalorder %v2502_v58, 3  ;;  %v2597_v63 = vshrl.u32 %v2596_v62, 23  ;;  %v9864_v50 = vld [vmem:[%s8067_s30 + $0xc0] sm:$0xff] }
 0x251   : > { %7672 = vcosq.f32 %v2369_v3  ;;  %v2451_v59 = vsub.s32 0, %v9818_v19  ;;  %vm2522_vm6 = vcmp.lt.s32.totalorder %v2502_v58, 2  ;;  %vm2524_vm7 = vcmp.lt.s32.totalorder %v2502_v58, 4 }
 0x252   : > { %7674 = vsinq.f32 %v2369_v3  ;;  %v2525_v52 = vsel %vm2521_vm3, %v2505_v45, %v2508_v5  ;;  %v2526_v11 = vsel %vm2524_vm7, %v2514_v38, 2102212464  ;;  %v2529_v51 = vsel %vm2521_vm3, %v2508_v5, %v2511_v10 }
 0x253   : > { %v7102_v25 = vmin.u32 %v2451_v59, %v9818_v19  ;;  %v2530_v20 = vsel %vm2524_vm7, %v2517_v41, 920167782  ;;  %v2527_v6 = vsel %vm2523_vm5, %v2511_v10, %v2526_v11  ;;  %v2533_v35 = vsel %vm2521_vm3, %v2511_v10, %v2514_v38 }
 0x254   : > { %v2531_v31 = vsel %vm2523_vm5, %v2514_v38, %v2530_v20  ;;  %v2534_v60 = vsel %vm2524_vm7, %v2520_v0, 1326507024  ;;  %v2375_v46 = vand.u32 3, %v2374_v40  ;;  %v2471_v27 = vsub.s32 4, %v2447_v57 }
 0x255   : > { %v2453_v9 = vclz %v7102_v25  ;;  %v2528_v53 = vsel %vm2522_vm6, %v2525_v52, %v2527_v6  ;;  %v2532_v42 = vsel %vm2522_vm6, %v2529_v51, %v2531_v31  ;;  %v2535_v4 = vsel %vm2523_vm5, %v2517_v41, %v2534_v60 }
 0x256   : > { %v7109_v18 = vadd.s32 4294967169, %v2597_v63  ;;  %v2536_v2 = vsel %vm2522_vm6, %v2533_v35, %v2535_v4  ;;  %v9832_v34 = vmul.u32.u64.low %v9808_v7, %v2532_v42  ;;  %v9833_v56 = vmul.u32.u64.high %v9808_v7, %v2532_v42, %v9832_v34 }
 0x257   : > { %v7103_v33 = vadd.s32 4294967294, %v2453_v9  ;;  %vm2387_vm8 = vcmp.lt.s32.totalorder %v9641_v37, 0  ;;  %v9838_v40 = vmul.u32.u64.low %v9808_v7, %v2536_v2  ;;  %v9839_v48 = vmul.u32.u64.high %v9808_v7, %v2536_v2, %v9838_v40 }
 0x258   : > { %v2593_v22 = vand.u32 2147483647, %v9795_v8  ;;  %vm2373_vm9 = vweird.f32 %v9549_v15  ;;  %v2441_v29 = vadd.s32 %v9775_v61, %v9772_v47  ;;  %v2472_v54 = vsel %vm2387_vm8, %v2471_v27, %v2447_v57 }
 0x259   : > { %vm7104_vm10 = vcmp.lt.s32.totalorder %v7103_v33, 0  ;;  %v2603_v49 = vadd.s32 1, %v7109_v18  ;;  %vm2376_vm12 = vcmp.lt.s32.totalorder %v2375_v46, 2  ;;  %vm9849_vm11 = vcmp.le.f32.partialorder %v2385_v44, 0.7853982 }
 0x25a   : > { %v2456_v1 = vsel %vm7104_vm10, 0, %v7103_v33  ;;  %v2544_v16 = vmul.u32 %v9808_v7, %v2528_v53  ;;  %v2547_v47 = vadd.s32 1, %v9833_v56  ;;  %v2474_v61 = vsel %vm9849_vm11, 0, %v2472_v54 }
 0x25b   : > { %v2457_v58 = vsub.s32 32, %v2456_v1  ;;  %v2458_v43 = vshll.u32 %v9818_v19, %v2456_v1  ;;  %v2461_v55 = vsub.s32 4294967266, %v2456_v1  ;;  %vm2546_vm13 = vc.u32 %v9839_v48, %v9832_v34 }
 0x25c   : > { %v2600_v44 = vand.u32 8388607, %v2593_v22  ;;  %vm2604_vm14 = vcmp.gt.s32.totalorder %v2603_v49, 0  ;;  %v2548_v7 = vsel %vm2546_vm13, %v2547_v47, %v9833_v56  ;;  %vm2377_vm0 = vcmp.eq.s32.totalorder %v2375_v46, 0 }
 0x25d   : > { %v2459_v57 = vshrl.u32 %v2441_v29, %v2457_v58  ;;  %v2462_v13 = vadd.s32 127, %v2461_v55  ;;  %v2605_v45 = vsel %vm2604_vm14, %v2603_v49, 0  ;;  %vm2380_vm15 = vcmp.eq.s32.totalorder %v2375_v46, 2 }
 0x25e   : > { %v7673_v62 = vpop.eup %7672  ;;  %v2549_v5 = vadd.s32 %v2548_v7, %v2544_v16  ;;  %v2607_v23 = vand.u32 31, %v2605_v45  ;;  %v9866_v38 = vadd.s32 3, %v2474_v61  ;;  %v2601_v0 = vor.u32 8388608, %v2600_v44 }
 0x25f   : > { %v7675_v17 = vpop.eup %7674  ;;  %v2381_v21 = vxor.u32 2147483648, %v7673_v62  ;;  %v2460_v19 = vor.u32 %v2459_v57, %v2458_v43  ;;  %v2463_v10 = vshll.u32 %v2462_v13, 23  ;;  %v2697_v11 = vand.u32 2147483647, %v9864_v50 }
 0x260   : > { %v2378_v3 = vxor.u32 2147483648, %v7675_v17  ;;  %v2550_v41 = vadd.s32 536870912, %v2549_v5  ;;  %v2608_v59 = vsub.s32 32, %v2607_v23  ;;  %v2606_v6 = vshrl.u32 %v2605_v45, 5 }
 0x261   : > { %v2382_v63 = vsel %vm2380_vm15, %v2381_v21, %v7675_v17  ;;  %v2464_v52 = vor.u32 4788187, %v2463_v10  ;;  %v2467_v25 = vcvt.s32.f32 %v2460_v19  ;;  %v2700_v31 = vand.u32 2139095040, %v9864_v50 }
 0x262   : > { %v2379_v51 = vsel %vm2377_vm0, %v7673_v62, %v2378_v3  ;;  %v2551_v20 = vshrl.u32 %v2550_v41, 30  ;;  %v2610_v9 = vshll.u32 %v7945_v24, %v2607_v23  ;;  %v2613_v27 = vshll.u32 %v7946_v26, %v2607_v23 }
 0x263   : > { %v2383_v35 = vsel %vm2376_vm12, %v2379_v51, %v2382_v63  ;;  %v2465_v60 = vand.u32 2147483647, %v2464_v52  ;;  %v2611_v4 = vshrl.u32 %v7946_v26, %v2608_v59  ;;  %v2614_v18 = vshrl.u32 %v7947_v28, %v2608_v59 }
 0x264   : > { %v2384_v53 = vsel %vm2373_vm9, nan, %v2383_v35  ;;  %v2552_v42 = vshll.u32 %v2551_v20, 30  ;;  %v2616_v2 = vshll.u32 %v7947_v28, %v2607_v23  ;;  %v2617_v56 = vshrl.u32 %v7948_v30, %v2608_v59 }
 0x265   : > { %v2468_v33 = vmul.f32 %v2467_v25, %v2465_v60  ;;  %v2619_v46 = vshll.u32 %v7948_v30, %v2607_v23  ;;  %6877 = vst [vmem:[%s8364_s17 + $0xa0] sm:$0xff] %v2384_v53  ;;  %v2620_v29 = vshrl.u32 %v7949_v32, %v2608_v59  ;;  %v2622_v15 = vshll.u32 %v7949_v32, %v2607_v23 }
 0x266   : > { %v9882_v40 = vsub.s32 %v2549_v5, %v2552_v42  ;;  %v9886_v54 = vshll.u32 %v2601_v0, 8  ;;  %v2545_v1 = vadd.s32 %v9832_v34, %v9839_v48  ;;  %v2623_v16 = vshrl.u32 %v7950_v39, %v2608_v59 }
 0x267   : > { %v2469_v49 = vxor.u32 2147483648, %v2468_v33  ;;  %v2701_v58 = vshrl.u32 %v2700_v31, 23  ;;  %vm2491_vm1 = vcmp.lt.s32.totalorder %v9727_v14, 0  ;;  %v2609_v55 = vshrl.u32 %v7945_v24, %v2608_v59 }
 0x268   : > { %v2555_v43 = vsub.s32 0, %v9882_v40  ;;  %v2612_v47 = vor.u32 %v2611_v4, %v2610_v9  ;;  %v2615_v61 = vor.u32 %v2614_v18, %v2613_v27  ;;  %v2618_v57 = vor.u32 %v2617_v56, %v2616_v2 }
 0x269   : > { %v2470_v44 = vsel %vm2387_vm8, %v2469_v49, %v2468_v33  ;;  %v2621_v13 = vor.u32 %v2620_v29, %v2619_v46  ;;  %vm2625_vm2 = vcmp.lt.s32.totalorder %v2606_v6, 1  ;;  %v2624_v7 = vor.u32 %v2623_v16, %v2622_v15 }
 0x26a   : > { %v2473_v34 = vsel %vm9849_vm11, %v9641_v37, %v2470_v44  ;;  %v7106_v48 = vmin.u32 %v2555_v43, %v9882_v40  ;;  %vm2628_vm4 = vcmp.lt.s32.totalorder %v2606_v6, 4  ;;  %vm2626_vm3 = vcmp.lt.s32.totalorder %v2606_v6, 2 }
 0x26b   : > { %7676 = vcosq.f32 %v2473_v34  ;;  %vm2627_vm5 = vcmp.lt.s32.totalorder %v2606_v6, 3  ;;  %v2630_v45 = vsel %vm2628_vm4, %v2618_v57, 2102212464  ;;  %v2629_v5 = vsel %vm2625_vm2, %v2609_v55, %v2612_v47 }
 0x26c   : > { %7678 = vsinq.f32 %v2473_v34  ;;  %v2557_v62 = vclz %v7106_v48  ;;  %v2633_v23 = vsel %vm2625_vm2, %v2612_v47, %v2615_v61  ;;  %v2575_v17 = vsub.s32 4, %v2551_v20 }
 0x26d   : > { %v2631_v21 = vsel %vm2627_vm5, %v2615_v61, %v2630_v45  ;;  %v2634_v19 = vsel %vm2628_vm4, %v2621_v13, 920167782  ;;  %v2637_v36 = vsel %vm2625_vm2, %v2615_v61, %v2618_v57  ;;  %v2638_v41 = vsel %vm2628_vm4, %v2624_v7, 1326507024 }
 0x26e   : > { %v7107_v10 = vadd.s32 4294967294, %v2557_v62  ;;  %v2635_v3 = vsel %vm2627_vm5, %v2618_v57, %v2634_v19  ;;  %v2704_v0 = vand.u32 8388607, %v2697_v11  ;;  %v2632_v59 = vsel %vm2626_vm3, %v2629_v5, %v2631_v21 }
 0x26f   : > { %v2636_v63 = vsel %vm2626_vm3, %v2633_v23, %v2635_v3  ;;  %v2639_v52 = vsel %vm2627_vm5, %v2621_v13, %v2638_v41  ;;  %v7113_v25 = vadd.s32 4294967169, %v2701_v58  ;;  %v2576_v9 = vsel %vm2491_vm1, %v2575_v17, %v2551_v20 }
 0x270   : > { %vm7108_vm6 = vcmp.lt.s32.totalorder %v7107_v10, 0  ;;  %v2640_v51 = vsel %vm2626_vm3, %v2637_v36, %v2639_v52  ;;  %v9912_v31 = vmul.u32.u64.low %v9886_v54, %v2636_v63  ;;  %v9913_v35 = vmul.u32.u64.high %v9886_v54, %v2636_v63, %v9912_v31 }
 0x271   : > { %v2560_v60 = vsel %vm7108_vm6, 0, %v7107_v10  ;;  %v9919_v27 = vmul.u32.u64.low %v9886_v54, %v2640_v51  ;;  %v9920_v53 = vmul.u32.u64.high %v9886_v54, %v2640_v51, %v9919_v27  ;;  %v2707_v33 = vadd.s32 1, %v7113_v25 }
 0x272   : > { %v2561_v42 = vsub.s32 32, %v2560_v60  ;;  %v2562_v4 = vshll.u32 %v9882_v40, %v2560_v60  ;;  %v2565_v18 = vsub.s32 4294967266, %v2560_v60  ;;  %v2479_v6 = vand.u32 3, %v9866_v38 }
 0x273   : > { %vm9926_vm7 = vcmp.le.f32.partialorder %v2489_v12, 0.7853982  ;;  %v2648_v56 = vmul.u32 %v9886_v54, %v2632_v59  ;;  %v2651_v29 = vadd.s32 1, %v9913_v35  ;;  %vm2708_vm8 = vcmp.gt.s32.totalorder %v2707_v33, 0 }
 0x274   : > { %v2563_v20 = vshrl.u32 %v2545_v1, %v2561_v42  ;;  %v2566_v46 = vadd.s32 127, %v2565_v18  ;;  %v2578_v40 = vsel %vm9926_vm7, 0, %v2576_v9  ;;  %vm2650_vm9 = vc.u32 %v9920_v53, %v9912_v31 }
 0x275   : > { %v2705_v38 = vor.u32 8388608, %v2704_v0  ;;  %v2709_v15 = vsel %vm2708_vm8, %v2707_v33, 0  ;;  %v2652_v16 = vsel %vm2650_vm9, %v2651_v29, %v9913_v35  ;;  %vm2477_vm10 = vweird.f32 %v9641_v37  ;;  %v9956_v35 = vld [vmem:[%s8067_s30 + $0xc8] sm:$0xff] }
 0x276   : > { %v2564_v49 = vor.u32 %v2563_v20, %v2562_v4  ;;  %v2567_v12 = vshll.u32 %v2566_v46, 23  ;;  %v9937_v58 = vshrl.u32 %v2709_v15, 5  ;;  %vm2480_vm12 = vcmp.lt.s32.totalorder %v2479_v6, 2 }
 0x277   : > { %v2653_v54 = vadd.s32 %v2652_v16, %v2648_v56  ;;  %v2711_v1 = vand.u32 31, %v2709_v15  ;;  %vm2481_vm11 = vcmp.eq.s32.totalorder %v2479_v6, 0  ;;  %vm2484_vm13 = vcmp.eq.s32.totalorder %v2479_v6, 2 }
 0x278   : > { %v7677_v43 = vpop.eup %7676  ;;  %v2568_v55 = vor.u32 4788187, %v2567_v12  ;;  %v2571_v47 = vcvt.s32.f32 %v2564_v49  ;;  %v2582_v57 = vadd.s32 3, %v2578_v40  ;;  %vm2729_vm14 = vcmp.lt.s32.totalorder %v9937_v58, 1 }
 0x279   : > { %v7679_v61 = vpop.eup %7678  ;;  %v2485_v44 = vxor.u32 2147483648, %v7677_v43  ;;  %v2654_v13 = vadd.s32 536870912, %v2653_v54  ;;  %v2712_v34 = vsub.s32 32, %v2711_v1  ;;  %v9941_v45 = vshll.u32 %v2705_v38, 8 }
 0x27a   : > { %v2482_v48 = vxor.u32 2147483648, %v7679_v61  ;;  %v2569_v7 = vand.u32 2147483647, %v2568_v55  ;;  %v2714_v23 = vshll.u32 %v7945_v24, %v2711_v1  ;;  %vm2595_vm0 = vcmp.lt.s32.totalorder %v9795_v8, 0 }
 0x27b   : > { %v2486_v62 = vsel %vm2484_vm13, %v2485_v44, %v7679_v61  ;;  %v2655_v5 = vshrl.u32 %v2654_v13, 30  ;;  %v2715_v17 = vshrl.u32 %v7946_v26, %v2712_v34  ;;  %v2717_v36 = vshll.u32 %v7946_v26, %v2711_v1 }
 0x27c   : > { %v2483_v21 = vsel %vm2481_vm11, %v7677_v43, %v2482_v48  ;;  %v2572_v19 = vmul.f32 %v2571_v47, %v2569_v7  ;;  %v2718_v10 = vshrl.u32 %v7947_v28, %v2712_v34  ;;  %v2720_v0 = vshll.u32 %v7947_v28, %v2711_v1 }
 0x27d   : > { %v2487_v3 = vsel %vm2480_vm12, %v2483_v21, %v2486_v62  ;;  %v2656_v41 = vshll.u32 %v2655_v5, 30  ;;  %v2721_v59 = vshrl.u32 %v7948_v30, %v2712_v34  ;;  %v2679_v25 = vsub.s32 4, %v2655_v5 }
 0x27e   : > { %v2488_v63 = vsel %vm2477_vm10, nan, %v2487_v3  ;;  %v2573_v52 = vxor.u32 2147483648, %v2572_v19  ;;  %v2713_v51 = vshrl.u32 %v7945_v24, %v2712_v34  ;;  %v2716_v9 = vor.u32 %v2715_v17, %v2714_v23 }
 0x27f   : > { %v9958_v60 = vsub.s32 %v2653_v54, %v2656_v41  ;;  %v2723_v27 = vshll.u32 %v7948_v30, %v2711_v1  ;;  %v2724_v42 = vshrl.u32 %v7949_v32, %v2712_v34  ;;  %6878 = vst [vmem:[%s8364_s17 + $0xa8] sm:$0xff] %v2488_v63  ;;  %v2719_v18 = vor.u32 %v2718_v10, %v2717_v36 }
 0x280   : > { %v2574_v4 = vsel %vm2491_vm1, %v2573_v52, %v2572_v19  ;;  %v2726_v37 = vshll.u32 %v7949_v32, %v2711_v1  ;;  %v2727_v33 = vshrl.u32 %v7950_v39, %v2712_v34  ;;  %vm9972_vm15 = vcmp.le.f32.partialorder %v2593_v22, 0.7853982 }
 0x281   : > { %v2577_v6 = vsel %vm9926_vm7, %v9727_v14, %v2574_v4  ;;  %v2659_v20 = vsub.s32 0, %v9958_v60  ;;  %v2722_v46 = vor.u32 %v2721_v59, %v2720_v0  ;;  %v2725_v29 = vor.u32 %v2724_v42, %v2723_v27 }
 0x282   : > { %7680 = vcosq.f32 %v2577_v6  ;;  %v2728_v40 = vor.u32 %v2727_v33, %v2726_v37  ;;  %vm2732_vm1 = vcmp.lt.s32.totalorder %v9937_v58, 4  ;;  %v2804_v38 = vand.u32 2139095040, %v9956_v35 }
 0x283   : > { %7682 = vsinq.f32 %v2577_v6  ;;  %v7110_v2 = vmin.u32 %v2659_v20, %v9958_v60  ;;  %vm2730_vm2 = vcmp.lt.s32.totalorder %v9937_v58, 2  ;;  %vm2731_vm4 = vcmp.lt.s32.totalorder %v9937_v58, 3 }
 0x284   : > { %v2733_v22 = vsel %vm2729_vm14, %v2713_v51, %v2716_v9  ;;  %v2734_v15 = vsel %vm2732_vm1, %v2722_v46, 2102212464  ;;  %v2737_v49 = vsel %vm2729_vm14, %v2716_v9, %v2719_v18  ;;  %v2738_v12 = vsel %vm2732_vm1, %v2725_v29, 920167782 }
 0x285   : > { %v9990_v16 = vand.u32 3, %v2582_v57  ;;  %v2661_v54 = vclz %v7110_v2  ;;  %v2680_v1 = vsel %vm2595_vm0, %v2679_v25, %v2655_v5  ;;  %v2741_v43 = vsel %vm2729_vm14, %v2719_v18, %v2722_v46 }
 0x286   : > { %v2735_v55 = vsel %vm2731_vm4, %v2719_v18, %v2734_v15  ;;  %v2739_v47 = vsel %vm2731_vm4, %v2722_v46, %v2738_v12  ;;  %v2742_v61 = vsel %vm2732_vm1, %v2728_v40, 1326507024  ;;  %v2805_v44 = vshrl.u32 %v2804_v38, 23 }
 0x287   : > { %v7111_v13 = vadd.s32 4294967294, %v2661_v54  ;;  %v2736_v57 = vsel %vm2730_vm2, %v2733_v22, %v2735_v55  ;;  %v2740_v34 = vsel %vm2730_vm2, %v2737_v49, %v2739_v47  ;;  %v2743_v48 = vsel %vm2731_vm4, %v2725_v29, %v2742_v61 }
 0x288   : > { %v2649_v7 = vadd.s32 %v9912_v31, %v9920_v53  ;;  %v2744_v62 = vsel %vm2730_vm2, %v2741_v43, %v2743_v48  ;;  %v10013_v5 = vmul.u32.u64.low %v9941_v45, %v2740_v34  ;;  %v10014_v23 = vmul.u32.u64.high %v9941_v45, %v2740_v34, %v10013_v5 }
 0x289   : > { %vm7112_vm3 = vcmp.lt.s32.totalorder %v7111_v13, 0  ;;  %v10018_v17 = vmul.u32.u64.low %v9941_v45, %v2744_v62  ;;  %v10019_v21 = vmul.u32.u64.high %v9941_v45, %v2744_v62, %v10018_v17  ;;  %v7117_v19 = vadd.s32 4294967169, %v2805_v44 }
 0x28a   : > { %v2664_v36 = vsel %vm7112_vm3, 0, %v7111_v13  ;;  %v2682_v10 = vsel %vm9972_vm15, 0, %v2680_v1  ;;  %v2752_v31 = vmul.u32 %v9941_v45, %v2736_v57  ;;  %v2801_v53 = vand.u32 2147483647, %v9956_v35  ;;  %v10042_v1 = vld [vmem:[%s8067_s30 + $0xd0] sm:$0xff] }
 0x28b   : > { %v2665_v58 = vsub.s32 32, %v2664_v36  ;;  %v2666_v3 = vshll.u32 %v9958_v60, %v2664_v36  ;;  %v2669_v41 = vsub.s32 4294967266, %v2664_v36  ;;  %v2811_v0 = vadd.s32 1, %v7117_v19 }
 0x28c   : > { %vm2581_vm5 = vweird.f32 %v9727_v14  ;;  %v2755_v59 = vadd.s32 1, %v10014_v23  ;;  %vm2588_vm6 = vcmp.eq.s32.totalorder %v9990_v16, 2  ;;  %vm2754_vm7 = vc.u32 %v10019_v21, %v10013_v5 }
 0x28d   : > { %v2667_v63 = vshrl.u32 %v2649_v7, %v2665_v58  ;;  %v2670_v52 = vadd.s32 127, %v2669_v41  ;;  %v2686_v25 = vadd.s32 3, %v2682_v10  ;;  %v2808_v51 = vand.u32 8388607, %v2801_v53 }
 0x28e   : > { %v2756_v45 = vsel %vm2754_vm7, %v2755_v59, %v10014_v23  ;;  %vm2812_vm8 = vcmp.gt.s32.totalorder %v2811_v0, 0  ;;  %vm2584_vm9 = vcmp.lt.s32.totalorder %v9990_v16, 2  ;;  %vm2585_vm10 = vcmp.eq.s32.totalorder %v9990_v16, 0 }
 0x28f   : > { %v7681_v60 = vpop.eup %7680  ;;  %v2668_v9 = vor.u32 %v2667_v63, %v2666_v3  ;;  %v2671_v27 = vshll.u32 %v2670_v52, 23  ;;  %v2757_v42 = vadd.s32 %v2756_v45, %v2752_v31  ;;  %v2813_v4 = vsel %vm2812_vm8, %v2811_v0, 0 }
 0x290   : > { %v7683_v18 = vpop.eup %7682  ;;  %v2589_v37 = vxor.u32 2147483648, %v7681_v60  ;;  %v2815_v33 = vand.u32 31, %v2813_v4  ;;  %v10038_v38 = vand.u32 3, %v2686_v25  ;;  %v2809_v2 = vor.u32 8388608, %v2808_v51 }
 0x291   : > { %v2586_v6 = vxor.u32 2147483648, %v7683_v18  ;;  %v2672_v20 = vor.u32 4788187, %v2671_v27  ;;  %v2675_v46 = vcvt.s32.f32 %v2668_v9  ;;  %v2758_v29 = vadd.s32 536870912, %v2757_v42 }
 0x292   : > { %v2590_v40 = vsel %vm2588_vm6, %v2589_v37, %v7683_v18  ;;  %v2816_v22 = vsub.s32 32, %v2815_v33  ;;  %v2818_v54 = vshll.u32 %v7945_v24, %v2815_v33  ;;  %v2821_v47 = vshll.u32 %v7946_v26, %v2815_v33 }
 0x293   : > { %v2587_v15 = vsel %vm2585_vm10, %v7681_v60, %v2586_v6  ;;  %v2673_v49 = vand.u32 2147483647, %v2672_v20  ;;  %v2759_v12 = vshrl.u32 %v2758_v29, 30  ;;  %v2824_v61 = vshll.u32 %v7947_v28, %v2815_v33 }
 0x294   : > { %v2591_v43 = vsel %vm2584_vm9, %v2587_v15, %v2590_v40  ;;  %v2819_v55 = vshrl.u32 %v7946_v26, %v2816_v22  ;;  %v2822_v34 = vshrl.u32 %v7947_v28, %v2816_v22  ;;  %v2814_v48 = vshrl.u32 %v2813_v4, 5 }
 0x295   : > { %v2592_v44 = vsel %vm2581_vm5, nan, %v2591_v43  ;;  %v2676_v13 = vmul.f32 %v2675_v46, %v2673_v49  ;;  %v2760_v57 = vshll.u32 %v2759_v12, 30  ;;  %v2825_v7 = vshrl.u32 %v7948_v30, %v2816_v22 }
 0x296   : > { %v2827_v62 = vshll.u32 %v7948_v30, %v2815_v33  ;;  %v2905_v16 = vand.u32 2147483647, %v10042_v1  ;;  %6879 = vst [vmem:[%s8364_s17 + $0xb0] sm:$0xff] %v2592_v44  ;;  %v2828_v19 = vshrl.u32 %v7949_v32, %v2816_v22  ;;  %v2908_v14 = vand.u32 2139095040, %v10042_v1 }
 0x297   : > { %v2677_v23 = vxor.u32 2147483648, %v2676_v13  ;;  %v10056_v17 = vsub.s32 %v2757_v42, %v2760_v57  ;;  %vm2699_vm12 = vcmp.lt.s32.totalorder %v9864_v50, 0  ;;  %v2817_v36 = vshrl.u32 %v7945_v24, %v2816_v22 }
 0x298   : > { %v2820_v10 = vor.u32 %v2819_v55, %v2818_v54  ;;  %v2830_v31 = vshll.u32 %v7949_v32, %v2815_v33  ;;  %v2831_v58 = vshrl.u32 %v7950_v39, %v2816_v22  ;;  %v2823_v0 = vor.u32 %v2822_v34, %v2821_v47 }
 0x299   : > { %v2678_v3 = vsel %vm2595_vm0, %v2677_v23, %v2676_v13  ;;  %v2763_v41 = vsub.s32 0, %v10056_v17  ;;  %v2826_v59 = vor.u32 %v2825_v7, %v2824_v61  ;;  %v2829_v52 = vor.u32 %v2828_v19, %v2827_v62 }
 0x29a   : > { %v2681_v63 = vsel %vm9972_vm15, %v9795_v8, %v2678_v3  ;;  %v2832_v25 = vor.u32 %v2831_v58, %v2830_v31  ;;  %vm2833_vm11 = vcmp.lt.s32.totalorder %v2814_v48, 1  ;;  %vm10072_vm13 = vcmp.le.f32.partialorder %v2697_v11, 0.7853982 }
 0x29b   : > { %7684 = vcosq.f32 %v2681_v63  ;;  %v7114_v51 = vmin.u32 %v2763_v41, %v10056_v17  ;;  %v2849_v60 = vshll.u32 %v2809_v2, 8  ;;  %v2909_v9 = vshrl.u32 %v2908_v14, 23 }
 0x29c   : > { %7686 = vsinq.f32 %v2681_v63  ;;  %v2783_v27 = vsub.s32 4, %v2759_v12  ;;  %vm2835_vm14 = vcmp.lt.s32.totalorder %v2814_v48, 3  ;;  %vm2836_vm0 = vcmp.lt.s32.totalorder %v2814_v48, 4 }
 0x29d   : > { %v2765_v56 = vclz %v7114_v51  ;;  %vm2834_vm15 = vcmp.lt.s32.totalorder %v2814_v48, 2  ;;  %v2837_v42 = vsel %vm2833_vm11, %v2817_v36, %v2820_v10  ;;  %v2841_v4 = vsel %vm2833_vm11, %v2820_v10, %v2823_v0 }
 0x29e   : > { %v2838_v18 = vsel %vm2836_vm0, %v2826_v59, 2102212464  ;;  %v2842_v37 = vsel %vm2836_vm0, %v2829_v52, 920167782  ;;  %v2845_v11 = vsel %vm2833_vm11, %v2823_v0, %v2826_v59  ;;  %v2846_v33 = vsel %vm2836_vm0, %v2832_v25, 1326507024 }
 0x29f   : > { %v7115_v6 = vadd.s32 4294967294, %v2765_v56  ;;  %v2839_v20 = vsel %vm2835_vm14, %v2823_v0, %v2838_v18  ;;  %v2843_v46 = vsel %vm2835_vm14, %v2826_v59, %v2842_v37  ;;  %v2847_v29 = vsel %vm2835_vm14, %v2829_v52, %v2846_v33 }
 0x2a0   : > { %v2753_v40 = vadd.s32 %v10013_v5, %v10019_v21  ;;  %v2844_v2 = vsel %vm2834_vm15, %v2841_v4, %v2843_v46  ;;  %v2848_v22 = vsel %vm2834_vm15, %v2845_v11, %v2847_v29  ;;  %v7121_v15 = vadd.s32 4294967169, %v2909_v9  ;;  %v10110_v4 = vld [vmem:[%s8067_s30 + $0xd8] sm:$0xff] }
 0x2a1   : > { %vm7116_vm1 = vcmp.lt.s32.totalorder %v7115_v6, 0  ;;  %v2784_v49 = vsel %vm2699_vm12, %v2783_v27, %v2759_v12  ;;  %v10086_v54 = vmul.u32.u64.low %v2849_v60, %v2848_v22  ;;  %v10087_v43 = vmul.u32.u64.high %v2849_v60, %v2848_v22, %v10086_v54 }
 0x2a2   : > { %v2768_v55 = vsel %vm7116_vm1, 0, %v7115_v6  ;;  %v2840_v47 = vsel %vm2834_vm15, %v2837_v42, %v2839_v20  ;;  %v10090_v61 = vmul.u32.u64.low %v2849_v60, %v2844_v2  ;;  %v10091_v44 = vmul.u32.u64.high %v2849_v60, %v2844_v2, %v10090_v61 }
 0x2a3   : > { %v2769_v5 = vsub.s32 32, %v2768_v55  ;;  %v2770_v21 = vshll.u32 %v10056_v17, %v2768_v55  ;;  %v2773_v13 = vsub.s32 4294967266, %v2768_v55  ;;  %v2915_v57 = vadd.s32 1, %v7121_v15 }
 0x2a4   : > { %vm2685_vm2 = vweird.f32 %v9795_v8  ;;  %v2786_v12 = vsel %vm10072_vm13, 0, %v2784_v49  ;;  %v2856_v62 = vmul.u32 %v2849_v60, %v2840_v47  ;;  %vm2858_vm4 = vc.u32 %v10087_v43, %v10090_v61 }
 0x2a5   : > { %v2771_v34 = vshrl.u32 %v2753_v40, %v2769_v5  ;;  %v2774_v7 = vadd.s32 127, %v2773_v13  ;;  %vm2688_vm3 = vcmp.lt.s32.totalorder %v10038_v38, 2  ;;  %v2859_v48 = vadd.s32 1, %v10091_v44 }
 0x2a6   : > { %v2912_v23 = vand.u32 8388607, %v2905_v16  ;;  %vm2916_vm5 = vcmp.gt.s32.totalorder %v2915_v57, 0  ;;  %vm2689_vm6 = vcmp.eq.s32.totalorder %v10038_v38, 0  ;;  %vm2692_vm7 = vcmp.eq.s32.totalorder %v10038_v38, 2 }
 0x2a7   : > { %v2772_v17 = vor.u32 %v2771_v34, %v2770_v21  ;;  %v2775_v19 = vshll.u32 %v2774_v7, 23  ;;  %v2917_v14 = vsel %vm2916_vm5, %v2915_v57, 0  ;;  %v2790_v10 = vadd.s32 3, %v2786_v12 }
 0x2a8   : > { %v7685_v36 = vpop.eup %7684  ;;  %v2860_v31 = vsel %vm2858_vm4, %v2859_v48, %v10091_v44  ;;  %v2919_v58 = vand.u32 31, %v2917_v14  ;;  %v2913_v25 = vor.u32 8388608, %v2912_v23  ;;  %v2918_v2 = vshrl.u32 %v2917_v14, 5 }
 0x2a9   : > { %v7687_v3 = vpop.eup %7686  ;;  %v2693_v41 = vxor.u32 2147483648, %v7685_v36  ;;  %v2776_v0 = vor.u32 4788187, %v2775_v19  ;;  %v2779_v59 = vcvt.s32.f32 %v2772_v17  ;;  %v2861_v63 = vadd.s32 %v2860_v31, %v2856_v62 }
 0x2aa   : > { %v2690_v52 = vxor.u32 2147483648, %v7687_v3  ;;  %v2920_v51 = vsub.s32 32, %v2919_v58  ;;  %v2922_v60 = vshll.u32 %v7945_v24, %v2919_v58  ;;  %v2925_v42 = vshll.u32 %v7946_v26, %v2919_v58 }
 0x2ab   : > { %v2694_v9 = vsel %vm2692_vm7, %v2693_v41, %v7687_v3  ;;  %v2777_v27 = vand.u32 2147483647, %v2776_v0  ;;  %v2862_v56 = vadd.s32 536870912, %v2861_v63  ;;  %v2928_v33 = vshll.u32 %v7947_v28, %v2919_v58 }
 0x2ac   : > { %v2691_v18 = vsel %vm2689_vm6, %v7685_v36, %v2690_v52  ;;  %v2923_v37 = vshrl.u32 %v7946_v26, %v2920_v51  ;;  %v2926_v11 = vshrl.u32 %v7947_v28, %v2920_v51  ;;  %v2929_v29 = vshrl.u32 %v7948_v30, %v2920_v51 }
 0x2ad   : > { %v2695_v6 = vsel %vm2688_vm3, %v2691_v18, %v2694_v9  ;;  %v2780_v20 = vmul.f32 %v2779_v59, %v2777_v27  ;;  %v2863_v46 = vshrl.u32 %v2862_v56, 30  ;;  %v2931_v22 = vshll.u32 %v7948_v30, %v2919_v58 }
 0x2ae   : > { %v2696_v40 = vsel %vm2685_vm2, nan, %v2695_v6  ;;  %v10123_v15 = vshll.u32 %v2913_v25, 8  ;;  %v2921_v55 = vshrl.u32 %v7945_v24, %v2920_v51  ;;  %v3012_v47 = vand.u32 2139095040, %v10110_v4 }
 0x2af   : > { %v2781_v49 = vxor.u32 2147483648, %v2780_v20  ;;  %v2864_v54 = vshll.u32 %v2863_v46, 30  ;;  %6880 = vst [vmem:[%s8364_s17 + $0xb8] sm:$0xff] %v2696_v40  ;;  %v2924_v38 = vor.u32 %v2923_v37, %v2922_v60  ;;  %v2932_v44 = vshrl.u32 %v7949_v32, %v2920_v51 }
 0x2b0   : > { %v2934_v5 = vshll.u32 %v7949_v32, %v2919_v58  ;;  %v2935_v8 = vshrl.u32 %v7950_v39, %v2920_v51  ;;  %v2927_v57 = vor.u32 %v2926_v11, %v2925_v42  ;;  %v2930_v12 = vor.u32 %v2929_v29, %v2928_v33 }
 0x2b1   : > { %v2782_v21 = vsel %vm2699_vm12, %v2781_v49, %v2780_v20  ;;  %v10133_v13 = vsub.s32 %v2861_v63, %v2864_v54  ;;  %v2933_v7 = vor.u32 %v2932_v44, %v2931_v22  ;;  %vm2937_vm8 = vcmp.lt.s32.totalorder %v2918_v2, 1 }
 0x2b2   : > { %v2785_v34 = vsel %vm10072_vm13, %v9864_v50, %v2782_v21  ;;  %v2936_v62 = vor.u32 %v2935_v8, %v2934_v5  ;;  %vm2939_vm9 = vcmp.lt.s32.totalorder %v2918_v2, 3  ;;  %v3013_v23 = vshrl.u32 %v3012_v47, 23  ;;  %v10179_v8 = vld [vmem:[%s8067_s30 + $0xe0] sm:$0xff] }
 0x2b3   : > { %7688 = vcosq.f32 %v2785_v34  ;;  %v2867_v48 = vsub.s32 0, %v10133_v13  ;;  %vm2938_vm10 = vcmp.lt.s32.totalorder %v2918_v2, 2  ;;  %vm2940_vm11 = vcmp.lt.s32.totalorder %v2918_v2, 4 }
 0x2b4   : > { %7690 = vsinq.f32 %v2785_v34  ;;  %v2941_v17 = vsel %vm2937_vm8, %v2921_v55, %v2924_v38  ;;  %v2942_v14 = vsel %vm2940_vm11, %v2930_v12, 2102212464  ;;  %v2945_v36 = vsel %vm2937_vm8, %v2924_v38, %v2927_v57 }
 0x2b5   : > { %v7118_v19 = vmin.u32 %v2867_v48, %v10133_v13  ;;  %v2946_v31 = vsel %vm2940_vm11, %v2933_v7, 920167782  ;;  %v2943_v45 = vsel %vm2939_vm9, %v2927_v57, %v2942_v14  ;;  %v2949_v3 = vsel %vm2937_vm8, %v2927_v57, %v2930_v12 }
 0x2b6   : > { %v2947_v58 = vsel %vm2939_vm9, %v2930_v12, %v2946_v31  ;;  %v2950_v41 = vsel %vm2940_vm11, %v2936_v62, 1326507024  ;;  %v2791_v0 = vand.u32 3, %v2790_v10  ;;  %v2887_v63 = vsub.s32 4, %v2863_v46 }
 0x2b7   : > { %v2869_v59 = vclz %v7118_v19  ;;  %v2944_v52 = vsel %vm2938_vm10, %v2941_v17, %v2943_v45  ;;  %v2948_v25 = vsel %vm2938_vm10, %v2945_v36, %v2947_v58  ;;  %v2951_v51 = vsel %vm2939_vm9, %v2933_v7, %v2950_v41 }
 0x2b8   : > { %v7125_v60 = vadd.s32 4294967169, %v3013_v23  ;;  %v2952_v27 = vsel %vm2938_vm10, %v2949_v3, %v2951_v51  ;;  %v10147_v56 = vmul.u32.u64.low %v10123_v15, %v2948_v25  ;;  %v10148_v42 = vmul.u32.u64.high %v10123_v15, %v2948_v25, %v10147_v56 }
 0x2b9   : > { %v7119_v9 = vadd.s32 4294967294, %v2869_v59  ;;  %vm2803_vm12 = vcmp.lt.s32.totalorder %v9956_v35, 0  ;;  %v10153_v10 = vmul.u32.u64.low %v10123_v15, %v2952_v27  ;;  %v10154_v18 = vmul.u32.u64.high %v10123_v15, %v2952_v27, %v10153_v10 }
 0x2ba   : > { %v3009_v37 = vand.u32 2147483647, %v10110_v4  ;;  %vm2789_vm13 = vweird.f32 %v9864_v50  ;;  %v2857_v11 = vadd.s32 %v10090_v61, %v10087_v43  ;;  %v2888_v33 = vsel %vm2803_vm12, %v2887_v63, %v2863_v46 }
 0x2bb   : > { %vm7120_vm14 = vcmp.lt.s32.totalorder %v7119_v9, 0  ;;  %v3019_v6 = vadd.s32 1, %v7125_v60  ;;  %vm2792_vm0 = vcmp.lt.s32.totalorder %v2791_v0, 2  ;;  %vm10164_vm15 = vcmp.le.f32.partialorder %v2801_v53, 0.7853982 }
 0x2bc   : > { %v2872_v29 = vsel %vm7120_vm14, 0, %v7119_v9  ;;  %v2960_v40 = vmul.u32 %v10123_v15, %v2944_v52  ;;  %v2963_v43 = vadd.s32 1, %v10148_v42  ;;  %v2890_v61 = vsel %vm10164_vm15, 0, %v2888_v33 }
 0x2bd   : > { %v2873_v2 = vsub.s32 32, %v2872_v29  ;;  %v2874_v22 = vshll.u32 %v10133_v13, %v2872_v29  ;;  %v2877_v49 = vsub.s32 4294967266, %v2872_v29  ;;  %vm2962_vm1 = vc.u32 %v10154_v18, %v10147_v56 }
 0x2be   : > { %v3016_v53 = vand.u32 8388607, %v3009_v37  ;;  %vm3020_vm2 = vcmp.gt.s32.totalorder %v3019_v6, 0  ;;  %v2964_v15 = vsel %vm2962_vm1, %v2963_v43, %v10148_v42  ;;  %vm2793_vm4 = vcmp.eq.s32.totalorder %v2791_v0, 0 }
 0x2bf   : > { %v2875_v46 = vshrl.u32 %v2857_v11, %v2873_v2  ;;  %v2878_v54 = vadd.s32 127, %v2877_v49  ;;  %v3021_v55 = vsel %vm3020_vm2, %v3019_v6, 0  ;;  %vm2796_vm3 = vcmp.eq.s32.totalorder %v2791_v0, 2 }
 0x2c0   : > { %v7689_v47 = vpop.eup %7688  ;;  %v2965_v38 = vadd.s32 %v2964_v15, %v2960_v40  ;;  %v3023_v44 = vand.u32 31, %v3021_v55  ;;  %v10181_v12 = vadd.s32 3, %v2890_v61  ;;  %v3017_v62 = vor.u32 8388608, %v3016_v53 }
 0x2c1   : > { %v7691_v5 = vpop.eup %7690  ;;  %v2797_v21 = vxor.u32 2147483648, %v7689_v47  ;;  %v2876_v13 = vor.u32 %v2875_v46, %v2874_v22  ;;  %v2879_v57 = vshll.u32 %v2878_v54, 23  ;;  %v3113_v14 = vand.u32 2147483647, %v10179_v8 }
 0x2c2   : > { %v2794_v34 = vxor.u32 2147483648, %v7691_v5  ;;  %v2966_v7 = vadd.s32 536870912, %v2965_v38  ;;  %v3024_v48 = vsub.s32 32, %v3023_v44  ;;  %v3022_v45 = vshrl.u32 %v3021_v55, 5 }
 0x2c3   : > { %v2798_v23 = vsel %vm2796_vm3, %v2797_v21, %v7691_v5  ;;  %v2880_v17 = vor.u32 4788187, %v2879_v57  ;;  %v2883_v19 = vcvt.s32.f32 %v2876_v13  ;;  %v3116_v58 = vand.u32 2139095040, %v10179_v8 }
 0x2c4   : > { %v2795_v36 = vsel %vm2793_vm4, %v7689_v47, %v2794_v34  ;;  %v2967_v31 = vshrl.u32 %v2966_v7, 30  ;;  %v3026_v59 = vshll.u32 %v7945_v24, %v3023_v44  ;;  %v3029_v63 = vshll.u32 %v7946_v26, %v3023_v44 }
 0x2c5   : > { %v2799_v3 = vsel %vm2792_vm0, %v2795_v36, %v2798_v23  ;;  %v2881_v41 = vand.u32 2147483647, %v2880_v17  ;;  %v3027_v51 = vshrl.u32 %v7946_v26, %v3024_v48  ;;  %v3030_v60 = vshrl.u32 %v7947_v28, %v3024_v48 }
 0x2c6   : > { %v2800_v52 = vsel %vm2789_vm13, nan, %v2799_v3  ;;  %v2968_v25 = vshll.u32 %v2967_v31, 30  ;;  %v3032_v27 = vshll.u32 %v7947_v28, %v3023_v44  ;;  %v3033_v42 = vshrl.u32 %v7948_v30, %v3024_v48 }
 0x2c7   : > { %v2884_v9 = vmul.f32 %v2883_v19, %v2881_v41  ;;  %v3035_v0 = vshll.u32 %v7948_v30, %v3023_v44  ;;  %6881 = vst [vmem:[%s8364_s17 + $0xc0] sm:$0xff] %v2800_v52  ;;  %v3036_v11 = vshrl.u32 %v7949_v32, %v3024_v48  ;;  %v3038_v50 = vshll.u32 %v7949_v32, %v3023_v44 }
 0x2c8   : > { %v10197_v10 = vsub.s32 %v2965_v38, %v2968_v25  ;;  %v10201_v33 = vshll.u32 %v3017_v62, 8  ;;  %v2961_v29 = vadd.s32 %v10147_v56, %v10154_v18  ;;  %v3039_v40 = vshrl.u32 %v7950_v39, %v3024_v48 }
 0x2c9   : > { %v2885_v6 = vxor.u32 2147483648, %v2884_v9  ;;  %v3117_v2 = vshrl.u32 %v3116_v58, 23  ;;  %vm2907_vm5 = vcmp.lt.s32.totalorder %v10042_v1, 0  ;;  %v3025_v49 = vshrl.u32 %v7945_v24, %v3024_v48 }
 0x2ca   : > { %v2971_v22 = vsub.s32 0, %v10197_v10  ;;  %v3028_v43 = vor.u32 %v3027_v51, %v3026_v59  ;;  %v3031_v61 = vor.u32 %v3030_v60, %v3029_v63  ;;  %v3034_v46 = vor.u32 %v3033_v42, %v3032_v27 }
 0x2cb   : > { %v2886_v53 = vsel %vm2803_vm12, %v2885_v6, %v2884_v9  ;;  %v3037_v54 = vor.u32 %v3036_v11, %v3035_v0  ;;  %vm3041_vm6 = vcmp.lt.s32.totalorder %v3022_v45, 1  ;;  %v3040_v15 = vor.u32 %v3039_v40, %v3038_v50 }
 0x2cc   : > { %v2889_v56 = vsel %vm10164_vm15, %v9956_v35, %v2886_v53  ;;  %v7122_v18 = vmin.u32 %v2971_v22, %v10197_v10  ;;  %vm3044_vm7 = vcmp.lt.s32.totalorder %v3022_v45, 4  ;;  %vm3042_vm8 = vcmp.lt.s32.totalorder %v3022_v45, 2 }
 0x2cd   : > { %7692 = vcosq.f32 %v2889_v56  ;;  %vm3043_vm9 = vcmp.lt.s32.totalorder %v3022_v45, 3  ;;  %v3046_v55 = vsel %vm3044_vm7, %v3034_v46, 2102212464  ;;  %v3045_v38 = vsel %vm3041_vm6, %v3025_v49, %v3028_v43 }
 0x2ce   : > { %7694 = vsinq.f32 %v2889_v56  ;;  %v2973_v47 = vclz %v7122_v18  ;;  %v3049_v44 = vsel %vm3041_vm6, %v3028_v43, %v3031_v61  ;;  %v2991_v5 = vsub.s32 4, %v2967_v31 }
 0x2cf   : > { %v3047_v21 = vsel %vm3043_vm9, %v3031_v61, %v3046_v55  ;;  %v3050_v13 = vsel %vm3044_vm7, %v3037_v54, 920167782  ;;  %v3053_v20 = vsel %vm3041_vm6, %v3031_v61, %v3034_v46  ;;  %v3054_v7 = vsel %vm3044_vm7, %v3040_v15, 1326507024 }
 0x2d0   : > { %v7123_v57 = vadd.s32 4294967294, %v2973_v47  ;;  %v3051_v34 = vsel %vm3043_vm9, %v3034_v46, %v3050_v13  ;;  %v3120_v62 = vand.u32 8388607, %v3113_v14  ;;  %v3048_v48 = vsel %vm3042_vm8, %v3045_v38, %v3047_v21 }
 0x2d1   : > { %v3052_v23 = vsel %vm3042_vm8, %v3049_v44, %v3051_v34  ;;  %v3055_v17 = vsel %vm3043_vm9, %v3037_v54, %v3054_v7  ;;  %v7129_v19 = vadd.s32 4294967169, %v3117_v2  ;;  %v2992_v59 = vsel %vm2907_vm5, %v2991_v5, %v2967_v31 }
 0x2d2   : > { %vm7124_vm10 = vcmp.lt.s32.totalorder %v7123_v57, 0  ;;  %v3056_v36 = vsel %vm3042_vm8, %v3053_v20, %v3055_v17  ;;  %v10227_v58 = vmul.u32.u64.low %v10201_v33, %v3052_v23  ;;  %v10228_v3 = vmul.u32.u64.high %v10201_v33, %v3052_v23, %v10227_v58 }
 0x2d3   : > { %v2976_v41 = vsel %vm7124_vm10, 0, %v7123_v57  ;;  %v10234_v63 = vmul.u32.u64.low %v10201_v33, %v3056_v36  ;;  %v10235_v52 = vmul.u32.u64.high %v10201_v33, %v3056_v36, %v10234_v63  ;;  %v3123_v9 = vadd.s32 1, %v7129_v19 }
 0x2d4   : > { %v2977_v25 = vsub.s32 32, %v2976_v41  ;;  %v2978_v51 = vshll.u32 %v10197_v10, %v2976_v41  ;;  %v2981_v60 = vsub.s32 4294967266, %v2976_v41  ;;  %v2895_v45 = vand.u32 3, %v10181_v12 }
 0x2d5   : > { %vm10241_vm11 = vcmp.le.f32.partialorder %v2905_v16, 0.7853982  ;;  %v3064_v42 = vmul.u32 %v10201_v33, %v3048_v48  ;;  %v3067_v11 = vadd.s32 1, %v10228_v3  ;;  %vm3124_vm12 = vcmp.gt.s32.totalorder %v3123_v9, 0 }
 0x2d6   : > { %v2979_v31 = vshrl.u32 %v2961_v29, %v2977_v25  ;;  %v2982_v0 = vadd.s32 127, %v2981_v60  ;;  %v2994_v10 = vsel %vm10241_vm11, 0, %v2992_v59  ;;  %vm3066_vm13 = vc.u32 %v10235_v52, %v10227_v58 }
 0x2d7   : > { %v3121_v12 = vor.u32 8388608, %v3120_v62  ;;  %v3125_v50 = vsel %vm3124_vm12, %v3123_v9, 0  ;;  %v3068_v40 = vsel %vm3066_vm13, %v3067_v11, %v10228_v3  ;;  %vm2893_vm14 = vweird.f32 %v9956_v35  ;;  %v10271_v3 = vld [vmem:[%s8067_s30 + $0xe8] sm:$0xff] }
 0x2d8   : > { %v2980_v6 = vor.u32 %v2979_v31, %v2978_v51  ;;  %v2983_v16 = vshll.u32 %v2982_v0, 23  ;;  %v10252_v2 = vshrl.u32 %v3125_v50, 5  ;;  %vm2896_vm0 = vcmp.lt.s32.totalorder %v2895_v45, 2 }
 0x2d9   : > { %v3069_v33 = vadd.s32 %v3068_v40, %v3064_v42  ;;  %v3127_v29 = vand.u32 31, %v3125_v50  ;;  %vm2897_vm15 = vcmp.eq.s32.totalorder %v2895_v45, 0  ;;  %vm2900_vm1 = vcmp.eq.s32.totalorder %v2895_v45, 2 }
 0x2da   : > { %v7693_v22 = vpop.eup %7692  ;;  %v2984_v49 = vor.u32 4788187, %v2983_v16  ;;  %v2987_v43 = vcvt.s32.f32 %v2980_v6  ;;  %v2998_v46 = vadd.s32 3, %v2994_v10  ;;  %vm3145_vm2 = vcmp.lt.s32.totalorder %v10252_v2, 1 }
 0x2db   : > { %v7695_v61 = vpop.eup %7694  ;;  %v2901_v53 = vxor.u32 2147483648, %v7693_v22  ;;  %v3070_v54 = vadd.s32 536870912, %v3069_v33  ;;  %v3128_v56 = vsub.s32 32, %v3127_v29  ;;  %v10256_v55 = vshll.u32 %v3121_v12, 8 }
 0x2dc   : > { %v2898_v18 = vxor.u32 2147483648, %v7695_v61  ;;  %v2985_v15 = vand.u32 2147483647, %v2984_v49  ;;  %v3130_v44 = vshll.u32 %v7945_v24, %v3127_v29  ;;  %vm3011_vm4 = vcmp.lt.s32.totalorder %v10110_v4, 0 }
 0x2dd   : > { %v2902_v47 = vsel %vm2900_vm1, %v2901_v53, %v7695_v61  ;;  %v3071_v38 = vshrl.u32 %v3070_v54, 30  ;;  %v3131_v5 = vshrl.u32 %v7946_v26, %v3128_v56  ;;  %v3133_v20 = vshll.u32 %v7946_v26, %v3127_v29 }
 0x2de   : > { %v2899_v21 = vsel %vm2897_vm15, %v7693_v22, %v2898_v18  ;;  %v2988_v13 = vmul.f32 %v2987_v43, %v2985_v15  ;;  %v3134_v57 = vshrl.u32 %v7947_v28, %v3128_v56  ;;  %v3136_v62 = vshll.u32 %v7947_v28, %v3127_v29 }
 0x2df   : > { %v2903_v34 = vsel %vm2896_vm0, %v2899_v21, %v2902_v47  ;;  %v3072_v7 = vshll.u32 %v3071_v38, 30  ;;  %v3137_v48 = vshrl.u32 %v7948_v30, %v3128_v56  ;;  %v3095_v19 = vsub.s32 4, %v3071_v38 }
 0x2e0   : > { %v2904_v23 = vsel %vm2893_vm14, nan, %v2903_v34  ;;  %v2989_v17 = vxor.u32 2147483648, %v2988_v13  ;;  %v3129_v36 = vshrl.u32 %v7945_v24, %v3128_v56  ;;  %v3132_v59 = vor.u32 %v3131_v5, %v3130_v44 }
 0x2e1   : > { %v10273_v41 = vsub.s32 %v3069_v33, %v3072_v7  ;;  %v3139_v63 = vshll.u32 %v7948_v30, %v3127_v29  ;;  %v3140_v25 = vshrl.u32 %v7949_v32, %v3128_v56  ;;  %6882 = vst [vmem:[%s8364_s17 + $0xc8] sm:$0xff] %v2904_v23  ;;  %v3135_v60 = vor.u32 %v3134_v57, %v3133_v20 }
 0x2e2   : > { %v2990_v51 = vsel %vm2907_vm5, %v2989_v17, %v2988_v13  ;;  %v3142_v35 = vshll.u32 %v7949_v32, %v3127_v29  ;;  %v3143_v9 = vshrl.u32 %v7950_v39, %v3128_v56  ;;  %vm10287_vm3 = vcmp.le.f32.partialorder %v3009_v37, 0.7853982 }
 0x2e3   : > { %v2993_v45 = vsel %vm10241_vm11, %v10042_v1, %v2990_v51  ;;  %v3075_v31 = vsub.s32 0, %v10273_v41  ;;  %v3138_v0 = vor.u32 %v3137_v48, %v3136_v62  ;;  %v3141_v11 = vor.u32 %v3140_v25, %v3139_v63 }
 0x2e4   : > { %7696 = vcosq.f32 %v2993_v45  ;;  %v3144_v10 = vor.u32 %v3143_v9, %v3142_v35  ;;  %vm3148_vm5 = vcmp.lt.s32.totalorder %v10252_v2, 4  ;;  %v3220_v12 = vand.u32 2139095040, %v10271_v3 }
 0x2e5   : > { %7698 = vsinq.f32 %v2993_v45  ;;  %v7126_v27 = vmin.u32 %v3075_v31, %v10273_v41  ;;  %vm3146_vm6 = vcmp.lt.s32.totalorder %v10252_v2, 2  ;;  %vm3147_vm7 = vcmp.lt.s32.totalorder %v10252_v2, 3 }
 0x2e6   : > { %v3149_v37 = vsel %vm3145_vm2, %v3129_v36, %v3132_v59  ;;  %v3150_v50 = vsel %vm3148_vm5, %v3138_v0, 2102212464  ;;  %v3153_v6 = vsel %vm3145_vm2, %v3132_v59, %v3135_v60  ;;  %v3154_v16 = vsel %vm3148_vm5, %v3141_v11, 920167782 }
 0x2e7   : > { %v10305_v40 = vand.u32 3, %v2998_v46  ;;  %v3077_v33 = vclz %v7126_v27  ;;  %v3096_v29 = vsel %vm3011_vm4, %v3095_v19, %v3071_v38  ;;  %v3157_v22 = vsel %vm3145_vm2, %v3135_v60, %v3138_v0 }
 0x2e8   : > { %v3151_v49 = vsel %vm3147_vm7, %v3135_v60, %v3150_v50  ;;  %v3155_v43 = vsel %vm3147_vm7, %v3138_v0, %v3154_v16  ;;  %v3158_v61 = vsel %vm3148_vm5, %v3144_v10, 1326507024  ;;  %v3221_v53 = vshrl.u32 %v3220_v12, 23 }
 0x2e9   : > { %v7127_v54 = vadd.s32 4294967294, %v3077_v33  ;;  %v3152_v46 = vsel %vm3146_vm6, %v3149_v37, %v3151_v49  ;;  %v3156_v56 = vsel %vm3146_vm6, %v3153_v6, %v3155_v43  ;;  %v3159_v18 = vsel %vm3147_vm7, %v3141_v11, %v3158_v61 }
 0x2ea   : > { %v3065_v15 = vadd.s32 %v10227_v58, %v10235_v52  ;;  %v3160_v47 = vsel %vm3146_vm6, %v3157_v22, %v3159_v18  ;;  %v10328_v38 = vmul.u32.u64.low %v10256_v55, %v3156_v56  ;;  %v10329_v44 = vmul.u32.u64.high %v10256_v55, %v3156_v56, %v10328_v38 }
 0x2eb   : > { %vm7128_vm8 = vcmp.lt.s32.totalorder %v7127_v54, 0  ;;  %v10333_v5 = vmul.u32.u64.low %v10256_v55, %v3160_v47  ;;  %v10334_v21 = vmul.u32.u64.high %v10256_v55, %v3160_v47, %v10333_v5  ;;  %v7133_v13 = vadd.s32 4294967169, %v3221_v53 }
 0x2ec   : > { %v3080_v20 = vsel %vm7128_vm8, 0, %v7127_v54  ;;  %v3098_v57 = vsel %vm10287_vm3, 0, %v3096_v29  ;;  %v3168_v58 = vmul.u32 %v10256_v55, %v3152_v46  ;;  %v3217_v52 = vand.u32 2147483647, %v10271_v3  ;;  %v10357_v29 = vld [vmem:[%s8067_s30 + $0xf0] sm:$0xff] }
 0x2ed   : > { %v3081_v2 = vsub.s32 32, %v3080_v20  ;;  %v3082_v34 = vshll.u32 %v10273_v41, %v3080_v20  ;;  %v3085_v7 = vsub.s32 4294967266, %v3080_v20  ;;  %v3227_v62 = vadd.s32 1, %v7133_v13 }
 0x2ee   : > { %vm2997_vm9 = vweird.f32 %v10042_v1  ;;  %v3171_v48 = vadd.s32 1, %v10329_v44  ;;  %vm3004_vm10 = vcmp.eq.s32.totalorder %v10305_v40, 2  ;;  %vm3170_vm11 = vc.u32 %v10334_v21, %v10328_v38 }
 0x2ef   : > { %v3083_v23 = vshrl.u32 %v3065_v15, %v3081_v2  ;;  %v3086_v17 = vadd.s32 127, %v3085_v7  ;;  %v3102_v19 = vadd.s32 3, %v3098_v57  ;;  %v3224_v36 = vand.u32 8388607, %v3217_v52 }
 0x2f0   : > { %v3172_v55 = vsel %vm3170_vm11, %v3171_v48, %v10329_v44  ;;  %vm3228_vm12 = vcmp.gt.s32.totalorder %v3227_v62, 0  ;;  %vm3000_vm13 = vcmp.lt.s32.totalorder %v10305_v40, 2  ;;  %vm3001_vm14 = vcmp.eq.s32.totalorder %v10305_v40, 0 }
 0x2f1   : > { %v7697_v41 = vpop.eup %7696  ;;  %v3084_v59 = vor.u32 %v3083_v23, %v3082_v34  ;;  %v3087_v63 = vshll.u32 %v3086_v17, 23  ;;  %v3173_v25 = vadd.s32 %v3172_v55, %v3168_v58  ;;  %v3229_v51 = vsel %vm3228_vm12, %v3227_v62, 0 }
 0x2f2   : > { %v7699_v60 = vpop.eup %7698  ;;  %v3005_v35 = vxor.u32 2147483648, %v7697_v41  ;;  %v3231_v9 = vand.u32 31, %v3229_v51  ;;  %v10353_v12 = vand.u32 3, %v3102_v19  ;;  %v3225_v27 = vor.u32 8388608, %v3224_v36 }
 0x2f3   : > { %v3002_v45 = vxor.u32 2147483648, %v7699_v60  ;;  %v3088_v31 = vor.u32 4788187, %v3087_v63  ;;  %v3091_v0 = vcvt.s32.f32 %v3084_v59  ;;  %v3174_v11 = vadd.s32 536870912, %v3173_v25 }
 0x2f4   : > { %v3006_v10 = vsel %vm3004_vm10, %v3005_v35, %v7699_v60  ;;  %v3232_v37 = vsub.s32 32, %v3231_v9  ;;  %v3234_v33 = vshll.u32 %v7945_v24, %v3231_v9  ;;  %v3237_v43 = vshll.u32 %v7946_v26, %v3231_v9 }
 0x2f5   : > { %v3003_v50 = vsel %vm3001_vm14, %v7697_v41, %v3002_v45  ;;  %v3089_v6 = vand.u32 2147483647, %v3088_v31  ;;  %v3175_v16 = vshrl.u32 %v3174_v11, 30  ;;  %v3240_v61 = vshll.u32 %v7947_v28, %v3231_v9 }
 0x2f6   : > { %v3007_v22 = vsel %vm3000_vm13, %v3003_v50, %v3006_v10  ;;  %v3235_v49 = vshrl.u32 %v7946_v26, %v3232_v37  ;;  %v3238_v56 = vshrl.u32 %v7947_v28, %v3232_v37  ;;  %v3230_v18 = vshrl.u32 %v3229_v51, 5 }
 0x2f7   : > { %v3008_v53 = vsel %vm2997_vm9, nan, %v3007_v22  ;;  %v3092_v54 = vmul.f32 %v3091_v0, %v3089_v6  ;;  %v3176_v46 = vshll.u32 %v3175_v16, 30  ;;  %v3241_v15 = vshrl.u32 %v7948_v30, %v3232_v37 }
 0x2f8   : > { %v3243_v47 = vshll.u32 %v7948_v30, %v3231_v9  ;;  %v3321_v40 = vand.u32 2147483647, %v10357_v29  ;;  %6883 = vst [vmem:[%s8364_s17 + $0xd0] sm:$0xff] %v3008_v53  ;;  %v3244_v13 = vshrl.u32 %v7949_v32, %v3232_v37  ;;  %v3324_v1 = vand.u32 2139095040, %v10357_v29 }
 0x2f9   : > { %v3093_v44 = vxor.u32 2147483648, %v3092_v54  ;;  %v10371_v5 = vsub.s32 %v3173_v25, %v3176_v46  ;;  %vm3115_vm0 = vcmp.lt.s32.totalorder %v10179_v8, 0  ;;  %v3233_v20 = vshrl.u32 %v7945_v24, %v3232_v37 }
 0x2fa   : > { %v3236_v57 = vor.u32 %v3235_v49, %v3234_v33  ;;  %v3246_v58 = vshll.u32 %v7949_v32, %v3231_v9  ;;  %v3247_v2 = vshrl.u32 %v7950_v39, %v3232_v37  ;;  %v3239_v62 = vor.u32 %v3238_v56, %v3237_v43 }
 0x2fb   : > { %v3094_v34 = vsel %vm3011_vm4, %v3093_v44, %v3092_v54  ;;  %v3179_v7 = vsub.s32 0, %v10371_v5  ;;  %v3242_v48 = vor.u32 %v3241_v15, %v3240_v61  ;;  %v3245_v17 = vor.u32 %v3244_v13, %v3243_v47 }
 0x2fc   : > { %v3097_v23 = vsel %vm10287_vm3, %v10110_v4, %v3094_v34  ;;  %v3248_v19 = vor.u32 %v3247_v2, %v3246_v58  ;;  %vm3249_vm15 = vcmp.lt.s32.totalorder %v3230_v18, 1  ;;  %vm10387_vm1 = vcmp.le.f32.partialorder %v3113_v14, 0.7853982 }
 0x2fd   : > { %7700 = vcosq.f32 %v3097_v23  ;;  %v7130_v36 = vmin.u32 %v3179_v7, %v10371_v5  ;;  %v3265_v41 = vshll.u32 %v3225_v27, 8  ;;  %v3325_v59 = vshrl.u32 %v3324_v1, 23 }
 0x2fe   : > { %7702 = vsinq.f32 %v3097_v23  ;;  %v3199_v63 = vsub.s32 4, %v3175_v16  ;;  %vm3251_vm2 = vcmp.lt.s32.totalorder %v3230_v18, 3  ;;  %vm3252_vm4 = vcmp.lt.s32.totalorder %v3230_v18, 4 }
 0x2ff   : > { %v3181_v42 = vclz %v7130_v36  ;;  %vm3250_vm3 = vcmp.lt.s32.totalorder %v3230_v18, 2  ;;  %v3253_v25 = vsel %vm3249_vm15, %v3233_v20, %v3236_v57  ;;  %v3257_v51 = vsel %vm3249_vm15, %v3236_v57, %v3239_v62 }
 0x300   : > { %v3254_v60 = vsel %vm3252_vm4, %v3242_v48, 2102212464  ;;  %v3258_v35 = vsel %vm3252_vm4, %v3245_v17, 920167782  ;;  %v3261_v14 = vsel %vm3249_vm15, %v3239_v62, %v3242_v48  ;;  %v3262_v9 = vsel %vm3252_vm4, %v3248_v19, 1326507024 }
 0x301   : > { %v7131_v45 = vadd.s32 4294967294, %v3181_v42  ;;  %v3255_v31 = vsel %vm3251_vm2, %v3239_v62, %v3254_v60  ;;  %v3259_v0 = vsel %vm3251_vm2, %v3242_v48, %v3258_v35  ;;  %v3263_v11 = vsel %vm3251_vm2, %v3245_v17, %v3262_v9 }
 0x302   : > { %v3169_v10 = vadd.s32 %v10328_v38, %v10334_v21  ;;  %v3260_v27 = vsel %vm3250_vm3, %v3257_v51, %v3259_v0  ;;  %v3264_v37 = vsel %vm3250_vm3, %v3261_v14, %v3263_v11  ;;  %v7137_v50 = vadd.s32 4294967169, %v3325_v59  ;;  %v10425_v51 = vld [vmem:[%s8067_s30 + $0xf8] sm:$0xff] }
 0x303   : > { %vm7132_vm5 = vcmp.lt.s32.totalorder %v7131_v45, 0  ;;  %v3200_v6 = vsel %vm3115_vm0, %v3199_v63, %v3175_v16  ;;  %v10401_v33 = vmul.u32.u64.low %v3265_v41, %v3264_v37  ;;  %v10402_v22 = vmul.u32.u64.high %v3265_v41, %v3264_v37, %v10401_v33 }
 0x304   : > { %v3184_v49 = vsel %vm7132_vm5, 0, %v7131_v45  ;;  %v3256_v43 = vsel %vm3250_vm3, %v3253_v25, %v3255_v31  ;;  %v10405_v61 = vmul.u32.u64.low %v3265_v41, %v3260_v27  ;;  %v10406_v53 = vmul.u32.u64.high %v3265_v41, %v3260_v27, %v10405_v61 }
 0x305   : > { %v3185_v38 = vsub.s32 32, %v3184_v49  ;;  %v3186_v21 = vshll.u32 %v10371_v5, %v3184_v49  ;;  %v3189_v54 = vsub.s32 4294967266, %v3184_v49  ;;  %v3331_v46 = vadd.s32 1, %v7137_v50 }
 0x306   : > { %vm3101_vm6 = vweird.f32 %v10110_v4  ;;  %v3202_v16 = vsel %vm10387_vm1, 0, %v3200_v6  ;;  %v3272_v47 = vmul.u32 %v3265_v41, %v3256_v43  ;;  %vm3274_vm7 = vc.u32 %v10402_v22, %v10405_v61 }
 0x307   : > { %v3187_v56 = vshrl.u32 %v3169_v10, %v3185_v38  ;;  %v3190_v15 = vadd.s32 127, %v3189_v54  ;;  %vm3104_vm8 = vcmp.lt.s32.totalorder %v10353_v12, 2  ;;  %v3275_v18 = vadd.s32 1, %v10406_v53 }
 0x308   : > { %v3328_v44 = vand.u32 8388607, %v3321_v40  ;;  %vm3332_vm9 = vcmp.gt.s32.totalorder %v3331_v46, 0  ;;  %vm3105_vm10 = vcmp.eq.s32.totalorder %v10353_v12, 0  ;;  %vm3108_vm11 = vcmp.eq.s32.totalorder %v10353_v12, 2 }
 0x309   : > { %v3188_v5 = vor.u32 %v3187_v56, %v3186_v21  ;;  %v3191_v13 = vshll.u32 %v3190_v15, 23  ;;  %v3333_v1 = vsel %vm3332_vm9, %v3331_v46, 0  ;;  %v3206_v57 = vadd.s32 3, %v3202_v16 }
 0x30a   : > { %v7701_v20 = vpop.eup %7700  ;;  %v3276_v58 = vsel %vm3274_vm7, %v3275_v18, %v10406_v53  ;;  %v3335_v2 = vand.u32 31, %v3333_v1  ;;  %v3329_v19 = vor.u32 8388608, %v3328_v44  ;;  %v3334_v27 = vshrl.u32 %v3333_v1, 5 }
 0x30b   : > { %v7703_v34 = vpop.eup %7702  ;;  %v3109_v7 = vxor.u32 2147483648, %v7701_v20  ;;  %v3192_v62 = vor.u32 4788187, %v3191_v13  ;;  %v3195_v48 = vcvt.s32.f32 %v3188_v5  ;;  %v3277_v23 = vadd.s32 %v3276_v58, %v3272_v47 }
 0x30c   : > { %v3106_v17 = vxor.u32 2147483648, %v7703_v34  ;;  %v3336_v36 = vsub.s32 32, %v3335_v2  ;;  %v3338_v41 = vshll.u32 %v7945_v24, %v3335_v2  ;;  %v3341_v25 = vshll.u32 %v7946_v26, %v3335_v2 }
 0x30d   : > { %v3110_v59 = vsel %vm3108_vm11, %v3109_v7, %v7703_v34  ;;  %v3193_v63 = vand.u32 2147483647, %v3192_v62  ;;  %v3278_v42 = vadd.s32 536870912, %v3277_v23  ;;  %v3344_v9 = vshll.u32 %v7947_v28, %v3335_v2 }
 0x30e   : > { %v3107_v60 = vsel %vm3105_vm10, %v7701_v20, %v3106_v17  ;;  %v3339_v35 = vshrl.u32 %v7946_v26, %v3336_v36  ;;  %v3342_v14 = vshrl.u32 %v7947_v28, %v3336_v36  ;;  %v3345_v11 = vshrl.u32 %v7948_v30, %v3336_v36 }
 0x30f   : > { %v3111_v45 = vsel %vm3104_vm8, %v3107_v60, %v3110_v59  ;;  %v3196_v31 = vmul.f32 %v3195_v48, %v3193_v63  ;;  %v3279_v0 = vshrl.u32 %v3278_v42, 30  ;;  %v3347_v37 = vshll.u32 %v7948_v30, %v3335_v2 }
 0x310   : > { %v3112_v10 = vsel %vm3101_vm6, nan, %v3111_v45  ;;  %v10438_v50 = vshll.u32 %v3329_v19, 8  ;;  %v3337_v49 = vshrl.u32 %v7945_v24, %v3336_v36  ;;  %v3428_v43 = vand.u32 2139095040, %v10425_v51 }
 0x311   : > { %v3197_v6 = vxor.u32 2147483648, %v3196_v31  ;;  %v3280_v33 = vshll.u32 %v3279_v0, 30  ;;  %6884 = vst [vmem:[%s8364_s17 + $0xd8] sm:$0xff] %v3112_v10  ;;  %v3340_v12 = vor.u32 %v3339_v35, %v3338_v41  ;;  %v3348_v53 = vshrl.u32 %v7949_v32, %v3336_v36 }
 0x312   : > { %v3350_v38 = vshll.u32 %v7949_v32, %v3335_v2  ;;  %v3351_v4 = vshrl.u32 %v7950_v39, %v3336_v36  ;;  %v3343_v46 = vor.u32 %v3342_v14, %v3341_v25  ;;  %v3346_v16 = vor.u32 %v3345_v11, %v3344_v9 }
 0x313   : > { %v3198_v21 = vsel %vm3115_vm0, %v3197_v6, %v3196_v31  ;;  %v10448_v54 = vsub.s32 %v3277_v23, %v3280_v33  ;;  %v3349_v15 = vor.u32 %v3348_v53, %v3347_v37  ;;  %vm3353_vm12 = vcmp.lt.s32.totalorder %v3334_v27, 1 }
 0x314   : > { %v3201_v56 = vsel %vm10387_vm1, %v10179_v8, %v3198_v21  ;;  %v3352_v47 = vor.u32 %v3351_v4, %v3350_v38  ;;  %vm3355_vm13 = vcmp.lt.s32.totalorder %v3334_v27, 3  ;;  %v3429_v44 = vshrl.u32 %v3428_v43, 23  ;;  %v10494_v4 = vld [vmem:[%s8067_s30 + $0x100] sm:$0xff] }
 0x315   : > { %7704 = vcosq.f32 %v3201_v56  ;;  %v3283_v18 = vsub.s32 0, %v10448_v54  ;;  %vm3354_vm14 = vcmp.lt.s32.totalorder %v3334_v27, 2  ;;  %vm3356_vm15 = vcmp.lt.s32.totalorder %v3334_v27, 4 }
 0x316   : > { %7706 = vsinq.f32 %v3201_v56  ;;  %v3357_v5 = vsel %vm3353_vm12, %v3337_v49, %v3340_v12  ;;  %v3358_v1 = vsel %vm3356_vm15, %v3346_v16, 2102212464  ;;  %v3361_v20 = vsel %vm3353_vm12, %v3340_v12, %v3343_v46 }
 0x317   : > { %v7134_v13 = vmin.u32 %v3283_v18, %v10448_v54  ;;  %v3362_v58 = vsel %vm3356_vm15, %v3349_v15, 920167782  ;;  %v3359_v55 = vsel %vm3355_vm13, %v3343_v46, %v3358_v1  ;;  %v3365_v34 = vsel %vm3353_vm12, %v3343_v46, %v3346_v16 }
 0x318   : > { %v3363_v2 = vsel %vm3355_vm13, %v3346_v16, %v3362_v58  ;;  %v3366_v7 = vsel %vm3356_vm15, %v3352_v47, 1326507024  ;;  %v3207_v62 = vand.u32 3, %v3206_v57  ;;  %v3303_v23 = vsub.s32 4, %v3279_v0 }
 0x319   : > { %v3285_v48 = vclz %v7134_v13  ;;  %v3360_v17 = vsel %vm3354_vm14, %v3357_v5, %v3359_v55  ;;  %v3364_v19 = vsel %vm3354_vm14, %v3361_v20, %v3363_v2  ;;  %v3367_v36 = vsel %vm3355_vm13, %v3349_v15, %v3366_v7 }
 0x31a   : > { %v7141_v41 = vadd.s32 4294967169, %v3429_v44  ;;  %v3368_v63 = vsel %vm3354_vm14, %v3365_v34, %v3367_v36  ;;  %v10462_v42 = vmul.u32.u64.low %v10438_v50, %v3364_v19  ;;  %v10463_v25 = vmul.u32.u64.high %v10438_v50, %v3364_v19, %v10462_v42 }
 0x31b   : > { %v7135_v59 = vadd.s32 4294967294, %v3285_v48  ;;  %vm3219_vm0 = vcmp.lt.s32.totalorder %v10271_v3, 0  ;;  %v10468_v57 = vmul.u32.u64.low %v10438_v50, %v3368_v63  ;;  %v10469_v60 = vmul.u32.u64.high %v10438_v50, %v3368_v63, %v10468_v57 }
 0x31c   : > { %v3425_v35 = vand.u32 2147483647, %v10425_v51  ;;  %vm3205_vm1 = vweird.f32 %v10179_v8  ;;  %v3273_v14 = vadd.s32 %v10405_v61, %v10402_v22  ;;  %v3304_v9 = vsel %vm3219_vm0, %v3303_v23, %v3279_v0 }
 0x31d   : > { %vm7136_vm2 = vcmp.lt.s32.totalorder %v7135_v59, 0  ;;  %v3435_v45 = vadd.s32 1, %v7141_v41  ;;  %vm3208_vm4 = vcmp.lt.s32.totalorder %v3207_v62, 2  ;;  %vm10479_vm3 = vcmp.le.f32.partialorder %v3217_v52, 0.7853982 }
 0x31e   : > { %v3288_v11 = vsel %vm7136_vm2, 0, %v7135_v59  ;;  %v3376_v10 = vmul.u32 %v10438_v50, %v3360_v17  ;;  %v3379_v22 = vadd.s32 1, %v10463_v25  ;;  %v3306_v61 = vsel %vm10479_vm3, 0, %v3304_v9 }
 0x31f   : > { %v3289_v27 = vsub.s32 32, %v3288_v11  ;;  %v3290_v37 = vshll.u32 %v10448_v54, %v3288_v11  ;;  %v3293_v6 = vsub.s32 4294967266, %v3288_v11  ;;  %vm3378_vm5 = vc.u32 %v10469_v60, %v10462_v42 }
 0x320   : > { %v3432_v52 = vand.u32 8388607, %v3425_v35  ;;  %vm3436_vm6 = vcmp.gt.s32.totalorder %v3435_v45, 0  ;;  %v3380_v50 = vsel %vm3378_vm5, %v3379_v22, %v10463_v25  ;;  %vm3209_vm7 = vcmp.eq.s32.totalorder %v3207_v62, 0 }
 0x321   : > { %v3291_v0 = vshrl.u32 %v3273_v14, %v3289_v27  ;;  %v3294_v33 = vadd.s32 127, %v3293_v6  ;;  %v3437_v49 = vsel %vm3436_vm6, %v3435_v45, 0  ;;  %vm3212_vm8 = vcmp.eq.s32.totalorder %v3207_v62, 2 }
 0x322   : > { %v7705_v43 = vpop.eup %7704  ;;  %v3381_v12 = vadd.s32 %v3380_v50, %v3376_v10  ;;  %v3439_v53 = vand.u32 31, %v3437_v49  ;;  %v10496_v16 = vadd.s32 3, %v3306_v61  ;;  %v3433_v47 = vor.u32 8388608, %v3432_v52 }
 0x323   : > { %v7707_v38 = vpop.eup %7706  ;;  %v3213_v21 = vxor.u32 2147483648, %v7705_v43  ;;  %v3292_v54 = vor.u32 %v3291_v0, %v3290_v37  ;;  %v3295_v46 = vshll.u32 %v3294_v33, 23  ;;  %v3529_v1 = vand.u32 2147483647, %v10494_v4 }
 0x324   : > { %v3210_v56 = vxor.u32 2147483648, %v7707_v38  ;;  %v3382_v15 = vadd.s32 536870912, %v3381_v12  ;;  %v3440_v18 = vsub.s32 32, %v3439_v53  ;;  %v3438_v55 = vshrl.u32 %v3437_v49, 5 }
 0x325   : > { %v3214_v44 = vsel %vm3212_vm8, %v3213_v21, %v7707_v38  ;;  %v3296_v5 = vor.u32 4788187, %v3295_v46  ;;  %v3299_v13 = vcvt.s32.f32 %v3292_v54  ;;  %v3532_v2 = vand.u32 2139095040, %v10494_v4 }
 0x326   : > { %v3211_v20 = vsel %vm3209_vm7, %v7705_v43, %v3210_v56  ;;  %v3383_v58 = vshrl.u32 %v3382_v15, 30  ;;  %v3442_v48 = vshll.u32 %v7945_v24, %v3439_v53  ;;  %v3445_v23 = vshll.u32 %v7946_v26, %v3439_v53 }
 0x327   : > { %v3215_v34 = vsel %vm3208_vm4, %v3211_v20, %v3214_v44  ;;  %v3297_v7 = vand.u32 2147483647, %v3296_v5  ;;  %v3443_v36 = vshrl.u32 %v7946_v26, %v3440_v18  ;;  %v3446_v41 = vshrl.u32 %v7947_v28, %v3440_v18 }
 0x328   : > { %v3216_v17 = vsel %vm3205_vm1, nan, %v3215_v34  ;;  %v3384_v19 = vshll.u32 %v3383_v58, 30  ;;  %v3448_v63 = vshll.u32 %v7947_v28, %v3439_v53  ;;  %v3449_v25 = vshrl.u32 %v7948_v30, %v3440_v18 }
 0x329   : > { %v3300_v59 = vmul.f32 %v3299_v13, %v3297_v7  ;;  %v3451_v62 = vshll.u32 %v7948_v30, %v3439_v53  ;;  %6885 = vst [vmem:[%s8364_s17 + $0xe0] sm:$0xff] %v3216_v17  ;;  %v3452_v14 = vshrl.u32 %v7949_v32, %v3440_v18  ;;  %v3454_v8 = vshll.u32 %v7949_v32, %v3439_v53 }
 0x32a   : > { %v10512_v57 = vsub.s32 %v3381_v12, %v3384_v19  ;;  %v10516_v9 = vshll.u32 %v3433_v47, 8  ;;  %v3377_v11 = vadd.s32 %v10462_v42, %v10469_v60  ;;  %v3455_v10 = vshrl.u32 %v7950_v39, %v3440_v18 }
 0x32b   : > { %v3301_v45 = vxor.u32 2147483648, %v3300_v59  ;;  %v3533_v27 = vshrl.u32 %v3532_v2, 23  ;;  %vm3323_vm9 = vcmp.lt.s32.totalorder %v10357_v29, 0  ;;  %v3441_v6 = vshrl.u32 %v7945_v24, %v3440_v18 }
 0x32c   : > { %v3387_v37 = vsub.s32 0, %v10512_v57  ;;  %v3444_v22 = vor.u32 %v3443_v36, %v3442_v48  ;;  %v3447_v61 = vor.u32 %v3446_v41, %v3445_v23  ;;  %v3450_v0 = vor.u32 %v3449_v25, %v3448_v63 }
 0x32d   : > { %v3302_v52 = vsel %vm3219_vm0, %v3301_v45, %v3300_v59  ;;  %v3453_v33 = vor.u32 %v3452_v14, %v3451_v62  ;;  %vm3457_vm10 = vcmp.lt.s32.totalorder %v3438_v55, 1  ;;  %v3456_v50 = vor.u32 %v3455_v10, %v3454_v8 }
 0x32e   : > { %v3305_v42 = vsel %vm10479_vm3, %v10271_v3, %v3302_v52  ;;  %v7138_v60 = vmin.u32 %v3387_v37, %v10512_v57  ;;  %vm3460_vm11 = vcmp.lt.s32.totalorder %v3438_v55, 4  ;;  %vm3458_vm12 = vcmp.lt.s32.totalorder %v3438_v55, 2 }
 0x32f   : > { %7708 = vcosq.f32 %v3305_v42  ;;  %vm3459_vm13 = vcmp.lt.s32.totalorder %v3438_v55, 3  ;;  %v3462_v49 = vsel %vm3460_vm11, %v3450_v0, 2102212464  ;;  %v3461_v12 = vsel %vm3457_vm10, %v3441_v6, %v3444_v22 }
 0x330   : > { %7710 = vsinq.f32 %v3305_v42  ;;  %v3389_v43 = vclz %v7138_v60  ;;  %v3465_v53 = vsel %vm3457_vm10, %v3444_v22, %v3447_v61  ;;  %v3407_v38 = vsub.s32 4, %v3383_v58 }
 0x331   : > { %v3463_v21 = vsel %vm3459_vm13, %v3447_v61, %v3462_v49  ;;  %v3466_v54 = vsel %vm3460_vm11, %v3453_v33, 920167782  ;;  %v3469_v31 = vsel %vm3457_vm10, %v3447_v61, %v3450_v0  ;;  %v3470_v15 = vsel %vm3460_vm11, %v3456_v50, 1326507024 }
 0x332   : > { %v7139_v46 = vadd.s32 4294967294, %v3389_v43  ;;  %v3467_v56 = vsel %vm3459_vm13, %v3450_v0, %v3466_v54  ;;  %v3536_v47 = vand.u32 8388607, %v3529_v1  ;;  %v3464_v18 = vsel %vm3458_vm12, %v3461_v12, %v3463_v21 }
 0x333   : > { %v3468_v44 = vsel %vm3458_vm12, %v3465_v53, %v3467_v56  ;;  %v3471_v5 = vsel %vm3459_vm13, %v3453_v33, %v3470_v15  ;;  %v7145_v13 = vadd.s32 4294967169, %v3533_v27  ;;  %v3408_v48 = vsel %vm3323_vm9, %v3407_v38, %v3383_v58 }
 0x334   : > { %vm7140_vm14 = vcmp.lt.s32.totalorder %v7139_v46, 0  ;;  %v3472_v20 = vsel %vm3458_vm12, %v3469_v31, %v3471_v5  ;;  %v10542_v2 = vmul.u32.u64.low %v10516_v9, %v3468_v44  ;;  %v10543_v34 = vmul.u32.u64.high %v10516_v9, %v3468_v44, %v10542_v2 }
 0x335   : > { %v3392_v7 = vsel %vm7140_vm14, 0, %v7139_v46  ;;  %v10549_v23 = vmul.u32.u64.low %v10516_v9, %v3472_v20  ;;  %v10550_v17 = vmul.u32.u64.high %v10516_v9, %v3472_v20, %v10549_v23  ;;  %v3539_v59 = vadd.s32 1, %v7145_v13 }
 0x336   : > { %v3393_v19 = vsub.s32 32, %v3392_v7  ;;  %v3394_v36 = vshll.u32 %v10512_v57, %v3392_v7  ;;  %v3397_v41 = vsub.s32 4294967266, %v3392_v7  ;;  %v3311_v55 = vand.u32 3, %v10496_v16 }
 0x337   : > { %vm10556_vm15 = vcmp.le.f32.partialorder %v3321_v40, 0.7853982  ;;  %v3480_v25 = vmul.u32 %v10516_v9, %v3464_v18  ;;  %v3483_v14 = vadd.s32 1, %v10543_v34  ;;  %vm3540_vm0 = vcmp.gt.s32.totalorder %v3539_v59, 0 }
 0x338   : > { %v3395_v58 = vshrl.u32 %v3377_v11, %v3393_v19  ;;  %v3398_v62 = vadd.s32 127, %v3397_v41  ;;  %v3410_v57 = vsel %vm10556_vm15, 0, %v3408_v48  ;;  %vm3482_vm1 = vc.u32 %v10550_v17, %v10542_v2 }
 0x339   : > { %v3537_v16 = vor.u32 8388608, %v3536_v47  ;;  %v3541_v8 = vsel %vm3540_vm0, %v3539_v59, 0  ;;  %v3484_v10 = vsel %vm3482_vm1, %v3483_v14, %v10543_v34  ;;  %vm3309_vm2 = vweird.f32 %v10271_v3  ;;  %v10586_v34 = vld [vmem:[%s8067_s30 + $0x108] sm:$0xff] }
 0x33a   : > { %v3396_v45 = vor.u32 %v3395_v58, %v3394_v36  ;;  %v3399_v40 = vshll.u32 %v3398_v62, 23  ;;  %v10567_v27 = vshrl.u32 %v3541_v8, 5  ;;  %vm3312_vm4 = vcmp.lt.s32.totalorder %v3311_v55, 2 }
 0x33b   : > { %v3485_v9 = vadd.s32 %v3484_v10, %v3480_v25  ;;  %v3543_v11 = vand.u32 31, %v3541_v8  ;;  %vm3313_vm3 = vcmp.eq.s32.totalorder %v3311_v55, 0  ;;  %vm3316_vm5 = vcmp.eq.s32.totalorder %v3311_v55, 2 }
 0x33c   : > { %v7709_v37 = vpop.eup %7708  ;;  %v3400_v6 = vor.u32 4788187, %v3399_v40  ;;  %v3403_v22 = vcvt.s32.f32 %v3396_v45  ;;  %v3414_v0 = vadd.s32 3, %v3410_v57  ;;  %vm3561_vm6 = vcmp.lt.s32.totalorder %v10567_v27, 1 }
 0x33d   : > { %v7711_v61 = vpop.eup %7710  ;;  %v3317_v52 = vxor.u32 2147483648, %v7709_v37  ;;  %v3486_v33 = vadd.s32 536870912, %v3485_v9  ;;  %v3544_v42 = vsub.s32 32, %v3543_v11  ;;  %v10571_v49 = vshll.u32 %v3537_v16, 8 }
 0x33e   : > { %v3314_v60 = vxor.u32 2147483648, %v7711_v61  ;;  %v3401_v50 = vand.u32 2147483647, %v3400_v6  ;;  %v3546_v53 = vshll.u32 %v7945_v24, %v3543_v11  ;;  %vm3427_vm7 = vcmp.lt.s32.totalorder %v10425_v51, 0 }
 0x33f   : > { %v3318_v43 = vsel %vm3316_vm5, %v3317_v52, %v7711_v61  ;;  %v3487_v12 = vshrl.u32 %v3486_v33, 30  ;;  %v3547_v38 = vshrl.u32 %v7946_v26, %v3544_v42  ;;  %v3549_v31 = vshll.u32 %v7946_v26, %v3543_v11 }
 0x340   : > { %v3315_v21 = vsel %vm3313_vm3, %v7709_v37, %v3314_v60  ;;  %v3404_v54 = vmul.f32 %v3403_v22, %v3401_v50  ;;  %v3550_v46 = vshrl.u32 %v7947_v28, %v3544_v42  ;;  %v3552_v47 = vshll.u32 %v7947_v28, %v3543_v11 }
 0x341   : > { %v3319_v56 = vsel %vm3312_vm4, %v3315_v21, %v3318_v43  ;;  %v3488_v15 = vshll.u32 %v3487_v12, 30  ;;  %v3553_v18 = vshrl.u32 %v7948_v30, %v3544_v42  ;;  %v3511_v13 = vsub.s32 4, %v3487_v12 }
 0x342   : > { %v3320_v44 = vsel %vm3309_vm2, nan, %v3319_v56  ;;  %v3405_v5 = vxor.u32 2147483648, %v3404_v54  ;;  %v3545_v20 = vshrl.u32 %v7945_v24, %v3544_v42  ;;  %v3548_v48 = vor.u32 %v3547_v38, %v3546_v53 }
 0x343   : > { %v10588_v7 = vsub.s32 %v3485_v9, %v3488_v15  ;;  %v3555_v23 = vshll.u32 %v7948_v30, %v3543_v11  ;;  %v3556_v19 = vshrl.u32 %v7949_v32, %v3544_v42  ;;  %6886 = vst [vmem:[%s8364_s17 + $0xe8] sm:$0xff] %v3320_v44  ;;  %v3551_v41 = vor.u32 %v3550_v46, %v3549_v31 }
 0x344   : > { %v3406_v36 = vsel %vm3323_vm9, %v3405_v5, %v3404_v54  ;;  %v3558_v3 = vshll.u32 %v7949_v32, %v3543_v11  ;;  %v3559_v59 = vshrl.u32 %v7950_v39, %v3544_v42  ;;  %vm10602_vm8 = vcmp.le.f32.partialorder %v3425_v35, 0.7853982 }
 0x345   : > { %v3409_v55 = vsel %vm10556_vm15, %v10357_v29, %v3406_v36  ;;  %v3491_v58 = vsub.s32 0, %v10588_v7  ;;  %v3554_v62 = vor.u32 %v3553_v18, %v3552_v47  ;;  %v3557_v14 = vor.u32 %v3556_v19, %v3555_v23 }
 0x346   : > { %7712 = vcosq.f32 %v3409_v55  ;;  %v3560_v57 = vor.u32 %v3559_v59, %v3558_v3  ;;  %vm3564_vm9 = vcmp.lt.s32.totalorder %v10567_v27, 4  ;;  %v3636_v16 = vand.u32 2139095040, %v10586_v34 }
 0x347   : > { %7714 = vsinq.f32 %v3409_v55  ;;  %v7142_v63 = vmin.u32 %v3491_v58, %v10588_v7  ;;  %vm3562_vm10 = vcmp.lt.s32.totalorder %v10567_v27, 2  ;;  %vm3563_vm11 = vcmp.lt.s32.totalorder %v10567_v27, 3 }
 0x348   : > { %v3565_v35 = vsel %vm3561_vm6, %v3545_v20, %v3548_v48  ;;  %v3566_v8 = vsel %vm3564_vm9, %v3554_v62, 2102212464  ;;  %v3569_v45 = vsel %vm3561_vm6, %v3548_v48, %v3551_v41  ;;  %v3570_v40 = vsel %vm3564_vm9, %v3557_v14, 920167782 }
 0x349   : > { %v10620_v10 = vand.u32 3, %v3414_v0  ;;  %v3493_v9 = vclz %v7142_v63  ;;  %v3512_v11 = vsel %vm3427_vm7, %v3511_v13, %v3487_v12  ;;  %v3573_v37 = vsel %vm3561_vm6, %v3551_v41, %v3554_v62 }
 0x34a   : > { %v3567_v6 = vsel %vm3563_vm11, %v3551_v41, %v3566_v8  ;;  %v3571_v22 = vsel %vm3563_vm11, %v3554_v62, %v3570_v40  ;;  %v3574_v61 = vsel %vm3564_vm9, %v3560_v57, 1326507024  ;;  %v3637_v52 = vshrl.u32 %v3636_v16, 23 }
 0x34b   : > { %v7143_v33 = vadd.s32 4294967294, %v3493_v9  ;;  %v3568_v0 = vsel %vm3562_vm10, %v3565_v35, %v3567_v6  ;;  %v3572_v42 = vsel %vm3562_vm10, %v3569_v45, %v3571_v22  ;;  %v3575_v60 = vsel %vm3563_vm11, %v3557_v14, %v3574_v61 }
 0x34c   : > { %v3481_v50 = vadd.s32 %v10542_v2, %v10550_v17  ;;  %v3576_v43 = vsel %vm3562_vm10, %v3573_v37, %v3575_v60  ;;  %v10643_v12 = vmul.u32.u64.low %v10571_v49, %v3572_v42  ;;  %v10644_v53 = vmul.u32.u64.high %v10571_v49, %v3572_v42, %v10643_v12 }
 0x34d   : > { %vm7144_vm12 = vcmp.lt.s32.totalorder %v7143_v33, 0  ;;  %v10648_v38 = vmul.u32.u64.low %v10571_v49, %v3576_v43  ;;  %v10649_v21 = vmul.u32.u64.high %v10571_v49, %v3576_v43, %v10648_v38  ;;  %v7149_v54 = vadd.s32 4294967169, %v3637_v52 }
 0x34e   : > { %v3496_v31 = vsel %vm7144_vm12, 0, %v7143_v33  ;;  %v3514_v46 = vsel %vm10602_vm8, 0, %v3512_v11  ;;  %v3584_v2 = vmul.u32 %v10571_v49, %v3568_v0  ;;  %v3633_v17 = vand.u32 2147483647, %v10586_v34  ;;  %v10672_v11 = vld [vmem:[%s8067_s30 + $0x110] sm:$0xff] }
 0x34f   : > { %v3497_v27 = vsub.s32 32, %v3496_v31  ;;  %v3498_v56 = vshll.u32 %v10588_v7, %v3496_v31  ;;  %v3501_v15 = vsub.s32 4294967266, %v3496_v31  ;;  %v3643_v47 = vadd.s32 1, %v7149_v54 }
 0x350   : > { %vm3413_vm13 = vweird.f32 %v10357_v29  ;;  %v3587_v18 = vadd.s32 1, %v10644_v53  ;;  %vm3420_vm14 = vcmp.eq.s32.totalorder %v10620_v10, 2  ;;  %vm3586_vm15 = vc.u32 %v10649_v21, %v10643_v12 }
 0x351   : > { %v3499_v44 = vshrl.u32 %v3481_v50, %v3497_v27  ;;  %v3502_v5 = vadd.s32 127, %v3501_v15  ;;  %v3518_v13 = vadd.s32 3, %v3514_v46  ;;  %v3640_v20 = vand.u32 8388607, %v3633_v17 }
 0x352   : > { %v3588_v49 = vsel %vm3586_vm15, %v3587_v18, %v10644_v53  ;;  %vm3644_vm0 = vcmp.gt.s32.totalorder %v3643_v47, 0  ;;  %vm3416_vm1 = vcmp.lt.s32.totalorder %v10620_v10, 2  ;;  %vm3417_vm2 = vcmp.eq.s32.totalorder %v10620_v10, 0 }
 0x353   : > { %v7713_v7 = vpop.eup %7712  ;;  %v3500_v48 = vor.u32 %v3499_v44, %v3498_v56  ;;  %v3503_v23 = vshll.u32 %v3502_v5, 23  ;;  %v3589_v19 = vadd.s32 %v3588_v49, %v3584_v2  ;;  %v3645_v36 = vsel %vm3644_vm0, %v3643_v47, 0 }
 0x354   : > { %v7715_v41 = vpop.eup %7714  ;;  %v3421_v3 = vxor.u32 2147483648, %v7713_v7  ;;  %v3647_v59 = vand.u32 31, %v3645_v36  ;;  %v10668_v16 = vand.u32 3, %v3518_v13  ;;  %v3641_v63 = vor.u32 8388608, %v3640_v20 }
 0x355   : > { %v3418_v55 = vxor.u32 2147483648, %v7715_v41  ;;  %v3504_v58 = vor.u32 4788187, %v3503_v23  ;;  %v3507_v62 = vcvt.s32.f32 %v3500_v48  ;;  %v3590_v14 = vadd.s32 536870912, %v3589_v19 }
 0x356   : > { %v3422_v57 = vsel %vm3420_vm14, %v3421_v3, %v7715_v41  ;;  %v3648_v35 = vsub.s32 32, %v3647_v59  ;;  %v3650_v9 = vshll.u32 %v7945_v24, %v3647_v59  ;;  %v3653_v22 = vshll.u32 %v7946_v26, %v3647_v59 }
 0x357   : > { %v3419_v8 = vsel %vm3417_vm2, %v7713_v7, %v3418_v55  ;;  %v3505_v45 = vand.u32 2147483647, %v3504_v58  ;;  %v3591_v40 = vshrl.u32 %v3590_v14, 30  ;;  %v3656_v61 = vshll.u32 %v7947_v28, %v3647_v59 }
 0x358   : > { %v3423_v37 = vsel %vm3416_vm1, %v3419_v8, %v3422_v57  ;;  %v3651_v6 = vshrl.u32 %v7946_v26, %v3648_v35  ;;  %v3654_v42 = vshrl.u32 %v7947_v28, %v3648_v35  ;;  %v3646_v60 = vshrl.u32 %v3645_v36, 5 }
 0x359   : > { %v3424_v52 = vsel %vm3413_vm13, nan, %v3423_v37  ;;  %v3508_v33 = vmul.f32 %v3507_v62, %v3505_v45  ;;  %v3592_v0 = vshll.u32 %v3591_v40, 30  ;;  %v3657_v50 = vshrl.u32 %v7948_v30, %v3648_v35 }
 0x35a   : > { %v3659_v43 = vshll.u32 %v7948_v30, %v3647_v59  ;;  %v3737_v10 = vand.u32 2147483647, %v10672_v11  ;;  %6887 = vst [vmem:[%s8364_s17 + $0xf0] sm:$0xff] %v3424_v52  ;;  %v3660_v54 = vshrl.u32 %v7949_v32, %v3648_v35  ;;  %v3740_v29 = vand.u32 2139095040, %v10672_v11 }
 0x35b   : > { %v3509_v53 = vxor.u32 2147483648, %v3508_v33  ;;  %v10686_v38 = vsub.s32 %v3589_v19, %v3592_v0  ;;  %vm3531_vm4 = vcmp.lt.s32.totalorder %v10494_v4, 0  ;;  %v3649_v31 = vshrl.u32 %v7945_v24, %v3648_v35 }
 0x35c   : > { %v3652_v46 = vor.u32 %v3651_v6, %v3650_v9  ;;  %v3662_v2 = vshll.u32 %v7949_v32, %v3647_v59  ;;  %v3663_v27 = vshrl.u32 %v7950_v39, %v3648_v35  ;;  %v3655_v47 = vor.u32 %v3654_v42, %v3653_v22 }
 0x35d   : > { %v3510_v56 = vsel %vm3427_vm7, %v3509_v53, %v3508_v33  ;;  %v3595_v15 = vsub.s32 0, %v10686_v38  ;;  %v3658_v18 = vor.u32 %v3657_v50, %v3656_v61  ;;  %v3661_v5 = vor.u32 %v3660_v54, %v3659_v43 }
 0x35e   : > { %v3513_v44 = vsel %vm10602_vm8, %v10425_v51, %v3510_v56  ;;  %v3664_v13 = vor.u32 %v3663_v27, %v3662_v2  ;;  %vm3665_vm3 = vcmp.lt.s32.totalorder %v3646_v60, 1  ;;  %vm10702_vm5 = vcmp.le.f32.partialorder %v3529_v1, 0.7853982 }
 0x35f   : > { %7716 = vcosq.f32 %v3513_v44  ;;  %v7146_v20 = vmin.u32 %v3595_v15, %v10686_v38  ;;  %v3681_v7 = vshll.u32 %v3641_v63, 8  ;;  %v3741_v48 = vshrl.u32 %v3740_v29, 23 }
 0x360   : > { %7718 = vsinq.f32 %v3513_v44  ;;  %v3615_v23 = vsub.s32 4, %v3591_v40  ;;  %vm3667_vm6 = vcmp.lt.s32.totalorder %v3646_v60, 3  ;;  %vm3668_vm7 = vcmp.lt.s32.totalorder %v3646_v60, 4 }
 0x361   : > { %v3597_v25 = vclz %v7146_v20  ;;  %vm3666_vm8 = vcmp.lt.s32.totalorder %v3646_v60, 2  ;;  %v3669_v19 = vsel %vm3665_vm3, %v3649_v31, %v3652_v46  ;;  %v3673_v36 = vsel %vm3665_vm3, %v3652_v46, %v3655_v47 }
 0x362   : > { %v3670_v41 = vsel %vm3668_vm7, %v3658_v18, 2102212464  ;;  %v3674_v3 = vsel %vm3668_vm7, %v3661_v5, 920167782  ;;  %v3677_v1 = vsel %vm3665_vm3, %v3655_v47, %v3658_v18  ;;  %v3678_v59 = vsel %vm3668_vm7, %v3664_v13, 1326507024 }
 0x363   : > { %v7147_v55 = vadd.s32 4294967294, %v3597_v25  ;;  %v3671_v58 = vsel %vm3667_vm6, %v3655_v47, %v3670_v41  ;;  %v3675_v62 = vsel %vm3667_vm6, %v3658_v18, %v3674_v3  ;;  %v3679_v14 = vsel %vm3667_vm6, %v3661_v5, %v3678_v59 }
 0x364   : > { %v3585_v57 = vadd.s32 %v10643_v12, %v10649_v21  ;;  %v3676_v63 = vsel %vm3666_vm8, %v3673_v36, %v3675_v62  ;;  %v3680_v35 = vsel %vm3666_vm8, %v3677_v1, %v3679_v14  ;;  %v7153_v8 = vadd.s32 4294967169, %v3741_v48  ;;  %v10740_v36 = vld [vmem:[%s8067_s30 + $0x118] sm:$0xff] }
 0x365   : > { %vm7148_vm9 = vcmp.lt.s32.totalorder %v7147_v55, 0  ;;  %v3616_v45 = vsel %vm3531_vm4, %v3615_v23, %v3591_v40  ;;  %v10716_v9 = vmul.u32.u64.low %v3681_v7, %v3680_v35  ;;  %v10717_v37 = vmul.u32.u64.high %v3681_v7, %v3680_v35, %v10716_v9 }
 0x366   : > { %v3600_v6 = vsel %vm7148_vm9, 0, %v7147_v55  ;;  %v3672_v22 = vsel %vm3666_vm8, %v3669_v19, %v3671_v58  ;;  %v10720_v61 = vmul.u32.u64.low %v3681_v7, %v3676_v63  ;;  %v10721_v52 = vmul.u32.u64.high %v3681_v7, %v3676_v63, %v10720_v61 }
 0x367   : > { %v3601_v12 = vsub.s32 32, %v3600_v6  ;;  %v3602_v21 = vshll.u32 %v10686_v38, %v3600_v6  ;;  %v3605_v33 = vsub.s32 4294967266, %v3600_v6  ;;  %v3747_v0 = vadd.s32 1, %v7153_v8 }
 0x368   : > { %vm3517_vm10 = vweird.f32 %v10425_v51  ;;  %v3618_v40 = vsel %vm10702_vm5, 0, %v3616_v45  ;;  %v3688_v43 = vmul.u32 %v3681_v7, %v3672_v22  ;;  %vm3690_vm11 = vc.u32 %v10717_v37, %v10720_v61 }
 0x369   : > { %v3603_v42 = vshrl.u32 %v3585_v57, %v3601_v12  ;;  %v3606_v50 = vadd.s32 127, %v3605_v33  ;;  %vm3520_vm12 = vcmp.lt.s32.totalorder %v10668_v16, 2  ;;  %v3691_v60 = vadd.s32 1, %v10721_v52 }
 0x36a   : > { %v3744_v53 = vand.u32 8388607, %v3737_v10  ;;  %vm3748_vm13 = vcmp.gt.s32.totalorder %v3747_v0, 0  ;;  %vm3521_vm14 = vcmp.eq.s32.totalorder %v10668_v16, 0  ;;  %vm3524_vm15 = vcmp.eq.s32.totalorder %v10668_v16, 2 }
 0x36b   : > { %v3604_v38 = vor.u32 %v3603_v42, %v3602_v21  ;;  %v3607_v54 = vshll.u32 %v3606_v50, 23  ;;  %v3749_v29 = vsel %vm3748_vm13, %v3747_v0, 0  ;;  %v3622_v46 = vadd.s32 3, %v3618_v40 }
 0x36c   : > { %v7717_v31 = vpop.eup %7716  ;;  %v3692_v2 = vsel %vm3690_vm11, %v3691_v60, %v10721_v52  ;;  %v3751_v27 = vand.u32 31, %v3749_v29  ;;  %v3745_v13 = vor.u32 8388608, %v3744_v53  ;;  %v3750_v63 = vshrl.u32 %v3749_v29, 5 }
 0x36d   : > { %v7719_v56 = vpop.eup %7718  ;;  %v3525_v15 = vxor.u32 2147483648, %v7717_v31  ;;  %v3608_v47 = vor.u32 4788187, %v3607_v54  ;;  %v3611_v18 = vcvt.s32.f32 %v3604_v38  ;;  %v3693_v44 = vadd.s32 %v3692_v2, %v3688_v43 }
 0x36e   : > { %v3522_v5 = vxor.u32 2147483648, %v7719_v56  ;;  %v3752_v20 = vsub.s32 32, %v3751_v27  ;;  %v3754_v7 = vshll.u32 %v7945_v24, %v3751_v27  ;;  %v3757_v19 = vshll.u32 %v7946_v26, %v3751_v27 }
 0x36f   : > { %v3526_v48 = vsel %vm3524_vm15, %v3525_v15, %v7719_v56  ;;  %v3609_v23 = vand.u32 2147483647, %v3608_v47  ;;  %v3694_v25 = vadd.s32 536870912, %v3693_v44  ;;  %v3760_v59 = vshll.u32 %v7947_v28, %v3751_v27 }
 0x370   : > { %v3523_v41 = vsel %vm3521_vm14, %v7717_v31, %v3522_v5  ;;  %v3755_v3 = vshrl.u32 %v7946_v26, %v3752_v20  ;;  %v3758_v1 = vshrl.u32 %v7947_v28, %v3752_v20  ;;  %v3761_v14 = vshrl.u32 %v7948_v30, %v3752_v20 }
 0x371   : > { %v3527_v55 = vsel %vm3520_vm12, %v3523_v41, %v3526_v48  ;;  %v3612_v58 = vmul.f32 %v3611_v18, %v3609_v23  ;;  %v3695_v62 = vshrl.u32 %v3694_v25, 30  ;;  %v3763_v35 = vshll.u32 %v7948_v30, %v3751_v27 }
 0x372   : > { %v3528_v57 = vsel %vm3517_vm10, nan, %v3527_v55  ;;  %v10753_v8 = vshll.u32 %v3745_v13, 8  ;;  %v3753_v6 = vshrl.u32 %v7945_v24, %v3752_v20  ;;  %v3844_v22 = vand.u32 2139095040, %v10740_v36 }
 0x373   : > { %v3613_v45 = vxor.u32 2147483648, %v3612_v58  ;;  %v3696_v9 = vshll.u32 %v3695_v62, 30  ;;  %6888 = vst [vmem:[%s8364_s17 + $0xf8] sm:$0xff] %v3528_v57  ;;  %v3756_v16 = vor.u32 %v3755_v3, %v3754_v7  ;;  %v3764_v52 = vshrl.u32 %v7949_v32, %v3752_v20 }
 0x374   : > { %v3766_v12 = vshll.u32 %v7949_v32, %v3751_v27  ;;  %v3767_v51 = vshrl.u32 %v7950_v39, %v3752_v20  ;;  %v3759_v0 = vor.u32 %v3758_v1, %v3757_v19  ;;  %v3762_v40 = vor.u32 %v3761_v14, %v3760_v59 }
 0x375   : > { %v3614_v21 = vsel %vm3531_vm4, %v3613_v45, %v3612_v58  ;;  %v10763_v33 = vsub.s32 %v3693_v44, %v3696_v9  ;;  %v3765_v50 = vor.u32 %v3764_v52, %v3763_v35  ;;  %vm3769_vm0 = vcmp.lt.s32.totalorder %v3750_v63, 1 }
 0x376   : > { %v3617_v42 = vsel %vm10702_vm5, %v10494_v4, %v3614_v21  ;;  %v3768_v43 = vor.u32 %v3767_v51, %v3766_v12  ;;  %vm3771_vm1 = vcmp.lt.s32.totalorder %v3750_v63, 3  ;;  %v3845_v53 = vshrl.u32 %v3844_v22, 23  ;;  %v10809_v51 = vld [vmem:[%s8067_s30 + $0x120] sm:$0xff] }
 0x377   : > { %7720 = vcosq.f32 %v3617_v42  ;;  %v3699_v60 = vsub.s32 0, %v10763_v33  ;;  %vm3770_vm2 = vcmp.lt.s32.totalorder %v3750_v63, 2  ;;  %vm3772_vm3 = vcmp.lt.s32.totalorder %v3750_v63, 4 }
 0x378   : > { %7722 = vsinq.f32 %v3617_v42  ;;  %v3773_v38 = vsel %vm3769_vm0, %v3753_v6, %v3756_v16  ;;  %v3774_v29 = vsel %vm3772_vm3, %v3762_v40, 2102212464  ;;  %v3777_v31 = vsel %vm3769_vm0, %v3756_v16, %v3759_v0 }
 0x379   : > { %v7150_v54 = vmin.u32 %v3699_v60, %v10763_v33  ;;  %v3778_v2 = vsel %vm3772_vm3, %v3765_v50, 920167782  ;;  %v3775_v49 = vsel %vm3771_vm1, %v3759_v0, %v3774_v29  ;;  %v3781_v56 = vsel %vm3769_vm0, %v3759_v0, %v3762_v40 }
 0x37a   : > { %v3779_v27 = vsel %vm3771_vm1, %v3762_v40, %v3778_v2  ;;  %v3782_v15 = vsel %vm3772_vm3, %v3768_v43, 1326507024  ;;  %v3623_v47 = vand.u32 3, %v3622_v46  ;;  %v3719_v44 = vsub.s32 4, %v3695_v62 }
 0x37b   : > { %v3701_v18 = vclz %v7150_v54  ;;  %v3776_v5 = vsel %vm3770_vm2, %v3773_v38, %v3775_v49  ;;  %v3780_v13 = vsel %vm3770_vm2, %v3777_v31, %v3779_v27  ;;  %v3783_v20 = vsel %vm3771_vm1, %v3765_v50, %v3782_v15 }
 0x37c   : > { %v7157_v7 = vadd.s32 4294967169, %v3845_v53  ;;  %v3784_v23 = vsel %vm3770_vm2, %v3781_v56, %v3783_v20  ;;  %v10777_v25 = vmul.u32.u64.low %v10753_v8, %v3780_v13  ;;  %v10778_v19 = vmul.u32.u64.high %v10753_v8, %v3780_v13, %v10777_v25 }
 0x37d   : > { %v7151_v48 = vadd.s32 4294967294, %v3701_v18  ;;  %vm3635_vm4 = vcmp.lt.s32.totalorder %v10586_v34, 0  ;;  %v10783_v46 = vmul.u32.u64.low %v10753_v8, %v3784_v23  ;;  %v10784_v41 = vmul.u32.u64.high %v10753_v8, %v3784_v23, %v10783_v46 }
 0x37e   : > { %v3841_v3 = vand.u32 2147483647, %v10740_v36  ;;  %vm3621_vm5 = vweird.f32 %v10494_v4  ;;  %v3689_v1 = vadd.s32 %v10720_v61, %v10717_v37  ;;  %v3720_v59 = vsel %vm3635_vm4, %v3719_v44, %v3695_v62 }
 0x37f   : > { %vm7152_vm6 = vcmp.lt.s32.totalorder %v7151_v48, 0  ;;  %v3851_v55 = vadd.s32 1, %v7157_v7  ;;  %vm3624_vm7 = vcmp.lt.s32.totalorder %v3623_v47, 2  ;;  %vm10794_vm8 = vcmp.le.f32.partialorder %v3633_v17, 0.7853982 }
 0x380   : > { %v3704_v14 = vsel %vm7152_vm6, 0, %v7151_v48  ;;  %v3792_v57 = vmul.u32 %v10753_v8, %v3776_v5  ;;  %v3795_v37 = vadd.s32 1, %v10778_v19  ;;  %v3722_v61 = vsel %vm10794_vm8, 0, %v3720_v59 }
 0x381   : > { %v3705_v63 = vsub.s32 32, %v3704_v14  ;;  %v3706_v35 = vshll.u32 %v10763_v33, %v3704_v14  ;;  %v3709_v45 = vsub.s32 4294967266, %v3704_v14  ;;  %vm3794_vm9 = vc.u32 %v10784_v41, %v10777_v25 }
 0x382   : > { %v3848_v17 = vand.u32 8388607, %v3841_v3  ;;  %vm3852_vm10 = vcmp.gt.s32.totalorder %v3851_v55, 0  ;;  %v3796_v8 = vsel %vm3794_vm9, %v3795_v37, %v10778_v19  ;;  %vm3625_vm11 = vcmp.eq.s32.totalorder %v3623_v47, 0 }
 0x383   : > { %v3707_v62 = vshrl.u32 %v3689_v1, %v3705_v63  ;;  %v3710_v9 = vadd.s32 127, %v3709_v45  ;;  %v3853_v6 = vsel %vm3852_vm10, %v3851_v55, 0  ;;  %vm3628_vm12 = vcmp.eq.s32.totalorder %v3623_v47, 2 }
 0x384   : > { %v7721_v22 = vpop.eup %7720  ;;  %v3797_v16 = vadd.s32 %v3796_v8, %v3792_v57  ;;  %v3855_v52 = vand.u32 31, %v3853_v6  ;;  %v10811_v40 = vadd.s32 3, %v3722_v61  ;;  %v3849_v43 = vor.u32 8388608, %v3848_v17 }
 0x385   : > { %v7723_v12 = vpop.eup %7722  ;;  %v3629_v21 = vxor.u32 2147483648, %v7721_v22  ;;  %v3708_v33 = vor.u32 %v3707_v62, %v3706_v35  ;;  %v3711_v0 = vshll.u32 %v3710_v9, 23  ;;  %v3945_v29 = vand.u32 2147483647, %v10809_v51 }
 0x386   : > { %v3626_v42 = vxor.u32 2147483648, %v7723_v12  ;;  %v3798_v50 = vadd.s32 536870912, %v3797_v16  ;;  %v3856_v60 = vsub.s32 32, %v3855_v52  ;;  %v3854_v49 = vshrl.u32 %v3853_v6, 5 }
 0x387   : > { %v3630_v53 = vsel %vm3628_vm12, %v3629_v21, %v7723_v12  ;;  %v3712_v38 = vor.u32 4788187, %v3711_v0  ;;  %v3715_v54 = vcvt.s32.f32 %v3708_v33  ;;  %v3948_v27 = vand.u32 2139095040, %v10809_v51 }
 0x388   : > { %v3627_v31 = vsel %vm3625_vm11, %v7721_v22, %v3626_v42  ;;  %v3799_v2 = vshrl.u32 %v3798_v50, 30  ;;  %v3858_v18 = vshll.u32 %v7945_v24, %v3855_v52  ;;  %v3861_v44 = vshll.u32 %v7946_v26, %v3855_v52 }
 0x389   : > { %v3631_v56 = vsel %vm3624_vm7, %v3627_v31, %v3630_v53  ;;  %v3713_v15 = vand.u32 2147483647, %v3712_v38  ;;  %v3859_v20 = vshrl.u32 %v7946_v26, %v3856_v60  ;;  %v3862_v7 = vshrl.u32 %v7947_v28, %v3856_v60 }
 0x38a   : > { %v3632_v5 = vsel %vm3621_vm5, nan, %v3631_v56  ;;  %v3800_v13 = vshll.u32 %v3799_v2, 30  ;;  %v3864_v23 = vshll.u32 %v7947_v28, %v3855_v52  ;;  %v3865_v19 = vshrl.u32 %v7948_v30, %v3856_v60 }
 0x38b   : > { %v3716_v48 = vmul.f32 %v3715_v54, %v3713_v15  ;;  %v3867_v47 = vshll.u32 %v7948_v30, %v3855_v52  ;;  %6889 = vst [vmem:[%s8364_s17 + $0x100] sm:$0xff] %v3632_v5  ;;  %v3868_v1 = vshrl.u32 %v7949_v32, %v3856_v60  ;;  %v3870_v4 = vshll.u32 %v7949_v32, %v3855_v52 }
 0x38c   : > { %v10827_v46 = vsub.s32 %v3797_v16, %v3800_v13  ;;  %v10831_v59 = vshll.u32 %v3849_v43, 8  ;;  %v3793_v14 = vadd.s32 %v10777_v25, %v10784_v41  ;;  %v3871_v57 = vshrl.u32 %v7950_v39, %v3856_v60 }
 0x38d   : > { %v3717_v55 = vxor.u32 2147483648, %v3716_v48  ;;  %v3949_v63 = vshrl.u32 %v3948_v27, 23  ;;  %vm3739_vm13 = vcmp.lt.s32.totalorder %v10672_v11, 0  ;;  %v3857_v45 = vshrl.u32 %v7945_v24, %v3856_v60 }
 0x38e   : > { %v3803_v35 = vsub.s32 0, %v10827_v46  ;;  %v3860_v37 = vor.u32 %v3859_v20, %v3858_v18  ;;  %v3863_v61 = vor.u32 %v3862_v7, %v3861_v44  ;;  %v3866_v62 = vor.u32 %v3865_v19, %v3864_v23 }
 0x38f   : > { %v3718_v17 = vsel %vm3635_vm4, %v3717_v55, %v3716_v48  ;;  %v3869_v9 = vor.u32 %v3868_v1, %v3867_v47  ;;  %vm3873_vm14 = vcmp.lt.s32.totalorder %v3854_v49, 1  ;;  %v3872_v8 = vor.u32 %v3871_v57, %v3870_v4 }
 0x390   : > { %v3721_v25 = vsel %vm10794_vm8, %v10586_v34, %v3718_v17  ;;  %v7154_v41 = vmin.u32 %v3803_v35, %v10827_v46  ;;  %vm3876_vm15 = vcmp.lt.s32.totalorder %v3854_v49, 4  ;;  %vm3874_vm0 = vcmp.lt.s32.totalorder %v3854_v49, 2 }
 0x391   : > { %7724 = vcosq.f32 %v3721_v25  ;;  %vm3875_vm1 = vcmp.lt.s32.totalorder %v3854_v49, 3  ;;  %v3878_v6 = vsel %vm3876_vm15, %v3866_v62, 2102212464  ;;  %v3877_v16 = vsel %vm3873_vm14, %v3857_v45, %v3860_v37 }
 0x392   : > { %7726 = vsinq.f32 %v3721_v25  ;;  %v3805_v22 = vclz %v7154_v41  ;;  %v3881_v52 = vsel %vm3873_vm14, %v3860_v37, %v3863_v61  ;;  %v3823_v12 = vsub.s32 4, %v3799_v2 }
 0x393   : > { %v3879_v21 = vsel %vm3875_vm1, %v3863_v61, %v3878_v6  ;;  %v3882_v33 = vsel %vm3876_vm15, %v3869_v9, 920167782  ;;  %v3885_v58 = vsel %vm3873_vm14, %v3863_v61, %v3866_v62  ;;  %v3886_v50 = vsel %vm3876_vm15, %v3872_v8, 1326507024 }
 0x394   : > { %v7155_v0 = vadd.s32 4294967294, %v3805_v22  ;;  %v3883_v42 = vsel %vm3875_vm1, %v3866_v62, %v3882_v33  ;;  %v3952_v43 = vand.u32 8388607, %v3945_v29  ;;  %v3880_v60 = vsel %vm3874_vm0, %v3877_v16, %v3879_v21 }
 0x395   : > { %v3884_v53 = vsel %vm3874_vm0, %v3881_v52, %v3883_v42  ;;  %v3887_v38 = vsel %vm3875_vm1, %v3869_v9, %v3886_v50  ;;  %v7161_v54 = vadd.s32 4294967169, %v3949_v63  ;;  %v3824_v18 = vsel %vm3739_vm13, %v3823_v12, %v3799_v2 }
 0x396   : > { %vm7156_vm2 = vcmp.lt.s32.totalorder %v7155_v0, 0  ;;  %v3888_v31 = vsel %vm3874_vm0, %v3885_v58, %v3887_v38  ;;  %v10857_v27 = vmul.u32.u64.low %v10831_v59, %v3884_v53  ;;  %v10858_v56 = vmul.u32.u64.high %v10831_v59, %v3884_v53, %v10857_v27 }
 0x397   : > { %v3808_v15 = vsel %vm7156_vm2, 0, %v7155_v0  ;;  %v10864_v44 = vmul.u32.u64.low %v10831_v59, %v3888_v31  ;;  %v10865_v5 = vmul.u32.u64.high %v10831_v59, %v3888_v31, %v10864_v44  ;;  %v3955_v48 = vadd.s32 1, %v7161_v54 }
 0x398   : > { %v3809_v13 = vsub.s32 32, %v3808_v15  ;;  %v3810_v20 = vshll.u32 %v10827_v46, %v3808_v15  ;;  %v3813_v7 = vsub.s32 4294967266, %v3808_v15  ;;  %v3727_v49 = vand.u32 3, %v10811_v40 }
 0x399   : > { %vm10871_vm3 = vcmp.le.f32.partialorder %v3737_v10, 0.7853982  ;;  %v3896_v19 = vmul.u32 %v10831_v59, %v3880_v60  ;;  %v3899_v1 = vadd.s32 1, %v10858_v56  ;;  %vm3956_vm4 = vcmp.gt.s32.totalorder %v3955_v48, 0 }
 0x39a   : > { %v3811_v2 = vshrl.u32 %v3793_v14, %v3809_v13  ;;  %v3814_v47 = vadd.s32 127, %v3813_v7  ;;  %v3826_v46 = vsel %vm10871_vm3, 0, %v3824_v18  ;;  %vm3898_vm5 = vc.u32 %v10865_v5, %v10857_v27 }
 0x39b   : > { %v3953_v40 = vor.u32 8388608, %v3952_v43  ;;  %v3957_v4 = vsel %vm3956_vm4, %v3955_v48, 0  ;;  %v3900_v57 = vsel %vm3898_vm5, %v3899_v1, %v10858_v56  ;;  %vm3725_vm6 = vweird.f32 %v10586_v34  ;;  %v10901_v56 = vld [vmem:[%s8067_s30 + $0x128] sm:$0xff] }
 0x39c   : > { %v3812_v55 = vor.u32 %v3811_v2, %v3810_v20  ;;  %v3815_v10 = vshll.u32 %v3814_v47, 23  ;;  %v10882_v63 = vshrl.u32 %v3957_v4, 5  ;;  %vm3728_vm7 = vcmp.lt.s32.totalorder %v3727_v49, 2 }
 0x39d   : > { %v3901_v59 = vadd.s32 %v3900_v57, %v3896_v19  ;;  %v3959_v14 = vand.u32 31, %v3957_v4  ;;  %vm3729_vm8 = vcmp.eq.s32.totalorder %v3727_v49, 0  ;;  %vm3732_vm9 = vcmp.eq.s32.totalorder %v3727_v49, 2 }
 0x39e   : > { %v7725_v35 = vpop.eup %7724  ;;  %v3816_v45 = vor.u32 4788187, %v3815_v10  ;;  %v3819_v37 = vcvt.s32.f32 %v3812_v55  ;;  %v3830_v62 = vadd.s32 3, %v3826_v46  ;;  %vm3977_vm10 = vcmp.lt.s32.totalorder %v10882_v63, 1 }
 0x39f   : > { %v7727_v61 = vpop.eup %7726  ;;  %v3733_v17 = vxor.u32 2147483648, %v7725_v35  ;;  %v3902_v9 = vadd.s32 536870912, %v3901_v59  ;;  %v3960_v25 = vsub.s32 32, %v3959_v14  ;;  %v10886_v6 = vshll.u32 %v3953_v40, 8 }
 0x3a0   : > { %v3730_v41 = vxor.u32 2147483648, %v7727_v61  ;;  %v3817_v8 = vand.u32 2147483647, %v3816_v45  ;;  %v3962_v52 = vshll.u32 %v7945_v24, %v3959_v14  ;;  %vm3843_vm11 = vcmp.lt.s32.totalorder %v10740_v36, 0 }
 0x3a1   : > { %v3734_v22 = vsel %vm3732_vm9, %v3733_v17, %v7727_v61  ;;  %v3903_v16 = vshrl.u32 %v3902_v9, 30  ;;  %v3963_v12 = vshrl.u32 %v7946_v26, %v3960_v25  ;;  %v3965_v58 = vshll.u32 %v7946_v26, %v3959_v14 }
 0x3a2   : > { %v3731_v21 = vsel %vm3729_vm8, %v7725_v35, %v3730_v41  ;;  %v3820_v33 = vmul.f32 %v3819_v37, %v3817_v8  ;;  %v3966_v0 = vshrl.u32 %v7947_v28, %v3960_v25  ;;  %v3968_v43 = vshll.u32 %v7947_v28, %v3959_v14 }
 0x3a3   : > { %v3735_v42 = vsel %vm3728_vm7, %v3731_v21, %v3734_v22  ;;  %v3904_v50 = vshll.u32 %v3903_v16, 30  ;;  %v3969_v60 = vshrl.u32 %v7948_v30, %v3960_v25  ;;  %v3927_v54 = vsub.s32 4, %v3903_v16 }
 0x3a4   : > { %v3736_v53 = vsel %vm3725_vm6, nan, %v3735_v42  ;;  %v3821_v38 = vxor.u32 2147483648, %v3820_v33  ;;  %v3961_v31 = vshrl.u32 %v7945_v24, %v3960_v25  ;;  %v3964_v18 = vor.u32 %v3963_v12, %v3962_v52 }
 0x3a5   : > { %v10903_v15 = vsub.s32 %v3901_v59, %v3904_v50  ;;  %v3971_v44 = vshll.u32 %v7948_v30, %v3959_v14  ;;  %v3972_v13 = vshrl.u32 %v7949_v32, %v3960_v25  ;;  %6890 = vst [vmem:[%s8364_s17 + $0x108] sm:$0xff] %v3736_v53  ;;  %v3967_v7 = vor.u32 %v3966_v0, %v3965_v58 }
 0x3a6   : > { %v3822_v20 = vsel %vm3739_vm13, %v3821_v38, %v3820_v33  ;;  %v3974_v34 = vshll.u32 %v7949_v32, %v3959_v14  ;;  %v3975_v48 = vshrl.u32 %v7950_v39, %v3960_v25  ;;  %vm10917_vm12 = vcmp.le.f32.partialorder %v3841_v3, 0.7853982 }
 0x3a7   : > { %v3825_v49 = vsel %vm10871_vm3, %v10672_v11, %v3822_v20  ;;  %v3907_v2 = vsub.s32 0, %v10903_v15  ;;  %v3970_v47 = vor.u32 %v3969_v60, %v3968_v43  ;;  %v3973_v1 = vor.u32 %v3972_v13, %v3971_v44 }
 0x3a8   : > { %7728 = vcosq.f32 %v3825_v49  ;;  %v3976_v46 = vor.u32 %v3975_v48, %v3974_v34  ;;  %vm3980_vm13 = vcmp.lt.s32.totalorder %v10882_v63, 4  ;;  %v4052_v40 = vand.u32 2139095040, %v10901_v56 }
 0x3a9   : > { %7730 = vsinq.f32 %v3825_v49  ;;  %v7158_v23 = vmin.u32 %v3907_v2, %v10903_v15  ;;  %vm3978_vm14 = vcmp.lt.s32.totalorder %v10882_v63, 2  ;;  %vm3979_vm15 = vcmp.lt.s32.totalorder %v10882_v63, 3 }
 0x3aa   : > { %v3981_v3 = vsel %vm3977_vm10, %v3961_v31, %v3964_v18  ;;  %v3982_v4 = vsel %vm3980_vm13, %v3970_v47, 2102212464  ;;  %v3985_v55 = vsel %vm3977_vm10, %v3964_v18, %v3967_v7  ;;  %v3986_v10 = vsel %vm3980_vm13, %v3973_v1, 920167782 }
 0x3ab   : > { %v10935_v57 = vand.u32 3, %v3830_v62  ;;  %v3909_v59 = vclz %v7158_v23  ;;  %v3928_v14 = vsel %vm3843_vm11, %v3927_v54, %v3903_v16  ;;  %v3989_v35 = vsel %vm3977_vm10, %v3967_v7, %v3970_v47 }
 0x3ac   : > { %v3983_v45 = vsel %vm3979_vm15, %v3967_v7, %v3982_v4  ;;  %v3987_v37 = vsel %vm3979_vm15, %v3970_v47, %v3986_v10  ;;  %v3990_v61 = vsel %vm3980_vm13, %v3976_v46, 1326507024  ;;  %v4053_v17 = vshrl.u32 %v4052_v40, 23 }
 0x3ad   : > { %v7159_v9 = vadd.s32 4294967294, %v3909_v59  ;;  %v3984_v62 = vsel %vm3978_vm14, %v3981_v3, %v3983_v45  ;;  %v3988_v25 = vsel %vm3978_vm14, %v3985_v55, %v3987_v37  ;;  %v3991_v41 = vsel %vm3979_vm15, %v3973_v1, %v3990_v61 }
 0x3ae   : > { %v3897_v8 = vadd.s32 %v10857_v27, %v10865_v5  ;;  %v3992_v22 = vsel %vm3978_vm14, %v3989_v35, %v3991_v41  ;;  %v10958_v16 = vmul.u32.u64.low %v10886_v6, %v3988_v25  ;;  %v10959_v52 = vmul.u32.u64.high %v10886_v6, %v3988_v25, %v10958_v16 }
 0x3af   : > { %vm7160_vm0 = vcmp.lt.s32.totalorder %v7159_v9, 0  ;;  %v10963_v12 = vmul.u32.u64.low %v10886_v6, %v3992_v22  ;;  %v10964_v21 = vmul.u32.u64.high %v10886_v6, %v3992_v22, %v10963_v12  ;;  %v7165_v33 = vadd.s32 4294967169, %v4053_v17 }
 0x3b0   : > { %v3912_v58 = vsel %vm7160_vm0, 0, %v7159_v9  ;;  %v3930_v0 = vsel %vm10917_vm12, 0, %v3928_v14  ;;  %v4000_v27 = vmul.u32 %v10886_v6, %v3984_v62  ;;  %v4049_v5 = vand.u32 2147483647, %v10901_v56  ;;  %v10987_v14 = vld [vmem:[%s8067_s30 + $0x130] sm:$0xff] }
 0x3b1   : > { %v3913_v63 = vsub.s32 32, %v3912_v58  ;;  %v3914_v42 = vshll.u32 %v10903_v15, %v3912_v58  ;;  %v3917_v50 = vsub.s32 4294967266, %v3912_v58  ;;  %v4059_v43 = vadd.s32 1, %v7165_v33 }
 0x3b2   : > { %vm3829_vm1 = vweird.f32 %v10672_v11  ;;  %v4003_v60 = vadd.s32 1, %v10959_v52  ;;  %vm3836_vm2 = vcmp.eq.s32.totalorder %v10935_v57, 2  ;;  %vm4002_vm3 = vc.u32 %v10964_v21, %v10958_v16 }
 0x3b3   : > { %v3915_v53 = vshrl.u32 %v3897_v8, %v3913_v63  ;;  %v3918_v38 = vadd.s32 127, %v3917_v50  ;;  %v3934_v54 = vadd.s32 3, %v3930_v0  ;;  %v4056_v31 = vand.u32 8388607, %v4049_v5 }
 0x3b4   : > { %v4004_v6 = vsel %vm4002_vm3, %v4003_v60, %v10959_v52  ;;  %vm4060_vm4 = vcmp.gt.s32.totalorder %v4059_v43, 0  ;;  %vm3832_vm5 = vcmp.lt.s32.totalorder %v10935_v57, 2  ;;  %vm3833_vm6 = vcmp.eq.s32.totalorder %v10935_v57, 0 }
 0x3b5   : > { %v7729_v15 = vpop.eup %7728  ;;  %v3916_v18 = vor.u32 %v3915_v53, %v3914_v42  ;;  %v3919_v44 = vshll.u32 %v3918_v38, 23  ;;  %v4005_v13 = vadd.s32 %v4004_v6, %v4000_v27  ;;  %v4061_v20 = vsel %vm4060_vm4, %v4059_v43, 0 }
 0x3b6   : > { %v7731_v7 = vpop.eup %7730  ;;  %v3837_v34 = vxor.u32 2147483648, %v7729_v15  ;;  %v4063_v48 = vand.u32 31, %v4061_v20  ;;  %v10983_v40 = vand.u32 3, %v3934_v54  ;;  %v4057_v23 = vor.u32 8388608, %v4056_v31 }
 0x3b7   : > { %v3834_v49 = vxor.u32 2147483648, %v7731_v7  ;;  %v3920_v2 = vor.u32 4788187, %v3919_v44  ;;  %v3923_v47 = vcvt.s32.f32 %v3916_v18  ;;  %v4006_v1 = vadd.s32 536870912, %v4005_v13 }
 0x3b8   : > { %v3838_v46 = vsel %vm3836_vm2, %v3837_v34, %v7731_v7  ;;  %v4064_v3 = vsub.s32 32, %v4063_v48  ;;  %v4066_v59 = vshll.u32 %v7945_v24, %v4063_v48  ;;  %v4069_v37 = vshll.u32 %v7946_v26, %v4063_v48 }
 0x3b9   : > { %v3835_v4 = vsel %vm3833_vm6, %v7729_v15, %v3834_v49  ;;  %v3921_v55 = vand.u32 2147483647, %v3920_v2  ;;  %v4007_v10 = vshrl.u32 %v4006_v1, 30  ;;  %v4072_v61 = vshll.u32 %v7947_v28, %v4063_v48 }
 0x3ba   : > { %v3839_v35 = vsel %vm3832_vm5, %v3835_v4, %v3838_v46  ;;  %v4067_v45 = vshrl.u32 %v7946_v26, %v4064_v3  ;;  %v4070_v25 = vshrl.u32 %v7947_v28, %v4064_v3  ;;  %v4062_v41 = vshrl.u32 %v4061_v20, 5 }
 0x3bb   : > { %v3840_v17 = vsel %vm3829_vm1, nan, %v3839_v35  ;;  %v3924_v9 = vmul.f32 %v3923_v47, %v3921_v55  ;;  %v4008_v62 = vshll.u32 %v4007_v10, 30  ;;  %v4073_v8 = vshrl.u32 %v7948_v30, %v4064_v3 }
 0x3bc   : > { %v4075_v22 = vshll.u32 %v7948_v30, %v4063_v48  ;;  %v4153_v57 = vand.u32 2147483647, %v10987_v14  ;;  %6891 = vst [vmem:[%s8364_s17 + $0x110] sm:$0xff] %v3840_v17  ;;  %v4076_v33 = vshrl.u32 %v7949_v32, %v4064_v3  ;;  %v4156_v11 = vand.u32 2139095040, %v10987_v14 }
 0x3bd   : > { %v3925_v52 = vxor.u32 2147483648, %v3924_v9  ;;  %v11001_v12 = vsub.s32 %v4005_v13, %v4008_v62  ;;  %vm3947_vm7 = vcmp.lt.s32.totalorder %v10809_v51, 0  ;;  %v4065_v58 = vshrl.u32 %v7945_v24, %v4064_v3 }
 0x3be   : > { %v4068_v0 = vor.u32 %v4067_v45, %v4066_v59  ;;  %v4078_v27 = vshll.u32 %v7949_v32, %v4063_v48  ;;  %v4079_v63 = vshrl.u32 %v7950_v39, %v4064_v3  ;;  %v4071_v43 = vor.u32 %v4070_v25, %v4069_v37 }
 0x3bf   : > { %v3926_v42 = vsel %vm3843_vm11, %v3925_v52, %v3924_v9  ;;  %v4011_v50 = vsub.s32 0, %v11001_v12  ;;  %v4074_v60 = vor.u32 %v4073_v8, %v4072_v61  ;;  %v4077_v38 = vor.u32 %v4076_v33, %v4075_v22 }
 0x3c0   : > { %v3929_v53 = vsel %vm10917_vm12, %v10740_v36, %v3926_v42  ;;  %v4080_v54 = vor.u32 %v4079_v63, %v4078_v27  ;;  %vm4081_vm8 = vcmp.lt.s32.totalorder %v4062_v41, 1  ;;  %vm11017_vm9 = vcmp.le.f32.partialorder %v3945_v29, 0.7853982 }
 0x3c1   : > { %7732 = vcosq.f32 %v3929_v53  ;;  %v7162_v31 = vmin.u32 %v4011_v50, %v11001_v12  ;;  %v4097_v15 = vshll.u32 %v4057_v23, 8  ;;  %v4157_v18 = vshrl.u32 %v4156_v11, 23 }
 0x3c2   : > { %7734 = vsinq.f32 %v3929_v53  ;;  %v4031_v44 = vsub.s32 4, %v4007_v10  ;;  %vm4083_vm10 = vcmp.lt.s32.totalorder %v4062_v41, 3  ;;  %vm4084_vm11 = vcmp.lt.s32.totalorder %v4062_v41, 4 }
 0x3c3   : > { %v4013_v19 = vclz %v7162_v31  ;;  %vm4082_vm12 = vcmp.lt.s32.totalorder %v4062_v41, 2  ;;  %v4085_v13 = vsel %vm4081_vm8, %v4065_v58, %v4068_v0  ;;  %v4089_v20 = vsel %vm4081_vm8, %v4068_v0, %v4071_v43 }
 0x3c4   : > { %v4086_v7 = vsel %vm4084_vm11, %v4074_v60, 2102212464  ;;  %v4090_v34 = vsel %vm4084_vm11, %v4077_v38, 920167782  ;;  %v4093_v29 = vsel %vm4081_vm8, %v4071_v43, %v4074_v60  ;;  %v4094_v48 = vsel %vm4084_vm11, %v4080_v54, 1326507024 }
 0x3c5   : > { %v7163_v49 = vadd.s32 4294967294, %v4013_v19  ;;  %v4087_v2 = vsel %vm4083_vm10, %v4071_v43, %v4086_v7  ;;  %v4091_v47 = vsel %vm4083_vm10, %v4074_v60, %v4090_v34  ;;  %v4095_v1 = vsel %vm4083_vm10, %v4077_v38, %v4094_v48 }
 0x3c6   : > { %v4001_v46 = vadd.s32 %v10958_v16, %v10964_v21  ;;  %v4092_v23 = vsel %vm4082_vm12, %v4089_v20, %v4091_v47  ;;  %v4096_v3 = vsel %vm4082_vm12, %v4093_v29, %v4095_v1  ;;  %v7169_v4 = vadd.s32 4294967169, %v4157_v18  ;;  %v11055_v20 = vld [vmem:[%s8067_s30 + $0x138] sm:$0xff] }
 0x3c7   : > { %vm7164_vm13 = vcmp.lt.s32.totalorder %v7163_v49, 0  ;;  %v4032_v55 = vsel %vm3947_vm7, %v4031_v44, %v4007_v10  ;;  %v11031_v59 = vmul.u32.u64.low %v4097_v15, %v4096_v3  ;;  %v11032_v35 = vmul.u32.u64.high %v4097_v15, %v4096_v3, %v11031_v59 }
 0x3c8   : > { %v4016_v45 = vsel %vm7164_vm13, 0, %v7163_v49  ;;  %v4088_v37 = vsel %vm4082_vm12, %v4085_v13, %v4087_v2  ;;  %v11035_v61 = vmul.u32.u64.low %v4097_v15, %v4092_v23  ;;  %v11036_v17 = vmul.u32.u64.high %v4097_v15, %v4092_v23, %v11035_v61 }
 0x3c9   : > { %v4017_v16 = vsub.s32 32, %v4016_v45  ;;  %v4018_v21 = vshll.u32 %v11001_v12, %v4016_v45  ;;  %v4021_v9 = vsub.s32 4294967266, %v4016_v45  ;;  %v4163_v62 = vadd.s32 1, %v7169_v4 }
 0x3ca   : > { %vm3933_vm14 = vweird.f32 %v10740_v36  ;;  %v4034_v10 = vsel %vm11017_vm9, 0, %v4032_v55  ;;  %v4104_v22 = vmul.u32 %v4097_v15, %v4088_v37  ;;  %vm4106_vm15 = vc.u32 %v11032_v35, %v11035_v61 }
 0x3cb   : > { %v4019_v25 = vshrl.u32 %v4001_v46, %v4017_v16  ;;  %v4022_v8 = vadd.s32 127, %v4021_v9  ;;  %vm3936_vm0 = vcmp.lt.s32.totalorder %v10983_v40, 2  ;;  %v4107_v41 = vadd.s32 1, %v11036_v17 }
 0x3cc   : > { %v4160_v52 = vand.u32 8388607, %v4153_v57  ;;  %vm4164_vm1 = vcmp.gt.s32.totalorder %v4163_v62, 0  ;;  %vm3937_vm2 = vcmp.eq.s32.totalorder %v10983_v40, 0  ;;  %vm3940_vm3 = vcmp.eq.s32.totalorder %v10983_v40, 2 }
 0x3cd   : > { %v4020_v12 = vor.u32 %v4019_v25, %v4018_v21  ;;  %v4023_v33 = vshll.u32 %v4022_v8, 23  ;;  %v4165_v11 = vsel %vm4164_vm1, %v4163_v62, 0  ;;  %v4038_v0 = vadd.s32 3, %v4034_v10 }
 0x3ce   : > { %v7733_v58 = vpop.eup %7732  ;;  %v4108_v27 = vsel %vm4106_vm15, %v4107_v41, %v11036_v17  ;;  %v4167_v63 = vand.u32 31, %v4165_v11  ;;  %v4161_v54 = vor.u32 8388608, %v4160_v52  ;;  %v4166_v23 = vshrl.u32 %v4165_v11, 5 }
 0x3cf   : > { %v7735_v42 = vpop.eup %7734  ;;  %v3941_v50 = vxor.u32 2147483648, %v7733_v58  ;;  %v4024_v43 = vor.u32 4788187, %v4023_v33  ;;  %v4027_v60 = vcvt.s32.f32 %v4020_v12  ;;  %v4109_v53 = vadd.s32 %v4108_v27, %v4104_v22 }
 0x3d0   : > { %v3938_v38 = vxor.u32 2147483648, %v7735_v42  ;;  %v4168_v31 = vsub.s32 32, %v4167_v63  ;;  %v4170_v15 = vshll.u32 %v7945_v24, %v4167_v63  ;;  %v4173_v13 = vshll.u32 %v7946_v26, %v4167_v63 }
 0x3d1   : > { %v3942_v18 = vsel %vm3940_vm3, %v3941_v50, %v7735_v42  ;;  %v4025_v44 = vand.u32 2147483647, %v4024_v43  ;;  %v4110_v19 = vadd.s32 536870912, %v4109_v53  ;;  %v4176_v48 = vshll.u32 %v7947_v28, %v4167_v63 }
 0x3d2   : > { %v3939_v7 = vsel %vm3937_vm2, %v7733_v58, %v3938_v38  ;;  %v4171_v34 = vshrl.u32 %v7946_v26, %v4168_v31  ;;  %v4174_v29 = vshrl.u32 %v7947_v28, %v4168_v31  ;;  %v4177_v1 = vshrl.u32 %v7948_v30, %v4168_v31 }
 0x3d3   : > { %v3943_v49 = vsel %vm3936_vm0, %v3939_v7, %v3942_v18  ;;  %v4028_v2 = vmul.f32 %v4027_v60, %v4025_v44  ;;  %v4111_v47 = vshrl.u32 %v4110_v19, 30  ;;  %v4179_v3 = vshll.u32 %v7948_v30, %v4167_v63 }
 0x3d4   : > { %v3944_v46 = vsel %vm3933_vm14, nan, %v3943_v49  ;;  %v11068_v4 = vshll.u32 %v4161_v54, 8  ;;  %v4169_v45 = vshrl.u32 %v7945_v24, %v4168_v31  ;;  %v4260_v37 = vand.u32 2139095040, %v11055_v20 }
 0x3d5   : > { %v4029_v55 = vxor.u32 2147483648, %v4028_v2  ;;  %v4112_v59 = vshll.u32 %v4111_v47, 30  ;;  %6892 = vst [vmem:[%s8364_s17 + $0x118] sm:$0xff] %v3944_v46  ;;  %v4172_v40 = vor.u32 %v4171_v34, %v4170_v15  ;;  %v4180_v17 = vshrl.u32 %v7949_v32, %v4168_v31 }
 0x3d6   : > { %v4182_v16 = vshll.u32 %v7949_v32, %v4167_v63  ;;  %v4183_v36 = vshrl.u32 %v7950_v39, %v4168_v31  ;;  %v4175_v62 = vor.u32 %v4174_v29, %v4173_v13  ;;  %v4178_v10 = vor.u32 %v4177_v1, %v4176_v48 }
 0x3d7   : > { %v4030_v21 = vsel %vm3947_vm7, %v4029_v55, %v4028_v2  ;;  %v11078_v9 = vsub.s32 %v4109_v53, %v4112_v59  ;;  %v4181_v8 = vor.u32 %v4180_v17, %v4179_v3  ;;  %vm4185_vm4 = vcmp.lt.s32.totalorder %v4166_v23, 1 }
 0x3d8   : > { %v4033_v25 = vsel %vm11017_vm9, %v10809_v51, %v4030_v21  ;;  %v4184_v22 = vor.u32 %v4183_v36, %v4182_v16  ;;  %vm4187_vm5 = vcmp.lt.s32.totalorder %v4166_v23, 3  ;;  %v4261_v52 = vshrl.u32 %v4260_v37, 23  ;;  %v11124_v36 = vld [vmem:[%s8067_s30 + $0x140] sm:$0xff] }
 0x3d9   : > { %7736 = vcosq.f32 %v4033_v25  ;;  %v4115_v41 = vsub.s32 0, %v11078_v9  ;;  %vm4186_vm6 = vcmp.lt.s32.totalorder %v4166_v23, 2  ;;  %vm4188_vm8 = vcmp.lt.s32.totalorder %v4166_v23, 4 }
 0x3da   : > { %7738 = vsinq.f32 %v4033_v25  ;;  %v4189_v12 = vsel %vm4185_vm4, %v4169_v45, %v4172_v40  ;;  %v4190_v11 = vsel %vm4188_vm8, %v4178_v10, 2102212464  ;;  %v4193_v58 = vsel %vm4185_vm4, %v4172_v40, %v4175_v62 }
 0x3db   : > { %v7166_v33 = vmin.u32 %v4115_v41, %v11078_v9  ;;  %v4194_v27 = vsel %vm4188_vm8, %v4181_v8, 920167782  ;;  %v4191_v6 = vsel %vm4187_vm5, %v4175_v62, %v4190_v11  ;;  %v4197_v42 = vsel %vm4185_vm4, %v4175_v62, %v4178_v10 }
 0x3dc   : > { %v4195_v63 = vsel %vm4187_vm5, %v4178_v10, %v4194_v27  ;;  %v4198_v50 = vsel %vm4188_vm8, %v4184_v22, 1326507024  ;;  %v4039_v43 = vand.u32 3, %v4038_v0  ;;  %v4135_v53 = vsub.s32 4, %v4111_v47 }
 0x3dd   : > { %v4117_v60 = vclz %v7166_v33  ;;  %v4192_v38 = vsel %vm4186_vm6, %v4189_v12, %v4191_v6  ;;  %v4196_v54 = vsel %vm4186_vm6, %v4193_v58, %v4195_v63  ;;  %v4199_v31 = vsel %vm4187_vm5, %v4181_v8, %v4198_v50 }
 0x3de   : > { %v7173_v15 = vadd.s32 4294967169, %v4261_v52  ;;  %v4200_v44 = vsel %vm4186_vm6, %v4197_v42, %v4199_v31  ;;  %v11092_v19 = vmul.u32.u64.low %v11068_v4, %v4196_v54  ;;  %v11093_v13 = vmul.u32.u64.high %v11068_v4, %v4196_v54, %v11092_v19 }
 0x3df   : > { %v7167_v18 = vadd.s32 4294967294, %v4117_v60  ;;  %vm4051_vm7 = vcmp.lt.s32.totalorder %v10901_v56, 0  ;;  %v11098_v0 = vmul.u32.u64.low %v11068_v4, %v4200_v44  ;;  %v11099_v7 = vmul.u32.u64.high %v11068_v4, %v4200_v44, %v11098_v0 }
 0x3e0   : > { %v4257_v34 = vand.u32 2147483647, %v11055_v20  ;;  %vm4037_vm9 = vweird.f32 %v10809_v51  ;;  %v4105_v29 = vadd.s32 %v11035_v61, %v11032_v35  ;;  %v4136_v48 = vsel %vm4051_vm7, %v4135_v53, %v4111_v47 }
 0x3e1   : > { %vm7168_vm10 = vcmp.lt.s32.totalorder %v7167_v18, 0  ;;  %v4267_v49 = vadd.s32 1, %v7173_v15  ;;  %vm4040_vm11 = vcmp.lt.s32.totalorder %v4039_v43, 2  ;;  %vm11109_vm12 = vcmp.le.f32.partialorder %v4049_v5, 0.7853982 }
 0x3e2   : > { %v4120_v1 = vsel %vm7168_vm10, 0, %v7167_v18  ;;  %v4208_v46 = vmul.u32 %v11068_v4, %v4192_v38  ;;  %v4211_v35 = vadd.s32 1, %v11093_v13  ;;  %v4138_v61 = vsel %vm11109_vm12, 0, %v4136_v48 }
 0x3e3   : > { %v4121_v23 = vsub.s32 32, %v4120_v1  ;;  %v4122_v3 = vshll.u32 %v11078_v9, %v4120_v1  ;;  %v4125_v55 = vsub.s32 4294967266, %v4120_v1  ;;  %vm4210_vm13 = vc.u32 %v11099_v7, %v11092_v19 }
 0x3e4   : > { %v4264_v5 = vand.u32 8388607, %v4257_v34  ;;  %vm4268_vm14 = vcmp.gt.s32.totalorder %v4267_v49, 0  ;;  %v4212_v4 = vsel %vm4210_vm13, %v4211_v35, %v11093_v13  ;;  %vm4041_vm15 = vcmp.eq.s32.totalorder %v4039_v43, 0 }
 0x3e5   : > { %v4123_v47 = vshrl.u32 %v4105_v29, %v4121_v23  ;;  %v4126_v59 = vadd.s32 127, %v4125_v55  ;;  %v4269_v45 = vsel %vm4268_vm14, %v4267_v49, 0  ;;  %vm4044_vm0 = vcmp.eq.s32.totalorder %v4039_v43, 2 }
 0x3e6   : > { %v7737_v37 = vpop.eup %7736  ;;  %v4213_v40 = vadd.s32 %v4212_v4, %v4208_v46  ;;  %v4271_v17 = vand.u32 31, %v4269_v45  ;;  %v11126_v10 = vadd.s32 3, %v4138_v61  ;;  %v4265_v22 = vor.u32 8388608, %v4264_v5 }
 0x3e7   : > { %v7739_v16 = vpop.eup %7738  ;;  %v4045_v21 = vxor.u32 2147483648, %v7737_v37  ;;  %v4124_v9 = vor.u32 %v4123_v47, %v4122_v3  ;;  %v4127_v62 = vshll.u32 %v4126_v59, 23  ;;  %v4361_v11 = vand.u32 2147483647, %v11124_v36 }
 0x3e8   : > { %v4042_v25 = vxor.u32 2147483648, %v7739_v16  ;;  %v4214_v8 = vadd.s32 536870912, %v4213_v40  ;;  %v4272_v41 = vsub.s32 32, %v4271_v17  ;;  %v4270_v6 = vshrl.u32 %v4269_v45, 5 }
 0x3e9   : > { %v4046_v52 = vsel %vm4044_vm0, %v4045_v21, %v7739_v16  ;;  %v4128_v12 = vor.u32 4788187, %v4127_v62  ;;  %v4131_v33 = vcvt.s32.f32 %v4124_v9  ;;  %v4364_v63 = vand.u32 2139095040, %v11124_v36 }
 0x3ea   : > { %v4043_v58 = vsel %vm4041_vm15, %v7737_v37, %v4042_v25  ;;  %v4215_v27 = vshrl.u32 %v4214_v8, 30  ;;  %v4274_v60 = vshll.u32 %v7945_v24, %v4271_v17  ;;  %v4277_v53 = vshll.u32 %v7946_v26, %v4271_v17 }
 0x3eb   : > { %v4047_v42 = vsel %vm4040_vm11, %v4043_v58, %v4046_v52  ;;  %v4129_v50 = vand.u32 2147483647, %v4128_v12  ;;  %v4275_v31 = vshrl.u32 %v7946_v26, %v4272_v41  ;;  %v4278_v15 = vshrl.u32 %v7947_v28, %v4272_v41 }
 0x3ec   : > { %v4048_v38 = vsel %vm4037_vm9, nan, %v4047_v42  ;;  %v4216_v54 = vshll.u32 %v4215_v27, 30  ;;  %v4280_v44 = vshll.u32 %v7947_v28, %v4271_v17  ;;  %v4281_v13 = vshrl.u32 %v7948_v30, %v4272_v41 }
 0x3ed   : > { %v4132_v18 = vmul.f32 %v4131_v33, %v4129_v50  ;;  %v4283_v43 = vshll.u32 %v7948_v30, %v4271_v17  ;;  %6893 = vst [vmem:[%s8364_s17 + $0x120] sm:$0xff] %v4048_v38  ;;  %v4284_v29 = vshrl.u32 %v7949_v32, %v4272_v41  ;;  %v4286_v51 = vshll.u32 %v7949_v32, %v4271_v17 }
 0x3ee   : > { %v11142_v0 = vsub.s32 %v4213_v40, %v4216_v54  ;;  %v11146_v48 = vshll.u32 %v4265_v22, 8  ;;  %v4209_v1 = vadd.s32 %v11092_v19, %v11099_v7  ;;  %v4287_v46 = vshrl.u32 %v7950_v39, %v4272_v41 }
 0x3ef   : > { %v4133_v49 = vxor.u32 2147483648, %v4132_v18  ;;  %v4365_v23 = vshrl.u32 %v4364_v63, 23  ;;  %vm4155_vm1 = vcmp.lt.s32.totalorder %v10987_v14, 0  ;;  %v4273_v55 = vshrl.u32 %v7945_v24, %v4272_v41 }
 0x3f0   : > { %v4219_v3 = vsub.s32 0, %v11142_v0  ;;  %v4276_v35 = vor.u32 %v4275_v31, %v4274_v60  ;;  %v4279_v61 = vor.u32 %v4278_v15, %v4277_v53  ;;  %v4282_v47 = vor.u32 %v4281_v13, %v4280_v44 }
 0x3f1   : > { %v4134_v5 = vsel %vm4051_vm7, %v4133_v49, %v4132_v18  ;;  %v4285_v59 = vor.u32 %v4284_v29, %v4283_v43  ;;  %vm4289_vm2 = vcmp.lt.s32.totalorder %v4270_v6, 1  ;;  %v4288_v4 = vor.u32 %v4287_v46, %v4286_v51 }
 0x3f2   : > { %v4137_v19 = vsel %vm11109_vm12, %v10901_v56, %v4134_v5  ;;  %v7170_v7 = vmin.u32 %v4219_v3, %v11142_v0  ;;  %vm4292_vm3 = vcmp.lt.s32.totalorder %v4270_v6, 4  ;;  %vm4290_vm4 = vcmp.lt.s32.totalorder %v4270_v6, 2 }
 0x3f3   : > { %7740 = vcosq.f32 %v4137_v19  ;;  %vm4291_vm5 = vcmp.lt.s32.totalorder %v4270_v6, 3  ;;  %v4294_v45 = vsel %vm4292_vm3, %v4282_v47, 2102212464  ;;  %v4293_v40 = vsel %vm4289_vm2, %v4273_v55, %v4276_v35 }
 0x3f4   : > { %7742 = vsinq.f32 %v4137_v19  ;;  %v4221_v37 = vclz %v7170_v7  ;;  %v4297_v17 = vsel %vm4289_vm2, %v4276_v35, %v4279_v61  ;;  %v4239_v16 = vsub.s32 4, %v4215_v27 }
 0x3f5   : > { %v4295_v21 = vsel %vm4291_vm5, %v4279_v61, %v4294_v45  ;;  %v4298_v9 = vsel %vm4292_vm3, %v4285_v59, 920167782  ;;  %v4301_v2 = vsel %vm4289_vm2, %v4279_v61, %v4282_v47  ;;  %v4302_v8 = vsel %vm4292_vm3, %v4288_v4, 1326507024 }
 0x3f6   : > { %v7171_v62 = vadd.s32 4294967294, %v4221_v37  ;;  %v4299_v25 = vsel %vm4291_vm5, %v4282_v47, %v4298_v9  ;;  %v4368_v22 = vand.u32 8388607, %v4361_v11  ;;  %v4296_v41 = vsel %vm4290_vm4, %v4293_v40, %v4295_v21 }
 0x3f7   : > { %v4300_v52 = vsel %vm4290_vm4, %v4297_v17, %v4299_v25  ;;  %v4303_v12 = vsel %vm4291_vm5, %v4285_v59, %v4302_v8  ;;  %v7177_v33 = vadd.s32 4294967169, %v4365_v23  ;;  %v4240_v60 = vsel %vm4155_vm1, %v4239_v16, %v4215_v27 }
 0x3f8   : > { %vm7172_vm6 = vcmp.lt.s32.totalorder %v7171_v62, 0  ;;  %v4304_v58 = vsel %vm4290_vm4, %v4301_v2, %v4303_v12  ;;  %v11172_v63 = vmul.u32.u64.low %v11146_v48, %v4300_v52  ;;  %v11173_v42 = vmul.u32.u64.high %v11146_v48, %v4300_v52, %v11172_v63 }
 0x3f9   : > { %v4224_v50 = vsel %vm7172_vm6, 0, %v7171_v62  ;;  %v11179_v53 = vmul.u32.u64.low %v11146_v48, %v4304_v58  ;;  %v11180_v38 = vmul.u32.u64.high %v11146_v48, %v4304_v58, %v11179_v53  ;;  %v4371_v18 = vadd.s32 1, %v7177_v33 }
 0x3fa   : > { %v4225_v54 = vsub.s32 32, %v4224_v50  ;;  %v4226_v31 = vshll.u32 %v11142_v0, %v4224_v50  ;;  %v4229_v15 = vsub.s32 4294967266, %v4224_v50  ;;  %v4143_v6 = vand.u32 3, %v11126_v10 }
 0x3fb   : > { %vm11186_vm8 = vcmp.le.f32.partialorder %v4153_v57, 0.7853982  ;;  %v4312_v13 = vmul.u32 %v11146_v48, %v4296_v41  ;;  %v4315_v29 = vadd.s32 1, %v11173_v42  ;;  %vm4372_vm7 = vcmp.gt.s32.totalorder %v4371_v18, 0 }
 0x3fc   : > { %v4227_v27 = vshrl.u32 %v4209_v1, %v4225_v54  ;;  %v4230_v43 = vadd.s32 127, %v4229_v15  ;;  %v4242_v0 = vsel %vm11186_vm8, 0, %v4240_v60  ;;  %vm4314_vm9 = vc.u32 %v11180_v38, %v11172_v63 }
 0x3fd   : > { %v4369_v10 = vor.u32 8388608, %v4368_v22  ;;  %v4373_v51 = vsel %vm4372_vm7, %v4371_v18, 0  ;;  %v4316_v46 = vsel %vm4314_vm9, %v4315_v29, %v11173_v42  ;;  %vm4141_vm10 = vweird.f32 %v10901_v56  ;;  %v11216_v42 = vld [vmem:[%s8067_s30 + $0x148] sm:$0xff] }
 0x3fe   : > { %v4228_v49 = vor.u32 %v4227_v27, %v4226_v31  ;;  %v4231_v57 = vshll.u32 %v4230_v43, 23  ;;  %v11197_v23 = vshrl.u32 %v4373_v51, 5  ;;  %vm4144_vm11 = vcmp.lt.s32.totalorder %v4143_v6, 2 }
 0x3ff   : > { %v4317_v48 = vadd.s32 %v4316_v46, %v4312_v13  ;;  %v4375_v1 = vand.u32 31, %v4373_v51  ;;  %vm4145_vm12 = vcmp.eq.s32.totalorder %v4143_v6, 0  ;;  %vm4148_vm13 = vcmp.eq.s32.totalorder %v4143_v6, 2 }
 0x400   : > { %v7741_v3 = vpop.eup %7740  ;;  %v4232_v55 = vor.u32 4788187, %v4231_v57  ;;  %v4235_v35 = vcvt.s32.f32 %v4228_v49  ;;  %v4246_v47 = vadd.s32 3, %v4242_v0  ;;  %vm4393_vm14 = vcmp.lt.s32.totalorder %v11197_v23, 1 }
 0x401   : > { %v7743_v61 = vpop.eup %7742  ;;  %v4149_v5 = vxor.u32 2147483648, %v7741_v3  ;;  %v4318_v59 = vadd.s32 536870912, %v4317_v48  ;;  %v4376_v19 = vsub.s32 32, %v4375_v1  ;;  %v11201_v45 = vshll.u32 %v4369_v10, 8 }
 0x402   : > { %v4146_v7 = vxor.u32 2147483648, %v7743_v61  ;;  %v4233_v4 = vand.u32 2147483647, %v4232_v55  ;;  %v4378_v17 = vshll.u32 %v7945_v24, %v4375_v1  ;;  %vm4259_vm15 = vcmp.lt.s32.totalorder %v11055_v20, 0 }
 0x403   : > { %v4150_v37 = vsel %vm4148_vm13, %v4149_v5, %v7743_v61  ;;  %v4319_v40 = vshrl.u32 %v4318_v59, 30  ;;  %v4379_v16 = vshrl.u32 %v7946_v26, %v4376_v19  ;;  %v4381_v2 = vshll.u32 %v7946_v26, %v4375_v1 }
 0x404   : > { %v4147_v21 = vsel %vm4145_vm12, %v7741_v3, %v4146_v7  ;;  %v4236_v9 = vmul.f32 %v4235_v35, %v4233_v4  ;;  %v4382_v62 = vshrl.u32 %v7947_v28, %v4376_v19  ;;  %v4384_v22 = vshll.u32 %v7947_v28, %v4375_v1 }
 0x405   : > { %v4151_v25 = vsel %vm4144_vm11, %v4147_v21, %v4150_v37  ;;  %v4320_v8 = vshll.u32 %v4319_v40, 30  ;;  %v4385_v41 = vshrl.u32 %v7948_v30, %v4376_v19  ;;  %v4343_v33 = vsub.s32 4, %v4319_v40 }
 0x406   : > { %v4152_v52 = vsel %vm4141_vm10, nan, %v4151_v25  ;;  %v4237_v12 = vxor.u32 2147483648, %v4236_v9  ;;  %v4377_v58 = vshrl.u32 %v7945_v24, %v4376_v19  ;;  %v4380_v60 = vor.u32 %v4379_v16, %v4378_v17 }
 0x407   : > { %v11218_v50 = vsub.s32 %v4317_v48, %v4320_v8  ;;  %v4387_v53 = vshll.u32 %v7948_v30, %v4375_v1  ;;  %v4388_v54 = vshrl.u32 %v7949_v32, %v4376_v19  ;;  %6894 = vst [vmem:[%s8364_s17 + $0x128] sm:$0xff] %v4152_v52  ;;  %v4383_v15 = vor.u32 %v4382_v62, %v4381_v2 }
 0x408   : > { %v4238_v31 = vsel %vm4155_vm1, %v4237_v12, %v4236_v9  ;;  %v4390_v56 = vshll.u32 %v7949_v32, %v4375_v1  ;;  %v4391_v18 = vshrl.u32 %v7950_v39, %v4376_v19  ;;  %vm11232_vm0 = vcmp.le.f32.partialorder %v4257_v34, 0.7853982 }
 0x409   : > { %v4241_v6 = vsel %vm11186_vm8, %v10987_v14, %v4238_v31  ;;  %v4323_v27 = vsub.s32 0, %v11218_v50  ;;  %v4386_v43 = vor.u32 %v4385_v41, %v4384_v22  ;;  %v4389_v29 = vor.u32 %v4388_v54, %v4387_v53 }
 0x40a   : > { %7744 = vcosq.f32 %v4241_v6  ;;  %v4392_v0 = vor.u32 %v4391_v18, %v4390_v56  ;;  %vm4396_vm1 = vcmp.lt.s32.totalorder %v11197_v23, 4  ;;  %v4468_v10 = vand.u32 2139095040, %v11216_v42 }
 0x40b   : > { %7746 = vsinq.f32 %v4241_v6  ;;  %v7174_v44 = vmin.u32 %v4323_v27, %v11218_v50  ;;  %vm4394_vm2 = vcmp.lt.s32.totalorder %v11197_v23, 2  ;;  %vm4395_vm3 = vcmp.lt.s32.totalorder %v11197_v23, 3 }
 0x40c   : > { %v4397_v34 = vsel %vm4393_vm14, %v4377_v58, %v4380_v60  ;;  %v4398_v51 = vsel %vm4396_vm1, %v4386_v43, 2102212464  ;;  %v4401_v49 = vsel %vm4393_vm14, %v4380_v60, %v4383_v15  ;;  %v4402_v57 = vsel %vm4396_vm1, %v4389_v29, 920167782 }
 0x40d   : > { %v11250_v46 = vand.u32 3, %v4246_v47  ;;  %v4325_v48 = vclz %v7174_v44  ;;  %v4344_v1 = vsel %vm4259_vm15, %v4343_v33, %v4319_v40  ;;  %v4405_v3 = vsel %vm4393_vm14, %v4383_v15, %v4386_v43 }
 0x40e   : > { %v4399_v55 = vsel %vm4395_vm3, %v4383_v15, %v4398_v51  ;;  %v4403_v35 = vsel %vm4395_vm3, %v4386_v43, %v4402_v57  ;;  %v4406_v61 = vsel %vm4396_vm1, %v4392_v0, 1326507024  ;;  %v4469_v5 = vshrl.u32 %v4468_v10, 23 }
 0x40f   : > { %v7175_v59 = vadd.s32 4294967294, %v4325_v48  ;;  %v4400_v47 = vsel %vm4394_vm2, %v4397_v34, %v4399_v55  ;;  %v4404_v19 = vsel %vm4394_vm2, %v4401_v49, %v4403_v35  ;;  %v4407_v7 = vsel %vm4395_vm3, %v4389_v29, %v4406_v61 }
 0x410   : > { %v4313_v4 = vadd.s32 %v11172_v63, %v11180_v38  ;;  %v4408_v37 = vsel %vm4394_vm2, %v4405_v3, %v4407_v7  ;;  %v11273_v40 = vmul.u32.u64.low %v11201_v45, %v4404_v19  ;;  %v11274_v17 = vmul.u32.u64.high %v11201_v45, %v4404_v19, %v11273_v40 }
 0x411   : > { %vm7176_vm4 = vcmp.lt.s32.totalorder %v7175_v59, 0  ;;  %v11278_v16 = vmul.u32.u64.low %v11201_v45, %v4408_v37  ;;  %v11279_v21 = vmul.u32.u64.high %v11201_v45, %v4408_v37, %v11278_v16  ;;  %v7181_v9 = vadd.s32 4294967169, %v4469_v5 }
 0x412   : > { %v4328_v2 = vsel %vm7176_vm4, 0, %v7175_v59  ;;  %v4346_v62 = vsel %vm11232_vm0, 0, %v4344_v1  ;;  %v4416_v63 = vmul.u32 %v11201_v45, %v4400_v47  ;;  %v4465_v38 = vand.u32 2147483647, %v11216_v42  ;;  %v11302_v1 = vld [vmem:[%s8067_s30 + $0x150] sm:$0xff] }
 0x413   : > { %v4329_v23 = vsub.s32 32, %v4328_v2  ;;  %v4330_v25 = vshll.u32 %v11218_v50, %v4328_v2  ;;  %v4333_v8 = vsub.s32 4294967266, %v4328_v2  ;;  %v4475_v22 = vadd.s32 1, %v7181_v9 }
 0x414   : > { %vm4245_vm5 = vweird.f32 %v10987_v14  ;;  %v4419_v41 = vadd.s32 1, %v11274_v17  ;;  %vm4252_vm6 = vcmp.eq.s32.totalorder %v11250_v46, 2  ;;  %vm4418_vm8 = vc.u32 %v11279_v21, %v11273_v40 }
 0x415   : > { %v4331_v52 = vshrl.u32 %v4313_v4, %v4329_v23  ;;  %v4334_v12 = vadd.s32 127, %v4333_v8  ;;  %v4350_v33 = vadd.s32 3, %v4346_v62  ;;  %v4472_v58 = vand.u32 8388607, %v4465_v38 }
 0x416   : > { %v4420_v45 = vsel %vm4418_vm8, %v4419_v41, %v11274_v17  ;;  %vm4476_vm7 = vcmp.gt.s32.totalorder %v4475_v22, 0  ;;  %vm4248_vm9 = vcmp.lt.s32.totalorder %v11250_v46, 2  ;;  %vm4249_vm10 = vcmp.eq.s32.totalorder %v11250_v46, 0 }
 0x417   : > { %v7745_v50 = vpop.eup %7744  ;;  %v4332_v60 = vor.u32 %v4331_v52, %v4330_v25  ;;  %v4335_v53 = vshll.u32 %v4334_v12, 23  ;;  %v4421_v54 = vadd.s32 %v4420_v45, %v4416_v63  ;;  %v4477_v31 = vsel %vm4476_vm7, %v4475_v22, 0 }
 0x418   : > { %v7747_v15 = vpop.eup %7746  ;;  %v4253_v56 = vxor.u32 2147483648, %v7745_v50  ;;  %v4479_v18 = vand.u32 31, %v4477_v31  ;;  %v11298_v10 = vand.u32 3, %v4350_v33  ;;  %v4473_v44 = vor.u32 8388608, %v4472_v58 }
 0x419   : > { %v4250_v6 = vxor.u32 2147483648, %v7747_v15  ;;  %v4336_v27 = vor.u32 4788187, %v4335_v53  ;;  %v4339_v43 = vcvt.s32.f32 %v4332_v60  ;;  %v4422_v29 = vadd.s32 536870912, %v4421_v54 }
 0x41a   : > { %v4254_v0 = vsel %vm4252_vm6, %v4253_v56, %v7747_v15  ;;  %v4480_v34 = vsub.s32 32, %v4479_v18  ;;  %v4482_v48 = vshll.u32 %v7945_v24, %v4479_v18  ;;  %v4485_v35 = vshll.u32 %v7946_v26, %v4479_v18 }
 0x41b   : > { %v4251_v51 = vsel %vm4249_vm10, %v7745_v50, %v4250_v6  ;;  %v4337_v49 = vand.u32 2147483647, %v4336_v27  ;;  %v4423_v57 = vshrl.u32 %v4422_v29, 30  ;;  %v4488_v61 = vshll.u32 %v7947_v28, %v4479_v18 }
 0x41c   : > { %v4255_v3 = vsel %vm4248_vm9, %v4251_v51, %v4254_v0  ;;  %v4483_v55 = vshrl.u32 %v7946_v26, %v4480_v34  ;;  %v4486_v19 = vshrl.u32 %v7947_v28, %v4480_v34  ;;  %v4478_v7 = vshrl.u32 %v4477_v31, 5 }
 0x41d   : > { %v4256_v5 = vsel %vm4245_vm5, nan, %v4255_v3  ;;  %v4340_v59 = vmul.f32 %v4339_v43, %v4337_v49  ;;  %v4424_v47 = vshll.u32 %v4423_v57, 30  ;;  %v4489_v4 = vshrl.u32 %v7948_v30, %v4480_v34 }
 0x41e   : > { %v4491_v37 = vshll.u32 %v7948_v30, %v4479_v18  ;;  %v4569_v46 = vand.u32 2147483647, %v11302_v1  ;;  %6895 = vst [vmem:[%s8364_s17 + $0x130] sm:$0xff] %v4256_v5  ;;  %v4492_v9 = vshrl.u32 %v7949_v32, %v4480_v34  ;;  %v4572_v14 = vand.u32 2139095040, %v11302_v1 }
 0x41f   : > { %v4341_v17 = vxor.u32 2147483648, %v4340_v59  ;;  %v11316_v16 = vsub.s32 %v4421_v54, %v4424_v47  ;;  %vm4363_vm11 = vcmp.lt.s32.totalorder %v11124_v36, 0  ;;  %v4481_v2 = vshrl.u32 %v7945_v24, %v4480_v34 }
 0x420   : > { %v4484_v62 = vor.u32 %v4483_v55, %v4482_v48  ;;  %v4494_v63 = vshll.u32 %v7949_v32, %v4479_v18  ;;  %v4495_v23 = vshrl.u32 %v7950_v39, %v4480_v34  ;;  %v4487_v22 = vor.u32 %v4486_v19, %v4485_v35 }
 0x421   : > { %v4342_v25 = vsel %vm4259_vm15, %v4341_v17, %v4340_v59  ;;  %v4427_v8 = vsub.s32 0, %v11316_v16  ;;  %v4490_v41 = vor.u32 %v4489_v4, %v4488_v61  ;;  %v4493_v12 = vor.u32 %v4492_v9, %v4491_v37 }
 0x422   : > { %v4345_v52 = vsel %vm11232_vm0, %v11055_v20, %v4342_v25  ;;  %v4496_v33 = vor.u32 %v4495_v23, %v4494_v63  ;;  %vm4497_vm12 = vcmp.lt.s32.totalorder %v4478_v7, 1  ;;  %vm11332_vm13 = vcmp.le.f32.partialorder %v4361_v11, 0.7853982 }
 0x423   : > { %7748 = vcosq.f32 %v4345_v52  ;;  %v7178_v58 = vmin.u32 %v4427_v8, %v11316_v16  ;;  %v4513_v50 = vshll.u32 %v4473_v44, 8  ;;  %v4573_v60 = vshrl.u32 %v4572_v14, 23 }
 0x424   : > { %7750 = vsinq.f32 %v4345_v52  ;;  %v4447_v53 = vsub.s32 4, %v4423_v57  ;;  %vm4499_vm14 = vcmp.lt.s32.totalorder %v4478_v7, 3  ;;  %vm4500_vm15 = vcmp.lt.s32.totalorder %v4478_v7, 4 }
 0x425   : > { %v4429_v13 = vclz %v7178_v58  ;;  %vm4498_vm0 = vcmp.lt.s32.totalorder %v4478_v7, 2  ;;  %v4501_v54 = vsel %vm4497_vm12, %v4481_v2, %v4484_v62  ;;  %v4505_v31 = vsel %vm4497_vm12, %v4484_v62, %v4487_v22 }
 0x426   : > { %v4502_v15 = vsel %vm4500_vm15, %v4490_v41, 2102212464  ;;  %v4506_v56 = vsel %vm4500_vm15, %v4493_v12, 920167782  ;;  %v4509_v11 = vsel %vm4497_vm12, %v4487_v22, %v4490_v41  ;;  %v4510_v18 = vsel %vm4500_vm15, %v4496_v33, 1326507024 }
 0x427   : > { %v7179_v6 = vadd.s32 4294967294, %v4429_v13  ;;  %v4503_v27 = vsel %vm4499_vm14, %v4487_v22, %v4502_v15  ;;  %v4507_v43 = vsel %vm4499_vm14, %v4490_v41, %v4506_v56  ;;  %v4511_v29 = vsel %vm4499_vm14, %v4493_v12, %v4510_v18 }
 0x428   : > { %v4417_v0 = vadd.s32 %v11273_v40, %v11279_v21  ;;  %v4508_v44 = vsel %vm4498_vm0, %v4505_v31, %v4507_v43  ;;  %v4512_v34 = vsel %vm4498_vm0, %v4509_v11, %v4511_v29  ;;  %v7185_v51 = vadd.s32 4294967169, %v4573_v60  ;;  %v11370_v31 = vld [vmem:[%s8067_s30 + $0x158] sm:$0xff] }
 0x429   : > { %vm7180_vm1 = vcmp.lt.s32.totalorder %v7179_v6, 0  ;;  %v4448_v49 = vsel %vm4363_vm11, %v4447_v53, %v4423_v57  ;;  %v11346_v48 = vmul.u32.u64.low %v4513_v50, %v4512_v34  ;;  %v11347_v3 = vmul.u32.u64.high %v4513_v50, %v4512_v34, %v11346_v48 }
 0x42a   : > { %v4432_v55 = vsel %vm7180_vm1, 0, %v7179_v6  ;;  %v4504_v35 = vsel %vm4498_vm0, %v4501_v54, %v4503_v27  ;;  %v11350_v61 = vmul.u32.u64.low %v4513_v50, %v4508_v44  ;;  %v11351_v5 = vmul.u32.u64.high %v4513_v50, %v4508_v44, %v11350_v61 }
 0x42b   : > { %v4433_v40 = vsub.s32 32, %v4432_v55  ;;  %v4434_v21 = vshll.u32 %v11316_v16, %v4432_v55  ;;  %v4437_v59 = vsub.s32 4294967266, %v4432_v55  ;;  %v4579_v47 = vadd.s32 1, %v7185_v51 }
 0x42c   : > { %vm4349_vm2 = vweird.f32 %v11055_v20  ;;  %v4450_v57 = vsel %vm11332_vm13, 0, %v4448_v49  ;;  %v4520_v37 = vmul.u32 %v4513_v50, %v4504_v35  ;;  %vm4522_vm3 = vc.u32 %v11347_v3, %v11350_v61 }
 0x42d   : > { %v4435_v19 = vshrl.u32 %v4417_v0, %v4433_v40  ;;  %v4438_v4 = vadd.s32 127, %v4437_v59  ;;  %vm4352_vm4 = vcmp.lt.s32.totalorder %v11298_v10, 2  ;;  %v4523_v7 = vadd.s32 1, %v11351_v5 }
 0x42e   : > { %v4576_v17 = vand.u32 8388607, %v4569_v46  ;;  %vm4580_vm5 = vcmp.gt.s32.totalorder %v4579_v47, 0  ;;  %vm4353_vm6 = vcmp.eq.s32.totalorder %v11298_v10, 0  ;;  %vm4356_vm8 = vcmp.eq.s32.totalorder %v11298_v10, 2 }
 0x42f   : > { %v4436_v16 = vor.u32 %v4435_v19, %v4434_v21  ;;  %v4439_v9 = vshll.u32 %v4438_v4, 23  ;;  %v4581_v14 = vsel %vm4580_vm5, %v4579_v47, 0  ;;  %v4454_v62 = vadd.s32 3, %v4450_v57 }
 0x430   : > { %v7749_v2 = vpop.eup %7748  ;;  %v4524_v63 = vsel %vm4522_vm3, %v4523_v7, %v11351_v5  ;;  %v4583_v23 = vand.u32 31, %v4581_v14  ;;  %v4577_v33 = vor.u32 8388608, %v4576_v17  ;;  %v4582_v44 = vshrl.u32 %v4581_v14, 5 }
 0x431   : > { %v7751_v25 = vpop.eup %7750  ;;  %v4357_v8 = vxor.u32 2147483648, %v7749_v2  ;;  %v4440_v22 = vor.u32 4788187, %v4439_v9  ;;  %v4443_v41 = vcvt.s32.f32 %v4436_v16  ;;  %v4525_v52 = vadd.s32 %v4524_v63, %v4520_v37 }
 0x432   : > { %v4354_v12 = vxor.u32 2147483648, %v7751_v25  ;;  %v4584_v58 = vsub.s32 32, %v4583_v23  ;;  %v4586_v50 = vshll.u32 %v7945_v24, %v4583_v23  ;;  %v4589_v54 = vshll.u32 %v7946_v26, %v4583_v23 }
 0x433   : > { %v4358_v60 = vsel %vm4356_vm8, %v4357_v8, %v7751_v25  ;;  %v4441_v53 = vand.u32 2147483647, %v4440_v22  ;;  %v4526_v13 = vadd.s32 536870912, %v4525_v52  ;;  %v4592_v18 = vshll.u32 %v7947_v28, %v4583_v23 }
 0x434   : > { %v4355_v15 = vsel %vm4353_vm6, %v7749_v2, %v4354_v12  ;;  %v4587_v56 = vshrl.u32 %v7946_v26, %v4584_v58  ;;  %v4590_v11 = vshrl.u32 %v7947_v28, %v4584_v58  ;;  %v4593_v29 = vshrl.u32 %v7948_v30, %v4584_v58 }
 0x435   : > { %v4359_v6 = vsel %vm4352_vm4, %v4355_v15, %v4358_v60  ;;  %v4444_v27 = vmul.f32 %v4443_v41, %v4441_v53  ;;  %v4527_v43 = vshrl.u32 %v4526_v13, 30  ;;  %v4595_v34 = vshll.u32 %v7948_v30, %v4583_v23 }
 0x436   : > { %v4360_v0 = vsel %vm4349_vm2, nan, %v4359_v6  ;;  %v11383_v51 = vshll.u32 %v4577_v33, 8  ;;  %v4585_v55 = vshrl.u32 %v7945_v24, %v4584_v58  ;;  %v4676_v35 = vand.u32 2139095040, %v11370_v31 }
 0x437   : > { %v4445_v49 = vxor.u32 2147483648, %v4444_v27  ;;  %v4528_v48 = vshll.u32 %v4527_v43, 30  ;;  %6896 = vst [vmem:[%s8364_s17 + $0x138] sm:$0xff] %v4360_v0  ;;  %v4588_v10 = vor.u32 %v4587_v56, %v4586_v50  ;;  %v4596_v5 = vshrl.u32 %v7949_v32, %v4584_v58 }
 0x438   : > { %v4598_v40 = vshll.u32 %v7949_v32, %v4583_v23  ;;  %v4599_v20 = vshrl.u32 %v7950_v39, %v4584_v58  ;;  %v4591_v47 = vor.u32 %v4590_v11, %v4589_v54  ;;  %v4594_v57 = vor.u32 %v4593_v29, %v4592_v18 }
 0x439   : > { %v4446_v21 = vsel %vm4363_vm11, %v4445_v49, %v4444_v27  ;;  %v11393_v59 = vsub.s32 %v4525_v52, %v4528_v48  ;;  %v4597_v4 = vor.u32 %v4596_v5, %v4595_v34  ;;  %vm4601_vm7 = vcmp.lt.s32.totalorder %v4582_v44, 1 }
 0x43a   : > { %v4449_v19 = vsel %vm11332_vm13, %v11124_v36, %v4446_v21  ;;  %v4600_v37 = vor.u32 %v4599_v20, %v4598_v40  ;;  %vm4603_vm9 = vcmp.lt.s32.totalorder %v4582_v44, 3  ;;  %v4677_v17 = vshrl.u32 %v4676_v35, 23  ;;  %v11439_v20 = vld [vmem:[%s8067_s30 + $0x160] sm:$0xff] }
 0x43b   : > { %7752 = vcosq.f32 %v4449_v19  ;;  %v4531_v7 = vsub.s32 0, %v11393_v59  ;;  %vm4602_vm10 = vcmp.lt.s32.totalorder %v4582_v44, 2  ;;  %vm4604_vm12 = vcmp.lt.s32.totalorder %v4582_v44, 4 }
 0x43c   : > { %7754 = vsinq.f32 %v4449_v19  ;;  %v4605_v16 = vsel %vm4601_vm7, %v4585_v55, %v4588_v10  ;;  %v4606_v14 = vsel %vm4604_vm12, %v4594_v57, 2102212464  ;;  %v4609_v2 = vsel %vm4601_vm7, %v4588_v10, %v4591_v47 }
 0x43d   : > { %v7182_v9 = vmin.u32 %v4531_v7, %v11393_v59  ;;  %v4610_v63 = vsel %vm4604_vm12, %v4597_v4, 920167782  ;;  %v4607_v45 = vsel %vm4603_vm9, %v4591_v47, %v4606_v14  ;;  %v4613_v25 = vsel %vm4601_vm7, %v4591_v47, %v4594_v57 }
 0x43e   : > { %v4611_v23 = vsel %vm4603_vm9, %v4594_v57, %v4610_v63  ;;  %v4614_v8 = vsel %vm4604_vm12, %v4600_v37, 1326507024  ;;  %v4455_v22 = vand.u32 3, %v4454_v62  ;;  %v4551_v52 = vsub.s32 4, %v4527_v43 }
 0x43f   : > { %v4533_v41 = vclz %v7182_v9  ;;  %v4608_v12 = vsel %vm4602_vm10, %v4605_v16, %v4607_v45  ;;  %v4612_v33 = vsel %vm4602_vm10, %v4609_v2, %v4611_v23  ;;  %v4615_v58 = vsel %vm4603_vm9, %v4597_v4, %v4614_v8 }
 0x440   : > { %v7189_v50 = vadd.s32 4294967169, %v4677_v17  ;;  %v4616_v53 = vsel %vm4602_vm10, %v4613_v25, %v4615_v58  ;;  %v11407_v13 = vmul.u32.u64.low %v11383_v51, %v4612_v33  ;;  %v11408_v54 = vmul.u32.u64.high %v11383_v51, %v4612_v33, %v11407_v13 }
 0x441   : > { %v7183_v60 = vadd.s32 4294967294, %v4533_v41  ;;  %vm4467_vm11 = vcmp.lt.s32.totalorder %v11216_v42, 0  ;;  %v11413_v62 = vmul.u32.u64.low %v11383_v51, %v4616_v53  ;;  %v11414_v15 = vmul.u32.u64.high %v11383_v51, %v4616_v53, %v11413_v62 }
 0x442   : > { %v4673_v56 = vand.u32 2147483647, %v11370_v31  ;;  %vm4453_vm13 = vweird.f32 %v11124_v36  ;;  %v4521_v11 = vadd.s32 %v11350_v61, %v11347_v3  ;;  %v4552_v18 = vsel %vm4467_vm11, %v4551_v52, %v4527_v43 }
 0x443   : > { %vm7184_vm14 = vcmp.lt.s32.totalorder %v7183_v60, 0  ;;  %v4683_v6 = vadd.s32 1, %v7189_v50  ;;  %vm4456_vm15 = vcmp.lt.s32.totalorder %v4455_v22, 2  ;;  %vm11424_vm0 = vcmp.le.f32.partialorder %v4465_v38, 0.7853982 }
 0x444   : > { %v4536_v29 = vsel %vm7184_vm14, 0, %v7183_v60  ;;  %v4624_v0 = vmul.u32 %v11383_v51, %v4608_v12  ;;  %v4627_v3 = vadd.s32 1, %v11408_v54  ;;  %v4554_v61 = vsel %vm11424_vm0, 0, %v4552_v18 }
 0x445   : > { %v4537_v44 = vsub.s32 32, %v4536_v29  ;;  %v4538_v34 = vshll.u32 %v11393_v59, %v4536_v29  ;;  %v4541_v49 = vsub.s32 4294967266, %v4536_v29  ;;  %vm4626_vm1 = vc.u32 %v11414_v15, %v11407_v13 }
 0x446   : > { %v4680_v38 = vand.u32 8388607, %v4673_v56  ;;  %vm4684_vm2 = vcmp.gt.s32.totalorder %v4683_v6, 0  ;;  %v4628_v51 = vsel %vm4626_vm1, %v4627_v3, %v11408_v54  ;;  %vm4457_vm3 = vcmp.eq.s32.totalorder %v4455_v22, 0 }
 0x447   : > { %v4539_v43 = vshrl.u32 %v4521_v11, %v4537_v44  ;;  %v4542_v48 = vadd.s32 127, %v4541_v49  ;;  %v4685_v55 = vsel %vm4684_vm2, %v4683_v6, 0  ;;  %vm4460_vm4 = vcmp.eq.s32.totalorder %v4455_v22, 2 }
 0x448   : > { %v7753_v35 = vpop.eup %7752  ;;  %v4629_v10 = vadd.s32 %v4628_v51, %v4624_v0  ;;  %v4687_v5 = vand.u32 31, %v4685_v55  ;;  %v11441_v57 = vadd.s32 3, %v4554_v61  ;;  %v4681_v37 = vor.u32 8388608, %v4680_v38 }
 0x449   : > { %v7755_v40 = vpop.eup %7754  ;;  %v4461_v21 = vxor.u32 2147483648, %v7753_v35  ;;  %v4540_v59 = vor.u32 %v4539_v43, %v4538_v34  ;;  %v4543_v47 = vshll.u32 %v4542_v48, 23  ;;  %v4777_v14 = vand.u32 2147483647, %v11439_v20 }
 0x44a   : > { %v4458_v19 = vxor.u32 2147483648, %v7755_v40  ;;  %v4630_v4 = vadd.s32 536870912, %v4629_v10  ;;  %v4688_v7 = vsub.s32 32, %v4687_v5  ;;  %v4686_v45 = vshrl.u32 %v4685_v55, 5 }
 0x44b   : > { %v4462_v17 = vsel %vm4460_vm4, %v4461_v21, %v7755_v40  ;;  %v4544_v16 = vor.u32 4788187, %v4543_v47  ;;  %v4547_v9 = vcvt.s32.f32 %v4540_v59  ;;  %v4780_v23 = vand.u32 2139095040, %v11439_v20 }
 0x44c   : > { %v4459_v2 = vsel %vm4457_vm3, %v7753_v35, %v4458_v19  ;;  %v4631_v63 = vshrl.u32 %v4630_v4, 30  ;;  %v4690_v41 = vshll.u32 %v7945_v24, %v4687_v5  ;;  %v4693_v52 = vshll.u32 %v7946_v26, %v4687_v5 }
 0x44d   : > { %v4463_v25 = vsel %vm4456_vm15, %v4459_v2, %v4462_v17  ;;  %v4545_v8 = vand.u32 2147483647, %v4544_v16  ;;  %v4691_v58 = vshrl.u32 %v7946_v26, %v4688_v7  ;;  %v4694_v50 = vshrl.u32 %v7947_v28, %v4688_v7 }
 0x44e   : > { %v4464_v12 = vsel %vm4453_vm13, nan, %v4463_v25  ;;  %v4632_v33 = vshll.u32 %v4631_v63, 30  ;;  %v4696_v53 = vshll.u32 %v7947_v28, %v4687_v5  ;;  %v4697_v54 = vshrl.u32 %v7948_v30, %v4688_v7 }
 0x44f   : > { %v4548_v60 = vmul.f32 %v4547_v9, %v4545_v8  ;;  %v4699_v22 = vshll.u32 %v7948_v30, %v4687_v5  ;;  %6897 = vst [vmem:[%s8364_s17 + $0x140] sm:$0xff] %v4464_v12  ;;  %v4700_v11 = vshrl.u32 %v7949_v32, %v4688_v7  ;;  %v4702_v36 = vshll.u32 %v7949_v32, %v4687_v5 }
 0x450   : > { %v11457_v62 = vsub.s32 %v4629_v10, %v4632_v33  ;;  %v11461_v18 = vshll.u32 %v4681_v37, 8  ;;  %v4625_v29 = vadd.s32 %v11407_v13, %v11414_v15  ;;  %v4703_v0 = vshrl.u32 %v7950_v39, %v4688_v7 }
 0x451   : > { %v4549_v6 = vxor.u32 2147483648, %v4548_v60  ;;  %v4781_v44 = vshrl.u32 %v4780_v23, 23  ;;  %vm4571_vm5 = vcmp.lt.s32.totalorder %v11302_v1, 0  ;;  %v4689_v49 = vshrl.u32 %v7945_v24, %v4688_v7 }
 0x452   : > { %v4635_v34 = vsub.s32 0, %v11457_v62  ;;  %v4692_v3 = vor.u32 %v4691_v58, %v4690_v41  ;;  %v4695_v61 = vor.u32 %v4694_v50, %v4693_v52  ;;  %v4698_v43 = vor.u32 %v4697_v54, %v4696_v53 }
 0x453   : > { %v4550_v38 = vsel %vm4467_vm11, %v4549_v6, %v4548_v60  ;;  %v4701_v48 = vor.u32 %v4700_v11, %v4699_v22  ;;  %vm4705_vm6 = vcmp.lt.s32.totalorder %v4686_v45, 1  ;;  %v4704_v51 = vor.u32 %v4703_v0, %v4702_v36 }
 0x454   : > { %v4553_v13 = vsel %vm11424_vm0, %v11216_v42, %v4550_v38  ;;  %v7186_v15 = vmin.u32 %v4635_v34, %v11457_v62  ;;  %vm4708_vm8 = vcmp.lt.s32.totalorder %v4686_v45, 4  ;;  %vm4706_vm7 = vcmp.lt.s32.totalorder %v4686_v45, 2 }
 0x455   : > { %7756 = vcosq.f32 %v4553_v13  ;;  %vm4707_vm9 = vcmp.lt.s32.totalorder %v4686_v45, 3  ;;  %v4710_v55 = vsel %vm4708_vm8, %v4698_v43, 2102212464  ;;  %v4709_v10 = vsel %vm4705_vm6, %v4689_v49, %v4692_v3 }
 0x456   : > { %7758 = vsinq.f32 %v4553_v13  ;;  %v4637_v35 = vclz %v7186_v15  ;;  %v4713_v5 = vsel %vm4705_vm6, %v4692_v3, %v4695_v61  ;;  %v4655_v40 = vsub.s32 4, %v4631_v63 }
 0x457   : > { %v4711_v21 = vsel %vm4707_vm9, %v4695_v61, %v4710_v55  ;;  %v4714_v59 = vsel %vm4708_vm8, %v4701_v48, 920167782  ;;  %v4717_v27 = vsel %vm4705_vm6, %v4695_v61, %v4698_v43  ;;  %v4718_v4 = vsel %vm4708_vm8, %v4704_v51, 1326507024 }
 0x458   : > { %v7187_v47 = vadd.s32 4294967294, %v4637_v35  ;;  %v4715_v19 = vsel %vm4707_vm9, %v4698_v43, %v4714_v59  ;;  %v4784_v37 = vand.u32 8388607, %v4777_v14  ;;  %v4712_v7 = vsel %vm4706_vm7, %v4709_v10, %v4711_v21 }
 0x459   : > { %v4716_v17 = vsel %vm4706_vm7, %v4713_v5, %v4715_v19  ;;  %v4719_v16 = vsel %vm4707_vm9, %v4701_v48, %v4718_v4  ;;  %v7193_v9 = vadd.s32 4294967169, %v4781_v44  ;;  %v4656_v41 = vsel %vm4571_vm5, %v4655_v40, %v4631_v63 }
 0x45a   : > { %vm7188_vm10 = vcmp.lt.s32.totalorder %v7187_v47, 0  ;;  %v4720_v2 = vsel %vm4706_vm7, %v4717_v27, %v4719_v16  ;;  %v11487_v23 = vmul.u32.u64.low %v11461_v18, %v4716_v17  ;;  %v11488_v25 = vmul.u32.u64.high %v11461_v18, %v4716_v17, %v11487_v23 }
 0x45b   : > { %v4640_v8 = vsel %vm7188_vm10, 0, %v7187_v47  ;;  %v11494_v52 = vmul.u32.u64.low %v11461_v18, %v4720_v2  ;;  %v11495_v12 = vmul.u32.u64.high %v11461_v18, %v4720_v2, %v11494_v52  ;;  %v4787_v60 = vadd.s32 1, %v7193_v9 }
 0x45c   : > { %v4641_v33 = vsub.s32 32, %v4640_v8  ;;  %v4642_v58 = vshll.u32 %v11457_v62, %v4640_v8  ;;  %v4645_v50 = vsub.s32 4294967266, %v4640_v8  ;;  %v4559_v45 = vand.u32 3, %v11441_v57 }
 0x45d   : > { %vm11501_vm12 = vcmp.le.f32.partialorder %v4569_v46, 0.7853982  ;;  %v4728_v54 = vmul.u32 %v11461_v18, %v4712_v7  ;;  %v4731_v11 = vadd.s32 1, %v11488_v25  ;;  %vm4788_vm11 = vcmp.gt.s32.totalorder %v4787_v60, 0 }
 0x45e   : > { %v4643_v63 = vshrl.u32 %v4625_v29, %v4641_v33  ;;  %v4646_v22 = vadd.s32 127, %v4645_v50  ;;  %v4658_v62 = vsel %vm11501_vm12, 0, %v4656_v41  ;;  %vm4730_vm13 = vc.u32 %v11495_v12, %v11487_v23 }
 0x45f   : > { %v4785_v57 = vor.u32 8388608, %v4784_v37  ;;  %v4789_v36 = vsel %vm4788_vm11, %v4787_v60, 0  ;;  %v4732_v0 = vsel %vm4730_vm13, %v4731_v11, %v11488_v25  ;;  %vm4557_vm14 = vweird.f32 %v11216_v42  ;;  %v11531_v25 = vld [vmem:[%s8067_s30 + $0x168] sm:$0xff] }
 0x460   : > { %v4644_v6 = vor.u32 %v4643_v63, %v4642_v58  ;;  %v4647_v46 = vshll.u32 %v4646_v22, 23  ;;  %v11512_v44 = vshrl.u32 %v4789_v36, 5  ;;  %vm4560_vm15 = vcmp.lt.s32.totalorder %v4559_v45, 2 }
 0x461   : > { %v4733_v18 = vadd.s32 %v4732_v0, %v4728_v54  ;;  %v4791_v29 = vand.u32 31, %v4789_v36  ;;  %vm4561_vm0 = vcmp.eq.s32.totalorder %v4559_v45, 0  ;;  %vm4564_vm1 = vcmp.eq.s32.totalorder %v4559_v45, 2 }
 0x462   : > { %v7757_v34 = vpop.eup %7756  ;;  %v4648_v49 = vor.u32 4788187, %v4647_v46  ;;  %v4651_v3 = vcvt.s32.f32 %v4644_v6  ;;  %v4662_v43 = vadd.s32 3, %v4658_v62  ;;  %vm4809_vm2 = vcmp.lt.s32.totalorder %v11512_v44, 1 }
 0x463   : > { %v7759_v61 = vpop.eup %7758  ;;  %v4565_v38 = vxor.u32 2147483648, %v7757_v34  ;;  %v4734_v48 = vadd.s32 536870912, %v4733_v18  ;;  %v4792_v13 = vsub.s32 32, %v4791_v29  ;;  %v11516_v55 = vshll.u32 %v4785_v57, 8 }
 0x464   : > { %v4562_v15 = vxor.u32 2147483648, %v7759_v61  ;;  %v4649_v51 = vand.u32 2147483647, %v4648_v49  ;;  %v4794_v5 = vshll.u32 %v7945_v24, %v4791_v29  ;;  %vm4675_vm3 = vcmp.lt.s32.totalorder %v11370_v31, 0 }
 0x465   : > { %v4566_v35 = vsel %vm4564_vm1, %v4565_v38, %v7759_v61  ;;  %v4735_v10 = vshrl.u32 %v4734_v48, 30  ;;  %v4795_v40 = vshrl.u32 %v7946_v26, %v4792_v13  ;;  %v4797_v27 = vshll.u32 %v7946_v26, %v4791_v29 }
 0x466   : > { %v4563_v21 = vsel %vm4561_vm0, %v7757_v34, %v4562_v15  ;;  %v4652_v59 = vmul.f32 %v4651_v3, %v4649_v51  ;;  %v4798_v47 = vshrl.u32 %v7947_v28, %v4792_v13  ;;  %v4800_v37 = vshll.u32 %v7947_v28, %v4791_v29 }
 0x467   : > { %v4567_v19 = vsel %vm4560_vm15, %v4563_v21, %v4566_v35  ;;  %v4736_v4 = vshll.u32 %v4735_v10, 30  ;;  %v4801_v7 = vshrl.u32 %v7948_v30, %v4792_v13  ;;  %v4759_v9 = vsub.s32 4, %v4735_v10 }
 0x468   : > { %v4568_v17 = vsel %vm4557_vm14, nan, %v4567_v19  ;;  %v4653_v16 = vxor.u32 2147483648, %v4652_v59  ;;  %v4793_v2 = vshrl.u32 %v7945_v24, %v4792_v13  ;;  %v4796_v41 = vor.u32 %v4795_v40, %v4794_v5 }
 0x469   : > { %v11533_v8 = vsub.s32 %v4733_v18, %v4736_v4  ;;  %v4803_v52 = vshll.u32 %v7948_v30, %v4791_v29  ;;  %v4804_v33 = vshrl.u32 %v7949_v32, %v4792_v13  ;;  %6898 = vst [vmem:[%s8364_s17 + $0x148] sm:$0xff] %v4568_v17  ;;  %v4799_v50 = vor.u32 %v4798_v47, %v4797_v27 }
 0x46a   : > { %v4654_v58 = vsel %vm4571_vm5, %v4653_v16, %v4652_v59  ;;  %v4806_v42 = vshll.u32 %v7949_v32, %v4791_v29  ;;  %v4807_v60 = vshrl.u32 %v7950_v39, %v4792_v13  ;;  %vm11547_vm4 = vcmp.le.f32.partialorder %v4673_v56, 0.7853982 }
 0x46b   : > { %v4657_v45 = vsel %vm11501_vm12, %v11302_v1, %v4654_v58  ;;  %v4739_v63 = vsub.s32 0, %v11533_v8  ;;  %v4802_v22 = vor.u32 %v4801_v7, %v4800_v37  ;;  %v4805_v11 = vor.u32 %v4804_v33, %v4803_v52 }
 0x46c   : > { %7760 = vcosq.f32 %v4657_v45  ;;  %v4808_v62 = vor.u32 %v4807_v60, %v4806_v42  ;;  %vm4812_vm5 = vcmp.lt.s32.totalorder %v11512_v44, 4  ;;  %v4884_v57 = vand.u32 2139095040, %v11531_v25 }
 0x46d   : > { %7762 = vsinq.f32 %v4657_v45  ;;  %v7190_v53 = vmin.u32 %v4739_v63, %v11533_v8  ;;  %vm4810_vm6 = vcmp.lt.s32.totalorder %v11512_v44, 2  ;;  %vm4811_vm8 = vcmp.lt.s32.totalorder %v11512_v44, 3 }
 0x46e   : > { %v4813_v56 = vsel %vm4809_vm2, %v4793_v2, %v4796_v41  ;;  %v4814_v36 = vsel %vm4812_vm5, %v4802_v22, 2102212464  ;;  %v4817_v6 = vsel %vm4809_vm2, %v4796_v41, %v4799_v50  ;;  %v4818_v46 = vsel %vm4812_vm5, %v4805_v11, 920167782 }
 0x46f   : > { %v11565_v0 = vand.u32 3, %v4662_v43  ;;  %v4741_v18 = vclz %v7190_v53  ;;  %v4760_v29 = vsel %vm4675_vm3, %v4759_v9, %v4735_v10  ;;  %v4821_v34 = vsel %vm4809_vm2, %v4799_v50, %v4802_v22 }
 0x470   : > { %v4815_v49 = vsel %vm4811_vm8, %v4799_v50, %v4814_v36  ;;  %v4819_v3 = vsel %vm4811_vm8, %v4802_v22, %v4818_v46  ;;  %v4822_v61 = vsel %vm4812_vm5, %v4808_v62, 1326507024  ;;  %v4885_v38 = vshrl.u32 %v4884_v57, 23 }
 0x471   : > { %v7191_v48 = vadd.s32 4294967294, %v4741_v18  ;;  %v4816_v43 = vsel %vm4810_vm6, %v4813_v56, %v4815_v49  ;;  %v4820_v13 = vsel %vm4810_vm6, %v4817_v6, %v4819_v3  ;;  %v4823_v15 = vsel %vm4811_vm8, %v4805_v11, %v4822_v61 }
 0x472   : > { %v4729_v51 = vadd.s32 %v11487_v23, %v11495_v12  ;;  %v4824_v35 = vsel %vm4810_vm6, %v4821_v34, %v4823_v15  ;;  %v11588_v10 = vmul.u32.u64.low %v11516_v55, %v4820_v13  ;;  %v11589_v5 = vmul.u32.u64.high %v11516_v55, %v4820_v13, %v11588_v10 }
 0x473   : > { %vm7192_vm7 = vcmp.lt.s32.totalorder %v7191_v48, 0  ;;  %v11593_v40 = vmul.u32.u64.low %v11516_v55, %v4824_v35  ;;  %v11594_v21 = vmul.u32.u64.high %v11516_v55, %v4824_v35, %v11593_v40  ;;  %v7197_v59 = vadd.s32 4294967169, %v4885_v38 }
 0x474   : > { %v4744_v27 = vsel %vm7192_vm7, 0, %v7191_v48  ;;  %v4762_v47 = vsel %vm11547_vm4, 0, %v4760_v29  ;;  %v4832_v23 = vmul.u32 %v11516_v55, %v4816_v43  ;;  %v4881_v12 = vand.u32 2147483647, %v11531_v25  ;;  %v11617_v29 = vld [vmem:[%s8067_s30 + $0x170] sm:$0xff] }
 0x475   : > { %v4745_v44 = vsub.s32 32, %v4744_v27  ;;  %v4746_v19 = vshll.u32 %v11533_v8, %v4744_v27  ;;  %v4749_v4 = vsub.s32 4294967266, %v4744_v27  ;;  %v4891_v37 = vadd.s32 1, %v7197_v59 }
 0x476   : > { %vm4661_vm9 = vweird.f32 %v11302_v1  ;;  %v4835_v7 = vadd.s32 1, %v11589_v5  ;;  %vm4668_vm10 = vcmp.eq.s32.totalorder %v11565_v0, 2  ;;  %vm4834_vm12 = vc.u32 %v11594_v21, %v11588_v10 }
 0x477   : > { %v4747_v17 = vshrl.u32 %v4729_v51, %v4745_v44  ;;  %v4750_v16 = vadd.s32 127, %v4749_v4  ;;  %v4766_v9 = vadd.s32 3, %v4762_v47  ;;  %v4888_v2 = vand.u32 8388607, %v4881_v12 }
 0x478   : > { %v4836_v55 = vsel %vm4834_vm12, %v4835_v7, %v11589_v5  ;;  %vm4892_vm11 = vcmp.gt.s32.totalorder %v4891_v37, 0  ;;  %vm4664_vm13 = vcmp.lt.s32.totalorder %v11565_v0, 2  ;;  %vm4665_vm14 = vcmp.eq.s32.totalorder %v11565_v0, 0 }
 0x479   : > { %v7761_v8 = vpop.eup %7760  ;;  %v4748_v41 = vor.u32 %v4747_v17, %v4746_v19  ;;  %v4751_v52 = vshll.u32 %v4750_v16, 23  ;;  %v4837_v33 = vadd.s32 %v4836_v55, %v4832_v23  ;;  %v4893_v58 = vsel %vm4892_vm11, %v4891_v37, 0 }
 0x47a   : > { %v7763_v50 = vpop.eup %7762  ;;  %v4669_v42 = vxor.u32 2147483648, %v7761_v8  ;;  %v4895_v60 = vand.u32 31, %v4893_v58  ;;  %v11613_v57 = vand.u32 3, %v4766_v9  ;;  %v4889_v53 = vor.u32 8388608, %v4888_v2 }
 0x47b   : > { %v4666_v45 = vxor.u32 2147483648, %v7763_v50  ;;  %v4752_v63 = vor.u32 4788187, %v4751_v52  ;;  %v4755_v22 = vcvt.s32.f32 %v4748_v41  ;;  %v4838_v11 = vadd.s32 536870912, %v4837_v33 }
 0x47c   : > { %v4670_v62 = vsel %vm4668_vm10, %v4669_v42, %v7763_v50  ;;  %v4896_v56 = vsub.s32 32, %v4895_v60  ;;  %v4898_v18 = vshll.u32 %v7945_v24, %v4895_v60  ;;  %v4901_v3 = vshll.u32 %v7946_v26, %v4895_v60 }
 0x47d   : > { %v4667_v36 = vsel %vm4665_vm14, %v7761_v8, %v4666_v45  ;;  %v4753_v6 = vand.u32 2147483647, %v4752_v63  ;;  %v4839_v46 = vshrl.u32 %v4838_v11, 30  ;;  %v4904_v61 = vshll.u32 %v7947_v28, %v4895_v60 }
 0x47e   : > { %v4671_v34 = vsel %vm4664_vm13, %v4667_v36, %v4670_v62  ;;  %v4899_v49 = vshrl.u32 %v7946_v26, %v4896_v56  ;;  %v4902_v13 = vshrl.u32 %v7947_v28, %v4896_v56  ;;  %v4894_v15 = vshrl.u32 %v4893_v58, 5 }
 0x47f   : > { %v4672_v38 = vsel %vm4661_vm9, nan, %v4671_v34  ;;  %v4756_v48 = vmul.f32 %v4755_v22, %v4753_v6  ;;  %v4840_v43 = vshll.u32 %v4839_v46, 30  ;;  %v4905_v51 = vshrl.u32 %v7948_v30, %v4896_v56 }
 0x480   : > { %v4907_v35 = vshll.u32 %v7948_v30, %v4895_v60  ;;  %v4985_v0 = vand.u32 2147483647, %v11617_v29  ;;  %6899 = vst [vmem:[%s8364_s17 + $0x150] sm:$0xff] %v4672_v38  ;;  %v4908_v59 = vshrl.u32 %v7949_v32, %v4896_v56  ;;  %v4988_v1 = vand.u32 2139095040, %v11617_v29 }
 0x481   : > { %v4757_v5 = vxor.u32 2147483648, %v4756_v48  ;;  %v11631_v40 = vsub.s32 %v4837_v33, %v4840_v43  ;;  %vm4779_vm15 = vcmp.lt.s32.totalorder %v11439_v20, 0  ;;  %v4897_v27 = vshrl.u32 %v7945_v24, %v4896_v56 }
 0x482   : > { %v4900_v47 = vor.u32 %v4899_v49, %v4898_v18  ;;  %v4910_v23 = vshll.u32 %v7949_v32, %v4895_v60  ;;  %v4911_v44 = vshrl.u32 %v7950_v39, %v4896_v56  ;;  %v4903_v37 = vor.u32 %v4902_v13, %v4901_v3 }
 0x483   : > { %v4758_v19 = vsel %vm4675_vm3, %v4757_v5, %v4756_v48  ;;  %v4843_v4 = vsub.s32 0, %v11631_v40  ;;  %v4906_v7 = vor.u32 %v4905_v51, %v4904_v61  ;;  %v4909_v16 = vor.u32 %v4908_v59, %v4907_v35 }
 0x484   : > { %v4761_v17 = vsel %vm11547_vm4, %v11370_v31, %v4758_v19  ;;  %v4912_v9 = vor.u32 %v4911_v44, %v4910_v23  ;;  %vm4913_vm0 = vcmp.lt.s32.totalorder %v4894_v15, 1  ;;  %vm11647_vm1 = vcmp.le.f32.partialorder %v4777_v14, 0.7853982 }
 0x485   : > { %7764 = vcosq.f32 %v4761_v17  ;;  %v7194_v2 = vmin.u32 %v4843_v4, %v11631_v40  ;;  %v4929_v8 = vshll.u32 %v4889_v53, 8  ;;  %v4989_v41 = vshrl.u32 %v4988_v1, 23 }
 0x486   : > { %7766 = vsinq.f32 %v4761_v17  ;;  %v4863_v52 = vsub.s32 4, %v4839_v46  ;;  %vm4915_vm2 = vcmp.lt.s32.totalorder %v4894_v15, 3  ;;  %vm4916_vm3 = vcmp.lt.s32.totalorder %v4894_v15, 4 }
 0x487   : > { %v4845_v54 = vclz %v7194_v2  ;;  %vm4914_vm4 = vcmp.lt.s32.totalorder %v4894_v15, 2  ;;  %v4917_v33 = vsel %vm4913_vm0, %v4897_v27, %v4900_v47  ;;  %v4921_v58 = vsel %vm4913_vm0, %v4900_v47, %v4903_v37 }
 0x488   : > { %v4918_v50 = vsel %vm4916_vm3, %v4906_v7, 2102212464  ;;  %v4922_v42 = vsel %vm4916_vm3, %v4909_v16, 920167782  ;;  %v4925_v14 = vsel %vm4913_vm0, %v4903_v37, %v4906_v7  ;;  %v4926_v60 = vsel %vm4916_vm3, %v4912_v9, 1326507024 }
 0x489   : > { %v7195_v45 = vadd.s32 4294967294, %v4845_v54  ;;  %v4919_v63 = vsel %vm4915_vm2, %v4903_v37, %v4918_v50  ;;  %v4923_v22 = vsel %vm4915_vm2, %v4906_v7, %v4922_v42  ;;  %v4927_v11 = vsel %vm4915_vm2, %v4909_v16, %v4926_v60 }
 0x48a   : > { %v4833_v62 = vadd.s32 %v11588_v10, %v11594_v21  ;;  %v4924_v53 = vsel %vm4914_vm4, %v4921_v58, %v4923_v22  ;;  %v4928_v56 = vsel %vm4914_vm4, %v4925_v14, %v4927_v11  ;;  %v7201_v36 = vadd.s32 4294967169, %v4989_v41  ;;  %v11685_v58 = vld [vmem:[%s8067_s30 + $0x178] sm:$0xff] }
 0x48b   : > { %vm7196_vm5 = vcmp.lt.s32.totalorder %v7195_v45, 0  ;;  %v4864_v6 = vsel %vm4779_vm15, %v4863_v52, %v4839_v46  ;;  %v11661_v18 = vmul.u32.u64.low %v4929_v8, %v4928_v56  ;;  %v11662_v34 = vmul.u32.u64.high %v4929_v8, %v4928_v56, %v11661_v18 }
 0x48c   : > { %v4848_v49 = vsel %vm7196_vm5, 0, %v7195_v45  ;;  %v4920_v3 = vsel %vm4914_vm4, %v4917_v33, %v4919_v63  ;;  %v11665_v61 = vmul.u32.u64.low %v4929_v8, %v4924_v53  ;;  %v11666_v38 = vmul.u32.u64.high %v4929_v8, %v4924_v53, %v11665_v61 }
 0x48d   : > { %v4849_v10 = vsub.s32 32, %v4848_v49  ;;  %v4850_v21 = vshll.u32 %v11631_v40, %v4848_v49  ;;  %v4853_v48 = vsub.s32 4294967266, %v4848_v49  ;;  %v4995_v43 = vadd.s32 1, %v7201_v36 }
 0x48e   : > { %vm4765_vm6 = vweird.f32 %v11370_v31  ;;  %v4866_v46 = vsel %vm11647_vm1, 0, %v4864_v6  ;;  %v4936_v35 = vmul.u32 %v4929_v8, %v4920_v3  ;;  %vm4938_vm8 = vc.u32 %v11662_v34, %v11665_v61 }
 0x48f   : > { %v4851_v13 = vshrl.u32 %v4833_v62, %v4849_v10  ;;  %v4854_v51 = vadd.s32 127, %v4853_v48  ;;  %vm4768_vm7 = vcmp.lt.s32.totalorder %v11613_v57, 2  ;;  %v4939_v15 = vadd.s32 1, %v11666_v38 }
 0x490   : > { %v4992_v5 = vand.u32 8388607, %v4985_v0  ;;  %vm4996_vm9 = vcmp.gt.s32.totalorder %v4995_v43, 0  ;;  %vm4769_vm10 = vcmp.eq.s32.totalorder %v11613_v57, 0  ;;  %vm4772_vm12 = vcmp.eq.s32.totalorder %v11613_v57, 2 }
 0x491   : > { %v4852_v40 = vor.u32 %v4851_v13, %v4850_v21  ;;  %v4855_v59 = vshll.u32 %v4854_v51, 23  ;;  %v4997_v1 = vsel %vm4996_vm9, %v4995_v43, 0  ;;  %v4870_v47 = vadd.s32 3, %v4866_v46 }
 0x492   : > { %v7765_v27 = vpop.eup %7764  ;;  %v4940_v23 = vsel %vm4938_vm8, %v4939_v15, %v11666_v38  ;;  %v4999_v44 = vand.u32 31, %v4997_v1  ;;  %v4993_v9 = vor.u32 8388608, %v4992_v5  ;;  %v4998_v53 = vshrl.u32 %v4997_v1, 5 }
 0x493   : > { %v7767_v19 = vpop.eup %7766  ;;  %v4773_v4 = vxor.u32 2147483648, %v7765_v27  ;;  %v4856_v37 = vor.u32 4788187, %v4855_v59  ;;  %v4859_v7 = vcvt.s32.f32 %v4852_v40  ;;  %v4941_v17 = vadd.s32 %v4940_v23, %v4936_v35 }
 0x494   : > { %v4770_v16 = vxor.u32 2147483648, %v7767_v19  ;;  %v5000_v2 = vsub.s32 32, %v4999_v44  ;;  %v5002_v8 = vshll.u32 %v7945_v24, %v4999_v44  ;;  %v5005_v33 = vshll.u32 %v7946_v26, %v4999_v44 }
 0x495   : > { %v4774_v41 = vsel %vm4772_vm12, %v4773_v4, %v7767_v19  ;;  %v4857_v52 = vand.u32 2147483647, %v4856_v37  ;;  %v4942_v54 = vadd.s32 536870912, %v4941_v17  ;;  %v5008_v60 = vshll.u32 %v7947_v28, %v4999_v44 }
 0x496   : > { %v4771_v50 = vsel %vm4769_vm10, %v7765_v27, %v4770_v16  ;;  %v5003_v42 = vshrl.u32 %v7946_v26, %v5000_v2  ;;  %v5006_v14 = vshrl.u32 %v7947_v28, %v5000_v2  ;;  %v5009_v11 = vshrl.u32 %v7948_v30, %v5000_v2 }
 0x497   : > { %v4775_v45 = vsel %vm4768_vm7, %v4771_v50, %v4774_v41  ;;  %v4860_v63 = vmul.f32 %v4859_v7, %v4857_v52  ;;  %v4943_v22 = vshrl.u32 %v4942_v54, 30  ;;  %v5011_v56 = vshll.u32 %v7948_v30, %v4999_v44 }
 0x498   : > { %v4776_v62 = vsel %vm4765_vm6, nan, %v4775_v45  ;;  %v11698_v36 = vshll.u32 %v4993_v9, 8  ;;  %v5001_v49 = vshrl.u32 %v7945_v24, %v5000_v2  ;;  %v5092_v3 = vand.u32 2139095040, %v11685_v58 }
 0x499   : > { %v4861_v6 = vxor.u32 2147483648, %v4860_v63  ;;  %v4944_v18 = vshll.u32 %v4943_v22, 30  ;;  %6900 = vst [vmem:[%s8364_s17 + $0x158] sm:$0xff] %v4776_v62  ;;  %v5004_v57 = vor.u32 %v5003_v42, %v5002_v8  ;;  %v5012_v38 = vshrl.u32 %v7949_v32, %v5000_v2 }
 0x49a   : > { %v5014_v10 = vshll.u32 %v7949_v32, %v4999_v44  ;;  %v5015_v31 = vshrl.u32 %v7950_v39, %v5000_v2  ;;  %v5007_v43 = vor.u32 %v5006_v14, %v5005_v33  ;;  %v5010_v46 = vor.u32 %v5009_v11, %v5008_v60 }
 0x49b   : > { %v4862_v21 = vsel %vm4779_vm15, %v4861_v6, %v4860_v63  ;;  %v11708_v48 = vsub.s32 %v4941_v17, %v4944_v18  ;;  %v5013_v51 = vor.u32 %v5012_v38, %v5011_v56  ;;  %vm5017_vm11 = vcmp.lt.s32.totalorder %v4998_v53, 1 }
 0x49c   : > { %v4865_v13 = vsel %vm11647_vm1, %v11439_v20, %v4862_v21  ;;  %v5016_v35 = vor.u32 %v5015_v31, %v5014_v10  ;;  %vm5019_vm13 = vcmp.lt.s32.totalorder %v4998_v53, 3  ;;  %v5093_v5 = vshrl.u32 %v5092_v3, 23  ;;  %v11754_v31 = vld [vmem:[%s8067_s30 + $0x180] sm:$0xff] }
 0x49d   : > { %7768 = vcosq.f32 %v4865_v13  ;;  %v4947_v15 = vsub.s32 0, %v11708_v48  ;;  %vm5018_vm14 = vcmp.lt.s32.totalorder %v4998_v53, 2  ;;  %vm5020_vm0 = vcmp.lt.s32.totalorder %v4998_v53, 4 }
 0x49e   : > { %7770 = vsinq.f32 %v4865_v13  ;;  %v5021_v40 = vsel %vm5017_vm11, %v5001_v49, %v5004_v57  ;;  %v5022_v1 = vsel %vm5020_vm0, %v5010_v46, 2102212464  ;;  %v5025_v27 = vsel %vm5017_vm11, %v5004_v57, %v5007_v43 }
 0x49f   : > { %v7198_v59 = vmin.u32 %v4947_v15, %v11708_v48  ;;  %v5026_v23 = vsel %vm5020_vm0, %v5013_v51, 920167782  ;;  %v5023_v55 = vsel %vm5019_vm13, %v5007_v43, %v5022_v1  ;;  %v5029_v19 = vsel %vm5017_vm11, %v5007_v43, %v5010_v46 }
 0x4a0   : > { %v5027_v44 = vsel %vm5019_vm13, %v5010_v46, %v5026_v23  ;;  %v5030_v4 = vsel %vm5020_vm0, %v5016_v35, 1326507024  ;;  %v4871_v37 = vand.u32 3, %v4870_v47  ;;  %v4967_v17 = vsub.s32 4, %v4943_v22 }
 0x4a1   : > { %v4949_v7 = vclz %v7198_v59  ;;  %v5024_v16 = vsel %vm5018_vm14, %v5021_v40, %v5023_v55  ;;  %v5028_v9 = vsel %vm5018_vm14, %v5025_v27, %v5027_v44  ;;  %v5031_v2 = vsel %vm5019_vm13, %v5013_v51, %v5030_v4 }
 0x4a2   : > { %v7205_v8 = vadd.s32 4294967169, %v5093_v5  ;;  %v5032_v52 = vsel %vm5018_vm14, %v5029_v19, %v5031_v2  ;;  %v11722_v54 = vmul.u32.u64.low %v11698_v36, %v5028_v9  ;;  %v11723_v33 = vmul.u32.u64.high %v11698_v36, %v5028_v9, %v11722_v54 }
 0x4a3   : > { %v7199_v41 = vadd.s32 4294967294, %v4949_v7  ;;  %vm4883_vm15 = vcmp.lt.s32.totalorder %v11531_v25, 0  ;;  %v11728_v47 = vmul.u32.u64.low %v11698_v36, %v5032_v52  ;;  %v11729_v50 = vmul.u32.u64.high %v11698_v36, %v5032_v52, %v11728_v47 }
 0x4a4   : > { %v5089_v42 = vand.u32 2147483647, %v11685_v58  ;;  %vm4869_vm1 = vweird.f32 %v11439_v20  ;;  %v4937_v14 = vadd.s32 %v11665_v61, %v11662_v34  ;;  %v4968_v60 = vsel %vm4883_vm15, %v4967_v17, %v4943_v22 }
 0x4a5   : > { %vm7200_vm2 = vcmp.lt.s32.totalorder %v7199_v41, 0  ;;  %v5099_v45 = vadd.s32 1, %v7205_v8  ;;  %vm4872_vm3 = vcmp.lt.s32.totalorder %v4871_v37, 2  ;;  %vm11739_vm4 = vcmp.le.f32.partialorder %v4881_v12, 0.7853982 }
 0x4a6   : > { %v4952_v11 = vsel %vm7200_vm2, 0, %v7199_v41  ;;  %v5040_v62 = vmul.u32 %v11698_v36, %v5024_v16  ;;  %v5043_v34 = vadd.s32 1, %v11723_v33  ;;  %v4970_v61 = vsel %vm11739_vm4, 0, %v4968_v60 }
 0x4a7   : > { %v4953_v53 = vsub.s32 32, %v4952_v11  ;;  %v4954_v56 = vshll.u32 %v11708_v48, %v4952_v11  ;;  %v4957_v6 = vsub.s32 4294967266, %v4952_v11  ;;  %vm5042_vm5 = vc.u32 %v11729_v50, %v11722_v54 }
 0x4a8   : > { %v5096_v12 = vand.u32 8388607, %v5089_v42  ;;  %vm5100_vm6 = vcmp.gt.s32.totalorder %v5099_v45, 0  ;;  %v5044_v36 = vsel %vm5042_vm5, %v5043_v34, %v11723_v33  ;;  %vm4873_vm8 = vcmp.eq.s32.totalorder %v4871_v37, 0 }
 0x4a9   : > { %v4955_v22 = vshrl.u32 %v4937_v14, %v4953_v53  ;;  %v4958_v18 = vadd.s32 127, %v4957_v6  ;;  %v5101_v49 = vsel %vm5100_vm6, %v5099_v45, 0  ;;  %vm4876_vm7 = vcmp.eq.s32.totalorder %v4871_v37, 2 }
 0x4aa   : > { %v7769_v3 = vpop.eup %7768  ;;  %v5045_v57 = vadd.s32 %v5044_v36, %v5040_v62  ;;  %v5103_v38 = vand.u32 31, %v5101_v49  ;;  %v11756_v46 = vadd.s32 3, %v4970_v61  ;;  %v5097_v35 = vor.u32 8388608, %v5096_v12 }
 0x4ab   : > { %v7771_v10 = vpop.eup %7770  ;;  %v4877_v21 = vxor.u32 2147483648, %v7769_v3  ;;  %v4956_v48 = vor.u32 %v4955_v22, %v4954_v56  ;;  %v4959_v43 = vshll.u32 %v4958_v18, 23  ;;  %v5193_v1 = vand.u32 2147483647, %v11754_v31 }
 0x4ac   : > { %v4874_v13 = vxor.u32 2147483648, %v7771_v10  ;;  %v5046_v51 = vadd.s32 536870912, %v5045_v57  ;;  %v5104_v15 = vsub.s32 32, %v5103_v38  ;;  %v5102_v55 = vshrl.u32 %v5101_v49, 5 }
 0x4ad   : > { %v4878_v5 = vsel %vm4876_vm7, %v4877_v21, %v7771_v10  ;;  %v4960_v40 = vor.u32 4788187, %v4959_v43  ;;  %v4963_v59 = vcvt.s32.f32 %v4956_v48  ;;  %v5196_v44 = vand.u32 2139095040, %v11754_v31 }
 0x4ae   : > { %v4875_v27 = vsel %vm4873_vm8, %v7769_v3, %v4874_v13  ;;  %v5047_v23 = vshrl.u32 %v5046_v51, 30  ;;  %v5106_v7 = vshll.u32 %v7945_v24, %v5103_v38  ;;  %v5109_v17 = vshll.u32 %v7946_v26, %v5103_v38 }
 0x4af   : > { %v4879_v19 = vsel %vm4872_vm3, %v4875_v27, %v4878_v5  ;;  %v4961_v4 = vand.u32 2147483647, %v4960_v40  ;;  %v5107_v2 = vshrl.u32 %v7946_v26, %v5104_v15  ;;  %v5110_v8 = vshrl.u32 %v7947_v28, %v5104_v15 }
 0x4b0   : > { %v4880_v16 = vsel %vm4869_vm1, nan, %v4879_v19  ;;  %v5048_v9 = vshll.u32 %v5047_v23, 30  ;;  %v5112_v52 = vshll.u32 %v7947_v28, %v5103_v38  ;;  %v5113_v33 = vshrl.u32 %v7948_v30, %v5104_v15 }
 0x4b1   : > { %v4964_v41 = vmul.f32 %v4963_v59, %v4961_v4  ;;  %v5115_v37 = vshll.u32 %v7948_v30, %v5103_v38  ;;  %6901 = vst [vmem:[%s8364_s17 + $0x160] sm:$0xff] %v4880_v16  ;;  %v5116_v14 = vshrl.u32 %v7949_v32, %v5104_v15  ;;  %v5118_v20 = vshll.u32 %v7949_v32, %v5103_v38 }
 0x4b2   : > { %v11772_v47 = vsub.s32 %v5045_v57, %v5048_v9  ;;  %v11776_v60 = vshll.u32 %v5097_v35, 8  ;;  %v5041_v11 = vadd.s32 %v11722_v54, %v11729_v50  ;;  %v5119_v62 = vshrl.u32 %v7950_v39, %v5104_v15 }
 0x4b3   : > { %v4965_v45 = vxor.u32 2147483648, %v4964_v41  ;;  %v5197_v53 = vshrl.u32 %v5196_v44, 23  ;;  %vm4987_vm9 = vcmp.lt.s32.totalorder %v11617_v29, 0  ;;  %v5105_v6 = vshrl.u32 %v7945_v24, %v5104_v15 }
 0x4b4   : > { %v5051_v56 = vsub.s32 0, %v11772_v47  ;;  %v5108_v34 = vor.u32 %v5107_v2, %v5106_v7  ;;  %v5111_v61 = vor.u32 %v5110_v8, %v5109_v17  ;;  %v5114_v22 = vor.u32 %v5113_v33, %v5112_v52 }
 0x4b5   : > { %v4966_v12 = vsel %vm4883_vm15, %v4965_v45, %v4964_v41  ;;  %v5117_v18 = vor.u32 %v5116_v14, %v5115_v37  ;;  %vm5121_vm10 = vcmp.lt.s32.totalorder %v5102_v55, 1  ;;  %v5120_v36 = vor.u32 %v5119_v62, %v5118_v20 }
 0x4b6   : > { %v4969_v54 = vsel %vm11739_vm4, %v11531_v25, %v4966_v12  ;;  %v7202_v50 = vmin.u32 %v5051_v56, %v11772_v47  ;;  %vm5124_vm12 = vcmp.lt.s32.totalorder %v5102_v55, 4  ;;  %vm5122_vm11 = vcmp.lt.s32.totalorder %v5102_v55, 2 }
 0x4b7   : > { %7772 = vcosq.f32 %v4969_v54  ;;  %vm5123_vm13 = vcmp.lt.s32.totalorder %v5102_v55, 3  ;;  %v5126_v49 = vsel %vm5124_vm12, %v5114_v22, 2102212464  ;;  %v5125_v57 = vsel %vm5121_vm10, %v5105_v6, %v5108_v34 }
 0x4b8   : > { %7774 = vsinq.f32 %v4969_v54  ;;  %v5053_v3 = vclz %v7202_v50  ;;  %v5129_v38 = vsel %vm5121_vm10, %v5108_v34, %v5111_v61  ;;  %v5071_v10 = vsub.s32 4, %v5047_v23 }
 0x4b9   : > { %v5127_v21 = vsel %vm5123_vm13, %v5111_v61, %v5126_v49  ;;  %v5130_v48 = vsel %vm5124_vm12, %v5117_v18, 920167782  ;;  %v5133_v63 = vsel %vm5121_vm10, %v5111_v61, %v5114_v22  ;;  %v5134_v51 = vsel %vm5124_vm12, %v5120_v36, 1326507024 }
 0x4ba   : > { %v7203_v43 = vadd.s32 4294967294, %v5053_v3  ;;  %v5131_v13 = vsel %vm5123_vm13, %v5114_v22, %v5130_v48  ;;  %v5200_v35 = vand.u32 8388607, %v5193_v1  ;;  %v5128_v15 = vsel %vm5122_vm11, %v5125_v57, %v5127_v21 }
 0x4bb   : > { %v5132_v5 = vsel %vm5122_vm11, %v5129_v38, %v5131_v13  ;;  %v5135_v40 = vsel %vm5123_vm13, %v5117_v18, %v5134_v51  ;;  %v7209_v59 = vadd.s32 4294967169, %v5197_v53  ;;  %v5072_v7 = vsel %vm4987_vm9, %v5071_v10, %v5047_v23 }
 0x4bc   : > { %vm7204_vm14 = vcmp.lt.s32.totalorder %v7203_v43, 0  ;;  %v5136_v27 = vsel %vm5122_vm11, %v5133_v63, %v5135_v40  ;;  %v11802_v44 = vmul.u32.u64.low %v11776_v60, %v5132_v5  ;;  %v11803_v19 = vmul.u32.u64.high %v11776_v60, %v5132_v5, %v11802_v44 }
 0x4bd   : > { %v5056_v4 = vsel %vm7204_vm14, 0, %v7203_v43  ;;  %v11809_v17 = vmul.u32.u64.low %v11776_v60, %v5136_v27  ;;  %v11810_v16 = vmul.u32.u64.high %v11776_v60, %v5136_v27, %v11809_v17  ;;  %v5203_v41 = vadd.s32 1, %v7209_v59 }
 0x4be   : > { %v5057_v9 = vsub.s32 32, %v5056_v4  ;;  %v5058_v2 = vshll.u32 %v11772_v47, %v5056_v4  ;;  %v5061_v8 = vsub.s32 4294967266, %v5056_v4  ;;  %v4975_v55 = vand.u32 3, %v11756_v46 }
 0x4bf   : > { %vm11816_vm0 = vcmp.le.f32.partialorder %v4985_v0, 0.7853982  ;;  %v5144_v33 = vmul.u32 %v11776_v60, %v5128_v15  ;;  %v5147_v14 = vadd.s32 1, %v11803_v19  ;;  %vm5204_vm15 = vcmp.gt.s32.totalorder %v5203_v41, 0 }
 0x4c0   : > { %v5059_v23 = vshrl.u32 %v5041_v11, %v5057_v9  ;;  %v5062_v37 = vadd.s32 127, %v5061_v8  ;;  %v5074_v47 = vsel %vm11816_vm0, 0, %v5072_v7  ;;  %vm5146_vm1 = vc.u32 %v11810_v16, %v11802_v44 }
 0x4c1   : > { %v5201_v46 = vor.u32 8388608, %v5200_v35  ;;  %v5205_v20 = vsel %vm5204_vm15, %v5203_v41, 0  ;;  %v5148_v62 = vsel %vm5146_vm1, %v5147_v14, %v11803_v19  ;;  %vm4973_vm2 = vweird.f32 %v11531_v25  ;;  %v11846_v19 = vld [vmem:[%s8067_s30 + $0x188] sm:$0xff] }
 0x4c2   : > { %v5060_v45 = vor.u32 %v5059_v23, %v5058_v2  ;;  %v5063_v0 = vshll.u32 %v5062_v37, 23  ;;  %v11827_v53 = vshrl.u32 %v5205_v20, 5  ;;  %vm4976_vm3 = vcmp.lt.s32.totalorder %v4975_v55, 2 }
 0x4c3   : > { %v5149_v60 = vadd.s32 %v5148_v62, %v5144_v33  ;;  %v5207_v11 = vand.u32 31, %v5205_v20  ;;  %vm4977_vm4 = vcmp.eq.s32.totalorder %v4975_v55, 0  ;;  %vm4980_vm5 = vcmp.eq.s32.totalorder %v4975_v55, 2 }
 0x4c4   : > { %v7773_v56 = vpop.eup %7772  ;;  %v5064_v6 = vor.u32 4788187, %v5063_v0  ;;  %v5067_v34 = vcvt.s32.f32 %v5060_v45  ;;  %v5078_v22 = vadd.s32 3, %v5074_v47  ;;  %vm5225_vm6 = vcmp.lt.s32.totalorder %v11827_v53, 1 }
 0x4c5   : > { %v7775_v61 = vpop.eup %7774  ;;  %v4981_v12 = vxor.u32 2147483648, %v7773_v56  ;;  %v5150_v18 = vadd.s32 536870912, %v5149_v60  ;;  %v5208_v54 = vsub.s32 32, %v5207_v11  ;;  %v11831_v49 = vshll.u32 %v5201_v46, 8 }
 0x4c6   : > { %v4978_v50 = vxor.u32 2147483648, %v7775_v61  ;;  %v5065_v36 = vand.u32 2147483647, %v5064_v6  ;;  %v5210_v38 = vshll.u32 %v7945_v24, %v5207_v11  ;;  %vm5091_vm8 = vcmp.lt.s32.totalorder %v11685_v58, 0 }
 0x4c7   : > { %v4982_v3 = vsel %vm4980_vm5, %v4981_v12, %v7775_v61  ;;  %v5151_v57 = vshrl.u32 %v5150_v18, 30  ;;  %v5211_v10 = vshrl.u32 %v7946_v26, %v5208_v54  ;;  %v5213_v63 = vshll.u32 %v7946_v26, %v5207_v11 }
 0x4c8   : > { %v4979_v21 = vsel %vm4977_vm4, %v7773_v56, %v4978_v50  ;;  %v5068_v48 = vmul.f32 %v5067_v34, %v5065_v36  ;;  %v5214_v43 = vshrl.u32 %v7947_v28, %v5208_v54  ;;  %v5216_v35 = vshll.u32 %v7947_v28, %v5207_v11 }
 0x4c9   : > { %v4983_v13 = vsel %vm4976_vm3, %v4979_v21, %v4982_v3  ;;  %v5152_v51 = vshll.u32 %v5151_v57, 30  ;;  %v5217_v15 = vshrl.u32 %v7948_v30, %v5208_v54  ;;  %v5175_v59 = vsub.s32 4, %v5151_v57 }
 0x4ca   : > { %v4984_v5 = vsel %vm4973_vm2, nan, %v4983_v13  ;;  %v5069_v40 = vxor.u32 2147483648, %v5068_v48  ;;  %v5209_v27 = vshrl.u32 %v7945_v24, %v5208_v54  ;;  %v5212_v7 = vor.u32 %v5211_v10, %v5210_v38 }
 0x4cb   : > { %v11848_v4 = vsub.s32 %v5149_v60, %v5152_v51  ;;  %v5219_v17 = vshll.u32 %v7948_v30, %v5207_v11  ;;  %v5220_v9 = vshrl.u32 %v7949_v32, %v5208_v54  ;;  %6902 = vst [vmem:[%s8364_s17 + $0x168] sm:$0xff] %v4984_v5  ;;  %v5215_v8 = vor.u32 %v5214_v43, %v5213_v63 }
 0x4cc   : > { %v5070_v2 = vsel %vm4987_vm9, %v5069_v40, %v5068_v48  ;;  %v5222_v25 = vshll.u32 %v7949_v32, %v5207_v11  ;;  %v5223_v41 = vshrl.u32 %v7950_v39, %v5208_v54  ;;  %vm11862_vm7 = vcmp.le.f32.partialorder %v5089_v42, 0.7853982 }
 0x4cd   : > { %v5073_v55 = vsel %vm11816_vm0, %v11617_v29, %v5070_v2  ;;  %v5155_v23 = vsub.s32 0, %v11848_v4  ;;  %v5218_v37 = vor.u32 %v5217_v15, %v5216_v35  ;;  %v5221_v14 = vor.u32 %v5220_v9, %v5219_v17 }
 0x4ce   : > { %7776 = vcosq.f32 %v5073_v55  ;;  %v5224_v47 = vor.u32 %v5223_v41, %v5222_v25  ;;  %vm5228_vm9 = vcmp.lt.s32.totalorder %v11827_v53, 4  ;;  %v5300_v46 = vand.u32 2139095040, %v11846_v19 }
 0x4cf   : > { %7778 = vsinq.f32 %v5073_v55  ;;  %v7206_v52 = vmin.u32 %v5155_v23, %v11848_v4  ;;  %vm5226_vm10 = vcmp.lt.s32.totalorder %v11827_v53, 2  ;;  %vm5227_vm12 = vcmp.lt.s32.totalorder %v11827_v53, 3 }
 0x4d0   : > { %v5229_v42 = vsel %vm5225_vm6, %v5209_v27, %v5212_v7  ;;  %v5230_v20 = vsel %vm5228_vm9, %v5218_v37, 2102212464  ;;  %v5233_v45 = vsel %vm5225_vm6, %v5212_v7, %v5215_v8  ;;  %v5234_v0 = vsel %vm5228_vm9, %v5221_v14, 920167782 }
 0x4d1   : > { %v11880_v62 = vand.u32 3, %v5078_v22  ;;  %v5157_v60 = vclz %v7206_v52  ;;  %v5176_v11 = vsel %vm5091_vm8, %v5175_v59, %v5151_v57  ;;  %v5237_v56 = vsel %vm5225_vm6, %v5215_v8, %v5218_v37 }
 0x4d2   : > { %v5231_v6 = vsel %vm5227_vm12, %v5215_v8, %v5230_v20  ;;  %v5235_v34 = vsel %vm5227_vm12, %v5218_v37, %v5234_v0  ;;  %v5238_v61 = vsel %vm5228_vm9, %v5224_v47, 1326507024  ;;  %v5301_v12 = vshrl.u32 %v5300_v46, 23 }
 0x4d3   : > { %v7207_v18 = vadd.s32 4294967294, %v5157_v60  ;;  %v5232_v22 = vsel %vm5226_vm10, %v5229_v42, %v5231_v6  ;;  %v5236_v54 = vsel %vm5226_vm10, %v5233_v45, %v5235_v34  ;;  %v5239_v50 = vsel %vm5227_vm12, %v5221_v14, %v5238_v61 }
 0x4d4   : > { %v5145_v36 = vadd.s32 %v11802_v44, %v11810_v16  ;;  %v5240_v3 = vsel %vm5226_vm10, %v5237_v56, %v5239_v50  ;;  %v11903_v57 = vmul.u32.u64.low %v11831_v49, %v5236_v54  ;;  %v11904_v38 = vmul.u32.u64.high %v11831_v49, %v5236_v54, %v11903_v57 }
 0x4d5   : > { %vm7208_vm11 = vcmp.lt.s32.totalorder %v7207_v18, 0  ;;  %v11908_v10 = vmul.u32.u64.low %v11831_v49, %v5240_v3  ;;  %v11909_v21 = vmul.u32.u64.high %v11831_v49, %v5240_v3, %v11908_v10  ;;  %v7213_v48 = vadd.s32 4294967169, %v5301_v12 }
 0x4d6   : > { %v5160_v63 = vsel %vm7208_vm11, 0, %v7207_v18  ;;  %v5178_v43 = vsel %vm11862_vm7, 0, %v5176_v11  ;;  %v5248_v44 = vmul.u32 %v11831_v49, %v5232_v22  ;;  %v5297_v16 = vand.u32 2147483647, %v11846_v19  ;;  %v11932_v11 = vld [vmem:[%s8067_s30 + $0x190] sm:$0xff] }
 0x4d7   : > { %v5161_v53 = vsub.s32 32, %v5160_v63  ;;  %v5162_v13 = vshll.u32 %v11848_v4, %v5160_v63  ;;  %v5165_v51 = vsub.s32 4294967266, %v5160_v63  ;;  %v5307_v35 = vadd.s32 1, %v7213_v48 }
 0x4d8   : > { %vm5077_vm13 = vweird.f32 %v11617_v29  ;;  %v5251_v15 = vadd.s32 1, %v11904_v38  ;;  %vm5084_vm14 = vcmp.eq.s32.totalorder %v11880_v62, 2  ;;  %vm5250_vm0 = vc.u32 %v11909_v21, %v11903_v57 }
 0x4d9   : > { %v5163_v5 = vshrl.u32 %v5145_v36, %v5161_v53  ;;  %v5166_v40 = vadd.s32 127, %v5165_v51  ;;  %v5182_v59 = vadd.s32 3, %v5178_v43  ;;  %v5304_v27 = vand.u32 8388607, %v5297_v16 }
 0x4da   : > { %v5252_v49 = vsel %vm5250_vm0, %v5251_v15, %v11904_v38  ;;  %vm5308_vm15 = vcmp.gt.s32.totalorder %v5307_v35, 0  ;;  %vm5080_vm1 = vcmp.lt.s32.totalorder %v11880_v62, 2  ;;  %vm5081_vm2 = vcmp.eq.s32.totalorder %v11880_v62, 0 }
 0x4db   : > { %v7777_v4 = vpop.eup %7776  ;;  %v5164_v7 = vor.u32 %v5163_v5, %v5162_v13  ;;  %v5167_v17 = vshll.u32 %v5166_v40, 23  ;;  %v5253_v9 = vadd.s32 %v5252_v49, %v5248_v44  ;;  %v5309_v2 = vsel %vm5308_vm15, %v5307_v35, 0 }
 0x4dc   : > { %v7779_v8 = vpop.eup %7778  ;;  %v5085_v25 = vxor.u32 2147483648, %v7777_v4  ;;  %v5311_v41 = vand.u32 31, %v5309_v2  ;;  %v11928_v46 = vand.u32 3, %v5182_v59  ;;  %v5305_v52 = vor.u32 8388608, %v5304_v27 }
 0x4dd   : > { %v5082_v55 = vxor.u32 2147483648, %v7779_v8  ;;  %v5168_v23 = vor.u32 4788187, %v5167_v17  ;;  %v5171_v37 = vcvt.s32.f32 %v5164_v7  ;;  %v5254_v14 = vadd.s32 536870912, %v5253_v9 }
 0x4de   : > { %v5086_v47 = vsel %vm5084_vm14, %v5085_v25, %v7779_v8  ;;  %v5312_v42 = vsub.s32 32, %v5311_v41  ;;  %v5314_v60 = vshll.u32 %v7945_v24, %v5311_v41  ;;  %v5317_v34 = vshll.u32 %v7946_v26, %v5311_v41 }
 0x4df   : > { %v5083_v20 = vsel %vm5081_vm2, %v7777_v4, %v5082_v55  ;;  %v5169_v45 = vand.u32 2147483647, %v5168_v23  ;;  %v5255_v0 = vshrl.u32 %v5254_v14, 30  ;;  %v5320_v61 = vshll.u32 %v7947_v28, %v5311_v41 }
 0x4e0   : > { %v5087_v56 = vsel %vm5080_vm1, %v5083_v20, %v5086_v47  ;;  %v5315_v6 = vshrl.u32 %v7946_v26, %v5312_v42  ;;  %v5318_v54 = vshrl.u32 %v7947_v28, %v5312_v42  ;;  %v5310_v50 = vshrl.u32 %v5309_v2, 5 }
 0x4e1   : > { %v5088_v12 = vsel %vm5077_vm13, nan, %v5087_v56  ;;  %v5172_v18 = vmul.f32 %v5171_v37, %v5169_v45  ;;  %v5256_v22 = vshll.u32 %v5255_v0, 30  ;;  %v5321_v36 = vshrl.u32 %v7948_v30, %v5312_v42 }
 0x4e2   : > { %v5323_v3 = vshll.u32 %v7948_v30, %v5311_v41  ;;  %v5401_v62 = vand.u32 2147483647, %v11932_v11  ;;  %6903 = vst [vmem:[%s8364_s17 + $0x170] sm:$0xff] %v5088_v12  ;;  %v5324_v48 = vshrl.u32 %v7949_v32, %v5312_v42  ;;  %v5404_v29 = vand.u32 2139095040, %v11932_v11 }
 0x4e3   : > { %v5173_v38 = vxor.u32 2147483648, %v5172_v18  ;;  %v11946_v10 = vsub.s32 %v5253_v9, %v5256_v22  ;;  %vm5195_vm3 = vcmp.lt.s32.totalorder %v11754_v31, 0  ;;  %v5313_v63 = vshrl.u32 %v7945_v24, %v5312_v42 }
 0x4e4   : > { %v5316_v43 = vor.u32 %v5315_v6, %v5314_v60  ;;  %v5326_v44 = vshll.u32 %v7949_v32, %v5311_v41  ;;  %v5327_v53 = vshrl.u32 %v7950_v39, %v5312_v42  ;;  %v5319_v35 = vor.u32 %v5318_v54, %v5317_v34 }
 0x4e5   : > { %v5174_v13 = vsel %vm5091_vm8, %v5173_v38, %v5172_v18  ;;  %v5259_v51 = vsub.s32 0, %v11946_v10  ;;  %v5322_v15 = vor.u32 %v5321_v36, %v5320_v61  ;;  %v5325_v40 = vor.u32 %v5324_v48, %v5323_v3 }
 0x4e6   : > { %v5177_v5 = vsel %vm11862_vm7, %v11685_v58, %v5174_v13  ;;  %v5328_v59 = vor.u32 %v5327_v53, %v5326_v44  ;;  %vm5329_vm4 = vcmp.lt.s32.totalorder %v5310_v50, 1  ;;  %vm11962_vm5 = vcmp.le.f32.partialorder %v5193_v1, 0.7853982 }
 0x4e7   : > { %7780 = vcosq.f32 %v5177_v5  ;;  %v7210_v27 = vmin.u32 %v5259_v51, %v11946_v10  ;;  %v5345_v4 = vshll.u32 %v5305_v52, 8  ;;  %v5405_v7 = vshrl.u32 %v5404_v29, 23 }
 0x4e8   : > { %7782 = vsinq.f32 %v5177_v5  ;;  %v5279_v17 = vsub.s32 4, %v5255_v0  ;;  %vm5331_vm6 = vcmp.lt.s32.totalorder %v5310_v50, 3  ;;  %vm5332_vm8 = vcmp.lt.s32.totalorder %v5310_v50, 4 }
 0x4e9   : > { %v5261_v33 = vclz %v7210_v27  ;;  %vm5330_vm7 = vcmp.lt.s32.totalorder %v5310_v50, 2  ;;  %v5333_v9 = vsel %vm5329_vm4, %v5313_v63, %v5316_v43  ;;  %v5337_v2 = vsel %vm5329_vm4, %v5316_v43, %v5319_v35 }
 0x4ea   : > { %v5334_v8 = vsel %vm5332_vm8, %v5322_v15, 2102212464  ;;  %v5338_v25 = vsel %vm5332_vm8, %v5325_v40, 920167782  ;;  %v5341_v1 = vsel %vm5329_vm4, %v5319_v35, %v5322_v15  ;;  %v5342_v41 = vsel %vm5332_vm8, %v5328_v59, 1326507024 }
 0x4eb   : > { %v7211_v55 = vadd.s32 4294967294, %v5261_v33  ;;  %v5335_v23 = vsel %vm5331_vm6, %v5319_v35, %v5334_v8  ;;  %v5339_v37 = vsel %vm5331_vm6, %v5322_v15, %v5338_v25  ;;  %v5343_v14 = vsel %vm5331_vm6, %v5325_v40, %v5342_v41 }
 0x4ec   : > { %v5249_v47 = vadd.s32 %v11903_v57, %v11909_v21  ;;  %v5340_v52 = vsel %vm5330_vm7, %v5337_v2, %v5339_v37  ;;  %v5344_v42 = vsel %vm5330_vm7, %v5341_v1, %v5343_v14  ;;  %v7217_v20 = vadd.s32 4294967169, %v5405_v7  ;;  %v12000_v2 = vld [vmem:[%s8067_s30 + $0x198] sm:$0xff] }
 0x4ed   : > { %vm7212_vm9 = vcmp.lt.s32.totalorder %v7211_v55, 0  ;;  %v5280_v45 = vsel %vm5195_vm3, %v5279_v17, %v5255_v0  ;;  %v11976_v60 = vmul.u32.u64.low %v5345_v4, %v5344_v42  ;;  %v11977_v56 = vmul.u32.u64.high %v5345_v4, %v5344_v42, %v11976_v60 }
 0x4ee   : > { %v5264_v6 = vsel %vm7212_vm9, 0, %v7211_v55  ;;  %v5336_v34 = vsel %vm5330_vm7, %v5333_v9, %v5335_v23  ;;  %v11980_v61 = vmul.u32.u64.low %v5345_v4, %v5340_v52  ;;  %v11981_v12 = vmul.u32.u64.high %v5345_v4, %v5340_v52, %v11980_v61 }
 0x4ef   : > { %v5265_v57 = vsub.s32 32, %v5264_v6  ;;  %v5266_v21 = vshll.u32 %v11946_v10, %v5264_v6  ;;  %v5269_v18 = vsub.s32 4294967266, %v5264_v6  ;;  %v5411_v22 = vadd.s32 1, %v7217_v20 }
 0x4f0   : > { %vm5181_vm10 = vweird.f32 %v11685_v58  ;;  %v5282_v0 = vsel %vm11962_vm5, 0, %v5280_v45  ;;  %v5352_v3 = vmul.u32 %v5345_v4, %v5336_v34  ;;  %vm5354_vm12 = vc.u32 %v11977_v56, %v11980_v61 }
 0x4f1   : > { %v5267_v54 = vshrl.u32 %v5249_v47, %v5265_v57  ;;  %v5270_v36 = vadd.s32 127, %v5269_v18  ;;  %vm5184_vm11 = vcmp.lt.s32.totalorder %v11928_v46, 2  ;;  %v5355_v50 = vadd.s32 1, %v11981_v12 }
 0x4f2   : > { %v5408_v38 = vand.u32 8388607, %v5401_v62  ;;  %vm5412_vm13 = vcmp.gt.s32.totalorder %v5411_v22, 0  ;;  %vm5185_vm14 = vcmp.eq.s32.totalorder %v11928_v46, 0  ;;  %vm5188_vm0 = vcmp.eq.s32.totalorder %v11928_v46, 2 }
 0x4f3   : > { %v5268_v10 = vor.u32 %v5267_v54, %v5266_v21  ;;  %v5271_v48 = vshll.u32 %v5270_v36, 23  ;;  %v5413_v29 = vsel %vm5412_vm13, %v5411_v22, 0  ;;  %v5286_v43 = vadd.s32 3, %v5282_v0 }
 0x4f4   : > { %v7781_v63 = vpop.eup %7780  ;;  %v5356_v44 = vsel %vm5354_vm12, %v5355_v50, %v11981_v12  ;;  %v5415_v53 = vand.u32 31, %v5413_v29  ;;  %v5409_v59 = vor.u32 8388608, %v5408_v38  ;;  %v5414_v52 = vshrl.u32 %v5413_v29, 5 }
 0x4f5   : > { %v7783_v13 = vpop.eup %7782  ;;  %v5189_v51 = vxor.u32 2147483648, %v7781_v63  ;;  %v5272_v35 = vor.u32 4788187, %v5271_v48  ;;  %v5275_v15 = vcvt.s32.f32 %v5268_v10  ;;  %v5357_v5 = vadd.s32 %v5356_v44, %v5352_v3 }
 0x4f6   : > { %v5186_v40 = vxor.u32 2147483648, %v7783_v13  ;;  %v5416_v27 = vsub.s32 32, %v5415_v53  ;;  %v5418_v4 = vshll.u32 %v7945_v24, %v5415_v53  ;;  %v5421_v9 = vshll.u32 %v7946_v26, %v5415_v53 }
 0x4f7   : > { %v5190_v7 = vsel %vm5188_vm0, %v5189_v51, %v7783_v13  ;;  %v5273_v17 = vand.u32 2147483647, %v5272_v35  ;;  %v5358_v33 = vadd.s32 536870912, %v5357_v5  ;;  %v5424_v41 = vshll.u32 %v7947_v28, %v5415_v53 }
 0x4f8   : > { %v5187_v8 = vsel %vm5185_vm14, %v7781_v63, %v5186_v40  ;;  %v5419_v25 = vshrl.u32 %v7946_v26, %v5416_v27  ;;  %v5422_v1 = vshrl.u32 %v7947_v28, %v5416_v27  ;;  %v5425_v14 = vshrl.u32 %v7948_v30, %v5416_v27 }
 0x4f9   : > { %v5191_v55 = vsel %vm5184_vm11, %v5187_v8, %v5190_v7  ;;  %v5276_v23 = vmul.f32 %v5275_v15, %v5273_v17  ;;  %v5359_v37 = vshrl.u32 %v5358_v33, 30  ;;  %v5427_v42 = vshll.u32 %v7948_v30, %v5415_v53 }
 0x4fa   : > { %v5192_v47 = vsel %vm5181_vm10, nan, %v5191_v55  ;;  %v12013_v20 = vshll.u32 %v5409_v59, 8  ;;  %v5417_v6 = vshrl.u32 %v7945_v24, %v5416_v27  ;;  %v5508_v34 = vand.u32 2139095040, %v12000_v2 }
 0x4fb   : > { %v5277_v45 = vxor.u32 2147483648, %v5276_v23  ;;  %v5360_v60 = vshll.u32 %v5359_v37, 30  ;;  %6904 = vst [vmem:[%s8364_s17 + $0x178] sm:$0xff] %v5192_v47  ;;  %v5420_v46 = vor.u32 %v5419_v25, %v5418_v4  ;;  %v5428_v12 = vshrl.u32 %v7949_v32, %v5416_v27 }
 0x4fc   : > { %v5430_v57 = vshll.u32 %v7949_v32, %v5415_v53  ;;  %v5431_v58 = vshrl.u32 %v7950_v39, %v5416_v27  ;;  %v5423_v22 = vor.u32 %v5422_v1, %v5421_v9  ;;  %v5426_v0 = vor.u32 %v5425_v14, %v5424_v41 }
 0x4fd   : > { %v5278_v21 = vsel %vm5195_vm3, %v5277_v45, %v5276_v23  ;;  %v12023_v18 = vsub.s32 %v5357_v5, %v5360_v60  ;;  %v5429_v36 = vor.u32 %v5428_v12, %v5427_v42  ;;  %vm5433_vm15 = vcmp.lt.s32.totalorder %v5414_v52, 1 }
 0x4fe   : > { %v5281_v54 = vsel %vm11962_vm5, %v11754_v31, %v5278_v21  ;;  %v5432_v3 = vor.u32 %v5431_v58, %v5430_v57  ;;  %vm5435_vm1 = vcmp.lt.s32.totalorder %v5414_v52, 3  ;;  %v5509_v38 = vshrl.u32 %v5508_v34, 23  ;;  %v12069_v58 = vld [vmem:[%s8067_s30 + $0x1a0] sm:$0xff] }
 0x4ff   : > { %7784 = vcosq.f32 %v5281_v54  ;;  %v5363_v50 = vsub.s32 0, %v12023_v18  ;;  %vm5434_vm2 = vcmp.lt.s32.totalorder %v5414_v52, 2  ;;  %vm5436_vm4 = vcmp.lt.s32.totalorder %v5414_v52, 4 }
 0x500   : > { %7786 = vsinq.f32 %v5281_v54  ;;  %v5437_v10 = vsel %vm5433_vm15, %v5417_v6, %v5420_v46  ;;  %v5438_v29 = vsel %vm5436_vm4, %v5426_v0, 2102212464  ;;  %v5441_v63 = vsel %vm5433_vm15, %v5420_v46, %v5423_v22 }
 0x501   : > { %v7214_v48 = vmin.u32 %v5363_v50, %v12023_v18  ;;  %v5442_v44 = vsel %vm5436_vm4, %v5429_v36, 920167782  ;;  %v5439_v49 = vsel %vm5435_vm1, %v5423_v22, %v5438_v29  ;;  %v5445_v13 = vsel %vm5433_vm15, %v5423_v22, %v5426_v0 }
 0x502   : > { %v5443_v53 = vsel %vm5435_vm1, %v5426_v0, %v5442_v44  ;;  %v5446_v51 = vsel %vm5436_vm4, %v5432_v3, 1326507024  ;;  %v5287_v35 = vand.u32 3, %v5286_v43  ;;  %v5383_v5 = vsub.s32 4, %v5359_v37 }
 0x503   : > { %v5365_v15 = vclz %v7214_v48  ;;  %v5440_v40 = vsel %vm5434_vm2, %v5437_v10, %v5439_v49  ;;  %v5444_v59 = vsel %vm5434_vm2, %v5441_v63, %v5443_v53  ;;  %v5447_v27 = vsel %vm5435_vm1, %v5429_v36, %v5446_v51 }
 0x504   : > { %v7221_v4 = vadd.s32 4294967169, %v5509_v38  ;;  %v5448_v17 = vsel %vm5434_vm2, %v5445_v13, %v5447_v27  ;;  %v12037_v33 = vmul.u32.u64.low %v12013_v20, %v5444_v59  ;;  %v12038_v9 = vmul.u32.u64.high %v12013_v20, %v5444_v59, %v12037_v33 }
 0x505   : > { %v7215_v7 = vadd.s32 4294967294, %v5365_v15  ;;  %vm5299_vm3 = vcmp.lt.s32.totalorder %v11846_v19, 0  ;;  %v12043_v43 = vmul.u32.u64.low %v12013_v20, %v5448_v17  ;;  %v12044_v8 = vmul.u32.u64.high %v12013_v20, %v5448_v17, %v12043_v43 }
 0x506   : > { %v5505_v25 = vand.u32 2147483647, %v12000_v2  ;;  %vm5285_vm5 = vweird.f32 %v11754_v31  ;;  %v5353_v1 = vadd.s32 %v11980_v61, %v11977_v56  ;;  %v5384_v41 = vsel %vm5299_vm3, %v5383_v5, %v5359_v37 }
 0x507   : > { %vm7216_vm6 = vcmp.lt.s32.totalorder %v7215_v7, 0  ;;  %v5515_v55 = vadd.s32 1, %v7221_v4  ;;  %vm5288_vm8 = vcmp.lt.s32.totalorder %v5287_v35, 2  ;;  %vm12054_vm7 = vcmp.le.f32.partialorder %v5297_v16, 0.7853982 }
 0x508   : > { %v5368_v14 = vsel %vm7216_vm6, 0, %v7215_v7  ;;  %v5456_v47 = vmul.u32 %v12013_v20, %v5440_v40  ;;  %v5459_v56 = vadd.s32 1, %v12038_v9  ;;  %v5386_v61 = vsel %vm12054_vm7, 0, %v5384_v41 }
 0x509   : > { %v5369_v52 = vsub.s32 32, %v5368_v14  ;;  %v5370_v42 = vshll.u32 %v12023_v18, %v5368_v14  ;;  %v5373_v45 = vsub.s32 4294967266, %v5368_v14  ;;  %vm5458_vm9 = vc.u32 %v12044_v8, %v12037_v33 }
 0x50a   : > { %v5512_v16 = vand.u32 8388607, %v5505_v25  ;;  %vm5516_vm10 = vcmp.gt.s32.totalorder %v5515_v55, 0  ;;  %v5460_v20 = vsel %vm5458_vm9, %v5459_v56, %v12038_v9  ;;  %vm5289_vm12 = vcmp.eq.s32.totalorder %v5287_v35, 0 }
 0x50b   : > { %v5371_v37 = vshrl.u32 %v5353_v1, %v5369_v52  ;;  %v5374_v60 = vadd.s32 127, %v5373_v45  ;;  %v5517_v6 = vsel %vm5516_vm10, %v5515_v55, 0  ;;  %vm5292_vm11 = vcmp.eq.s32.totalorder %v5287_v35, 2 }
 0x50c   : > { %v7785_v34 = vpop.eup %7784  ;;  %v5461_v46 = vadd.s32 %v5460_v20, %v5456_v47  ;;  %v5519_v12 = vand.u32 31, %v5517_v6  ;;  %v12071_v0 = vadd.s32 3, %v5386_v61  ;;  %v5513_v3 = vor.u32 8388608, %v5512_v16 }
 0x50d   : > { %v7787_v57 = vpop.eup %7786  ;;  %v5293_v21 = vxor.u32 2147483648, %v7785_v34  ;;  %v5372_v18 = vor.u32 %v5371_v37, %v5370_v42  ;;  %v5375_v22 = vshll.u32 %v5374_v60, 23  ;;  %v5609_v29 = vand.u32 2147483647, %v12069_v58 }
 0x50e   : > { %v5290_v54 = vxor.u32 2147483648, %v7787_v57  ;;  %v5462_v36 = vadd.s32 536870912, %v5461_v46  ;;  %v5520_v50 = vsub.s32 32, %v5519_v12  ;;  %v5518_v49 = vshrl.u32 %v5517_v6, 5 }
 0x50f   : > { %v5294_v38 = vsel %vm5292_vm11, %v5293_v21, %v7787_v57  ;;  %v5376_v10 = vor.u32 4788187, %v5375_v22  ;;  %v5379_v48 = vcvt.s32.f32 %v5372_v18  ;;  %v5612_v53 = vand.u32 2139095040, %v12069_v58 }
 0x510   : > { %v5291_v63 = vsel %vm5289_vm12, %v7785_v34, %v5290_v54  ;;  %v5463_v44 = vshrl.u32 %v5462_v36, 30  ;;  %v5522_v15 = vshll.u32 %v7945_v24, %v5519_v12  ;;  %v5525_v5 = vshll.u32 %v7946_v26, %v5519_v12 }
 0x511   : > { %v5295_v13 = vsel %vm5288_vm8, %v5291_v63, %v5294_v38  ;;  %v5377_v51 = vand.u32 2147483647, %v5376_v10  ;;  %v5523_v27 = vshrl.u32 %v7946_v26, %v5520_v50  ;;  %v5526_v4 = vshrl.u32 %v7947_v28, %v5520_v50 }
 0x512   : > { %v5296_v40 = vsel %vm5285_vm5, nan, %v5295_v13  ;;  %v5464_v59 = vshll.u32 %v5463_v44, 30  ;;  %v5528_v17 = vshll.u32 %v7947_v28, %v5519_v12  ;;  %v5529_v9 = vshrl.u32 %v7948_v30, %v5520_v50 }
 0x513   : > { %v5380_v7 = vmul.f32 %v5379_v48, %v5377_v51  ;;  %v5531_v35 = vshll.u32 %v7948_v30, %v5519_v12  ;;  %6905 = vst [vmem:[%s8364_s17 + $0x180] sm:$0xff] %v5296_v40  ;;  %v5532_v1 = vshrl.u32 %v7949_v32, %v5520_v50  ;;  %v5534_v31 = vshll.u32 %v7949_v32, %v5519_v12 }
 0x514   : > { %v12087_v43 = vsub.s32 %v5461_v46, %v5464_v59  ;;  %v12091_v41 = vshll.u32 %v5513_v3, 8  ;;  %v5457_v14 = vadd.s32 %v12037_v33, %v12044_v8  ;;  %v5535_v47 = vshrl.u32 %v7950_v39, %v5520_v50 }
 0x515   : > { %v5381_v55 = vxor.u32 2147483648, %v5380_v7  ;;  %v5613_v52 = vshrl.u32 %v5612_v53, 23  ;;  %vm5403_vm13 = vcmp.lt.s32.totalorder %v11932_v11, 0  ;;  %v5521_v45 = vshrl.u32 %v7945_v24, %v5520_v50 }
 0x516   : > { %v5467_v42 = vsub.s32 0, %v12087_v43  ;;  %v5524_v56 = vor.u32 %v5523_v27, %v5522_v15  ;;  %v5527_v61 = vor.u32 %v5526_v4, %v5525_v5  ;;  %v5530_v37 = vor.u32 %v5529_v9, %v5528_v17 }
 0x517   : > { %v5382_v16 = vsel %vm5299_vm3, %v5381_v55, %v5380_v7  ;;  %v5533_v60 = vor.u32 %v5532_v1, %v5531_v35  ;;  %vm5537_vm14 = vcmp.lt.s32.totalorder %v5518_v49, 1  ;;  %v5536_v20 = vor.u32 %v5535_v47, %v5534_v31 }
 0x518   : > { %v5385_v33 = vsel %vm12054_vm7, %v11846_v19, %v5382_v16  ;;  %v7218_v8 = vmin.u32 %v5467_v42, %v12087_v43  ;;  %vm5540_vm0 = vcmp.lt.s32.totalorder %v5518_v49, 4  ;;  %vm5538_vm15 = vcmp.lt.s32.totalorder %v5518_v49, 2 }
 0x519   : > { %7788 = vcosq.f32 %v5385_v33  ;;  %vm5539_vm1 = vcmp.lt.s32.totalorder %v5518_v49, 3  ;;  %v5542_v6 = vsel %vm5540_vm0, %v5530_v37, 2102212464  ;;  %v5541_v46 = vsel %vm5537_vm14, %v5521_v45, %v5524_v56 }
 0x51a   : > { %7790 = vsinq.f32 %v5385_v33  ;;  %v5469_v34 = vclz %v7218_v8  ;;  %v5545_v12 = vsel %vm5537_vm14, %v5524_v56, %v5527_v61  ;;  %v5487_v57 = vsub.s32 4, %v5463_v44 }
 0x51b   : > { %v5543_v21 = vsel %vm5539_vm1, %v5527_v61, %v5542_v6  ;;  %v5546_v18 = vsel %vm5540_vm0, %v5533_v60, 920167782  ;;  %v5549_v23 = vsel %vm5537_vm14, %v5527_v61, %v5530_v37  ;;  %v5550_v36 = vsel %vm5540_vm0, %v5536_v20, 1326507024 }
 0x51c   : > { %v7219_v22 = vadd.s32 4294967294, %v5469_v34  ;;  %v5547_v54 = vsel %vm5539_vm1, %v5530_v37, %v5546_v18  ;;  %v5616_v3 = vand.u32 8388607, %v5609_v29  ;;  %v5544_v50 = vsel %vm5538_vm15, %v5541_v46, %v5543_v21 }
 0x51d   : > { %v5548_v38 = vsel %vm5538_vm15, %v5545_v12, %v5547_v54  ;;  %v5551_v10 = vsel %vm5539_vm1, %v5533_v60, %v5550_v36  ;;  %v7225_v48 = vadd.s32 4294967169, %v5613_v52  ;;  %v5488_v15 = vsel %vm5403_vm13, %v5487_v57, %v5463_v44 }
 0x51e   : > { %vm7220_vm2 = vcmp.lt.s32.totalorder %v7219_v22, 0  ;;  %v5552_v63 = vsel %vm5538_vm15, %v5549_v23, %v5551_v10  ;;  %v12117_v53 = vmul.u32.u64.low %v12091_v41, %v5548_v38  ;;  %v12118_v13 = vmul.u32.u64.high %v12091_v41, %v5548_v38, %v12117_v53 }
 0x51f   : > { %v5472_v51 = vsel %vm7220_vm2, 0, %v7219_v22  ;;  %v12124_v5 = vmul.u32.u64.low %v12091_v41, %v5552_v63  ;;  %v12125_v40 = vmul.u32.u64.high %v12091_v41, %v5552_v63, %v12124_v5  ;;  %v5619_v7 = vadd.s32 1, %v7225_v48 }
 0x520   : > { %v5473_v59 = vsub.s32 32, %v5472_v51  ;;  %v5474_v27 = vshll.u32 %v12087_v43, %v5472_v51  ;;  %v5477_v4 = vsub.s32 4294967266, %v5472_v51  ;;  %v5391_v49 = vand.u32 3, %v12071_v0 }
 0x521   : > { %vm12131_vm4 = vcmp.le.f32.partialorder %v5401_v62, 0.7853982  ;;  %v5560_v9 = vmul.u32 %v12091_v41, %v5544_v50  ;;  %v5563_v1 = vadd.s32 1, %v12118_v13  ;;  %vm5620_vm3 = vcmp.gt.s32.totalorder %v5619_v7, 0 }
 0x522   : > { %v5475_v44 = vshrl.u32 %v5457_v14, %v5473_v59  ;;  %v5478_v35 = vadd.s32 127, %v5477_v4  ;;  %v5490_v43 = vsel %vm12131_vm4, 0, %v5488_v15  ;;  %vm5562_vm5 = vc.u32 %v12125_v40, %v12117_v53 }
 0x523   : > { %v5617_v0 = vor.u32 8388608, %v5616_v3  ;;  %v5621_v31 = vsel %vm5620_vm3, %v5619_v7, 0  ;;  %v5564_v47 = vsel %vm5562_vm5, %v5563_v1, %v12118_v13  ;;  %vm5389_vm6 = vweird.f32 %v11846_v19  ;;  %v12161_v13 = vld [vmem:[%s8067_s30 + $0x1a8] sm:$0xff] }
 0x524   : > { %v5476_v55 = vor.u32 %v5475_v44, %v5474_v27  ;;  %v5479_v62 = vshll.u32 %v5478_v35, 23  ;;  %v12142_v52 = vshrl.u32 %v5621_v31, 5  ;;  %vm5392_vm8 = vcmp.lt.s32.totalorder %v5391_v49, 2 }
 0x525   : > { %v5565_v41 = vadd.s32 %v5564_v47, %v5560_v9  ;;  %v5623_v14 = vand.u32 31, %v5621_v31  ;;  %vm5393_vm7 = vcmp.eq.s32.totalorder %v5391_v49, 0  ;;  %vm5396_vm9 = vcmp.eq.s32.totalorder %v5391_v49, 2 }
 0x526   : > { %v7789_v42 = vpop.eup %7788  ;;  %v5480_v45 = vor.u32 4788187, %v5479_v62  ;;  %v5483_v56 = vcvt.s32.f32 %v5476_v55  ;;  %v5494_v37 = vadd.s32 3, %v5490_v43  ;;  %vm5641_vm10 = vcmp.lt.s32.totalorder %v12142_v52, 1 }
 0x527   : > { %v7791_v61 = vpop.eup %7790  ;;  %v5397_v16 = vxor.u32 2147483648, %v7789_v42  ;;  %v5566_v60 = vadd.s32 536870912, %v5565_v41  ;;  %v5624_v33 = vsub.s32 32, %v5623_v14  ;;  %v12146_v6 = vshll.u32 %v5617_v0, 8 }
 0x528   : > { %v5394_v8 = vxor.u32 2147483648, %v7791_v61  ;;  %v5481_v20 = vand.u32 2147483647, %v5480_v45  ;;  %v5626_v12 = vshll.u32 %v7945_v24, %v5623_v14  ;;  %vm5507_vm12 = vcmp.lt.s32.totalorder %v12000_v2, 0 }
 0x529   : > { %v5398_v34 = vsel %vm5396_vm9, %v5397_v16, %v7791_v61  ;;  %v5567_v46 = vshrl.u32 %v5566_v60, 30  ;;  %v5627_v57 = vshrl.u32 %v7946_v26, %v5624_v33  ;;  %v5629_v23 = vshll.u32 %v7946_v26, %v5623_v14 }
 0x52a   : > { %v5395_v21 = vsel %vm5393_vm7, %v7789_v42, %v5394_v8  ;;  %v5484_v18 = vmul.f32 %v5483_v56, %v5481_v20  ;;  %v5630_v22 = vshrl.u32 %v7947_v28, %v5624_v33  ;;  %v5632_v3 = vshll.u32 %v7947_v28, %v5623_v14 }
 0x52b   : > { %v5399_v54 = vsel %vm5392_vm8, %v5395_v21, %v5398_v34  ;;  %v5568_v36 = vshll.u32 %v5567_v46, 30  ;;  %v5633_v50 = vshrl.u32 %v7948_v30, %v5624_v33  ;;  %v5591_v48 = vsub.s32 4, %v5567_v46 }
 0x52c   : > { %v5400_v38 = vsel %vm5389_vm6, nan, %v5399_v54  ;;  %v5485_v10 = vxor.u32 2147483648, %v5484_v18  ;;  %v5625_v63 = vshrl.u32 %v7945_v24, %v5624_v33  ;;  %v5628_v15 = vor.u32 %v5627_v57, %v5626_v12 }
 0x52d   : > { %v12163_v51 = vsub.s32 %v5565_v41, %v5568_v36  ;;  %v5635_v5 = vshll.u32 %v7948_v30, %v5623_v14  ;;  %v5636_v59 = vshrl.u32 %v7949_v32, %v5624_v33  ;;  %6906 = vst [vmem:[%s8364_s17 + $0x188] sm:$0xff] %v5400_v38  ;;  %v5631_v4 = vor.u32 %v5630_v22, %v5629_v23 }
 0x52e   : > { %v5486_v27 = vsel %vm5403_vm13, %v5485_v10, %v5484_v18  ;;  %v5638_v19 = vshll.u32 %v7949_v32, %v5623_v14  ;;  %v5639_v7 = vshrl.u32 %v7950_v39, %v5624_v33  ;;  %vm12177_vm11 = vcmp.le.f32.partialorder %v5505_v25, 0.7853982 }
 0x52f   : > { %v5489_v49 = vsel %vm12131_vm4, %v11932_v11, %v5486_v27  ;;  %v5571_v44 = vsub.s32 0, %v12163_v51  ;;  %v5634_v35 = vor.u32 %v5633_v50, %v5632_v3  ;;  %v5637_v1 = vor.u32 %v5636_v59, %v5635_v5 }
 0x530   : > { %7792 = vcosq.f32 %v5489_v49  ;;  %v5640_v43 = vor.u32 %v5639_v7, %v5638_v19  ;;  %vm5644_vm13 = vcmp.lt.s32.totalorder %v12142_v52, 4  ;;  %v5716_v0 = vand.u32 2139095040, %v12161_v13 }
 0x531   : > { %7794 = vsinq.f32 %v5489_v49  ;;  %v7222_v17 = vmin.u32 %v5571_v44, %v12163_v51  ;;  %vm5642_vm14 = vcmp.lt.s32.totalorder %v12142_v52, 2  ;;  %vm5643_vm0 = vcmp.lt.s32.totalorder %v12142_v52, 3 }
 0x532   : > { %v5645_v25 = vsel %vm5641_vm10, %v5625_v63, %v5628_v15  ;;  %v5646_v31 = vsel %vm5644_vm13, %v5634_v35, 2102212464  ;;  %v5649_v55 = vsel %vm5641_vm10, %v5628_v15, %v5631_v4  ;;  %v5650_v62 = vsel %vm5644_vm13, %v5637_v1, 920167782 }
 0x533   : > { %v12195_v47 = vand.u32 3, %v5494_v37  ;;  %v5573_v41 = vclz %v7222_v17  ;;  %v5592_v14 = vsel %vm5507_vm12, %v5591_v48, %v5567_v46  ;;  %v5653_v42 = vsel %vm5641_vm10, %v5631_v4, %v5634_v35 }
 0x534   : > { %v5647_v45 = vsel %vm5643_vm0, %v5631_v4, %v5646_v31  ;;  %v5651_v56 = vsel %vm5643_vm0, %v5634_v35, %v5650_v62  ;;  %v5654_v61 = vsel %vm5644_vm13, %v5640_v43, 1326507024  ;;  %v5717_v16 = vshrl.u32 %v5716_v0, 23 }
 0x535   : > { %v7223_v60 = vadd.s32 4294967294, %v5573_v41  ;;  %v5648_v37 = vsel %vm5642_vm14, %v5645_v25, %v5647_v45  ;;  %v5652_v33 = vsel %vm5642_vm14, %v5649_v55, %v5651_v56  ;;  %v5655_v8 = vsel %vm5643_vm0, %v5637_v1, %v5654_v61 }
 0x536   : > { %v5561_v20 = vadd.s32 %v12117_v53, %v12125_v40  ;;  %v5656_v34 = vsel %vm5642_vm14, %v5653_v42, %v5655_v8  ;;  %v12218_v46 = vmul.u32.u64.low %v12146_v6, %v5652_v33  ;;  %v12219_v12 = vmul.u32.u64.high %v12146_v6, %v5652_v33, %v12218_v46 }
 0x537   : > { %vm7224_vm15 = vcmp.lt.s32.totalorder %v7223_v60, 0  ;;  %v12223_v57 = vmul.u32.u64.low %v12146_v6, %v5656_v34  ;;  %v12224_v21 = vmul.u32.u64.high %v12146_v6, %v5656_v34, %v12223_v57  ;;  %v7229_v18 = vadd.s32 4294967169, %v5717_v16 }
 0x538   : > { %v5576_v23 = vsel %vm7224_vm15, 0, %v7223_v60  ;;  %v5594_v22 = vsel %vm12177_vm11, 0, %v5592_v14  ;;  %v5664_v53 = vmul.u32 %v12146_v6, %v5648_v37  ;;  %v5713_v40 = vand.u32 2147483647, %v12161_v13  ;;  %v12247_v14 = vld [vmem:[%s8067_s30 + $0x1b0] sm:$0xff] }
 0x539   : > { %v5577_v52 = vsub.s32 32, %v5576_v23  ;;  %v5578_v54 = vshll.u32 %v12163_v51, %v5576_v23  ;;  %v5581_v36 = vsub.s32 4294967266, %v5576_v23  ;;  %v5723_v3 = vadd.s32 1, %v7229_v18 }
 0x53a   : > { %vm5493_vm1 = vweird.f32 %v11932_v11  ;;  %v5667_v50 = vadd.s32 1, %v12219_v12  ;;  %vm5500_vm2 = vcmp.eq.s32.totalorder %v12195_v47, 2  ;;  %vm5666_vm4 = vc.u32 %v12224_v21, %v12218_v46 }
 0x53b   : > { %v5579_v38 = vshrl.u32 %v5561_v20, %v5577_v52  ;;  %v5582_v10 = vadd.s32 127, %v5581_v36  ;;  %v5598_v48 = vadd.s32 3, %v5594_v22  ;;  %v5720_v63 = vand.u32 8388607, %v5713_v40 }
 0x53c   : > { %v5668_v6 = vsel %vm5666_vm4, %v5667_v50, %v12219_v12  ;;  %vm5724_vm3 = vcmp.gt.s32.totalorder %v5723_v3, 0  ;;  %vm5496_vm5 = vcmp.lt.s32.totalorder %v12195_v47, 2  ;;  %vm5497_vm6 = vcmp.eq.s32.totalorder %v12195_v47, 0 }
 0x53d   : > { %v7793_v51 = vpop.eup %7792  ;;  %v5580_v15 = vor.u32 %v5579_v38, %v5578_v54  ;;  %v5583_v5 = vshll.u32 %v5582_v10, 23  ;;  %v5669_v59 = vadd.s32 %v5668_v6, %v5664_v53  ;;  %v5725_v27 = vsel %vm5724_vm3, %v5723_v3, 0 }
 0x53e   : > { %v7795_v4 = vpop.eup %7794  ;;  %v5501_v19 = vxor.u32 2147483648, %v7793_v51  ;;  %v5727_v7 = vand.u32 31, %v5725_v27  ;;  %v12243_v0 = vand.u32 3, %v5598_v48  ;;  %v5721_v17 = vor.u32 8388608, %v5720_v63 }
 0x53f   : > { %v5498_v49 = vxor.u32 2147483648, %v7795_v4  ;;  %v5584_v44 = vor.u32 4788187, %v5583_v5  ;;  %v5587_v35 = vcvt.s32.f32 %v5580_v15  ;;  %v5670_v1 = vadd.s32 536870912, %v5669_v59 }
 0x540   : > { %v5502_v43 = vsel %vm5500_vm2, %v5501_v19, %v7795_v4  ;;  %v5728_v25 = vsub.s32 32, %v5727_v7  ;;  %v5730_v41 = vshll.u32 %v7945_v24, %v5727_v7  ;;  %v5733_v56 = vshll.u32 %v7946_v26, %v5727_v7 }
 0x541   : > { %v5499_v31 = vsel %vm5497_vm6, %v7793_v51, %v5498_v49  ;;  %v5585_v55 = vand.u32 2147483647, %v5584_v44  ;;  %v5671_v62 = vshrl.u32 %v5670_v1, 30  ;;  %v5736_v61 = vshll.u32 %v7947_v28, %v5727_v7 }
 0x542   : > { %v5503_v42 = vsel %vm5496_vm5, %v5499_v31, %v5502_v43  ;;  %v5731_v45 = vshrl.u32 %v7946_v26, %v5728_v25  ;;  %v5734_v33 = vshrl.u32 %v7947_v28, %v5728_v25  ;;  %v5726_v8 = vshrl.u32 %v5725_v27, 5 }
 0x543   : > { %v5504_v16 = vsel %vm5493_vm1, nan, %v5503_v42  ;;  %v5588_v60 = vmul.f32 %v5587_v35, %v5585_v55  ;;  %v5672_v37 = vshll.u32 %v5671_v62, 30  ;;  %v5737_v20 = vshrl.u32 %v7948_v30, %v5728_v25 }
 0x544   : > { %v5739_v34 = vshll.u32 %v7948_v30, %v5727_v7  ;;  %v5817_v47 = vand.u32 2147483647, %v12247_v14  ;;  %6907 = vst [vmem:[%s8364_s17 + $0x190] sm:$0xff] %v5504_v16  ;;  %v5740_v18 = vshrl.u32 %v7949_v32, %v5728_v25  ;;  %v5820_v11 = vand.u32 2139095040, %v12247_v14 }
 0x545   : > { %v5589_v12 = vxor.u32 2147483648, %v5588_v60  ;;  %v12261_v57 = vsub.s32 %v5669_v59, %v5672_v37  ;;  %vm5611_vm8 = vcmp.lt.s32.totalorder %v12069_v58, 0  ;;  %v5729_v23 = vshrl.u32 %v7945_v24, %v5728_v25 }
 0x546   : > { %v5732_v22 = vor.u32 %v5731_v45, %v5730_v41  ;;  %v5742_v53 = vshll.u32 %v7949_v32, %v5727_v7  ;;  %v5743_v52 = vshrl.u32 %v7950_v39, %v5728_v25  ;;  %v5735_v3 = vor.u32 %v5734_v33, %v5733_v56 }
 0x547   : > { %v5590_v54 = vsel %vm5507_vm12, %v5589_v12, %v5588_v60  ;;  %v5675_v36 = vsub.s32 0, %v12261_v57  ;;  %v5738_v50 = vor.u32 %v5737_v20, %v5736_v61  ;;  %v5741_v10 = vor.u32 %v5740_v18, %v5739_v34 }
 0x548   : > { %v5593_v38 = vsel %vm12177_vm11, %v12000_v2, %v5590_v54  ;;  %v5744_v48 = vor.u32 %v5743_v52, %v5742_v53  ;;  %vm5745_vm7 = vcmp.lt.s32.totalorder %v5726_v8, 1  ;;  %vm12277_vm9 = vcmp.le.f32.partialorder %v5609_v29, 0.7853982 }
 0x549   : > { %7796 = vcosq.f32 %v5593_v38  ;;  %v7226_v63 = vmin.u32 %v5675_v36, %v12261_v57  ;;  %v5761_v51 = vshll.u32 %v5721_v17, 8  ;;  %v5821_v15 = vshrl.u32 %v5820_v11, 23 }
 0x54a   : > { %7798 = vsinq.f32 %v5593_v38  ;;  %v5695_v5 = vsub.s32 4, %v5671_v62  ;;  %vm5747_vm10 = vcmp.lt.s32.totalorder %v5726_v8, 3  ;;  %vm5748_vm12 = vcmp.lt.s32.totalorder %v5726_v8, 4 }
 0x54b   : > { %v5677_v9 = vclz %v7226_v63  ;;  %vm5746_vm11 = vcmp.lt.s32.totalorder %v5726_v8, 2  ;;  %v5749_v59 = vsel %vm5745_vm7, %v5729_v23, %v5732_v22  ;;  %v5753_v27 = vsel %vm5745_vm7, %v5732_v22, %v5735_v3 }
 0x54c   : > { %v5750_v4 = vsel %vm5748_vm12, %v5738_v50, 2102212464  ;;  %v5754_v19 = vsel %vm5748_vm12, %v5741_v10, 920167782  ;;  %v5757_v29 = vsel %vm5745_vm7, %v5735_v3, %v5738_v50  ;;  %v5758_v7 = vsel %vm5748_vm12, %v5744_v48, 1326507024 }
 0x54d   : > { %v7227_v49 = vadd.s32 4294967294, %v5677_v9  ;;  %v5751_v44 = vsel %vm5747_vm10, %v5735_v3, %v5750_v4  ;;  %v5755_v35 = vsel %vm5747_vm10, %v5738_v50, %v5754_v19  ;;  %v5759_v1 = vsel %vm5747_vm10, %v5741_v10, %v5758_v7 }
 0x54e   : > { %v5665_v43 = vadd.s32 %v12218_v46, %v12224_v21  ;;  %v5756_v17 = vsel %vm5746_vm11, %v5753_v27, %v5755_v35  ;;  %v5760_v25 = vsel %vm5746_vm11, %v5757_v29, %v5759_v1  ;;  %v7233_v31 = vadd.s32 4294967169, %v5821_v15  ;;  %v12315_v27 = vld [vmem:[%s8067_s30 + $0x1b8] sm:$0xff] }
 0x54f   : > { %vm7228_vm13 = vcmp.lt.s32.totalorder %v7227_v49, 0  ;;  %v5696_v55 = vsel %vm5611_vm8, %v5695_v5, %v5671_v62  ;;  %v12291_v41 = vmul.u32.u64.low %v5761_v51, %v5760_v25  ;;  %v12292_v42 = vmul.u32.u64.high %v5761_v51, %v5760_v25, %v12291_v41 }
 0x550   : > { %v5680_v45 = vsel %vm7228_vm13, 0, %v7227_v49  ;;  %v5752_v56 = vsel %vm5746_vm11, %v5749_v59, %v5751_v44  ;;  %v12295_v61 = vmul.u32.u64.low %v5761_v51, %v5756_v17  ;;  %v12296_v16 = vmul.u32.u64.high %v5761_v51, %v5756_v17, %v12295_v61 }
 0x551   : > { %v5681_v46 = vsub.s32 32, %v5680_v45  ;;  %v5682_v21 = vshll.u32 %v12261_v57, %v5680_v45  ;;  %v5685_v60 = vsub.s32 4294967266, %v5680_v45  ;;  %v5827_v37 = vadd.s32 1, %v7233_v31 }
 0x552   : > { %vm5597_vm14 = vweird.f32 %v12000_v2  ;;  %v5698_v62 = vsel %vm12277_vm9, 0, %v5696_v55  ;;  %v5768_v34 = vmul.u32 %v5761_v51, %v5752_v56  ;;  %vm5770_vm0 = vc.u32 %v12292_v42, %v12295_v61 }
 0x553   : > { %v5683_v33 = vshrl.u32 %v5665_v43, %v5681_v46  ;;  %v5686_v20 = vadd.s32 127, %v5685_v60  ;;  %vm5600_vm15 = vcmp.lt.s32.totalorder %v12243_v0, 2  ;;  %v5771_v8 = vadd.s32 1, %v12296_v16 }
 0x554   : > { %v5824_v12 = vand.u32 8388607, %v5817_v47  ;;  %vm5828_vm1 = vcmp.gt.s32.totalorder %v5827_v37, 0  ;;  %vm5601_vm2 = vcmp.eq.s32.totalorder %v12243_v0, 0  ;;  %vm5604_vm4 = vcmp.eq.s32.totalorder %v12243_v0, 2 }
 0x555   : > { %v5684_v57 = vor.u32 %v5683_v33, %v5682_v21  ;;  %v5687_v18 = vshll.u32 %v5686_v20, 23  ;;  %v5829_v11 = vsel %vm5828_vm1, %v5827_v37, 0  ;;  %v5702_v22 = vadd.s32 3, %v5698_v62 }
 0x556   : > { %v7797_v23 = vpop.eup %7796  ;;  %v5772_v53 = vsel %vm5770_vm0, %v5771_v8, %v12296_v16  ;;  %v5831_v52 = vand.u32 31, %v5829_v11  ;;  %v5825_v48 = vor.u32 8388608, %v5824_v12  ;;  %v5830_v17 = vshrl.u32 %v5829_v11, 5 }
 0x557   : > { %v7799_v54 = vpop.eup %7798  ;;  %v5605_v36 = vxor.u32 2147483648, %v7797_v23  ;;  %v5688_v3 = vor.u32 4788187, %v5687_v18  ;;  %v5691_v50 = vcvt.s32.f32 %v5684_v57  ;;  %v5773_v38 = vadd.s32 %v5772_v53, %v5768_v34 }
 0x558   : > { %v5602_v10 = vxor.u32 2147483648, %v7799_v54  ;;  %v5832_v63 = vsub.s32 32, %v5831_v52  ;;  %v5834_v51 = vshll.u32 %v7945_v24, %v5831_v52  ;;  %v5837_v59 = vshll.u32 %v7946_v26, %v5831_v52 }
 0x559   : > { %v5606_v15 = vsel %vm5604_vm4, %v5605_v36, %v7799_v54  ;;  %v5689_v5 = vand.u32 2147483647, %v5688_v3  ;;  %v5774_v9 = vadd.s32 536870912, %v5773_v38  ;;  %v5840_v7 = vshll.u32 %v7947_v28, %v5831_v52 }
 0x55a   : > { %v5603_v4 = vsel %vm5601_vm2, %v7797_v23, %v5602_v10  ;;  %v5835_v19 = vshrl.u32 %v7946_v26, %v5832_v63  ;;  %v5838_v29 = vshrl.u32 %v7947_v28, %v5832_v63  ;;  %v5841_v1 = vshrl.u32 %v7948_v30, %v5832_v63 }
 0x55b   : > { %v5607_v49 = vsel %vm5600_vm15, %v5603_v4, %v5606_v15  ;;  %v5692_v44 = vmul.f32 %v5691_v50, %v5689_v5  ;;  %v5775_v35 = vshrl.u32 %v5774_v9, 30  ;;  %v5843_v25 = vshll.u32 %v7948_v30, %v5831_v52 }
 0x55c   : > { %v5608_v43 = vsel %vm5597_vm14, nan, %v5607_v49  ;;  %v12328_v31 = vshll.u32 %v5825_v48, 8  ;;  %v5833_v45 = vshrl.u32 %v7945_v24, %v5832_v63  ;;  %v5924_v56 = vand.u32 2139095040, %v12315_v27 }
 0x55d   : > { %v5693_v55 = vxor.u32 2147483648, %v5692_v44  ;;  %v5776_v41 = vshll.u32 %v5775_v35, 30  ;;  %6908 = vst [vmem:[%s8364_s17 + $0x198] sm:$0xff] %v5608_v43  ;;  %v5836_v0 = vor.u32 %v5835_v19, %v5834_v51  ;;  %v5844_v16 = vshrl.u32 %v7949_v32, %v5832_v63 }
 0x55e   : > { %v5846_v46 = vshll.u32 %v7949_v32, %v5831_v52  ;;  %v5847_v2 = vshrl.u32 %v7950_v39, %v5832_v63  ;;  %v5839_v37 = vor.u32 %v5838_v29, %v5837_v59  ;;  %v5842_v62 = vor.u32 %v5841_v1, %v5840_v7 }
 0x55f   : > { %v5694_v21 = vsel %vm5611_vm8, %v5693_v55, %v5692_v44  ;;  %v12338_v60 = vsub.s32 %v5773_v38, %v5776_v41  ;;  %v5845_v20 = vor.u32 %v5844_v16, %v5843_v25  ;;  %vm5849_vm3 = vcmp.lt.s32.totalorder %v5830_v17, 1 }
 0x560   : > { %v5697_v33 = vsel %vm12277_vm9, %v12069_v58, %v5694_v21  ;;  %v5848_v34 = vor.u32 %v5847_v2, %v5846_v46  ;;  %vm5851_vm5 = vcmp.lt.s32.totalorder %v5830_v17, 3  ;;  %v5925_v12 = vshrl.u32 %v5924_v56, 23  ;;  %v12384_v2 = vld [vmem:[%s8067_s30 + $0x1c0] sm:$0xff] }
 0x561   : > { %7800 = vcosq.f32 %v5697_v33  ;;  %v5779_v8 = vsub.s32 0, %v12338_v60  ;;  %vm5850_vm6 = vcmp.lt.s32.totalorder %v5830_v17, 2  ;;  %vm5852_vm7 = vcmp.lt.s32.totalorder %v5830_v17, 4 }
 0x562   : > { %7802 = vsinq.f32 %v5697_v33  ;;  %v5853_v57 = vsel %vm5849_vm3, %v5833_v45, %v5836_v0  ;;  %v5854_v11 = vsel %vm5852_vm7, %v5842_v62, 2102212464  ;;  %v5857_v23 = vsel %vm5849_vm3, %v5836_v0, %v5839_v37 }
 0x563   : > { %v7230_v18 = vmin.u32 %v5779_v8, %v12338_v60  ;;  %v5858_v53 = vsel %vm5852_vm7, %v5845_v20, 920167782  ;;  %v5855_v6 = vsel %vm5851_vm5, %v5839_v37, %v5854_v11  ;;  %v5861_v54 = vsel %vm5849_vm3, %v5839_v37, %v5842_v62 }
 0x564   : > { %v5859_v52 = vsel %vm5851_vm5, %v5842_v62, %v5858_v53  ;;  %v5862_v36 = vsel %vm5852_vm7, %v5848_v34, 1326507024  ;;  %v5703_v3 = vand.u32 3, %v5702_v22  ;;  %v5799_v38 = vsub.s32 4, %v5775_v35 }
 0x565   : > { %v5781_v50 = vclz %v7230_v18  ;;  %v5856_v10 = vsel %vm5850_vm6, %v5853_v57, %v5855_v6  ;;  %v5860_v48 = vsel %vm5850_vm6, %v5857_v23, %v5859_v52  ;;  %v5863_v63 = vsel %vm5851_vm5, %v5845_v20, %v5862_v36 }
 0x566   : > { %v7237_v51 = vadd.s32 4294967169, %v5925_v12  ;;  %v5864_v5 = vsel %vm5850_vm6, %v5861_v54, %v5863_v63  ;;  %v12352_v9 = vmul.u32.u64.low %v12328_v31, %v5860_v48  ;;  %v12353_v59 = vmul.u32.u64.high %v12328_v31, %v5860_v48, %v12352_v9 }
 0x567   : > { %v7231_v15 = vadd.s32 4294967294, %v5781_v50  ;;  %vm5715_vm8 = vcmp.lt.s32.totalorder %v12161_v13, 0  ;;  %v12358_v22 = vmul.u32.u64.low %v12328_v31, %v5864_v5  ;;  %v12359_v4 = vmul.u32.u64.high %v12328_v31, %v5864_v5, %v12358_v22 }
 0x568   : > { %v5921_v19 = vand.u32 2147483647, %v12315_v27  ;;  %vm5701_vm9 = vweird.f32 %v12069_v58  ;;  %v5769_v29 = vadd.s32 %v12295_v61, %v12292_v42  ;;  %v5800_v7 = vsel %vm5715_vm8, %v5799_v38, %v5775_v35 }
 0x569   : > { %vm7232_vm10 = vcmp.lt.s32.totalorder %v7231_v15, 0  ;;  %v5931_v49 = vadd.s32 1, %v7237_v51  ;;  %vm5704_vm12 = vcmp.lt.s32.totalorder %v5703_v3, 2  ;;  %vm12369_vm11 = vcmp.le.f32.partialorder %v5713_v40, 0.7853982 }
 0x56a   : > { %v5784_v1 = vsel %vm7232_vm10, 0, %v7231_v15  ;;  %v5872_v43 = vmul.u32 %v12328_v31, %v5856_v10  ;;  %v5875_v42 = vadd.s32 1, %v12353_v59  ;;  %v5802_v61 = vsel %vm12369_vm11, 0, %v5800_v7 }
 0x56b   : > { %v5785_v17 = vsub.s32 32, %v5784_v1  ;;  %v5786_v25 = vshll.u32 %v12338_v60, %v5784_v1  ;;  %v5789_v55 = vsub.s32 4294967266, %v5784_v1  ;;  %vm5874_vm13 = vc.u32 %v12359_v4, %v12352_v9 }
 0x56c   : > { %v5928_v40 = vand.u32 8388607, %v5921_v19  ;;  %vm5932_vm14 = vcmp.gt.s32.totalorder %v5931_v49, 0  ;;  %v5876_v31 = vsel %vm5874_vm13, %v5875_v42, %v12353_v59  ;;  %vm5705_vm0 = vcmp.eq.s32.totalorder %v5703_v3, 0 }
 0x56d   : > { %v5787_v35 = vshrl.u32 %v5769_v29, %v5785_v17  ;;  %v5790_v41 = vadd.s32 127, %v5789_v55  ;;  %v5933_v45 = vsel %vm5932_vm14, %v5931_v49, 0  ;;  %vm5708_vm15 = vcmp.eq.s32.totalorder %v5703_v3, 2 }
 0x56e   : > { %v7801_v56 = vpop.eup %7800  ;;  %v5877_v0 = vadd.s32 %v5876_v31, %v5872_v43  ;;  %v5935_v16 = vand.u32 31, %v5933_v45  ;;  %v12386_v62 = vadd.s32 3, %v5802_v61  ;;  %v5929_v34 = vor.u32 8388608, %v5928_v40 }
 0x56f   : > { %v7803_v46 = vpop.eup %7802  ;;  %v5709_v21 = vxor.u32 2147483648, %v7801_v56  ;;  %v5788_v60 = vor.u32 %v5787_v35, %v5786_v25  ;;  %v5791_v37 = vshll.u32 %v5790_v41, 23  ;;  %v6025_v11 = vand.u32 2147483647, %v12384_v2 }
 0x570   : > { %v5706_v33 = vxor.u32 2147483648, %v7803_v46  ;;  %v5878_v20 = vadd.s32 536870912, %v5877_v0  ;;  %v5936_v8 = vsub.s32 32, %v5935_v16  ;;  %v5934_v6 = vshrl.u32 %v5933_v45, 5 }
 0x571   : > { %v5710_v12 = vsel %vm5708_vm15, %v5709_v21, %v7803_v46  ;;  %v5792_v57 = vor.u32 4788187, %v5791_v37  ;;  %v5795_v18 = vcvt.s32.f32 %v5788_v60  ;;  %v6028_v52 = vand.u32 2139095040, %v12384_v2 }
 0x572   : > { %v5707_v23 = vsel %vm5705_vm0, %v7801_v56, %v5706_v33  ;;  %v5879_v53 = vshrl.u32 %v5878_v20, 30  ;;  %v5938_v50 = vshll.u32 %v7945_v24, %v5935_v16  ;;  %v5941_v38 = vshll.u32 %v7946_v26, %v5935_v16 }
 0x573   : > { %v5711_v54 = vsel %vm5704_vm12, %v5707_v23, %v5710_v12  ;;  %v5793_v36 = vand.u32 2147483647, %v5792_v57  ;;  %v5939_v63 = vshrl.u32 %v7946_v26, %v5936_v8  ;;  %v5942_v51 = vshrl.u32 %v7947_v28, %v5936_v8 }
 0x574   : > { %v5712_v10 = vsel %vm5701_vm9, nan, %v5711_v54  ;;  %v5880_v48 = vshll.u32 %v5879_v53, 30  ;;  %v5944_v5 = vshll.u32 %v7947_v28, %v5935_v16  ;;  %v5945_v59 = vshrl.u32 %v7948_v30, %v5936_v8 }
 0x575   : > { %v5796_v15 = vmul.f32 %v5795_v18, %v5793_v36  ;;  %v5947_v3 = vshll.u32 %v7948_v30, %v5935_v16  ;;  %6909 = vst [vmem:[%s8364_s17 + $0x1a0] sm:$0xff] %v5712_v10  ;;  %v5948_v29 = vshrl.u32 %v7949_v32, %v5936_v8  ;;  %v5950_v58 = vshll.u32 %v7949_v32, %v5935_v16 }
 0x576   : > { %v12402_v22 = vsub.s32 %v5877_v0, %v5880_v48  ;;  %v12406_v7 = vshll.u32 %v5929_v34, 8  ;;  %v5873_v1 = vadd.s32 %v12352_v9, %v12359_v4  ;;  %v5951_v43 = vshrl.u32 %v7950_v39, %v5936_v8 }
 0x577   : > { %v5797_v49 = vxor.u32 2147483648, %v5796_v15  ;;  %v6029_v17 = vshrl.u32 %v6028_v52, 23  ;;  %vm5819_vm1 = vcmp.lt.s32.totalorder %v12247_v14, 0  ;;  %v5937_v55 = vshrl.u32 %v7945_v24, %v5936_v8 }
 0x578   : > { %v5883_v25 = vsub.s32 0, %v12402_v22  ;;  %v5940_v42 = vor.u32 %v5939_v63, %v5938_v50  ;;  %v5943_v61 = vor.u32 %v5942_v51, %v5941_v38  ;;  %v5946_v35 = vor.u32 %v5945_v59, %v5944_v5 }
 0x579   : > { %v5798_v40 = vsel %vm5715_vm8, %v5797_v49, %v5796_v15  ;;  %v5949_v41 = vor.u32 %v5948_v29, %v5947_v3  ;;  %vm5953_vm2 = vcmp.lt.s32.totalorder %v5934_v6, 1  ;;  %v5952_v31 = vor.u32 %v5951_v43, %v5950_v58 }
 0x57a   : > { %v5801_v9 = vsel %vm12369_vm11, %v12161_v13, %v5798_v40  ;;  %v7234_v4 = vmin.u32 %v5883_v25, %v12402_v22  ;;  %vm5956_vm4 = vcmp.lt.s32.totalorder %v5934_v6, 4  ;;  %vm5954_vm3 = vcmp.lt.s32.totalorder %v5934_v6, 2 }
 0x57b   : > { %7804 = vcosq.f32 %v5801_v9  ;;  %vm5955_vm5 = vcmp.lt.s32.totalorder %v5934_v6, 3  ;;  %v5958_v45 = vsel %vm5956_vm4, %v5946_v35, 2102212464  ;;  %v5957_v0 = vsel %vm5953_vm2, %v5937_v55, %v5940_v42 }
 0x57c   : > { %7806 = vsinq.f32 %v5801_v9  ;;  %v5885_v56 = vclz %v7234_v4  ;;  %v5961_v16 = vsel %vm5953_vm2, %v5940_v42, %v5943_v61  ;;  %v5903_v46 = vsub.s32 4, %v5879_v53 }
 0x57d   : > { %v5959_v21 = vsel %vm5955_vm5, %v5943_v61, %v5958_v45  ;;  %v5962_v60 = vsel %vm5956_vm4, %v5949_v41, 920167782  ;;  %v5965_v44 = vsel %vm5953_vm2, %v5943_v61, %v5946_v35  ;;  %v5966_v20 = vsel %vm5956_vm4, %v5952_v31, 1326507024 }
 0x57e   : > { %v7235_v37 = vadd.s32 4294967294, %v5885_v56  ;;  %v5963_v33 = vsel %vm5955_vm5, %v5946_v35, %v5962_v60  ;;  %v6032_v34 = vand.u32 8388607, %v6025_v11  ;;  %v5960_v8 = vsel %vm5954_vm3, %v5957_v0, %v5959_v21 }
 0x57f   : > { %v5964_v12 = vsel %vm5954_vm3, %v5961_v16, %v5963_v33  ;;  %v5967_v57 = vsel %vm5955_vm5, %v5949_v41, %v5966_v20  ;;  %v7241_v18 = vadd.s32 4294967169, %v6029_v17  ;;  %v5904_v50 = vsel %vm5819_vm1, %v5903_v46, %v5879_v53 }
 0x580   : > { %vm7236_vm6 = vcmp.lt.s32.totalorder %v7235_v37, 0  ;;  %v5968_v23 = vsel %vm5954_vm3, %v5965_v44, %v5967_v57  ;;  %v12432_v52 = vmul.u32.u64.low %v12406_v7, %v5964_v12  ;;  %v12433_v54 = vmul.u32.u64.high %v12406_v7, %v5964_v12, %v12432_v52 }
 0x581   : > { %v5888_v36 = vsel %vm7236_vm6, 0, %v7235_v37  ;;  %v12439_v38 = vmul.u32.u64.low %v12406_v7, %v5968_v23  ;;  %v12440_v10 = vmul.u32.u64.high %v12406_v7, %v5968_v23, %v12439_v38  ;;  %v6035_v15 = vadd.s32 1, %v7241_v18 }
 0x582   : > { %v5889_v48 = vsub.s32 32, %v5888_v36  ;;  %v5890_v63 = vshll.u32 %v12402_v22, %v5888_v36  ;;  %v5893_v51 = vsub.s32 4294967266, %v5888_v36  ;;  %v5807_v6 = vand.u32 3, %v12386_v62 }
 0x583   : > { %vm12446_vm7 = vcmp.le.f32.partialorder %v5817_v47, 0.7853982  ;;  %v5976_v59 = vmul.u32 %v12406_v7, %v5960_v8  ;;  %v5979_v29 = vadd.s32 1, %v12433_v54  ;;  %vm6036_vm8 = vcmp.gt.s32.totalorder %v6035_v15, 0 }
 0x584   : > { %v5891_v53 = vshrl.u32 %v5873_v1, %v5889_v48  ;;  %v5894_v3 = vadd.s32 127, %v5893_v51  ;;  %v5906_v22 = vsel %vm12446_vm7, 0, %v5904_v50  ;;  %vm5978_vm9 = vc.u32 %v12440_v10, %v12432_v52 }
 0x585   : > { %v6033_v62 = vor.u32 8388608, %v6032_v34  ;;  %v6037_v58 = vsel %vm6036_vm8, %v6035_v15, 0  ;;  %v5980_v43 = vsel %vm5978_vm9, %v5979_v29, %v12433_v54  ;;  %vm5805_vm10 = vweird.f32 %v12161_v13  ;;  %v12476_v54 = vld [vmem:[%s8067_s30 + $0x1c8] sm:$0xff] }
 0x586   : > { %v5892_v49 = vor.u32 %v5891_v53, %v5890_v63  ;;  %v5895_v47 = vshll.u32 %v5894_v3, 23  ;;  %v12457_v17 = vshrl.u32 %v6037_v58, 5  ;;  %vm5808_vm12 = vcmp.lt.s32.totalorder %v5807_v6, 2 }
 0x587   : > { %v5981_v7 = vadd.s32 %v5980_v43, %v5976_v59  ;;  %v6039_v1 = vand.u32 31, %v6037_v58  ;;  %vm5809_vm11 = vcmp.eq.s32.totalorder %v5807_v6, 0  ;;  %vm5812_vm13 = vcmp.eq.s32.totalorder %v5807_v6, 2 }
 0x588   : > { %v7805_v25 = vpop.eup %7804  ;;  %v5896_v55 = vor.u32 4788187, %v5895_v47  ;;  %v5899_v42 = vcvt.s32.f32 %v5892_v49  ;;  %v5910_v35 = vadd.s32 3, %v5906_v22  ;;  %vm6057_vm14 = vcmp.lt.s32.totalorder %v12457_v17, 1 }
 0x589   : > { %v7807_v61 = vpop.eup %7806  ;;  %v5813_v40 = vxor.u32 2147483648, %v7805_v25  ;;  %v5982_v41 = vadd.s32 536870912, %v5981_v7  ;;  %v6040_v9 = vsub.s32 32, %v6039_v1  ;;  %v12461_v45 = vshll.u32 %v6033_v62, 8 }
 0x58a   : > { %v5810_v4 = vxor.u32 2147483648, %v7807_v61  ;;  %v5897_v31 = vand.u32 2147483647, %v5896_v55  ;;  %v6042_v16 = vshll.u32 %v7945_v24, %v6039_v1  ;;  %vm5923_vm0 = vcmp.lt.s32.totalorder %v12315_v27, 0 }
 0x58b   : > { %v5814_v56 = vsel %vm5812_vm13, %v5813_v40, %v7807_v61  ;;  %v5983_v0 = vshrl.u32 %v5982_v41, 30  ;;  %v6043_v46 = vshrl.u32 %v7946_v26, %v6040_v9  ;;  %v6045_v44 = vshll.u32 %v7946_v26, %v6039_v1 }
 0x58c   : > { %v5811_v21 = vsel %vm5809_vm11, %v7805_v25, %v5810_v4  ;;  %v5900_v60 = vmul.f32 %v5899_v42, %v5897_v31  ;;  %v6046_v37 = vshrl.u32 %v7947_v28, %v6040_v9  ;;  %v6048_v34 = vshll.u32 %v7947_v28, %v6039_v1 }
 0x58d   : > { %v5815_v33 = vsel %vm5808_vm12, %v5811_v21, %v5814_v56  ;;  %v5984_v20 = vshll.u32 %v5983_v0, 30  ;;  %v6049_v8 = vshrl.u32 %v7948_v30, %v6040_v9  ;;  %v6007_v18 = vsub.s32 4, %v5983_v0 }
 0x58e   : > { %v5816_v12 = vsel %vm5805_vm10, nan, %v5815_v33  ;;  %v5901_v57 = vxor.u32 2147483648, %v5900_v60  ;;  %v6041_v23 = vshrl.u32 %v7945_v24, %v6040_v9  ;;  %v6044_v50 = vor.u32 %v6043_v46, %v6042_v16 }
 0x58f   : > { %v12478_v36 = vsub.s32 %v5981_v7, %v5984_v20  ;;  %v6051_v38 = vshll.u32 %v7948_v30, %v6039_v1  ;;  %v6052_v48 = vshrl.u32 %v7949_v32, %v6040_v9  ;;  %6910 = vst [vmem:[%s8364_s17 + $0x1a8] sm:$0xff] %v5816_v12  ;;  %v6047_v51 = vor.u32 %v6046_v37, %v6045_v44 }
 0x590   : > { %v5902_v63 = vsel %vm5819_vm1, %v5901_v57, %v5900_v60  ;;  %v6054_v13 = vshll.u32 %v7949_v32, %v6039_v1  ;;  %v6055_v15 = vshrl.u32 %v7950_v39, %v6040_v9  ;;  %vm12492_vm15 = vcmp.le.f32.partialorder %v5921_v19, 0.7853982 }
 0x591   : > { %v5905_v6 = vsel %vm12446_vm7, %v12247_v14, %v5902_v63  ;;  %v5987_v53 = vsub.s32 0, %v12478_v36  ;;  %v6050_v3 = vor.u32 %v6049_v8, %v6048_v34  ;;  %v6053_v29 = vor.u32 %v6052_v48, %v6051_v38 }
 0x592   : > { %7808 = vcosq.f32 %v5905_v6  ;;  %v6056_v22 = vor.u32 %v6055_v15, %v6054_v13  ;;  %vm6060_vm1 = vcmp.lt.s32.totalorder %v12457_v17, 4  ;;  %v6132_v62 = vand.u32 2139095040, %v12476_v54 }
 0x593   : > { %7810 = vsinq.f32 %v5905_v6  ;;  %v7238_v5 = vmin.u32 %v5987_v53, %v12478_v36  ;;  %vm6058_vm2 = vcmp.lt.s32.totalorder %v12457_v17, 2  ;;  %vm6059_vm4 = vcmp.lt.s32.totalorder %v12457_v17, 3 }
 0x594   : > { %v6061_v19 = vsel %vm6057_vm14, %v6041_v23, %v6044_v50  ;;  %v6062_v58 = vsel %vm6060_vm1, %v6050_v3, 2102212464  ;;  %v6065_v49 = vsel %vm6057_vm14, %v6044_v50, %v6047_v51  ;;  %v6066_v47 = vsel %vm6060_vm1, %v6053_v29, 920167782 }
 0x595   : > { %v12510_v43 = vand.u32 3, %v5910_v35  ;;  %v5989_v7 = vclz %v7238_v5  ;;  %v6008_v1 = vsel %vm5923_vm0, %v6007_v18, %v5983_v0  ;;  %v6069_v25 = vsel %vm6057_vm14, %v6047_v51, %v6050_v3 }
 0x596   : > { %v6063_v55 = vsel %vm6059_vm4, %v6047_v51, %v6062_v58  ;;  %v6067_v42 = vsel %vm6059_vm4, %v6050_v3, %v6066_v47  ;;  %v6070_v61 = vsel %vm6060_vm1, %v6056_v22, 1326507024  ;;  %v6133_v40 = vshrl.u32 %v6132_v62, 23 }
 0x597   : > { %v7239_v41 = vadd.s32 4294967294, %v5989_v7  ;;  %v6064_v35 = vsel %vm6058_vm2, %v6061_v19, %v6063_v55  ;;  %v6068_v9 = vsel %vm6058_vm2, %v6065_v49, %v6067_v42  ;;  %v6071_v4 = vsel %vm6059_vm4, %v6053_v29, %v6070_v61 }
 0x598   : > { %v5977_v31 = vadd.s32 %v12432_v52, %v12440_v10  ;;  %v6072_v56 = vsel %vm6058_vm2, %v6069_v25, %v6071_v4  ;;  %v12533_v0 = vmul.u32.u64.low %v12461_v45, %v6068_v9  ;;  %v12534_v16 = vmul.u32.u64.high %v12461_v45, %v6068_v9, %v12533_v0 }
 0x599   : > { %vm7240_vm3 = vcmp.lt.s32.totalorder %v7239_v41, 0  ;;  %v12538_v46 = vmul.u32.u64.low %v12461_v45, %v6072_v56  ;;  %v12539_v21 = vmul.u32.u64.high %v12461_v45, %v6072_v56, %v12538_v46  ;;  %v7245_v60 = vadd.s32 4294967169, %v6133_v40 }
 0x59a   : > { %v5992_v44 = vsel %vm7240_vm3, 0, %v7239_v41  ;;  %v6010_v37 = vsel %vm12492_vm15, 0, %v6008_v1  ;;  %v6080_v52 = vmul.u32 %v12461_v45, %v6064_v35  ;;  %v6129_v10 = vand.u32 2147483647, %v12476_v54  ;;  %v12562_v1 = vld [vmem:[%s8067_s30 + $0x1d0] sm:$0xff] }
 0x59b   : > { %v5993_v17 = vsub.s32 32, %v5992_v44  ;;  %v5994_v33 = vshll.u32 %v12478_v36, %v5992_v44  ;;  %v5997_v20 = vsub.s32 4294967266, %v5992_v44  ;;  %v6139_v34 = vadd.s32 1, %v7245_v60 }
 0x59c   : > { %vm5909_vm5 = vweird.f32 %v12247_v14  ;;  %v6083_v8 = vadd.s32 1, %v12534_v16  ;;  %vm5916_vm6 = vcmp.eq.s32.totalorder %v12510_v43, 2  ;;  %vm6082_vm7 = vc.u32 %v12539_v21, %v12533_v0 }
 0x59d   : > { %v5995_v12 = vshrl.u32 %v5977_v31, %v5993_v17  ;;  %v5998_v57 = vadd.s32 127, %v5997_v20  ;;  %v6014_v18 = vadd.s32 3, %v6010_v37  ;;  %v6136_v23 = vand.u32 8388607, %v6129_v10 }
 0x59e   : > { %v6084_v45 = vsel %vm6082_vm7, %v6083_v8, %v12534_v16  ;;  %vm6140_vm8 = vcmp.gt.s32.totalorder %v6139_v34, 0  ;;  %vm5912_vm9 = vcmp.lt.s32.totalorder %v12510_v43, 2  ;;  %vm5913_vm10 = vcmp.eq.s32.totalorder %v12510_v43, 0 }
 0x59f   : > { %v7809_v36 = vpop.eup %7808  ;;  %v5996_v50 = vor.u32 %v5995_v12, %v5994_v33  ;;  %v5999_v38 = vshll.u32 %v5998_v57, 23  ;;  %v6085_v48 = vadd.s32 %v6084_v45, %v6080_v52  ;;  %v6141_v63 = vsel %vm6140_vm8, %v6139_v34, 0 }
 0x5a0   : > { %v7811_v51 = vpop.eup %7810  ;;  %v5917_v13 = vxor.u32 2147483648, %v7809_v36  ;;  %v6143_v15 = vand.u32 31, %v6141_v63  ;;  %v12558_v62 = vand.u32 3, %v6014_v18  ;;  %v6137_v5 = vor.u32 8388608, %v6136_v23 }
 0x5a1   : > { %v5914_v6 = vxor.u32 2147483648, %v7811_v51  ;;  %v6000_v53 = vor.u32 4788187, %v5999_v38  ;;  %v6003_v3 = vcvt.s32.f32 %v5996_v50  ;;  %v6086_v29 = vadd.s32 536870912, %v6085_v48 }
 0x5a2   : > { %v5918_v22 = vsel %vm5916_vm6, %v5917_v13, %v7811_v51  ;;  %v6144_v19 = vsub.s32 32, %v6143_v15  ;;  %v6146_v7 = vshll.u32 %v7945_v24, %v6143_v15  ;;  %v6149_v42 = vshll.u32 %v7946_v26, %v6143_v15 }
 0x5a3   : > { %v5915_v58 = vsel %vm5913_vm10, %v7809_v36, %v5914_v6  ;;  %v6001_v49 = vand.u32 2147483647, %v6000_v53  ;;  %v6087_v47 = vshrl.u32 %v6086_v29, 30  ;;  %v6152_v61 = vshll.u32 %v7947_v28, %v6143_v15 }
 0x5a4   : > { %v5919_v25 = vsel %vm5912_vm9, %v5915_v58, %v5918_v22  ;;  %v6147_v55 = vshrl.u32 %v7946_v26, %v6144_v19  ;;  %v6150_v9 = vshrl.u32 %v7947_v28, %v6144_v19  ;;  %v6142_v4 = vshrl.u32 %v6141_v63, 5 }
 0x5a5   : > { %v5920_v40 = vsel %vm5909_vm5, nan, %v5919_v25  ;;  %v6004_v41 = vmul.f32 %v6003_v3, %v6001_v49  ;;  %v6088_v35 = vshll.u32 %v6087_v47, 30  ;;  %v6153_v31 = vshrl.u32 %v7948_v30, %v6144_v19 }
 0x5a6   : > { %v6155_v56 = vshll.u32 %v7948_v30, %v6143_v15  ;;  %v6233_v43 = vand.u32 2147483647, %v12562_v1  ;;  %6911 = vst [vmem:[%s8364_s17 + $0x1b0] sm:$0xff] %v5920_v40  ;;  %v6156_v60 = vshrl.u32 %v7949_v32, %v6144_v19  ;;  %v6236_v14 = vand.u32 2139095040, %v12562_v1 }
 0x5a7   : > { %v6005_v16 = vxor.u32 2147483648, %v6004_v41  ;;  %v12576_v46 = vsub.s32 %v6085_v48, %v6088_v35  ;;  %vm6027_vm12 = vcmp.lt.s32.totalorder %v12384_v2, 0  ;;  %v6145_v44 = vshrl.u32 %v7945_v24, %v6144_v19 }
 0x5a8   : > { %v6148_v37 = vor.u32 %v6147_v55, %v6146_v7  ;;  %v6158_v52 = vshll.u32 %v7949_v32, %v6143_v15  ;;  %v6159_v17 = vshrl.u32 %v7950_v39, %v6144_v19  ;;  %v6151_v34 = vor.u32 %v6150_v9, %v6149_v42 }
 0x5a9   : > { %v6006_v33 = vsel %vm5923_vm0, %v6005_v16, %v6004_v41  ;;  %v6091_v20 = vsub.s32 0, %v12576_v46  ;;  %v6154_v8 = vor.u32 %v6153_v31, %v6152_v61  ;;  %v6157_v57 = vor.u32 %v6156_v60, %v6155_v56 }
 0x5aa   : > { %v6009_v12 = vsel %vm12492_vm15, %v12315_v27, %v6006_v33  ;;  %v6160_v18 = vor.u32 %v6159_v17, %v6158_v52  ;;  %vm6161_vm11 = vcmp.lt.s32.totalorder %v6142_v4, 1  ;;  %vm12592_vm13 = vcmp.le.f32.partialorder %v6025_v11, 0.7853982 }
 0x5ab   : > { %7812 = vcosq.f32 %v6009_v12  ;;  %v7242_v23 = vmin.u32 %v6091_v20, %v12576_v46  ;;  %v6177_v36 = vshll.u32 %v6137_v5, 8  ;;  %v6237_v50 = vshrl.u32 %v6236_v14, 23 }
 0x5ac   : > { %7814 = vsinq.f32 %v6009_v12  ;;  %v6111_v38 = vsub.s32 4, %v6087_v47  ;;  %vm6163_vm14 = vcmp.lt.s32.totalorder %v6142_v4, 3  ;;  %vm6164_vm0 = vcmp.lt.s32.totalorder %v6142_v4, 4 }
 0x5ad   : > { %v6093_v59 = vclz %v7242_v23  ;;  %vm6162_vm15 = vcmp.lt.s32.totalorder %v6142_v4, 2  ;;  %v6165_v48 = vsel %vm6161_vm11, %v6145_v44, %v6148_v37  ;;  %v6169_v63 = vsel %vm6161_vm11, %v6148_v37, %v6151_v34 }
 0x5ae   : > { %v6166_v51 = vsel %vm6164_vm0, %v6154_v8, 2102212464  ;;  %v6170_v13 = vsel %vm6164_vm0, %v6157_v57, 920167782  ;;  %v6173_v11 = vsel %vm6161_vm11, %v6151_v34, %v6154_v8  ;;  %v6174_v15 = vsel %vm6164_vm0, %v6160_v18, 1326507024 }
 0x5af   : > { %v7243_v6 = vadd.s32 4294967294, %v6093_v59  ;;  %v6167_v53 = vsel %vm6163_vm14, %v6151_v34, %v6166_v51  ;;  %v6171_v3 = vsel %vm6163_vm14, %v6154_v8, %v6170_v13  ;;  %v6175_v29 = vsel %vm6163_vm14, %v6157_v57, %v6174_v15 }
 0x5b0   : > { %v6081_v22 = vadd.s32 %v12533_v0, %v12539_v21  ;;  %v6172_v5 = vsel %vm6162_vm15, %v6169_v63, %v6171_v3  ;;  %v6176_v19 = vsel %vm6162_vm15, %v6173_v11, %v6175_v29  ;;  %v7249_v58 = vadd.s32 4294967169, %v6237_v50  ;;  %v12630_v63 = vld [vmem:[%s8067_s30 + $0x1d8] sm:$0xff] }
 0x5b1   : > { %vm7244_vm1 = vcmp.lt.s32.totalorder %v7243_v6, 0  ;;  %v6112_v49 = vsel %vm6027_vm12, %v6111_v38, %v6087_v47  ;;  %v12606_v7 = vmul.u32.u64.low %v6177_v36, %v6176_v19  ;;  %v12607_v25 = vmul.u32.u64.high %v6177_v36, %v6176_v19, %v12606_v7 }
 0x5b2   : > { %v6096_v55 = vsel %vm7244_vm1, 0, %v7243_v6  ;;  %v6168_v42 = vsel %vm6162_vm15, %v6165_v48, %v6167_v53  ;;  %v12610_v61 = vmul.u32.u64.low %v6177_v36, %v6172_v5  ;;  %v12611_v40 = vmul.u32.u64.high %v6177_v36, %v6172_v5, %v12610_v61 }
 0x5b3   : > { %v6097_v0 = vsub.s32 32, %v6096_v55  ;;  %v6098_v21 = vshll.u32 %v12576_v46, %v6096_v55  ;;  %v6101_v41 = vsub.s32 4294967266, %v6096_v55  ;;  %v6243_v35 = vadd.s32 1, %v7249_v58 }
 0x5b4   : > { %vm6013_vm2 = vweird.f32 %v12315_v27  ;;  %v6114_v47 = vsel %vm12592_vm13, 0, %v6112_v49  ;;  %v6184_v56 = vmul.u32 %v6177_v36, %v6168_v42  ;;  %vm6186_vm4 = vc.u32 %v12607_v25, %v12610_v61 }
 0x5b5   : > { %v6099_v9 = vshrl.u32 %v6081_v22, %v6097_v0  ;;  %v6102_v31 = vadd.s32 127, %v6101_v41  ;;  %vm6016_vm3 = vcmp.lt.s32.totalorder %v12558_v62, 2  ;;  %v6187_v4 = vadd.s32 1, %v12611_v40 }
 0x5b6   : > { %v6240_v16 = vand.u32 8388607, %v6233_v43  ;;  %vm6244_vm5 = vcmp.gt.s32.totalorder %v6243_v35, 0  ;;  %vm6017_vm6 = vcmp.eq.s32.totalorder %v12558_v62, 0  ;;  %vm6020_vm7 = vcmp.eq.s32.totalorder %v12558_v62, 2 }
 0x5b7   : > { %v6100_v46 = vor.u32 %v6099_v9, %v6098_v21  ;;  %v6103_v60 = vshll.u32 %v6102_v31, 23  ;;  %v6245_v14 = vsel %vm6244_vm5, %v6243_v35, 0  ;;  %v6118_v37 = vadd.s32 3, %v6114_v47 }
 0x5b8   : > { %v7813_v44 = vpop.eup %7812  ;;  %v6188_v52 = vsel %vm6186_vm4, %v6187_v4, %v12611_v40  ;;  %v6247_v17 = vand.u32 31, %v6245_v14  ;;  %v6241_v18 = vor.u32 8388608, %v6240_v16  ;;  %v6246_v5 = vshrl.u32 %v6245_v14, 5 }
 0x5b9   : > { %v7815_v33 = vpop.eup %7814  ;;  %v6021_v20 = vxor.u32 2147483648, %v7813_v44  ;;  %v6104_v34 = vor.u32 4788187, %v6103_v60  ;;  %v6107_v8 = vcvt.s32.f32 %v6100_v46  ;;  %v6189_v12 = vadd.s32 %v6188_v52, %v6184_v56 }
 0x5ba   : > { %v6018_v57 = vxor.u32 2147483648, %v7815_v33  ;;  %v6248_v23 = vsub.s32 32, %v6247_v17  ;;  %v6250_v36 = vshll.u32 %v7945_v24, %v6247_v17  ;;  %v6253_v48 = vshll.u32 %v7946_v26, %v6247_v17 }
 0x5bb   : > { %v6022_v50 = vsel %vm6020_vm7, %v6021_v20, %v7815_v33  ;;  %v6105_v38 = vand.u32 2147483647, %v6104_v34  ;;  %v6190_v59 = vadd.s32 536870912, %v6189_v12  ;;  %v6256_v15 = vshll.u32 %v7947_v28, %v6247_v17 }
 0x5bc   : > { %v6019_v51 = vsel %vm6017_vm6, %v7813_v44, %v6018_v57  ;;  %v6251_v13 = vshrl.u32 %v7946_v26, %v6248_v23  ;;  %v6254_v11 = vshrl.u32 %v7947_v28, %v6248_v23  ;;  %v6257_v29 = vshrl.u32 %v7948_v30, %v6248_v23 }
 0x5bd   : > { %v6023_v6 = vsel %vm6016_vm3, %v6019_v51, %v6022_v50  ;;  %v6108_v53 = vmul.f32 %v6107_v8, %v6105_v38  ;;  %v6191_v3 = vshrl.u32 %v6190_v59, 30  ;;  %v6259_v19 = vshll.u32 %v7948_v30, %v6247_v17 }
 0x5be   : > { %v6024_v22 = vsel %vm6013_vm2, nan, %v6023_v6  ;;  %v12643_v58 = vshll.u32 %v6241_v18, 8  ;;  %v6249_v55 = vshrl.u32 %v7945_v24, %v6248_v23  ;;  %v6340_v42 = vand.u32 2139095040, %v12630_v63 }
 0x5bf   : > { %v6109_v49 = vxor.u32 2147483648, %v6108_v53  ;;  %v6192_v7 = vshll.u32 %v6191_v3, 30  ;;  %6912 = vst [vmem:[%s8364_s17 + $0x1b8] sm:$0xff] %v6024_v22  ;;  %v6252_v62 = vor.u32 %v6251_v13, %v6250_v36  ;;  %v6260_v40 = vshrl.u32 %v7949_v32, %v6248_v23 }
 0x5c0   : > { %v6262_v0 = vshll.u32 %v7949_v32, %v6247_v17  ;;  %v6263_v27 = vshrl.u32 %v7950_v39, %v6248_v23  ;;  %v6255_v35 = vor.u32 %v6254_v11, %v6253_v48  ;;  %v6258_v47 = vor.u32 %v6257_v29, %v6256_v15 }
 0x5c1   : > { %v6110_v21 = vsel %vm6027_vm12, %v6109_v49, %v6108_v53  ;;  %v12653_v41 = vsub.s32 %v6189_v12, %v6192_v7  ;;  %v6261_v31 = vor.u32 %v6260_v40, %v6259_v19  ;;  %vm6265_vm8 = vcmp.lt.s32.totalorder %v6246_v5, 1 }
 0x5c2   : > { %v6113_v9 = vsel %vm12592_vm13, %v12384_v2, %v6110_v21  ;;  %v6264_v56 = vor.u32 %v6263_v27, %v6262_v0  ;;  %vm6267_vm9 = vcmp.lt.s32.totalorder %v6246_v5, 3  ;;  %v6341_v16 = vshrl.u32 %v6340_v42, 23  ;;  %v12699_v27 = vld [vmem:[%s8067_s30 + $0x1e0] sm:$0xff] }
 0x5c3   : > { %7816 = vcosq.f32 %v6113_v9  ;;  %v6195_v4 = vsub.s32 0, %v12653_v41  ;;  %vm6266_vm10 = vcmp.lt.s32.totalorder %v6246_v5, 2  ;;  %vm6268_vm11 = vcmp.lt.s32.totalorder %v6246_v5, 4 }
 0x5c4   : > { %7818 = vsinq.f32 %v6113_v9  ;;  %v6269_v46 = vsel %vm6265_vm8, %v6249_v55, %v6252_v62  ;;  %v6270_v14 = vsel %vm6268_vm11, %v6258_v47, 2102212464  ;;  %v6273_v44 = vsel %vm6265_vm8, %v6252_v62, %v6255_v35 }
 0x5c5   : > { %v7246_v60 = vmin.u32 %v6195_v4, %v12653_v41  ;;  %v6274_v52 = vsel %vm6268_vm11, %v6261_v31, 920167782  ;;  %v6271_v45 = vsel %vm6267_vm9, %v6255_v35, %v6270_v14  ;;  %v6277_v33 = vsel %vm6265_vm8, %v6255_v35, %v6258_v47 }
 0x5c6   : > { %v6275_v17 = vsel %vm6267_vm9, %v6258_v47, %v6274_v52  ;;  %v6278_v20 = vsel %vm6268_vm11, %v6264_v56, 1326507024  ;;  %v6119_v34 = vand.u32 3, %v6118_v37  ;;  %v6215_v12 = vsub.s32 4, %v6191_v3 }
 0x5c7   : > { %v6197_v8 = vclz %v7246_v60  ;;  %v6272_v57 = vsel %vm6266_vm10, %v6269_v46, %v6271_v45  ;;  %v6276_v18 = vsel %vm6266_vm10, %v6273_v44, %v6275_v17  ;;  %v6279_v23 = vsel %vm6267_vm9, %v6261_v31, %v6278_v20 }
 0x5c8   : > { %v7253_v36 = vadd.s32 4294967169, %v6341_v16  ;;  %v6280_v38 = vsel %vm6266_vm10, %v6277_v33, %v6279_v23  ;;  %v12667_v59 = vmul.u32.u64.low %v12643_v58, %v6276_v18  ;;  %v12668_v48 = vmul.u32.u64.high %v12643_v58, %v6276_v18, %v12667_v59 }
 0x5c9   : > { %v7247_v50 = vadd.s32 4294967294, %v6197_v8  ;;  %vm6131_vm12 = vcmp.lt.s32.totalorder %v12476_v54, 0  ;;  %v12673_v37 = vmul.u32.u64.low %v12643_v58, %v6280_v38  ;;  %v12674_v51 = vmul.u32.u64.high %v12643_v58, %v6280_v38, %v12673_v37 }
 0x5ca   : > { %v6337_v13 = vand.u32 2147483647, %v12630_v63  ;;  %vm6117_vm13 = vweird.f32 %v12384_v2  ;;  %v6185_v11 = vadd.s32 %v12610_v61, %v12607_v25  ;;  %v6216_v15 = vsel %vm6131_vm12, %v6215_v12, %v6191_v3 }
 0x5cb   : > { %vm7248_vm14 = vcmp.lt.s32.totalorder %v7247_v50, 0  ;;  %v6347_v6 = vadd.s32 1, %v7253_v36  ;;  %vm6120_vm0 = vcmp.lt.s32.totalorder %v6119_v34, 2  ;;  %vm12684_vm15 = vcmp.le.f32.partialorder %v6129_v10, 0.7853982 }
 0x5cc   : > { %v6200_v29 = vsel %vm7248_vm14, 0, %v7247_v50  ;;  %v6288_v22 = vmul.u32 %v12643_v58, %v6272_v57  ;;  %v6291_v25 = vadd.s32 1, %v12668_v48  ;;  %v6218_v61 = vsel %vm12684_vm15, 0, %v6216_v15 }
 0x5cd   : > { %v6201_v5 = vsub.s32 32, %v6200_v29  ;;  %v6202_v19 = vshll.u32 %v12653_v41, %v6200_v29  ;;  %v6205_v49 = vsub.s32 4294967266, %v6200_v29  ;;  %vm6290_vm1 = vc.u32 %v12674_v51, %v12667_v59 }
 0x5ce   : > { %v6344_v10 = vand.u32 8388607, %v6337_v13  ;;  %vm6348_vm2 = vcmp.gt.s32.totalorder %v6347_v6, 0  ;;  %v6292_v58 = vsel %vm6290_vm1, %v6291_v25, %v12668_v48  ;;  %vm6121_vm4 = vcmp.eq.s32.totalorder %v6119_v34, 0 }
 0x5cf   : > { %v6203_v3 = vshrl.u32 %v6185_v11, %v6201_v5  ;;  %v6206_v7 = vadd.s32 127, %v6205_v49  ;;  %v6349_v55 = vsel %vm6348_vm2, %v6347_v6, 0  ;;  %vm6124_vm3 = vcmp.eq.s32.totalorder %v6119_v34, 2 }
 0x5d0   : > { %v7817_v42 = vpop.eup %7816  ;;  %v6293_v62 = vadd.s32 %v6292_v58, %v6288_v22  ;;  %v6351_v40 = vand.u32 31, %v6349_v55  ;;  %v12701_v47 = vadd.s32 3, %v6218_v61  ;;  %v6345_v56 = vor.u32 8388608, %v6344_v10 }
 0x5d1   : > { %v7819_v0 = vpop.eup %7818  ;;  %v6125_v21 = vxor.u32 2147483648, %v7817_v42  ;;  %v6204_v41 = vor.u32 %v6203_v3, %v6202_v19  ;;  %v6207_v35 = vshll.u32 %v6206_v7, 23  ;;  %v6441_v14 = vand.u32 2147483647, %v12699_v27 }
 0x5d2   : > { %v6122_v9 = vxor.u32 2147483648, %v7819_v0  ;;  %v6294_v31 = vadd.s32 536870912, %v6293_v62  ;;  %v6352_v4 = vsub.s32 32, %v6351_v40  ;;  %v6350_v45 = vshrl.u32 %v6349_v55, 5 }
 0x5d3   : > { %v6126_v16 = vsel %vm6124_vm3, %v6125_v21, %v7819_v0  ;;  %v6208_v46 = vor.u32 4788187, %v6207_v35  ;;  %v6211_v60 = vcvt.s32.f32 %v6204_v41  ;;  %v6444_v17 = vand.u32 2139095040, %v12699_v27 }
 0x5d4   : > { %v6123_v44 = vsel %vm6121_vm4, %v7817_v42, %v6122_v9  ;;  %v6295_v52 = vshrl.u32 %v6294_v31, 30  ;;  %v6354_v8 = vshll.u32 %v7945_v24, %v6351_v40  ;;  %v6357_v12 = vshll.u32 %v7946_v26, %v6351_v40 }
 0x5d5   : > { %v6127_v33 = vsel %vm6120_vm0, %v6123_v44, %v6126_v16  ;;  %v6209_v20 = vand.u32 2147483647, %v6208_v46  ;;  %v6355_v23 = vshrl.u32 %v7946_v26, %v6352_v4  ;;  %v6358_v36 = vshrl.u32 %v7947_v28, %v6352_v4 }
 0x5d6   : > { %v6128_v57 = vsel %vm6117_vm13, nan, %v6127_v33  ;;  %v6296_v18 = vshll.u32 %v6295_v52, 30  ;;  %v6360_v38 = vshll.u32 %v7947_v28, %v6351_v40  ;;  %v6361_v48 = vshrl.u32 %v7948_v30, %v6352_v4 }
 0x5d7   : > { %v6212_v50 = vmul.f32 %v6211_v60, %v6209_v20  ;;  %v6363_v34 = vshll.u32 %v7948_v30, %v6351_v40  ;;  %6913 = vst [vmem:[%s8364_s17 + $0x1c0] sm:$0xff] %v6128_v57  ;;  %v6364_v11 = vshrl.u32 %v7949_v32, %v6352_v4  ;;  %v6366_v2 = vshll.u32 %v7949_v32, %v6351_v40 }
 0x5d8   : > { %v12717_v37 = vsub.s32 %v6293_v62, %v6296_v18  ;;  %v12721_v15 = vshll.u32 %v6345_v56, 8  ;;  %v6289_v29 = vadd.s32 %v12667_v59, %v12674_v51  ;;  %v6367_v22 = vshrl.u32 %v7950_v39, %v6352_v4 }
 0x5d9   : > { %v6213_v6 = vxor.u32 2147483648, %v6212_v50  ;;  %v6445_v5 = vshrl.u32 %v6444_v17, 23  ;;  %vm6235_vm5 = vcmp.lt.s32.totalorder %v12562_v1, 0  ;;  %v6353_v49 = vshrl.u32 %v7945_v24, %v6352_v4 }
 0x5da   : > { %v6299_v19 = vsub.s32 0, %v12717_v37  ;;  %v6356_v25 = vor.u32 %v6355_v23, %v6354_v8  ;;  %v6359_v61 = vor.u32 %v6358_v36, %v6357_v12  ;;  %v6362_v3 = vor.u32 %v6361_v48, %v6360_v38 }
 0x5db   : > { %v6214_v10 = vsel %vm6131_vm12, %v6213_v6, %v6212_v50  ;;  %v6365_v7 = vor.u32 %v6364_v11, %v6363_v34  ;;  %vm6369_vm6 = vcmp.lt.s32.totalorder %v6350_v45, 1  ;;  %v6368_v58 = vor.u32 %v6367_v22, %v6366_v2 }
 0x5dc   : > { %v6217_v59 = vsel %vm12684_vm15, %v12476_v54, %v6214_v10  ;;  %v7250_v51 = vmin.u32 %v6299_v19, %v12717_v37  ;;  %vm6372_vm7 = vcmp.lt.s32.totalorder %v6350_v45, 4  ;;  %vm6370_vm8 = vcmp.lt.s32.totalorder %v6350_v45, 2 }
 0x5dd   : > { %7820 = vcosq.f32 %v6217_v59  ;;  %vm6371_vm9 = vcmp.lt.s32.totalorder %v6350_v45, 3  ;;  %v6374_v55 = vsel %vm6372_vm7, %v6362_v3, 2102212464  ;;  %v6373_v62 = vsel %vm6369_vm6, %v6353_v49, %v6356_v25 }
 0x5de   : > { %7822 = vsinq.f32 %v6217_v59  ;;  %v6301_v42 = vclz %v7250_v51  ;;  %v6377_v40 = vsel %vm6369_vm6, %v6356_v25, %v6359_v61  ;;  %v6319_v0 = vsub.s32 4, %v6295_v52 }
 0x5df   : > { %v6375_v21 = vsel %vm6371_vm9, %v6359_v61, %v6374_v55  ;;  %v6378_v41 = vsel %vm6372_vm7, %v6365_v7, 920167782  ;;  %v6381_v53 = vsel %vm6369_vm6, %v6359_v61, %v6362_v3  ;;  %v6382_v31 = vsel %vm6372_vm7, %v6368_v58, 1326507024 }
 0x5e0   : > { %v7251_v35 = vadd.s32 4294967294, %v6301_v42  ;;  %v6379_v9 = vsel %vm6371_vm9, %v6362_v3, %v6378_v41  ;;  %v6448_v56 = vand.u32 8388607, %v6441_v14  ;;  %v6376_v4 = vsel %vm6370_vm8, %v6373_v62, %v6375_v21 }
 0x5e1   : > { %v6380_v16 = vsel %vm6370_vm8, %v6377_v40, %v6379_v9  ;;  %v6383_v46 = vsel %vm6371_vm9, %v6365_v7, %v6382_v31  ;;  %v7257_v60 = vadd.s32 4294967169, %v6445_v5  ;;  %v6320_v8 = vsel %vm6235_vm5, %v6319_v0, %v6295_v52 }
 0x5e2   : > { %vm7252_vm10 = vcmp.lt.s32.totalorder %v7251_v35, 0  ;;  %v6384_v44 = vsel %vm6370_vm8, %v6381_v53, %v6383_v46  ;;  %v12747_v17 = vmul.u32.u64.low %v12721_v15, %v6380_v16  ;;  %v12748_v33 = vmul.u32.u64.high %v12721_v15, %v6380_v16, %v12747_v17 }
 0x5e3   : > { %v6304_v20 = vsel %vm7252_vm10, 0, %v7251_v35  ;;  %v12754_v12 = vmul.u32.u64.low %v12721_v15, %v6384_v44  ;;  %v12755_v57 = vmul.u32.u64.high %v12721_v15, %v6384_v44, %v12754_v12  ;;  %v6451_v50 = vadd.s32 1, %v7257_v60 }
 0x5e4   : > { %v6305_v18 = vsub.s32 32, %v6304_v20  ;;  %v6306_v23 = vshll.u32 %v12717_v37, %v6304_v20  ;;  %v6309_v36 = vsub.s32 4294967266, %v6304_v20  ;;  %v6223_v45 = vand.u32 3, %v12701_v47 }
 0x5e5   : > { %vm12761_vm11 = vcmp.le.f32.partialorder %v6233_v43, 0.7853982  ;;  %v6392_v48 = vmul.u32 %v12721_v15, %v6376_v4  ;;  %v6395_v11 = vadd.s32 1, %v12748_v33  ;;  %vm6452_vm12 = vcmp.gt.s32.totalorder %v6451_v50, 0 }
 0x5e6   : > { %v6307_v52 = vshrl.u32 %v6289_v29, %v6305_v18  ;;  %v6310_v34 = vadd.s32 127, %v6309_v36  ;;  %v6322_v37 = vsel %vm12761_vm11, 0, %v6320_v8  ;;  %vm6394_vm13 = vc.u32 %v12755_v57, %v12747_v17 }
 0x5e7   : > { %v6449_v47 = vor.u32 8388608, %v6448_v56  ;;  %v6453_v2 = vsel %vm6452_vm12, %v6451_v50, 0  ;;  %v6396_v22 = vsel %vm6394_vm13, %v6395_v11, %v12748_v33  ;;  %vm6221_vm14 = vweird.f32 %v12476_v54  ;;  %v12791_v33 = vld [vmem:[%s8067_s30 + $0x1e8] sm:$0xff] }
 0x5e8   : > { %v6308_v6 = vor.u32 %v6307_v52, %v6306_v23  ;;  %v6311_v43 = vshll.u32 %v6310_v34, 23  ;;  %v12772_v5 = vshrl.u32 %v6453_v2, 5  ;;  %vm6224_vm0 = vcmp.lt.s32.totalorder %v6223_v45, 2 }
 0x5e9   : > { %v6397_v15 = vadd.s32 %v6396_v22, %v6392_v48  ;;  %v6455_v29 = vand.u32 31, %v6453_v2  ;;  %vm6225_vm15 = vcmp.eq.s32.totalorder %v6223_v45, 0  ;;  %vm6228_vm1 = vcmp.eq.s32.totalorder %v6223_v45, 2 }
 0x5ea   : > { %v7821_v19 = vpop.eup %7820  ;;  %v6312_v49 = vor.u32 4788187, %v6311_v43  ;;  %v6315_v25 = vcvt.s32.f32 %v6308_v6  ;;  %v6326_v3 = vadd.s32 3, %v6322_v37  ;;  %vm6473_vm2 = vcmp.lt.s32.totalorder %v12772_v5, 1 }
 0x5eb   : > { %v7823_v61 = vpop.eup %7822  ;;  %v6229_v10 = vxor.u32 2147483648, %v7821_v19  ;;  %v6398_v7 = vadd.s32 536870912, %v6397_v15  ;;  %v6456_v59 = vsub.s32 32, %v6455_v29  ;;  %v12776_v55 = vshll.u32 %v6449_v47, 8 }
 0x5ec   : > { %v6226_v51 = vxor.u32 2147483648, %v7823_v61  ;;  %v6313_v58 = vand.u32 2147483647, %v6312_v49  ;;  %v6458_v40 = vshll.u32 %v7945_v24, %v6455_v29  ;;  %vm6339_vm4 = vcmp.lt.s32.totalorder %v12630_v63, 0 }
 0x5ed   : > { %v6230_v42 = vsel %vm6228_vm1, %v6229_v10, %v7823_v61  ;;  %v6399_v62 = vshrl.u32 %v6398_v7, 30  ;;  %v6459_v0 = vshrl.u32 %v7946_v26, %v6456_v59  ;;  %v6461_v53 = vshll.u32 %v7946_v26, %v6455_v29 }
 0x5ee   : > { %v6227_v21 = vsel %vm6225_vm15, %v7821_v19, %v6226_v51  ;;  %v6316_v41 = vmul.f32 %v6315_v25, %v6313_v58  ;;  %v6462_v35 = vshrl.u32 %v7947_v28, %v6456_v59  ;;  %v6464_v56 = vshll.u32 %v7947_v28, %v6455_v29 }
 0x5ef   : > { %v6231_v9 = vsel %vm6224_vm0, %v6227_v21, %v6230_v42  ;;  %v6400_v31 = vshll.u32 %v6399_v62, 30  ;;  %v6465_v4 = vshrl.u32 %v7948_v30, %v6456_v59  ;;  %v6423_v60 = vsub.s32 4, %v6399_v62 }
 0x5f0   : > { %v6232_v16 = vsel %vm6221_vm14, nan, %v6231_v9  ;;  %v6317_v46 = vxor.u32 2147483648, %v6316_v41  ;;  %v6457_v44 = vshrl.u32 %v7945_v24, %v6456_v59  ;;  %v6460_v8 = vor.u32 %v6459_v0, %v6458_v40 }
 0x5f1   : > { %v12793_v20 = vsub.s32 %v6397_v15, %v6400_v31  ;;  %v6467_v12 = vshll.u32 %v7948_v30, %v6455_v29  ;;  %v6468_v18 = vshrl.u32 %v7949_v32, %v6456_v59  ;;  %6914 = vst [vmem:[%s8364_s17 + $0x1c8] sm:$0xff] %v6232_v16  ;;  %v6463_v36 = vor.u32 %v6462_v35, %v6461_v53 }
 0x5f2   : > { %v6318_v23 = vsel %vm6235_vm5, %v6317_v46, %v6316_v41  ;;  %v6470_v54 = vshll.u32 %v7949_v32, %v6455_v29  ;;  %v6471_v50 = vshrl.u32 %v7950_v39, %v6456_v59  ;;  %vm12807_vm3 = vcmp.le.f32.partialorder %v6337_v13, 0.7853982 }
 0x5f3   : > { %v6321_v45 = vsel %vm12761_vm11, %v12562_v1, %v6318_v23  ;;  %v6403_v52 = vsub.s32 0, %v12793_v20  ;;  %v6466_v34 = vor.u32 %v6465_v4, %v6464_v56  ;;  %v6469_v11 = vor.u32 %v6468_v18, %v6467_v12 }
 0x5f4   : > { %7824 = vcosq.f32 %v6321_v45  ;;  %v6472_v37 = vor.u32 %v6471_v50, %v6470_v54  ;;  %vm6476_vm5 = vcmp.lt.s32.totalorder %v12772_v5, 4  ;;  %v6548_v47 = vand.u32 2139095040, %v12791_v33 }
 0x5f5   : > { %7826 = vsinq.f32 %v6321_v45  ;;  %v7254_v38 = vmin.u32 %v6403_v52, %v12793_v20  ;;  %vm6474_vm6 = vcmp.lt.s32.totalorder %v12772_v5, 2  ;;  %vm6475_vm7 = vcmp.lt.s32.totalorder %v12772_v5, 3 }
 0x5f6   : > { %v6477_v13 = vsel %vm6473_vm2, %v6457_v44, %v6460_v8  ;;  %v6478_v2 = vsel %vm6476_vm5, %v6466_v34, 2102212464  ;;  %v6481_v6 = vsel %vm6473_vm2, %v6460_v8, %v6463_v36  ;;  %v6482_v43 = vsel %vm6476_vm5, %v6469_v11, 920167782 }
 0x5f7   : > { %v6327_v22 = vand.u32 3, %v6326_v3  ;;  %v6405_v15 = vclz %v7254_v38  ;;  %v6424_v29 = vsel %vm6339_vm4, %v6423_v60, %v6399_v62  ;;  %v6485_v19 = vsel %vm6473_vm2, %v6463_v36, %v6466_v34 }
 0x5f8   : > { %v6479_v49 = vsel %vm6475_vm7, %v6463_v36, %v6478_v2  ;;  %v6483_v25 = vsel %vm6475_vm7, %v6466_v34, %v6482_v43  ;;  %v6486_v61 = vsel %vm6476_vm5, %v6472_v37, 1326507024  ;;  %v6549_v10 = vshrl.u32 %v6548_v47, 23 }
 0x5f9   : > { %v7255_v7 = vadd.s32 4294967294, %v6405_v15  ;;  %v6480_v3 = vsel %vm6474_vm6, %v6477_v13, %v6479_v49  ;;  %v6484_v59 = vsel %vm6474_vm6, %v6481_v6, %v6483_v25  ;;  %v6487_v51 = vsel %vm6475_vm7, %v6469_v11, %v6486_v61  ;;  %v12873_v15 = vld [vmem:[%s8067_s30 + $0x1f0] sm:$0xff] }
 0x5fa   : > { %v6393_v58 = vadd.s32 %v12747_v17, %v12755_v57  ;;  %v6488_v42 = vsel %vm6474_vm6, %v6485_v19, %v6487_v51  ;;  %v12846_v62 = vmul.u32.u64.low %v12776_v55, %v6484_v59  ;;  %v12847_v40 = vmul.u32.u64.high %v12776_v55, %v6484_v59, %v12846_v62 }
 0x5fb   : > { %vm7256_vm8 = vcmp.lt.s32.totalorder %v7255_v7, 0  ;;  %v12851_v0 = vmul.u32.u64.low %v12776_v55, %v6488_v42  ;;  %v12852_v21 = vmul.u32.u64.high %v12776_v55, %v6488_v42, %v12851_v0  ;;  %v7261_v41 = vadd.s32 4294967169, %v6549_v10 }
 0x5fc   : > { %v6408_v53 = vsel %vm7256_vm8, 0, %v7255_v7  ;;  %v6426_v35 = vsel %vm12807_vm3, 0, %v6424_v29  ;;  %v6496_v17 = vmul.u32 %v12776_v55, %v6480_v3  ;;  %vm6325_vm9 = vweird.f32 %v12562_v1 }
 0x5fd   : > { %v6409_v57 = vsub.s32 32, %v6408_v53  ;;  %v6410_v5 = vshll.u32 %v12793_v20, %v6408_v53  ;;  %v6413_v9 = vsub.s32 4294967266, %v6408_v53  ;;  %v6555_v31 = vadd.s32 1, %v7261_v41 }
 0x5fe   : > { %v6499_v56 = vadd.s32 1, %v12847_v40  ;;  %vm6332_vm10 = vcmp.eq.s32.totalorder %v6327_v22, 2  ;;  %vm6498_vm11 = vc.u32 %v12852_v21, %v12846_v62  ;;  %v6430_v46 = vadd.s32 3, %v6426_v35 }
 0x5ff   : > { %v6411_v4 = vshrl.u32 %v6393_v58, %v6409_v57  ;;  %v6414_v16 = vadd.s32 127, %v6413_v9  ;;  %v6545_v55 = vand.u32 2147483647, %v12791_v33  ;;  %vm6556_vm12 = vcmp.gt.s32.totalorder %v6555_v31, 0 }
 0x600   : > { %v6500_v60 = vsel %vm6498_vm11, %v6499_v56, %v12847_v40  ;;  %v6557_v18 = vsel %vm6556_vm12, %v6555_v31, 0  ;;  %vm6328_vm13 = vcmp.lt.s32.totalorder %v6327_v22, 2  ;;  %vm6329_vm14 = vcmp.eq.s32.totalorder %v6327_v22, 0 }
 0x601   : > { %v7825_v44 = vpop.eup %7824  ;;  %v6412_v20 = vor.u32 %v6411_v4, %v6410_v5  ;;  %v6415_v8 = vshll.u32 %v6414_v16, 23  ;;  %v6501_v12 = vadd.s32 %v6500_v60, %v6496_v17  ;;  %v6559_v54 = vand.u32 31, %v6557_v18 }
 0x602   : > { %v7827_v23 = vpop.eup %7826  ;;  %v6333_v36 = vxor.u32 2147483648, %v7825_v44  ;;  %v12865_v37 = vand.u32 3, %v6430_v46  ;;  %v6552_v47 = vand.u32 8388607, %v6545_v55  ;;  %v6558_v51 = vshrl.u32 %v6557_v18, 5 }
 0x603   : > { %v6330_v50 = vxor.u32 2147483648, %v7827_v23  ;;  %v6416_v45 = vor.u32 4788187, %v6415_v8  ;;  %v6419_v52 = vcvt.s32.f32 %v6412_v20  ;;  %v6502_v34 = vadd.s32 536870912, %v6501_v12 }
 0x604   : > { %v6334_v11 = vsel %vm6332_vm10, %v6333_v36, %v7827_v23  ;;  %v6560_v38 = vsub.s32 32, %v6559_v54  ;;  %v6562_v43 = vshll.u32 %v7945_v24, %v6559_v54  ;;  %v6565_v49 = vshll.u32 %v7946_v26, %v6559_v54 }
 0x605   : > { %v6331_v13 = vsel %vm6329_vm14, %v7825_v44, %v6330_v50  ;;  %v6417_v2 = vand.u32 2147483647, %v6416_v45  ;;  %v12869_v6 = vshrl.u32 %v6502_v34, 30  ;;  %v6568_v25 = vshll.u32 %v7947_v28, %v6559_v54 }
 0x606   : > { %v6335_v29 = vsel %vm6328_vm13, %v6331_v13, %v6334_v11  ;;  %v6563_v19 = vshrl.u32 %v7946_v26, %v6560_v38  ;;  %v6566_v3 = vshrl.u32 %v7947_v28, %v6560_v38  ;;  %v6553_v59 = vor.u32 8388608, %v6552_v47 }
 0x607   : > { %v6336_v61 = vsel %vm6325_vm9, nan, %v6335_v29  ;;  %v6420_v10 = vmul.f32 %v6419_v52, %v6417_v2  ;;  %v6504_v7 = vshll.u32 %v12869_v6, 30  ;;  %v6569_v58 = vshrl.u32 %v7948_v30, %v6560_v38 }
 0x608   : > { %v6571_v22 = vshll.u32 %v7948_v30, %v6559_v54  ;;  %6915 = vst [vmem:[%s8364_s17 + $0x1d0] sm:$0xff] %v6336_v61  ;;  %v6572_v0 = vshrl.u32 %v7949_v32, %v6560_v38  ;;  %v6652_v1 = vand.u32 2139095040, %v12873_v15  ;;  %v6561_v41 = vshrl.u32 %v7945_v24, %v6560_v38 }
 0x609   : > { %v6421_v42 = vxor.u32 2147483648, %v6420_v10  ;;  %v12886_v40 = vsub.s32 %v6501_v12, %v6504_v7  ;;  %v6564_v53 = vor.u32 %v6563_v19, %v6562_v43  ;;  %v6574_v35 = vshll.u32 %v7949_v32, %v6559_v54 }
 0x60a   : > { %v6575_v17 = vshrl.u32 %v7950_v39, %v6560_v38  ;;  %v6567_v9 = vor.u32 %v6566_v3, %v6565_v49  ;;  %v6570_v31 = vor.u32 %v6569_v58, %v6568_v25  ;;  %v6573_v4 = vor.u32 %v6572_v0, %v6571_v22 }
 0x60b   : > { %v6422_v57 = vsel %vm6339_vm4, %v6421_v42, %v6420_v10  ;;  %v6507_v5 = vsub.s32 0, %v12886_v40  ;;  %vm6577_vm0 = vcmp.lt.s32.totalorder %v6558_v51, 1  ;;  %vm6443_vm15 = vcmp.lt.s32.totalorder %v12699_v27, 0 }
 0x60c   : > { %v6425_v56 = vsel %vm12807_vm3, %v12630_v63, %v6422_v57  ;;  %v6576_v16 = vor.u32 %v6575_v17, %v6574_v35  ;;  %v6593_v60 = vshll.u32 %v6553_v59, 8  ;;  %v6649_v44 = vand.u32 2147483647, %v12873_v15 }
 0x60d   : > { %7828 = vcosq.f32 %v6425_v56  ;;  %v7258_v46 = vmin.u32 %v6507_v5, %v12886_v40  ;;  %vm6579_vm1 = vcmp.lt.s32.totalorder %v6558_v51, 3  ;;  %vm6580_vm2 = vcmp.lt.s32.totalorder %v6558_v51, 4 }
 0x60e   : > { %7830 = vsinq.f32 %v6425_v56  ;;  %v6653_v20 = vshrl.u32 %v6652_v1, 23  ;;  %vm6578_vm4 = vcmp.lt.s32.totalorder %v6558_v51, 2  ;;  %v6581_v48 = vsel %vm6577_vm0, %v6561_v41, %v6564_v53 }
 0x60f   : > { %v6509_v8 = vclz %v7258_v46  ;;  %v6585_v12 = vsel %vm6577_vm0, %v6564_v53, %v6567_v9  ;;  %v6582_v18 = vsel %vm6580_vm2, %v6570_v31, 2102212464  ;;  %v6586_v23 = vsel %vm6580_vm2, %v6573_v4, 920167782 }
 0x610   : > { %v6589_v36 = vsel %vm6577_vm0, %v6567_v9, %v6570_v31  ;;  %v6590_v54 = vsel %vm6580_vm2, %v6576_v16, 1326507024  ;;  %v6583_v45 = vsel %vm6579_vm1, %v6567_v9, %v6582_v18  ;;  %v6587_v52 = vsel %vm6579_vm1, %v6570_v31, %v6586_v23 }
 0x611   : > { %v7259_v50 = vadd.s32 4294967294, %v6509_v8  ;;  %v6591_v34 = vsel %vm6579_vm1, %v6573_v4, %v6590_v54  ;;  %v6527_v11 = vsub.s32 4, %v12869_v6  ;;  %v6588_v47 = vsel %vm6578_vm4, %v6585_v12, %v6587_v52  ;;  %v12946_v12 = vld [vmem:[%s8067_s30 + $0x1f8] sm:$0xff] }
 0x612   : > { %v6592_v38 = vsel %vm6578_vm4, %v6589_v36, %v6591_v34  ;;  %v7265_v13 = vadd.s32 4294967169, %v6653_v20  ;;  %v6497_v2 = vadd.s32 %v12846_v62, %v12852_v21  ;;  %v6584_v49 = vsel %vm6578_vm4, %v6581_v48, %v6583_v45 }
 0x613   : > { %vm7260_vm3 = vcmp.lt.s32.totalorder %v7259_v50, 0  ;;  %v12910_v43 = vmul.u32.u64.low %v6593_v60, %v6592_v38  ;;  %v12911_v29 = vmul.u32.u64.high %v6593_v60, %v6592_v38, %v12910_v43  ;;  %vm6429_vm5 = vweird.f32 %v12630_v63 }
 0x614   : > { %v6512_v19 = vsel %vm7260_vm3, 0, %v7259_v50  ;;  %v12914_v25 = vmul.u32.u64.low %v6593_v60, %v6588_v47  ;;  %v12915_v61 = vmul.u32.u64.high %v6593_v60, %v6588_v47, %v12914_v25  ;;  %v6659_v59 = vadd.s32 1, %v7265_v13 }
 0x615   : > { %v6513_v10 = vsub.s32 32, %v6512_v19  ;;  %v6514_v7 = vshll.u32 %v12886_v40, %v6512_v19  ;;  %v6517_v3 = vsub.s32 4294967266, %v6512_v19  ;;  %vm12922_vm6 = vcmp.le.f32.partialorder %v6441_v14, 0.7853982 }
 0x616   : > { %v12929_v21 = vsel %vm6443_vm15, %v6527_v11, %v12869_v6  ;;  %v6600_v22 = vmul.u32 %v6593_v60, %v6584_v49  ;;  %vm6602_vm7 = vc.u32 %v12911_v29, %v12914_v25  ;;  %vm6432_vm8 = vcmp.lt.s32.totalorder %v12865_v37, 2 }
 0x617   : > { %v6515_v51 = vshrl.u32 %v6497_v2, %v6513_v10  ;;  %v6518_v58 = vadd.s32 127, %v6517_v3  ;;  %v6603_v42 = vadd.s32 1, %v12915_v61  ;;  %v6656_v14 = vand.u32 8388607, %v6649_v44 }
 0x618   : > { %vm6660_vm9 = vcmp.gt.s32.totalorder %v6659_v59, 0  ;;  %vm6433_vm10 = vcmp.eq.s32.totalorder %v12865_v37, 0  ;;  %vm6436_vm11 = vcmp.eq.s32.totalorder %v12865_v37, 2  ;;  %v6530_v41 = vsel %vm12922_vm6, 0, %v12929_v21 }
 0x619   : > { %v6516_v40 = vor.u32 %v6515_v51, %v6514_v7  ;;  %v6519_v0 = vshll.u32 %v6518_v58, 23  ;;  %v6661_v6 = vsel %vm6660_vm9, %v6659_v59, 0  ;;  %v6604_v53 = vsel %vm6602_vm7, %v6603_v42, %v12915_v61 }
 0x61a   : > { %v7829_v1 = vpop.eup %7828  ;;  %v6663_v35 = vand.u32 31, %v6661_v6  ;;  %v6605_v31 = vadd.s32 %v6604_v53, %v6600_v22  ;;  %v6657_v4 = vor.u32 8388608, %v6656_v14  ;;  %v6662_v47 = vshrl.u32 %v6661_v6, 5 }
 0x61b   : > { %v7831_v17 = vpop.eup %7830  ;;  %v6437_v57 = vxor.u32 2147483648, %v7829_v1  ;;  %v6520_v5 = vor.u32 4788187, %v6519_v0  ;;  %v6523_v9 = vcvt.s32.f32 %v6516_v40  ;;  %v6756_v37 = vand.u32 2139095040, %v12946_v12 }
 0x61c   : > { %v6434_v56 = vxor.u32 2147483648, %v7831_v17  ;;  %v6664_v16 = vsub.s32 32, %v6663_v35  ;;  %v6666_v46 = vshll.u32 %v7945_v24, %v6663_v35  ;;  %v6606_v8 = vadd.s32 536870912, %v6605_v31 }
 0x61d   : > { %v6438_v60 = vsel %vm6436_vm11, %v6437_v57, %v7831_v17  ;;  %v6521_v20 = vand.u32 2147483647, %v6520_v5  ;;  %v6669_v48 = vshll.u32 %v7946_v26, %v6663_v35  ;;  %v6672_v54 = vshll.u32 %v7947_v28, %v6663_v35 }
 0x61e   : > { %v6435_v18 = vsel %vm6433_vm10, %v7829_v1, %v6434_v56  ;;  %v6667_v23 = vshrl.u32 %v7946_v26, %v6664_v16  ;;  %v6670_v36 = vshrl.u32 %v7947_v28, %v6664_v16  ;;  %v12955_v52 = vshrl.u32 %v6606_v8, 30 }
 0x61f   : > { %v6439_v50 = vsel %vm6432_vm8, %v6435_v18, %v6438_v60  ;;  %v6524_v45 = vmul.f32 %v6523_v9, %v6521_v20  ;;  %v6673_v34 = vshrl.u32 %v7948_v30, %v6664_v16  ;;  %v6675_v38 = vshll.u32 %v7948_v30, %v6663_v35 }
 0x620   : > { %v6440_v11 = vsel %vm6429_vm5, nan, %v6439_v50  ;;  %v12961_v13 = vshll.u32 %v6657_v4, 8  ;;  %v6608_v43 = vshll.u32 %v12955_v52, 30  ;;  %v6665_v19 = vshrl.u32 %v7945_v24, %v6664_v16 }
 0x621   : > { %v6525_v2 = vxor.u32 2147483648, %v6524_v45  ;;  %6916 = vst [vmem:[%s8364_s17 + $0x1d8] sm:$0xff] %v6440_v11  ;;  %v6668_v49 = vor.u32 %v6667_v23, %v6666_v46  ;;  %v6676_v61 = vshrl.u32 %v7949_v32, %v6664_v16  ;;  %v6678_v10 = vshll.u32 %v7949_v32, %v6663_v35 }
 0x622   : > { %v6679_v63 = vshrl.u32 %v7950_v39, %v6664_v16  ;;  %v12972_v3 = vsub.s32 %v6605_v31, %v6608_v43  ;;  %v6671_v59 = vor.u32 %v6670_v36, %v6669_v48  ;;  %v6674_v21 = vor.u32 %v6673_v34, %v6672_v54 }
 0x623   : > { %v6526_v7 = vsel %vm6443_vm15, %v6525_v2, %v6524_v45  ;;  %v6677_v58 = vor.u32 %v6676_v61, %v6675_v38  ;;  %vm6681_vm12 = vcmp.lt.s32.totalorder %v6662_v47, 1  ;;  %vm6683_vm13 = vcmp.lt.s32.totalorder %v6662_v47, 3 }
 0x624   : > { %v6529_v51 = vsel %vm12922_vm6, %v12699_v27, %v6526_v7  ;;  %v6680_v22 = vor.u32 %v6679_v63, %v6678_v10  ;;  %v6611_v42 = vsub.s32 0, %v12972_v3  ;;  %v6757_v14 = vshrl.u32 %v6756_v37, 23 }
 0x625   : > { %7832 = vcosq.f32 %v6529_v51  ;;  %vm6682_vm14 = vcmp.lt.s32.totalorder %v6662_v47, 2  ;;  %vm6684_vm0 = vcmp.lt.s32.totalorder %v6662_v47, 4  ;;  %v6685_v40 = vsel %vm6681_vm12, %v6665_v19, %v6668_v49 }
 0x626   : > { %7834 = vsinq.f32 %v6529_v51  ;;  %v7262_v0 = vmin.u32 %v6611_v42, %v12972_v3  ;;  %v6686_v6 = vsel %vm6684_vm0, %v6674_v21, 2102212464  ;;  %v6689_v1 = vsel %vm6681_vm12, %v6668_v49, %v6671_v59 }
 0x627   : > { %v6690_v53 = vsel %vm6684_vm0, %v6677_v58, 920167782  ;;  %v6687_v62 = vsel %vm6683_vm13, %v6671_v59, %v6686_v6  ;;  %v6693_v17 = vsel %vm6681_vm12, %v6671_v59, %v6674_v21  ;;  %v6694_v57 = vsel %vm6684_vm0, %v6680_v22, 1326507024 }
 0x628   : > { %v6691_v35 = vsel %vm6683_vm13, %v6674_v21, %v6690_v53  ;;  %v6534_v5 = vadd.s32 3, %v6530_v41  ;;  %v6613_v9 = vclz %v7262_v0  ;;  %v6688_v31 = vsel %vm6682_vm14, %v6685_v40, %v6687_v62 }
 0x629   : > { %v6692_v56 = vsel %vm6682_vm14, %v6689_v1, %v6691_v35  ;;  %v6695_v4 = vsel %vm6683_vm13, %v6677_v58, %v6694_v57  ;;  %v7269_v16 = vadd.s32 4294967169, %v6757_v14  ;;  %vm6533_vm15 = vweird.f32 %v12699_v27 }
 0x62a   : > { %v7263_v46 = vadd.s32 4294967294, %v6613_v9  ;;  %v6696_v60 = vsel %vm6682_vm14, %v6693_v17, %v6695_v4  ;;  %v12986_v20 = vmul.u32.u64.low %v12961_v13, %v6692_v56  ;;  %v12987_v8 = vmul.u32.u64.high %v12961_v13, %v6692_v56, %v12986_v20 }
 0x62b   : > { %v12991_v48 = vmul.u32.u64.low %v12961_v13, %v6696_v60  ;;  %v12992_v18 = vmul.u32.u64.high %v12961_v13, %v6696_v60, %v12991_v48  ;;  %v6601_v41 = vadd.s32 %v12914_v25, %v12911_v29  ;;  %v6763_v23 = vadd.s32 1, %v7269_v16 }
 0x62c   : > { %vm7264_vm1 = vcmp.lt.s32.totalorder %v7263_v46, 0  ;;  %v6535_v36 = vand.u32 3, %v6534_v5  ;;  %v6704_v50 = vmul.u32 %v12961_v13, %v6688_v31  ;;  %v6753_v45 = vand.u32 2147483647, %v12946_v12 }
 0x62d   : > { %v6616_v54 = vsel %vm7264_vm1, 0, %v7263_v46  ;;  %v6707_v38 = vadd.s32 1, %v12987_v8  ;;  %vm6547_vm2 = vcmp.lt.s32.totalorder %v12791_v33, 0  ;;  %v6631_v2 = vsub.s32 4, %v12955_v52 }
 0x62e   : > { %v6617_v34 = vsub.s32 32, %v6616_v54  ;;  %v6618_v11 = vshll.u32 %v12972_v3, %v6616_v54  ;;  %v6621_v47 = vsub.s32 4294967266, %v6616_v54  ;;  %vm6706_vm4 = vc.u32 %v12992_v18, %v12986_v20 }
 0x62f   : > { %vm6764_vm3 = vcmp.gt.s32.totalorder %v6763_v23, 0  ;;  %v6708_v13 = vsel %vm6706_vm4, %v6707_v38, %v12987_v8  ;;  %vm6540_vm5 = vcmp.eq.s32.totalorder %v6535_v36, 2  ;;  %v6760_v49 = vand.u32 8388607, %v6753_v45 }
 0x630   : > { %v6619_v29 = vshrl.u32 %v6601_v41, %v6617_v34  ;;  %v6622_v25 = vadd.s32 127, %v6621_v47  ;;  %v6765_v43 = vsel %vm6764_vm3, %v6763_v23, 0  ;;  %v6709_v37 = vadd.s32 %v6708_v13, %v6704_v50 }
 0x631   : > { %v6767_v61 = vand.u32 31, %v6765_v43  ;;  %vm6537_vm6 = vcmp.eq.s32.totalorder %v6535_v36, 0  ;;  %vm6536_vm7 = vcmp.lt.s32.totalorder %v6535_v36, 2  ;;  %v6632_v14 = vsel %vm6547_vm2, %v6631_v2, %v12955_v52 }
 0x632   : > { %v7833_v19 = vpop.eup %7832  ;;  %v6620_v7 = vor.u32 %v6619_v29, %v6618_v11  ;;  %v6623_v3 = vshll.u32 %v6622_v25, 23  ;;  %v6710_v21 = vadd.s32 536870912, %v6709_v37  ;;  %v6761_v6 = vor.u32 8388608, %v6760_v49 }
 0x633   : > { %v7835_v10 = vpop.eup %7834  ;;  %v6541_v63 = vxor.u32 2147483648, %v7833_v19  ;;  %v6768_v51 = vsub.s32 32, %v6767_v61  ;;  %v6766_v1 = vshrl.u32 %v6765_v43, 5  ;;  %v6770_v35 = vshll.u32 %v7945_v24, %v6767_v61 }
 0x634   : > { %v6538_v59 = vxor.u32 2147483648, %v7835_v10  ;;  %v6624_v22 = vor.u32 4788187, %v6623_v3  ;;  %v6627_v42 = vcvt.s32.f32 %v6620_v7  ;;  %v13011_v0 = vshrl.u32 %v6710_v21, 30 }
 0x635   : > { %v6542_v58 = vsel %vm6540_vm5, %v6541_v63, %v7835_v10  ;;  %v6773_v17 = vshll.u32 %v7946_v26, %v6767_v61  ;;  %v6771_v9 = vshrl.u32 %v7946_v26, %v6768_v51  ;;  %v6774_v52 = vshrl.u32 %v7947_v28, %v6768_v51 }
 0x636   : > { %v6539_v40 = vsel %vm6537_vm6, %v7833_v19, %v6538_v59  ;;  %v6625_v62 = vand.u32 2147483647, %v6624_v22  ;;  %v6712_v5 = vshll.u32 %v13011_v0, 30  ;;  %v6776_v56 = vshll.u32 %v7947_v28, %v6767_v61 }
 0x637   : > { %v6543_v53 = vsel %vm6536_vm7, %v6539_v40, %v6542_v58  ;;  %v6777_v4 = vshrl.u32 %v7948_v30, %v6768_v51  ;;  %v6779_v16 = vshll.u32 %v7948_v30, %v6767_v61  ;;  %vm13026_vm8 = vcmp.le.f32.partialorder %v6545_v55, 0.7853982 }
 0x638   : > { %v6544_v57 = vsel %vm6533_vm15, nan, %v6543_v53  ;;  %v6628_v31 = vmul.f32 %v6627_v42, %v6625_v62  ;;  %v6713_v27 = vsub.s32 %v6709_v37, %v6712_v5  ;;  %v6780_v60 = vshrl.u32 %v7949_v32, %v6768_v51 }
 0x639   : > { %6917 = vst [vmem:[%s8364_s17 + $0x1e0] sm:$0xff] %v6544_v57  ;;  %v6782_v26 = vshll.u32 %v7949_v32, %v6767_v61  ;;  %v6634_v28 = vsel %vm13026_vm8, 0, %v6632_v14  ;;  %v6783_v48 = vshrl.u32 %v7950_v39, %v6768_v51  ;;  %v6801_v41 = vshll.u32 %v6761_v6, 8 }
 0x63a   : > { %v6629_v8 = vxor.u32 2147483648, %v6628_v31  ;;  %v6715_v30 = vsub.s32 0, %v6713_v27  ;;  %v6769_v23 = vshrl.u32 %v7945_v24, %v6768_v51  ;;  %v6772_v36 = vor.u32 %v6771_v9, %v6770_v35 }
 0x63b   : > { %v6775_v55 = vor.u32 %v6774_v52, %v6773_v17  ;;  %v6778_v50 = vor.u32 %v6777_v4, %v6776_v56  ;;  %v6781_v34 = vor.u32 %v6780_v60, %v6779_v16  ;;  %vm6785_vm9 = vcmp.lt.s32.totalorder %v6766_v1, 1 }
 0x63c   : > { %v6630_v54 = vsel %vm6547_vm2, %v6629_v8, %v6628_v31  ;;  %v7266_v11 = vmin.u32 %v6715_v30, %v6713_v27  ;;  %v6784_v47 = vor.u32 %v6783_v48, %v6782_v26  ;;  %vm6788_vm10 = vcmp.lt.s32.totalorder %v6766_v1, 4 }
 0x63d   : > { %v6633_v32 = vsel %vm13026_vm8, %v12791_v33, %v6630_v54  ;;  %vm6786_vm11 = vcmp.lt.s32.totalorder %v6766_v1, 2  ;;  %vm6787_vm12 = vcmp.lt.s32.totalorder %v6766_v1, 3  ;;  %v6790_v39 = vsel %vm6788_vm10, %v6778_v50, 2102212464 }
 0x63e   : > { %7836 = vcosq.f32 %v6633_v32  ;;  %v6717_v24 = vclz %v7266_v11  ;;  %v6789_v38 = vsel %vm6785_vm9, %v6769_v23, %v6772_v36  ;;  %v6793_v2 = vsel %vm6785_vm9, %v6772_v36, %v6775_v55 }
 0x63f   : > { %7838 = vsinq.f32 %v6633_v32  ;;  %v6791_v29 = vsel %vm6787_vm12, %v6775_v55, %v6790_v39  ;;  %v6794_v25 = vsel %vm6788_vm10, %v6781_v34, 920167782  ;;  %v6797_v13 = vsel %vm6785_vm9, %v6775_v55, %v6778_v50 }
 0x640   : > { %v6638_v43 = vadd.s32 3, %v6634_v28  ;;  %v7267_v19 = vadd.s32 4294967294, %v6717_v24  ;;  %v6795_v37 = vsel %vm6787_vm12, %v6778_v50, %v6794_v25  ;;  %v6798_v49 = vsel %vm6788_vm10, %v6784_v47, 1326507024 }
 0x641   : > { %v6705_v61 = vadd.s32 %v12986_v20, %v12992_v18  ;;  %v6792_v10 = vsel %vm6786_vm11, %v6789_v38, %v6791_v29  ;;  %v6796_v63 = vsel %vm6786_vm11, %v6793_v2, %v6795_v37  ;;  %v6799_v7 = vsel %vm6787_vm12, %v6781_v34, %v6798_v49 }
 0x642   : > { %vm7268_vm13 = vcmp.lt.s32.totalorder %v7267_v19, 0  ;;  %v6800_v3 = vsel %vm6786_vm11, %v6797_v13, %v6799_v7  ;;  %v13049_v59 = vmul.u32.u64.low %v6801_v41, %v6796_v63  ;;  %v13050_v21 = vmul.u32.u64.high %v6801_v41, %v6796_v63, %v13049_v59 }
 0x643   : > { %v6720_v51 = vsel %vm7268_vm13, 0, %v7267_v19  ;;  %v13052_v58 = vmul.u32.u64.low %v6801_v41, %v6800_v3  ;;  %v13053_v22 = vmul.u32.u64.high %v6801_v41, %v6800_v3, %v13052_v58  ;;  %v6808_v20 = vmul.u32 %v6801_v41, %v6792_v10 }
 0x644   : > { %v6721_v42 = vsub.s32 32, %v6720_v51  ;;  %v6722_v14 = vshll.u32 %v6713_v27, %v6720_v51  ;;  %v6725_v40 = vsub.s32 4294967266, %v6720_v51  ;;  %v6639_v18 = vand.u32 3, %v6638_v43 }
 0x645   : > { %v6811_v62 = vadd.s32 1, %v13050_v21  ;;  %vm6810_vm14 = vc.u32 %v13053_v22, %v13049_v59  ;;  %vm6637_vm2 = vweird.f32 %v12791_v33  ;;  %vm6651_vm4 = vcmp.lt.s32.totalorder %v12873_v15, 0 }
 0x646   : > { %v6723_v6 = vshrl.u32 %v6705_v61, %v6721_v42  ;;  %v6726_v53 = vadd.s32 127, %v6725_v40  ;;  %vm6644_vm0 = vcmp.eq.s32.totalorder %v6639_v18, 2  ;;  %vm6641_vm15 = vcmp.eq.s32.totalorder %v6639_v18, 0 }
 0x647   : > { %v6812_v17 = vsel %vm6810_vm14, %v6811_v62, %v13050_v21  ;;  %vm6640_vm1 = vcmp.lt.s32.totalorder %v6639_v18, 2  ;;  %v6735_v48 = vsub.s32 4, %v13011_v0  ;;  %vm6650_vm3 = vcmp.le.f32.partialorder %v6649_v44, 0.7853982 }
 0x648   : > { %v6724_v1 = vor.u32 %v6723_v6, %v6722_v14  ;;  %v6727_v35 = vshll.u32 %v6726_v53, 23  ;;  %v6813_v57 = vadd.s32 %v6812_v17, %v6808_v20  ;;  %v6809_v24 = vadd.s32 %v13049_v59, %v13053_v22 }
 0x649   : > { %v6736_v33 = vsel %vm6651_vm4, %v6735_v48, %v13011_v0  ;;  %vm6741_vm9 = vweird.f32 %v12873_v15  ;;  %vm6755_vm10 = vcmp.lt.s32.totalorder %v12946_v12, 0  ;;  %vm6754_vm11 = vcmp.le.f32.partialorder %v6753_v45, 0.7853982 }
 0x64a   : > { %v6728_v9 = vor.u32 4788187, %v6727_v35  ;;  %v6731_v52 = vcvt.s32.f32 %v6724_v1  ;;  %v6814_v4 = vadd.s32 536870912, %v6813_v57  ;;  %v6738_v32 = vsel %vm6650_vm3, 0, %v6736_v33 }
 0x64b   : > { %v7837_v5 = vpop.eup %7836  ;;  %v6742_v47 = vadd.s32 3, %v6738_v32 }
 0x64c   : > { %v7839_v31 = vpop.eup %7838  ;;  %v6645_v56 = vxor.u32 2147483648, %v7837_v5  ;;  %v6729_v46 = vand.u32 2147483647, %v6728_v9  ;;  %v6815_v60 = vshrl.u32 %v6814_v4, 30 }
 0x64d   : > { %v6642_v16 = vxor.u32 2147483648, %v7839_v31  ;;  %v6743_v38 = vand.u32 3, %v6742_v47 }
 0x64e   : > { %v6646_v27 = vsel %vm6644_vm0, %v6645_v56, %v7839_v31  ;;  %v6732_v8 = vmul.f32 %v6731_v52, %v6729_v46  ;;  %v6816_v41 = vshll.u32 %v6815_v60, 30  ;;  %v6839_v42 = vsub.s32 4, %v6815_v60 }
 0x64f   : > { %v6643_v26 = vsel %vm6641_vm15, %v7837_v5, %v6642_v16  ;;  %vm6748_vm6 = vcmp.eq.s32.totalorder %v6743_v38, 2  ;;  %vm6745_vm7 = vcmp.eq.s32.totalorder %v6743_v38, 0  ;;  %vm6744_vm8 = vcmp.lt.s32.totalorder %v6743_v38, 2 }
 0x650   : > { %v6647_v28 = vsel %vm6640_vm1, %v6643_v26, %v6646_v27  ;;  %v6733_v23 = vxor.u32 2147483648, %v6732_v8  ;;  %v6817_v36 = vsub.s32 %v6813_v57, %v6816_v41  ;;  %v6840_v20 = vsel %vm6755_vm10, %v6839_v42, %v6815_v60 }
 0x651   : > { %v6648_v30 = vsel %vm6637_vm2, nan, %v6647_v28  ;;  %v6842_v18 = vsel %vm6754_vm11, 0, %v6840_v20  ;;  %vm6845_vm0 = vweird.f32 %v12946_v12 }
 0x652   : > { %6918 = vst [vmem:[%s8364_s17 + $0x1e8] sm:$0xff] %v6648_v30  ;;  %v6734_v55 = vsel %vm6651_vm4, %v6733_v23, %v6732_v8  ;;  %v6819_v50 = vsub.s32 0, %v6817_v36  ;;  %v6846_v6 = vadd.s32 3, %v6842_v18 }
 0x653   : > { %v6737_v54 = vsel %vm6650_vm3, %v12873_v15, %v6734_v55 }
 0x654   : > { %7840 = vcosq.f32 %v6737_v54  ;;  %v7270_v34 = vmin.u32 %v6819_v50, %v6817_v36  ;;  %v6847_v53 = vand.u32 3, %v6846_v6 }
 0x655   : > { %7842 = vsinq.f32 %v6737_v54 }
 0x656   : > { %v6821_v11 = vclz %v7270_v34  ;;  %vm6852_vm12 = vcmp.eq.s32.totalorder %v6847_v53, 2  ;;  %vm6849_vm13 = vcmp.eq.s32.totalorder %v6847_v53, 0  ;;  %vm6848_vm14 = vcmp.lt.s32.totalorder %v6847_v53, 2 }
 0x658   : > { %v7271_v39 = vadd.s32 4294967294, %v6821_v11 }
 0x65a   : > { %vm7272_vm5 = vcmp.lt.s32.totalorder %v7271_v39, 0 }
 0x65b   : > { %v6824_v44 = vsel %vm7272_vm5, 0, %v7271_v39 }
 0x65c   : > { %v6825_v2 = vsub.s32 32, %v6824_v44  ;;  %v6826_v29 = vshll.u32 %v6817_v36, %v6824_v44  ;;  %v6829_v25 = vsub.s32 4294967266, %v6824_v44 }
 0x65e   : > { %v6827_v13 = vshrl.u32 %v6809_v24, %v6825_v2  ;;  %v6830_v0 = vadd.s32 127, %v6829_v25 }
 0x660   : > { %v6828_v19 = vor.u32 %v6827_v13, %v6826_v29  ;;  %v6831_v37 = vshll.u32 %v6830_v0, 23 }
 0x661   : > { %v7841_v43 = vpop.eup %7840 }
 0x662   : > { %v7843_v49 = vpop.eup %7842  ;;  %v6749_v61 = vxor.u32 2147483648, %v7841_v43  ;;  %v6832_v63 = vor.u32 4788187, %v6831_v37  ;;  %v6835_v7 = vcvt.s32.f32 %v6828_v19 }
 0x663   : > { %v6746_v10 = vxor.u32 2147483648, %v7843_v49 }
 0x664   : > { %v6750_v3 = vsel %vm6748_vm6, %v6749_v61, %v7843_v49  ;;  %v6833_v21 = vand.u32 2147483647, %v6832_v63 }
 0x665   : > { %v6747_v59 = vsel %vm6745_vm7, %v7841_v43, %v6746_v10 }
 0x666   : > { %v6751_v51 = vsel %vm6744_vm8, %v6747_v59, %v6750_v3  ;;  %v6836_v22 = vmul.f32 %v6835_v7, %v6833_v21 }
 0x667   : > { %v6752_v58 = vsel %vm6741_vm9, nan, %v6751_v51 }
 0x668   : > { %6919 = vst [vmem:[%s8364_s17 + $0x1f0] sm:$0xff] %v6752_v58  ;;  %v6837_v14 = vxor.u32 2147483648, %v6836_v22 }
 0x66a   : > { %v6838_v40 = vsel %vm6755_vm10, %v6837_v14, %v6836_v22 }
 0x66b   : > { %v6841_v15 = vsel %vm6754_vm11, %v12946_v12, %v6838_v40 }
 0x66c   : > { %7844 = vcosq.f32 %v6841_v15 }
 0x66d   : > { %7846 = vsinq.f32 %v6841_v15 }
 0x679   : > { %v7845_v62 = vpop.eup %7844 }
 0x67a   : > { %v7847_v1 = vpop.eup %7846  ;;  %v6853_v35 = vxor.u32 2147483648, %v7845_v62 }
 0x67b   : > { %v6850_v45 = vxor.u32 2147483648, %v7847_v1 }
 0x67c   : > { %v6854_v17 = vsel %vm6852_vm12, %v6853_v35, %v7847_v1 }
 0x67d   : > { %v6851_v57 = vsel %vm6849_vm13, %v7845_v62, %v6850_v45 }
 0x67e   : > { %v6855_v5 = vsel %vm6848_vm14, %v6851_v57, %v6854_v17 }
 0x67f   : > { %v6856_v9 = vsel %vm6845_vm0, nan, %v6855_v5 }
 0x680   : > { %6920 = vst [vmem:[%s8364_s17 + $0x1f8] sm:$0xff] %v6856_v9 }
 0x681   : > { %7889 = shalt.err (!%p7886_p10)
}
 0x682   : > { %s7890_s13 = scalar_lea.hbm %s13079_s2, 8192  ;;  %s7894_s20 = scalar_lea.hbm %s13126_s1, 16384 }
 0x683   : > { %p7891_p0 = scmp.ne.s32.totalorder %s13079_s2, %s7890_s13  ;;  %p7895_p1 = scmp.lt.s32.totalorder %s13079_s2, %s13126_s1 }
 0x684   : > { %p7896_p3 = scmp.lt.s32.totalorder %s7894_s20, %s7890_s13 }
 0x685   : > { %p7892_p2 = pnand %p7891_p0, %p13259_p12 }
 0x686   : > { %p7897_p6 = por %p7896_p3, %p7895_p1 }
 0x687   : > { %p7893_p9 = pneg %p7892_p2 }
 0x689   : > { %p7898_p11 = pnand %p7897_p6, %p7893_p9 }
 0x68b   : > { %7901 = shalt.err (!%p7898_p11)
}
 0x68c   : > { %s7952_s24 = smov 128   ;;  %s7953_s26 = smov 8  }
 0x68d   : > { %7538 = dma.vmem_to_hbm [thread:$0]  (%p13259_p12), %s13081_s27, 8192, %s13079_s2, %s6922_s10, %s7952_s24, %s7952_s24, %s7953_s26  }
 0x68e PF: > { %s6950_s30 = sand.u32 1, %s7928_s6   ;;  %p13260_p13 = scmp.ne.s32.totalorder %s13132_s19, 0 }
 0x68f   : > { %p13261_p4 = scmp.ge.s32.totalorder %s7940_s9, 2  ;;  %s6951_s17 = scalar_lea.sflag [#allocation4], %s6950_s30 }
 0x691   : > { %p7545_p5 = pnand %p13261_p4, %p13260_p13 }
 0x693   : > { %p7546_p7 = pneg %p7545_p5 }
 0x695   : > { %7923 = dma.done.wait (%p7546_p7), %s6951_s17, 8192  }
 0x696   : > { %7925 = vsyncadd (%p7546_p7), %s6951_s17, 4294959104  ;;  %p14_p8 = scmp.ge.s32.totalorder %s7989_s12, 4   ;;  %s13262_s6 = smov %s7932_s7 }
 0x697   : > { %s13263_s7 = smov %s7936_s8  ;;  %s13264_s8 = smov %s8001_s15 }
 0x698   : > { %s13265_s9 = smov %s7989_s12  ;;  %16 = sbr.rel (!%p14_p8) target bundleno = 5 (0x5), region = 69 }
 0x69d   :  { %6956 = vsyncpa [#allocation3], 1 }
 0x69e   :  { %6958 = vsyncpa [#allocation3 + $0x1], 1 }
 0x69f   :  { %6959 = vsyncpa [#allocation4], 1 }
 0x6a0   :  { %6961 = vsyncpa [#allocation4 + $0x1], 1 }

</bundles_post_ra>
